<compile_context>
chip_gen: v5e
topology: v5e:2x2
jax: 0.10.0
libtpu: 0.0.40
codegen_flags: <defaults>
</compile_context>

<pallas_src>
import functools

import jax
import jax.numpy as jnp
from jax.experimental import pallas as pl
from jax.experimental.pallas import tpu as pltpu

LANE = 128          # lane width: resblock-chain channels are padded to this


def _round_up(x, m):
    return (x + m - 1) // m * m


def _pick_vmem_limit():
    # Generation-aware VMEM budget: ~3/4 of physical (v7x: 48 MiB of 64 MiB,
    # v5e/v6e: 96 MiB of 128 MiB); conservative fallback if the query fails.
    try:
        cap = pltpu.get_tpu_info().vmem_capacity_bytes
        return min(int(cap) * 3 // 4, 96 * 1024 * 1024)
    except Exception:
        return 32 * 1024 * 1024


VMEM_LIMIT = _pick_vmem_limit()


# --------------------------------------------------------------------------- #
# Packed-K conv kernel: one matmul over K = kh*kw*Cin_real (+bias | +IN +ReLU)
# --------------------------------------------------------------------------- #
def _packed_conv_kernel(*refs, apply_norm, apply_relu, has_bias, eps):
    it = iter(refs)
    x_ref = next(it)                       # (1, tm, Kp)   bf16 packed patches
    w_ref = next(it)                       # (Kp, Co)      bf16 packed weights
    b_ref = next(it) if has_bias else None          # (1, Co) f32
    g_ref = bt_ref = None
    if apply_norm:
        g_ref = next(it)                   # (1, Co) f32
        bt_ref = next(it)                  # (1, Co) f32
    o_ref = next(it)                       # (1, tm, Co)   bf16

    # Single dense contraction on the MXU; Mosaic blocks K internally, so the
    # accumulator live-range is short (no 49-matmul chained adds any more).
    y = jnp.dot(x_ref[0], w_ref[...], preferred_element_type=jnp.float32)
    if has_bias:
        y = y + b_ref[...]
    if apply_norm:
        # One-pass instance-norm statistics (full instance is in this block).
        m = y.shape[0]
        s1 = jnp.sum(y, axis=0, keepdims=True)
        s2 = jnp.sum(y * y, axis=0, keepdims=True)
        mean = s1 / m
        var = s2 / m - mean * mean
        y = (y - mean) * jax.lax.rsqrt(var + eps)
        y = y * g_ref[...] + bt_ref[...]
    if apply_relu:
        y = jnp.maximum(y, 0.0)
    o_ref[0] = y.astype(o_ref.dtype)


def _im2col_packed(x, kh, kw, stride, pad, kp):
    """Packed im2col (XLA glue): (N,H,W,Creal) -> (N, OH*OW, kh*kw*Creal) with
    taps interleaved along the contraction dim, zero-padded to Kp."""
    n, h, w, c = x.shape
    oh = (h + 2 * pad - kh) // stride + 1
    ow = (w + 2 * pad - kw) // stride + 1
    xp = jnp.pad(x, ((0, 0), (pad, pad), (pad, pad), (0, 0)))
    taps = []
    for i in range(kh):
        for j in range(kw):
            taps.append(xp[:, i:i + (oh - 1) * stride + 1:stride,
                           j:j + (ow - 1) * stride + 1:stride, :])
    patches = jnp.concatenate(taps, axis=-1).reshape(n, oh * ow, kh * kw * c)
    if kp > kh * kw * c:
        patches = jnp.pad(patches, ((0, 0), (0, 0), (0, kp - kh * kw * c)))
    return patches, oh, ow


def packed_conv_layer(x, w, b=None, gamma=None, beta=None, *, kh, kw, stride,
                      pad, apply_norm, apply_relu):
    """x: (N,H,W,Cin_real) bf16.  w: (Kp, Co) bf16 packed [tap x Cin] weights.
    b/gamma/beta: (1, Co) f32.  Returns (N, OH, OW, Co) bf16."""
    n = x.shape[0]
    kp, co = w.shape
    patches, oh, ow = _im2col_packed(x, kh, kw, stride, pad, kp)
    m = oh * ow

    if apply_norm:
        # IN needs full-instance statistics -> one spatial block per instance.
        tile_m, mb = m, 1
    else:
        tile_m = m if m <= 1024 else 512
        mb = pl.cdiv(m, tile_m)        # ragged trailing block: OOB writes drop
    has_bias = b is not None

    kernel = functools.partial(_packed_conv_kernel, apply_norm=apply_norm,
                               apply_relu=apply_relu, has_bias=has_bias,
                               eps=1e-5)

    inputs = [patches, w]
    in_specs = [pl.BlockSpec((1, tile_m, kp), lambda i, j: (i, j, 0)),
                pl.BlockSpec((kp, co), lambda i, j: (0, 0))]
    if has_bias:
        inputs.append(b)
        in_specs.append(pl.BlockSpec((1, co), lambda i, j: (0, 0)))
    if apply_norm:
        inputs += [gamma, beta]
        in_specs += [pl.BlockSpec((1, co), lambda i, j: (0, 0)),
                     pl.BlockSpec((1, co), lambda i, j: (0, 0))]

    out = pl.pallas_call(
        kernel,
        out_shape=jax.ShapeDtypeStruct((n, m, co), jnp.bfloat16),
        grid=(n, mb),
        in_specs=in_specs,
        out_specs=pl.BlockSpec((1, tile_m, co), lambda i, j: (i, j, 0)),
        compiler_params=pltpu.CompilerParams(
            dimension_semantics=("parallel",
                                 "arbitrary" if apply_norm else "parallel"),
            vmem_limit_bytes=VMEM_LIMIT),
    )(*inputs)
    return out.reshape(n, oh, ow, co)


# --------------------------------------------------------------------------- #
# Fused residual-block chain: activations resident in VMEM, one launch total
# --------------------------------------------------------------------------- #
def _resblock_chain_kernel(x_ref, w_ref, g_ref, bt_ref, mask_ref, o_ref,
                           act_ref, hid_ref, *, H, W, R, eps):
    # Padded flat layout: row index q = r*Wp + c over an (H+2, W+2) grid with a
    # zero border; conv output for (oh, ow) lives at q0 = oh*Wp + ow of the
    # shifted domain [0, Mv).  Every 3x3 tap operand is a CONTIGUOUS slice.
    Wp = W + 2
    Mv = (H - 1) * Wp + W
    inv_hw = 1.0 / float(H * W)

    act_ref[...] = x_ref[0]                       # centered, zero-bordered x
    hid_ref[...] = jnp.zeros_like(hid_ref)
    mask = mask_ref[...]                          # 1.0 at valid q0, 0.0 at pad

    def conv_in(src_ref, layer):                  # conv3x3 (s1,p1) + IN + affine
        acc = jnp.zeros((Mv, src_ref.shape[-1]), jnp.float32)
        for di in range(3):
            for dj in range(3):
                off = di * Wp + dj
                acc = acc + jnp.dot(src_ref[off:off + Mv, :],
                                    w_ref[layer * 9 + di * 3 + dj],
                                    preferred_element_type=jnp.float32)
        # One-pass masked instance-norm statistics over the H*W valid rows.
        s1 = jnp.sum(acc * mask, axis=0, keepdims=True)
        s2 = jnp.sum(acc * acc * mask, axis=0, keepdims=True)
        mean = s1 * inv_hw
        var = s2 * inv_hw - mean * mean
        y = (acc - mean) * jax.lax.rsqrt(var + eps)
        return y * g_ref[layer] + bt_ref[layer]

    for r in range(R):
        # h = ReLU(IN(conv1(x)))   (masked so the zero border stays zero)
        h = jnp.maximum(conv_in(act_ref, 2 * r), 0.0) * mask
        hid_ref[Wp + 1:Wp + 1 + Mv, :] = h.astype(hid_ref.dtype)
        # x = x + IN(conv2(h))
        y = conv_in(hid_ref, 2 * r + 1)
        resid = act_ref[Wp + 1:Wp + 1 + Mv, :].astype(jnp.float32)
        act_ref[Wp + 1:Wp + 1 + Mv, :] = ((resid + y) * mask).astype(act_ref.dtype)

    o_ref[0] = act_ref[...]


def resblock_chain(x, w, gamma, beta):
    """x: (N,H,W,Cp) bf16 lane-padded.  w: (2R*9, Cp, Cp) bf16.
    gamma/beta: (2R, 1, Cp) f32.  Returns (N,H,W,Cp) bf16."""
    n, hh, ww, cp = x.shape
    R = gamma.shape[0] // 2
    hp, wp = hh + 2, ww + 2
    p = hp * wp
    prows = _round_up(p, 8)
    mv = (hh - 1) * wp + ww

    # One small spatial pad for the whole chain (replaces per-layer gathers).
    xpad = jnp.pad(x, ((0, 0), (1, 1), (1, 1), (0, 0))).reshape(n, p, cp)
    if prows > p:
        xpad = jnp.pad(xpad, ((0, 0), (0, prows - p), (0, 0)))

    # Validity mask over the shifted-output domain (column index < W).
    col = jnp.arange(mv, dtype=jnp.int32) % wp
    mask = jnp.broadcast_to((col < ww).astype(jnp.float32)[:, None], (mv, cp))

    kernel = functools.partial(_resblock_chain_kernel, H=hh, W=ww, R=R, eps=1e-5)
    out = pl.pallas_call(
        kernel,
        out_shape=jax.ShapeDtypeStruct((n, prows, cp), jnp.bfloat16),
        grid=(n,),
        in_specs=[
            pl.BlockSpec((1, prows, cp), lambda i: (i, 0, 0)),
            pl.BlockSpec(w.shape, lambda i: (0, 0, 0)),
            pl.BlockSpec(gamma.shape, lambda i: (0, 0, 0)),
            pl.BlockSpec(beta.shape, lambda i: (0, 0, 0)),
            pl.BlockSpec((mv, cp), lambda i: (0, 0)),
        ],
        out_specs=pl.BlockSpec((1, prows, cp), lambda i: (i, 0, 0)),
        scratch_shapes=[pltpu.VMEM((prows, cp), jnp.bfloat16),
                        pltpu.VMEM((prows, cp), jnp.bfloat16)],
        compiler_params=pltpu.CompilerParams(
            dimension_semantics=("parallel",),
            vmem_limit_bytes=VMEM_LIMIT),
    )(xpad, w, gamma, beta, mask)
    # Strip the spatial zero border (tiny XLA slice).
    return out[:, :p, :].reshape(n, hp, wp, cp)[:, 1:hh + 1, 1:ww + 1, :]


# --------------------------------------------------------------------------- #
# Parameter preparation
# --------------------------------------------------------------------------- #
def _prep_packed_w(w_oihw, kp, cout_store):
    """OIHW conv weight -> (Kp, Cout_store) bf16, K packed as [tap x Cin]."""
    co, ci, kh, kw = w_oihw.shape
    w = jnp.transpose(w_oihw, (2, 3, 1, 0)).reshape(kh * kw * ci, co)
    w = jnp.pad(w, ((0, kp - kh * kw * ci), (0, cout_store - co)))
    return w.astype(jnp.bfloat16)


def _prep_res_w(w_oihw, cp):
    """OIHW 3x3 conv weight -> (9, Cp, Cp) bf16 (lane-padded, per-tap)."""
    co, ci, kh, kw = w_oihw.shape
    w = jnp.transpose(w_oihw, (2, 3, 1, 0)).reshape(kh * kw, ci, co)
    return jnp.pad(w, ((0, 0), (0, cp - ci), (0, cp - co))).astype(jnp.bfloat16)


def _prep_vec(v, c_p):
    """Per-channel vector -> (1, Cp) f32; padded lanes stay exactly zero
    (intentional, including gamma) so padded channels remain zero end to end."""
    return jnp.pad(v, (0, c_p - v.shape[0])).reshape(1, c_p).astype(jnp.float32)


def init_params(key, in_channels=3, layer_multiplier=8, repeat_num=4):
    def nrm(k, shape, scale=0.05):
        return scale * jax.random.normal(k, shape, dtype=jnp.float32)

    keys = iter(jax.random.split(key, 64))
    n = layer_multiplier

    params = {
        # Bare Conv2d(7x7, s1, p3, bias=True): the only conv that keeps a bias.
        "stem": {
            "w": _prep_packed_w(nrm(next(keys), (n, in_channels, 7, 7)),
                                _round_up(49 * in_channels, LANE), n),
            "b": nrm(next(keys), (n,)).reshape(1, n).astype(jnp.float32),
        },
        "convblocks": [],
    }
    for blk in range(2):
        cin, cout = n, n * 2
        # Last ConvBlock feeds the lane-padded resblock chain -> store Cp=128.
        cout_store = _round_up(cout, LANE) if blk == 1 else cout
        params["convblocks"].append({
            "w": _prep_packed_w(nrm(next(keys), (cout, cin, 4, 4)),
                                _round_up(16 * cin, LANE), cout_store),
            "gamma": _prep_vec(jnp.ones((cout,), jnp.float32), cout_store),
            "beta": _prep_vec(jnp.zeros((cout,), jnp.float32), cout_store),
        })
        n = cout

    cp = _round_up(n, LANE)
    ws, gs, bs = [], [], []
    for _ in range(repeat_num * 2):
        ws.append(_prep_res_w(nrm(next(keys), (n, n, 3, 3)), cp))
        gs.append(_prep_vec(jnp.ones((n,), jnp.float32), cp))
        bs.append(_prep_vec(jnp.zeros((n,), jnp.float32), cp))
    params["res_w"] = jnp.concatenate(ws, axis=0)       # (2R*9, Cp, Cp)
    params["res_gamma"] = jnp.stack(gs, axis=0)         # (2R, 1, Cp)
    params["res_beta"] = jnp.stack(bs, axis=0)          # (2R, 1, Cp)
    return params, n                                    # n == output_dim


# --------------------------------------------------------------------------- #
# Encoder forward
# --------------------------------------------------------------------------- #
def encoder_forward(x_nchw, params, out_dim):
    # NCHW in/out (PyTorch convention); real-channel bf16 NHWC between the
    # packed-conv layers, lane-padded Cp=128 inside the fused resblock chain.
    x = jnp.transpose(x_nchw, (0, 2, 3, 1)).astype(jnp.bfloat16)

    # Stem: bare Conv2d(7x7, s1, p3) with bias, no norm / activation.
    s = params["stem"]
    x = packed_conv_layer(x, s["w"], s["b"], kh=7, kw=7, stride=1, pad=3,
                          apply_norm=False, apply_relu=False)

    # Two downsampling ConvBlocks: Conv(4x4, s2, p1) + IN + ReLU, fully fused.
    for blk in params["convblocks"]:
        x = packed_conv_layer(x, blk["w"], None, blk["gamma"], blk["beta"],
                              kh=4, kw=4, stride=2, pad=1,
                              apply_norm=True, apply_relu=True)

    # Entire residual-block chain in one pallas_call (VMEM-resident activation).
    x = resblock_chain(x, params["res_w"], params["res_gamma"],
                       params["res_beta"])

    x = x[..., :out_dim].astype(jnp.float32)            # drop lane padding
    return jnp.transpose(x, (0, 3, 1, 2))


if __name__ == "__main__":
    key = jax.random.PRNGKey(0)
    pkey, xkey = jax.random.split(key)

    # Small test: batch=2, in_channels=3, spatial=16, layer_multiplier=8
    # -> output (2, 32, 4, 4) after two stride-2 downsamples.
    params, out_dim = init_params(pkey, in_channels=3, layer_multiplier=8,
                                  repeat_num=4)
    x = jax.random.normal(xkey, (2, 3, 16, 16), dtype=jnp.float32)

    fwd = jax.jit(lambda inp: encoder_forward(inp, params, out_dim))
    y = jax.block_until_ready(fwd(x))

    assert y.shape == (2, out_dim, 4, 4), y.shape
    assert bool(jnp.all(jnp.isfinite(y)))
    print("KERNEL_OK")
</pallas_src>

<mosaic_0001>
module attributes {stable_mosaic.version = 11 : i64} {
  func.func @_packed_conv_kernel(%arg0: i32, %arg1: i32, %arg2: memref<1x256x256xbf16, #tpu.memory_space<vmem>>, %arg3: memref<256x8xbf16, #tpu.memory_space<vmem>>, %arg4: memref<1x8xf32, #tpu.memory_space<vmem>>, %arg5: memref<1x256x8xbf16, #tpu.memory_space<vmem>>) attributes {dimension_semantics = [#tpu.dimension_semantics<parallel>, #tpu.dimension_semantics<parallel>], iteration_bounds = array<i64: 2, 1>, scalar_prefetch = 0 : i64, scratch_operands = 0 : i64, tpu.core_type = #tpu.core_type<tc>, window_params = [{transform_indices = @transform_0, window_bounds = array<i64: 1, 256, 256>}, {pipeline_mode = #tpu.pipeline_mode<synchronous>, transform_indices = @transform_1, window_bounds = array<i64: 256, 8>}, {pipeline_mode = #tpu.pipeline_mode<synchronous>, transform_indices = @transform_2, window_bounds = array<i64: 1, 8>}, {transform_indices = @transform_3, window_bounds = array<i64: 1, 256, 8>}]} {
    %c0 = arith.constant 0 : index
    %c0_0 = arith.constant 0 : index
    %c0_1 = arith.constant 0 : index
    %0 = vector.load %arg2[%c0, %c0_0, %c0_1] : memref<1x256x256xbf16, #tpu.memory_space<vmem>>, vector<1x256x256xbf16>
    %1 = vector.shape_cast %0 : vector<1x256x256xbf16> to vector<256x256xbf16>
    %c0_2 = arith.constant 0 : index
    %c0_3 = arith.constant 0 : index
    %2 = vector.load %arg3[%c0_2, %c0_3] : memref<256x8xbf16, #tpu.memory_space<vmem>>, vector<256x8xbf16>
    %cst = arith.constant dense<0.000000e+00> : vector<256x8xf32>
    %3 = tpu.matmul %1, %2, %cst {dimension_numbers = #tpu.dot_dimension_numbers<[1], [0], [0], [1], [0, 0, 1, 1], [], []>} : vector<256x256xbf16>, vector<256x8xbf16>, vector<256x8xf32> -> vector<256x8xf32>
    %c0_4 = arith.constant 0 : index
    %c0_5 = arith.constant 0 : index
    %4 = vector.load %arg4[%c0_4, %c0_5] : memref<1x8xf32, #tpu.memory_space<vmem>>, vector<1x8xf32>
    %5 = vector.broadcast %4 : vector<1x8xf32> to vector<256x8xf32>
    %6 = arith.addf %3, %5 : vector<256x8xf32>
    %7 = arith.truncf %6 : vector<256x8xf32> to vector<256x8xbf16>
    %c0_6 = arith.constant 0 : index
    %c0_7 = arith.constant 0 : index
    %c0_8 = arith.constant 0 : index
    %8 = vector.load %arg5[%c0_6, %c0_7, %c0_8] : memref<1x256x8xbf16, #tpu.memory_space<vmem>>, vector<1x256x8xbf16>
    %9 = vector.shape_cast %8 : vector<1x256x8xbf16> to vector<256x8xbf16>
    %10 = vector.shape_cast %7 : vector<256x8xbf16> to vector<1x256x8xbf16>
    tpu.vector_store %arg5[%c0_6, %c0_7, %c0_8], %10 {strides = array<i32>} : memref<1x256x8xbf16, #tpu.memory_space<vmem>>, vector<1x256x8xbf16>,
    return
  }
  func.func @transform_0(%arg0: i32, %arg1: i32) -> (i32, i32, i32) {
    %c0_i32 = arith.constant 0 : i32
    %c0_i32_0 = arith.constant 0 : i32
    return %arg0, %arg1, %c0_i32 : i32, i32, i32
  }
  func.func @transform_1(%arg0: i32, %arg1: i32) -> (i32, i32) {
    %c0_i32 = arith.constant 0 : i32
    %c0_i32_0 = arith.constant 0 : i32
    %c0_i32_1 = arith.constant 0 : i32
    return %c0_i32, %c0_i32_0 : i32, i32
  }
  func.func @transform_2(%arg0: i32, %arg1: i32) -> (i32, i32) {
    %c0_i32 = arith.constant 0 : i32
    %c0_i32_0 = arith.constant 0 : i32
    %c0_i32_1 = arith.constant 0 : i32
    return %c0_i32, %c0_i32_0 : i32, i32
  }
  func.func @transform_3(%arg0: i32, %arg1: i32) -> (i32, i32, i32) {
    %c0_i32 = arith.constant 0 : i32
    %c0_i32_0 = arith.constant 0 : i32
    return %arg0, %arg1, %c0_i32 : i32, i32, i32
  }
}

module attributes {stable_mosaic.version = 11 : i64} {
  func.func @_packed_conv_kernel(%arg0: i32, %arg1: i32, %arg2: memref<1x64x128xbf16, #tpu.memory_space<vmem>>, %arg3: memref<128x16xbf16, #tpu.memory_space<vmem>>, %arg4: memref<1x16xf32, #tpu.memory_space<vmem>>, %arg5: memref<1x16xf32, #tpu.memory_space<vmem>>, %arg6: memref<1x64x16xbf16, #tpu.memory_space<vmem>>) attributes {dimension_semantics = [#tpu.dimension_semantics<parallel>, #tpu.dimension_semantics<arbitrary>], iteration_bounds = array<i64: 2, 1>, scalar_prefetch = 0 : i64, scratch_operands = 0 : i64, tpu.core_type = #tpu.core_type<tc>, window_params = [{transform_indices = @transform_0, window_bounds = array<i64: 1, 64, 128>}, {pipeline_mode = #tpu.pipeline_mode<synchronous>, transform_indices = @transform_1, window_bounds = array<i64: 128, 16>}, {pipeline_mode = #tpu.pipeline_mode<synchronous>, transform_indices = @transform_2, window_bounds = array<i64: 1, 16>}, {pipeline_mode = #tpu.pipeline_mode<synchronous>, transform_indices = @transform_3, window_bounds = array<i64: 1, 16>}, {transform_indices = @transform_4, window_bounds = array<i64: 1, 64, 16>}]} {
    %c0 = arith.constant 0 : index
    %c0_0 = arith.constant 0 : index
    %c0_1 = arith.constant 0 : index
    %0 = vector.load %arg2[%c0, %c0_0, %c0_1] : memref<1x64x128xbf16, #tpu.memory_space<vmem>>, vector<1x64x128xbf16>
    %1 = vector.shape_cast %0 : vector<1x64x128xbf16> to vector<64x128xbf16>
    %c0_2 = arith.constant 0 : index
    %c0_3 = arith.constant 0 : index
    %2 = vector.load %arg3[%c0_2, %c0_3] : memref<128x16xbf16, #tpu.memory_space<vmem>>, vector<128x16xbf16>
    %cst = arith.constant dense<0.000000e+00> : vector<64x16xf32>
    %3 = tpu.matmul %1, %2, %cst {dimension_numbers = #tpu.dot_dimension_numbers<[1], [0], [0], [1], [0, 0, 1, 1], [], []>} : vector<64x128xbf16>, vector<128x16xbf16>, vector<64x16xf32> -> vector<64x16xf32>
    %cst_4 = arith.constant dense<0.000000e+00> : vector<16xf32>
    %4 = vector.multi_reduction <add>, %3, %cst_4 [0] : vector<64x16xf32> to vector<16xf32>
    %5 = vector.shape_cast %4 : vector<16xf32> to vector<1x16xf32>
    %6 = arith.mulf %3, %3 : vector<64x16xf32>
    %cst_5 = arith.constant dense<0.000000e+00> : vector<16xf32>
    %7 = vector.multi_reduction <add>, %6, %cst_5 [0] : vector<64x16xf32> to vector<16xf32>
    %8 = vector.shape_cast %7 : vector<16xf32> to vector<1x16xf32>
    %cst_6 = arith.constant 6.400000e+01 : f32
    %9 = vector.broadcast %cst_6 : f32 to vector<1x16xf32>
    %10 = arith.divf %5, %9 : vector<1x16xf32>
    %cst_7 = arith.constant 6.400000e+01 : f32
    %11 = vector.broadcast %cst_7 : f32 to vector<1x16xf32>
    %12 = arith.divf %8, %11 : vector<1x16xf32>
    %13 = arith.mulf %10, %10 : vector<1x16xf32>
    %14 = arith.subf %12, %13 : vector<1x16xf32>
    %15 = vector.broadcast %10 : vector<1x16xf32> to vector<64x16xf32>
    %16 = arith.subf %3, %15 : vector<64x16xf32>
    %cst_8 = arith.constant 9.99999974E-6 : f32
    %17 = vector.broadcast %cst_8 : f32 to vector<1x16xf32>
    %18 = arith.addf %14, %17 : vector<1x16xf32>
    %19 = math.rsqrt %18 : vector<1x16xf32>
    %20 = vector.broadcast %19 : vector<1x16xf32> to vector<64x16xf32>
    %21 = arith.mulf %16, %20 : vector<64x16xf32>
    %c0_9 = arith.constant 0 : index
    %c0_10 = arith.constant 0 : index
    %22 = vector.load %arg4[%c0_9, %c0_10] : memref<1x16xf32, #tpu.memory_space<vmem>>, vector<1x16xf32>
    %23 = vector.broadcast %22 : vector<1x16xf32> to vector<64x16xf32>
    %24 = arith.mulf %21, %23 : vector<64x16xf32>
    %c0_11 = arith.constant 0 : index
    %c0_12 = arith.constant 0 : index
    %25 = vector.load %arg5[%c0_11, %c0_12] : memref<1x16xf32, #tpu.memory_space<vmem>>, vector<1x16xf32>
    %26 = vector.broadcast %25 : vector<1x16xf32> to vector<64x16xf32>
    %27 = arith.addf %24, %26 : vector<64x16xf32>
    %cst_13 = arith.constant 0.000000e+00 : f32
    %28 = vector.broadcast %cst_13 : f32 to vector<64x16xf32>
    %29 = arith.maximumf %27, %28 : vector<64x16xf32>
    %30 = arith.truncf %29 : vector<64x16xf32> to vector<64x16xbf16>
    %c0_14 = arith.constant 0 : index
    %c0_15 = arith.constant 0 : index
    %c0_16 = arith.constant 0 : index
    %31 = vector.load %arg6[%c0_14, %c0_15, %c0_16] : memref<1x64x16xbf16, #tpu.memory_space<vmem>>, vector<1x64x16xbf16>
    %32 = vector.shape_cast %31 : vector<1x64x16xbf16> to vector<64x16xbf16>
    %33 = vector.shape_cast %30 : vector<64x16xbf16> to vector<1x64x16xbf16>
    tpu.vector_store %arg6[%c0_14, %c0_15, %c0_16], %33 {strides = array<i32>} : memref<1x64x16xbf16, #tpu.memory_space<vmem>>, vector<1x64x16xbf16>,
    return
  }
  func.func @transform_0(%arg0: i32, %arg1: i32) -> (i32, i32, i32) {
    %c0_i32 = arith.constant 0 : i32
    %c0_i32_0 = arith.constant 0 : i32
    return %arg0, %arg1, %c0_i32 : i32, i32, i32
  }
  func.func @transform_1(%arg0: i32, %arg1: i32) -> (i32, i32) {
    %c0_i32 = arith.constant 0 : i32
    %c0_i32_0 = arith.constant 0 : i32
    %c0_i32_1 = arith.constant 0 : i32
    return %c0_i32, %c0_i32_0 : i32, i32
  }
  func.func @transform_2(%arg0: i32, %arg1: i32) -> (i32, i32) {
    %c0_i32 = arith.constant 0 : i32
    %c0_i32_0 = arith.constant 0 : i32
    %c0_i32_1 = arith.constant 0 : i32
    return %c0_i32, %c0_i32_0 : i32, i32
  }
  func.func @transform_3(%arg0: i32, %arg1: i32) -> (i32, i32) {
    %c0_i32 = arith.constant 0 : i32
    %c0_i32_0 = arith.constant 0 : i32
    %c0_i32_1 = arith.constant 0 : i32
    return %c0_i32, %c0_i32_0 : i32, i32
  }
  func.func @transform_4(%arg0: i32, %arg1: i32) -> (i32, i32, i32) {
    %c0_i32 = arith.constant 0 : i32
    %c0_i32_0 = arith.constant 0 : i32
    return %arg0, %arg1, %c0_i32 : i32, i32, i32
  }
}

module attributes {stable_mosaic.version = 11 : i64} {
  func.func @_packed_conv_kernel(%arg0: i32, %arg1: i32, %arg2: memref<1x16x256xbf16, #tpu.memory_space<vmem>>, %arg3: memref<256x128xbf16, #tpu.memory_space<vmem>>, %arg4: memref<1x128xf32, #tpu.memory_space<vmem>>, %arg5: memref<1x128xf32, #tpu.memory_space<vmem>>, %arg6: memref<1x16x128xbf16, #tpu.memory_space<vmem>>) attributes {dimension_semantics = [#tpu.dimension_semantics<parallel>, #tpu.dimension_semantics<arbitrary>], iteration_bounds = array<i64: 2, 1>, scalar_prefetch = 0 : i64, scratch_operands = 0 : i64, tpu.core_type = #tpu.core_type<tc>, window_params = [{transform_indices = @transform_0, window_bounds = array<i64: 1, 16, 256>}, {pipeline_mode = #tpu.pipeline_mode<synchronous>, transform_indices = @transform_1, window_bounds = array<i64: 256, 128>}, {pipeline_mode = #tpu.pipeline_mode<synchronous>, transform_indices = @transform_2, window_bounds = array<i64: 1, 128>}, {pipeline_mode = #tpu.pipeline_mode<synchronous>, transform_indices = @transform_3, window_bounds = array<i64: 1, 128>}, {transform_indices = @transform_4, window_bounds = array<i64: 1, 16, 128>}]} {
    %c0 = arith.constant 0 : index
    %c0_0 = arith.constant 0 : index
    %c0_1 = arith.constant 0 : index
    %0 = vector.load %arg2[%c0, %c0_0, %c0_1] : memref<1x16x256xbf16, #tpu.memory_space<vmem>>, vector<1x16x256xbf16>
    %1 = vector.shape_cast %0 : vector<1x16x256xbf16> to vector<16x256xbf16>
    %c0_2 = arith.constant 0 : index
    %c0_3 = arith.constant 0 : index
    %2 = vector.load %arg3[%c0_2, %c0_3] : memref<256x128xbf16, #tpu.memory_space<vmem>>, vector<256x128xbf16>
    %cst = arith.constant dense<0.000000e+00> : vector<16x128xf32>
    %3 = tpu.matmul %1, %2, %cst {dimension_numbers = #tpu.dot_dimension_numbers<[1], [0], [0], [1], [0, 0, 1, 1], [], []>} : vector<16x256xbf16>, vector<256x128xbf16>, vector<16x128xf32> -> vector<16x128xf32>
    %cst_4 = arith.constant dense<0.000000e+00> : vector<128xf32>
    %4 = vector.multi_reduction <add>, %3, %cst_4 [0] : vector<16x128xf32> to vector<128xf32>
    %5 = vector.shape_cast %4 : vector<128xf32> to vector<1x128xf32>
    %6 = arith.mulf %3, %3 : vector<16x128xf32>
    %cst_5 = arith.constant dense<0.000000e+00> : vector<128xf32>
    %7 = vector.multi_reduction <add>, %6, %cst_5 [0] : vector<16x128xf32> to vector<128xf32>
    %8 = vector.shape_cast %7 : vector<128xf32> to vector<1x128xf32>
    %cst_6 = arith.constant 1.600000e+01 : f32
    %9 = vector.broadcast %cst_6 : f32 to vector<1x128xf32>
    %10 = arith.divf %5, %9 : vector<1x128xf32>
    %cst_7 = arith.constant 1.600000e+01 : f32
    %11 = vector.broadcast %cst_7 : f32 to vector<1x128xf32>
    %12 = arith.divf %8, %11 : vector<1x128xf32>
    %13 = arith.mulf %10, %10 : vector<1x128xf32>
    %14 = arith.subf %12, %13 : vector<1x128xf32>
    %15 = vector.broadcast %10 : vector<1x128xf32> to vector<16x128xf32>
    %16 = arith.subf %3, %15 : vector<16x128xf32>
    %cst_8 = arith.constant 9.99999974E-6 : f32
    %17 = vector.broadcast %cst_8 : f32 to vector<1x128xf32>
    %18 = arith.addf %14, %17 : vector<1x128xf32>
    %19 = math.rsqrt %18 : vector<1x128xf32>
    %20 = vector.broadcast %19 : vector<1x128xf32> to vector<16x128xf32>
    %21 = arith.mulf %16, %20 : vector<16x128xf32>
    %c0_9 = arith.constant 0 : index
    %c0_10 = arith.constant 0 : index
    %22 = vector.load %arg4[%c0_9, %c0_10] : memref<1x128xf32, #tpu.memory_space<vmem>>, vector<1x128xf32>
    %23 = vector.broadcast %22 : vector<1x128xf32> to vector<16x128xf32>
    %24 = arith.mulf %21, %23 : vector<16x128xf32>
    %c0_11 = arith.constant 0 : index
    %c0_12 = arith.constant 0 : index
    %25 = vector.load %arg5[%c0_11, %c0_12] : memref<1x128xf32, #tpu.memory_space<vmem>>, vector<1x128xf32>
    %26 = vector.broadcast %25 : vector<1x128xf32> to vector<16x128xf32>
    %27 = arith.addf %24, %26 : vector<16x128xf32>
    %cst_13 = arith.constant 0.000000e+00 : f32
    %28 = vector.broadcast %cst_13 : f32 to vector<16x128xf32>
    %29 = arith.maximumf %27, %28 : vector<16x128xf32>
    %30 = arith.truncf %29 : vector<16x128xf32> to vector<16x128xbf16>
    %c0_14 = arith.constant 0 : index
    %c0_15 = arith.constant 0 : index
    %c0_16 = arith.constant 0 : index
    %31 = vector.load %arg6[%c0_14, %c0_15, %c0_16] : memref<1x16x128xbf16, #tpu.memory_space<vmem>>, vector<1x16x128xbf16>
    %32 = vector.shape_cast %31 : vector<1x16x128xbf16> to vector<16x128xbf16>
    %33 = vector.shape_cast %30 : vector<16x128xbf16> to vector<1x16x128xbf16>
    tpu.vector_store %arg6[%c0_14, %c0_15, %c0_16], %33 {strides = array<i32>} : memref<1x16x128xbf16, #tpu.memory_space<vmem>>, vector<1x16x128xbf16>,
    return
  }
  func.func @transform_0(%arg0: i32, %arg1: i32) -> (i32, i32, i32) {
    %c0_i32 = arith.constant 0 : i32
    %c0_i32_0 = arith.constant 0 : i32
    return %arg0, %arg1, %c0_i32 : i32, i32, i32
  }
  func.func @transform_1(%arg0: i32, %arg1: i32) -> (i32, i32) {
    %c0_i32 = arith.constant 0 : i32
    %c0_i32_0 = arith.constant 0 : i32
    %c0_i32_1 = arith.constant 0 : i32
    return %c0_i32, %c0_i32_0 : i32, i32
  }
  func.func @transform_2(%arg0: i32, %arg1: i32) -> (i32, i32) {
    %c0_i32 = arith.constant 0 : i32
    %c0_i32_0 = arith.constant 0 : i32
    %c0_i32_1 = arith.constant 0 : i32
    return %c0_i32, %c0_i32_0 : i32, i32
  }
  func.func @transform_3(%arg0: i32, %arg1: i32) -> (i32, i32) {
    %c0_i32 = arith.constant 0 : i32
    %c0_i32_0 = arith.constant 0 : i32
    %c0_i32_1 = arith.constant 0 : i32
    return %c0_i32, %c0_i32_0 : i32, i32
  }
  func.func @transform_4(%arg0: i32, %arg1: i32) -> (i32, i32, i32) {
    %c0_i32 = arith.constant 0 : i32
    %c0_i32_0 = arith.constant 0 : i32
    return %arg0, %arg1, %c0_i32 : i32, i32, i32
  }
}

module attributes {stable_mosaic.version = 11 : i64} {
  func.func @_resblock_chain_kernel(%arg0: i32, %arg1: memref<1x40x128xbf16, #tpu.memory_space<vmem>>, %arg2: memref<72x128x128xbf16, #tpu.memory_space<vmem>>, %arg3: memref<8x1x128xf32, #tpu.memory_space<vmem>>, %arg4: memref<8x1x128xf32, #tpu.memory_space<vmem>>, %arg5: memref<22x128xf32, #tpu.memory_space<vmem>>, %arg6: memref<1x40x128xbf16, #tpu.memory_space<vmem>>, %arg7: memref<40x128xbf16, #tpu.memory_space<vmem>>, %arg8: memref<40x128xbf16, #tpu.memory_space<vmem>>) attributes {dimension_semantics = [#tpu.dimension_semantics<parallel>], iteration_bounds = array<i64: 2>, scalar_prefetch = 0 : i64, scratch_operands = 2 : i64, tpu.core_type = #tpu.core_type<tc>, window_params = [{transform_indices = @transform_0, window_bounds = array<i64: 1, 40, 128>}, {pipeline_mode = #tpu.pipeline_mode<synchronous>, transform_indices = @transform_1, window_bounds = array<i64: 72, 128, 128>}, {pipeline_mode = #tpu.pipeline_mode<synchronous>, transform_indices = @transform_2, window_bounds = array<i64: 8, 1, 128>}, {pipeline_mode = #tpu.pipeline_mode<synchronous>, transform_indices = @transform_3, window_bounds = array<i64: 8, 1, 128>}, {pipeline_mode = #tpu.pipeline_mode<synchronous>, transform_indices = @transform_4, window_bounds = array<i64: 22, 128>}, {transform_indices = @transform_5, window_bounds = array<i64: 1, 40, 128>}]} {
    %c0 = arith.constant 0 : index
    %c0_0 = arith.constant 0 : index
    %c0_1 = arith.constant 0 : index
    %0 = vector.load %arg1[%c0, %c0_0, %c0_1] : memref<1x40x128xbf16, #tpu.memory_space<vmem>>, vector<1x40x128xbf16>
    %1 = vector.shape_cast %0 : vector<1x40x128xbf16> to vector<40x128xbf16>
    %c0_2 = arith.constant 0 : index
    %c0_3 = arith.constant 0 : index
    %2 = vector.load %arg7[%c0_2, %c0_3] : memref<40x128xbf16, #tpu.memory_space<vmem>>, vector<40x128xbf16>
    tpu.vector_store %arg7[%c0_2, %c0_3], %1 {strides = array<i32>} : memref<40x128xbf16, #tpu.memory_space<vmem>>, vector<40x128xbf16>,
    %cst = arith.constant 0.000000e+00 : bf16
    %3 = vector.broadcast %cst : bf16 to vector<40x128xbf16>
    %c0_4 = arith.constant 0 : index
    %c0_5 = arith.constant 0 : index
    %4 = vector.load %arg8[%c0_4, %c0_5] : memref<40x128xbf16, #tpu.memory_space<vmem>>, vector<40x128xbf16>
    tpu.vector_store %arg8[%c0_4, %c0_5], %3 {strides = array<i32>} : memref<40x128xbf16, #tpu.memory_space<vmem>>, vector<40x128xbf16>,
    %c0_6 = arith.constant 0 : index
    %c0_7 = arith.constant 0 : index
    %5 = vector.load %arg5[%c0_6, %c0_7] : memref<22x128xf32, #tpu.memory_space<vmem>>, vector<22x128xf32>
    %cst_8 = arith.constant 0.000000e+00 : f32
    %6 = vector.broadcast %cst_8 : f32 to vector<22x128xf32>
    %c0_9 = arith.constant 0 : index
    %c0_10 = arith.constant 0 : index
    %7 = vector.load %arg7[%c0_9, %c0_10] : memref<40x128xbf16, #tpu.memory_space<vmem>>, vector<22x128xbf16>
    %c0_11 = arith.constant 0 : index
    %c0_12 = arith.constant 0 : index
    %c0_13 = arith.constant 0 : index
    %8 = vector.load %arg2[%c0_11, %c0_12, %c0_13] : memref<72x128x128xbf16, #tpu.memory_space<vmem>>, vector<1x128x128xbf16>
    %9 = vector.shape_cast %8 : vector<1x128x128xbf16> to vector<128x128xbf16>
    %cst_14 = arith.constant dense<0.000000e+00> : vector<22x128xf32>
    %10 = tpu.matmul %7, %9, %cst_14 {dimension_numbers = #tpu.dot_dimension_numbers<[1], [0], [0], [1], [0, 0, 1, 1], [], []>} : vector<22x128xbf16>, vector<128x128xbf16>, vector<22x128xf32> -> vector<22x128xf32>
    %11 = arith.addf %6, %10 : vector<22x128xf32>
    %c1 = arith.constant 1 : index
    %c0_15 = arith.constant 0 : index
    %12 = vector.load %arg7[%c1, %c0_15] : memref<40x128xbf16, #tpu.memory_space<vmem>>, vector<22x128xbf16>
    %c1_16 = arith.constant 1 : index
    %c0_17 = arith.constant 0 : index
    %c0_18 = arith.constant 0 : index
    %13 = vector.load %arg2[%c1_16, %c0_17, %c0_18] : memref<72x128x128xbf16, #tpu.memory_space<vmem>>, vector<1x128x128xbf16>
    %14 = vector.shape_cast %13 : vector<1x128x128xbf16> to vector<128x128xbf16>
    %cst_19 = arith.constant dense<0.000000e+00> : vector<22x128xf32>
    %15 = tpu.matmul %12, %14, %cst_19 {dimension_numbers = #tpu.dot_dimension_numbers<[1], [0], [0], [1], [0, 0, 1, 1], [], []>} : vector<22x128xbf16>, vector<128x128xbf16>, vector<22x128xf32> -> vector<22x128xf32>
    %16 = arith.addf %11, %15 : vector<22x128xf32>
    %c2 = arith.constant 2 : index
    %c0_20 = arith.constant 0 : index
    %17 = vector.load %arg7[%c2, %c0_20] : memref<40x128xbf16, #tpu.memory_space<vmem>>, vector<22x128xbf16>
    %c2_21 = arith.constant 2 : index
    %c0_22 = arith.constant 0 : index
    %c0_23 = arith.constant 0 : index
    %18 = vector.load %arg2[%c2_21, %c0_22, %c0_23] : memref<72x128x128xbf16, #tpu.memory_space<vmem>>, vector<1x128x128xbf16>
    %19 = vector.shape_cast %18 : vector<1x128x128xbf16> to vector<128x128xbf16>
    %cst_24 = arith.constant dense<0.000000e+00> : vector<22x128xf32>
    %20 = tpu.matmul %17, %19, %cst_24 {dimension_numbers = #tpu.dot_dimension_numbers<[1], [0], [0], [1], [0, 0, 1, 1], [], []>} : vector<22x128xbf16>, vector<128x128xbf16>, vector<22x128xf32> -> vector<22x128xf32>
    %21 = arith.addf %16, %20 : vector<22x128xf32>
    %c6 = arith.constant 6 : index
    %c0_25 = arith.constant 0 : index
    %22 = vector.load %arg7[%c6, %c0_25] : memref<40x128xbf16, #tpu.memory_space<vmem>>, vector<22x128xbf16>
    %c3 = arith.constant 3 : index
    %c0_26 = arith.constant 0 : index
    %c0_27 = arith.constant 0 : index
    %23 = vector.load %arg2[%c3, %c0_26, %c0_27] : memref<72x128x128xbf16, #tpu.memory_space<vmem>>, vector<1x128x128xbf16>
    %24 = vector.shape_cast %23 : vector<1x128x128xbf16> to vector<128x128xbf16>
    %cst_28 = arith.constant dense<0.000000e+00> : vector<22x128xf32>
    %25 = tpu.matmul %22, %24, %cst_28 {dimension_numbers = #tpu.dot_dimension_numbers<[1], [0], [0], [1], [0, 0, 1, 1], [], []>} : vector<22x128xbf16>, vector<128x128xbf16>, vector<22x128xf32> -> vector<22x128xf32>
    %26 = arith.addf %21, %25 : vector<22x128xf32>
    %c7 = arith.constant 7 : index
    %c0_29 = arith.constant 0 : index
    %27 = vector.load %arg7[%c7, %c0_29] : memref<40x128xbf16, #tpu.memory_space<vmem>>, vector<22x128xbf16>
    %c4 = arith.constant 4 : index
    %c0_30 = arith.constant 0 : index
    %c0_31 = arith.constant 0 : index
    %28 = vector.load %arg2[%c4, %c0_30, %c0_31] : memref<72x128x128xbf16, #tpu.memory_space<vmem>>, vector<1x128x128xbf16>
    %29 = vector.shape_cast %28 : vector<1x128x128xbf16> to vector<128x128xbf16>
    %cst_32 = arith.constant dense<0.000000e+00> : vector<22x128xf32>
    %30 = tpu.matmul %27, %29, %cst_32 {dimension_numbers = #tpu.dot_dimension_numbers<[1], [0], [0], [1], [0, 0, 1, 1], [], []>} : vector<22x128xbf16>, vector<128x128xbf16>, vector<22x128xf32> -> vector<22x128xf32>
    %31 = arith.addf %26, %30 : vector<22x128xf32>
    %c8 = arith.constant 8 : index
    %c0_33 = arith.constant 0 : index
    %32 = vector.load %arg7[%c8, %c0_33] : memref<40x128xbf16, #tpu.memory_space<vmem>>, vector<22x128xbf16>
    %c5 = arith.constant 5 : index
    %c0_34 = arith.constant 0 : index
    %c0_35 = arith.constant 0 : index
    %33 = vector.load %arg2[%c5, %c0_34, %c0_35] : memref<72x128x128xbf16, #tpu.memory_space<vmem>>, vector<1x128x128xbf16>
    %34 = vector.shape_cast %33 : vector<1x128x128xbf16> to vector<128x128xbf16>
    %cst_36 = arith.constant dense<0.000000e+00> : vector<22x128xf32>
    %35 = tpu.matmul %32, %34, %cst_36 {dimension_numbers = #tpu.dot_dimension_numbers<[1], [0], [0], [1], [0, 0, 1, 1], [], []>} : vector<22x128xbf16>, vector<128x128xbf16>, vector<22x128xf32> -> vector<22x128xf32>
    %36 = arith.addf %31, %35 : vector<22x128xf32>
    %c12 = arith.constant 12 : index
    %c0_37 = arith.constant 0 : index
    %37 = vector.load %arg7[%c12, %c0_37] : memref<40x128xbf16, #tpu.memory_space<vmem>>, vector<22x128xbf16>
    %c6_38 = arith.constant 6 : index
    %c0_39 = arith.constant 0 : index
    %c0_40 = arith.constant 0 : index
    %38 = vector.load %arg2[%c6_38, %c0_39, %c0_40] : memref<72x128x128xbf16, #tpu.memory_space<vmem>>, vector<1x128x128xbf16>
    %39 = vector.shape_cast %38 : vector<1x128x128xbf16> to vector<128x128xbf16>
    %cst_41 = arith.constant dense<0.000000e+00> : vector<22x128xf32>
    %40 = tpu.matmul %37, %39, %cst_41 {dimension_numbers = #tpu.dot_dimension_numbers<[1], [0], [0], [1], [0, 0, 1, 1], [], []>} : vector<22x128xbf16>, vector<128x128xbf16>, vector<22x128xf32> -> vector<22x128xf32>
    %41 = arith.addf %36, %40 : vector<22x128xf32>
    %c13 = arith.constant 13 : index
    %c0_42 = arith.constant 0 : index
    %42 = vector.load %arg7[%c13, %c0_42] : memref<40x128xbf16, #tpu.memory_space<vmem>>, vector<22x128xbf16>
    %c7_43 = arith.constant 7 : index
    %c0_44 = arith.constant 0 : index
    %c0_45 = arith.constant 0 : index
    %43 = vector.load %arg2[%c7_43, %c0_44, %c0_45] : memref<72x128x128xbf16, #tpu.memory_space<vmem>>, vector<1x128x128xbf16>
    %44 = vector.shape_cast %43 : vector<1x128x128xbf16> to vector<128x128xbf16>
    %cst_46 = arith.constant dense<0.000000e+00> : vector<22x128xf32>
    %45 = tpu.matmul %42, %44, %cst_46 {dimension_numbers = #tpu.dot_dimension_numbers<[1], [0], [0], [1], [0, 0, 1, 1], [], []>} : vector<22x128xbf16>, vector<128x128xbf16>, vector<22x128xf32> -> vector<22x128xf32>
    %46 = arith.addf %41, %45 : vector<22x128xf32>
    %c14 = arith.constant 14 : index
    %c0_47 = arith.constant 0 : index
    %47 = vector.load %arg7[%c14, %c0_47] : memref<40x128xbf16, #tpu.memory_space<vmem>>, vector<22x128xbf16>
    %c8_48 = arith.constant 8 : index
    %c0_49 = arith.constant 0 : index
    %c0_50 = arith.constant 0 : index
    %48 = vector.load %arg2[%c8_48, %c0_49, %c0_50] : memref<72x128x128xbf16, #tpu.memory_space<vmem>>, vector<1x128x128xbf16>
    %49 = vector.shape_cast %48 : vector<1x128x128xbf16> to vector<128x128xbf16>
    %cst_51 = arith.constant dense<0.000000e+00> : vector<22x128xf32>
    %50 = tpu.matmul %47, %49, %cst_51 {dimension_numbers = #tpu.dot_dimension_numbers<[1], [0], [0], [1], [0, 0, 1, 1], [], []>} : vector<22x128xbf16>, vector<128x128xbf16>, vector<22x128xf32> -> vector<22x128xf32>
    %51 = arith.addf %46, %50 : vector<22x128xf32>
    %52 = arith.mulf %51, %5 : vector<22x128xf32>
    %cst_52 = arith.constant dense<0.000000e+00> : vector<128xf32>
    %53 = vector.multi_reduction <add>, %52, %cst_52 [0] : vector<22x128xf32> to vector<128xf32>
    %54 = vector.shape_cast %53 : vector<128xf32> to vector<1x128xf32>
    %55 = arith.mulf %51, %51 : vector<22x128xf32>
    %56 = arith.mulf %55, %5 : vector<22x128xf32>
    %cst_53 = arith.constant dense<0.000000e+00> : vector<128xf32>
    %57 = vector.multi_reduction <add>, %56, %cst_53 [0] : vector<22x128xf32> to vector<128xf32>
    %58 = vector.shape_cast %57 : vector<128xf32> to vector<1x128xf32>
    %cst_54 = arith.constant 6.250000e-02 : f32
    %59 = vector.broadcast %cst_54 : f32 to vector<1x128xf32>
    %60 = arith.mulf %54, %59 : vector<1x128xf32>
    %cst_55 = arith.constant 6.250000e-02 : f32
    %61 = vector.broadcast %cst_55 : f32 to vector<1x128xf32>
    %62 = arith.mulf %58, %61 : vector<1x128xf32>
    %63 = arith.mulf %60, %60 : vector<1x128xf32>
    %64 = arith.subf %62, %63 : vector<1x128xf32>
    %65 = vector.broadcast %60 : vector<1x128xf32> to vector<22x128xf32>
    %66 = arith.subf %51, %65 : vector<22x128xf32>
    %cst_56 = arith.constant 9.99999974E-6 : f32
    %67 = vector.broadcast %cst_56 : f32 to vector<1x128xf32>
    %68 = arith.addf %64, %67 : vector<1x128xf32>
    %69 = math.rsqrt %68 : vector<1x128xf32>
    %70 = vector.broadcast %69 : vector<1x128xf32> to vector<22x128xf32>
    %71 = arith.mulf %66, %70 : vector<22x128xf32>
    %c0_57 = arith.constant 0 : index
    %c0_58 = arith.constant 0 : index
    %c0_59 = arith.constant 0 : index
    %72 = vector.load %arg3[%c0_57, %c0_58, %c0_59] : memref<8x1x128xf32, #tpu.memory_space<vmem>>, vector<1x1x128xf32>
    %73 = vector.shape_cast %72 : vector<1x1x128xf32> to vector<1x128xf32>
    %74 = vector.broadcast %73 : vector<1x128xf32> to vector<22x128xf32>
    %75 = arith.mulf %71, %74 : vector<22x128xf32>
    %c0_60 = arith.constant 0 : index
    %c0_61 = arith.constant 0 : index
    %c0_62 = arith.constant 0 : index
    %76 = vector.load %arg4[%c0_60, %c0_61, %c0_62] : memref<8x1x128xf32, #tpu.memory_space<vmem>>, vector<1x1x128xf32>
    %77 = vector.shape_cast %76 : vector<1x1x128xf32> to vector<1x128xf32>
    %78 = vector.broadcast %77 : vector<1x128xf32> to vector<22x128xf32>
    %79 = arith.addf %75, %78 : vector<22x128xf32>
    %cst_63 = arith.constant 0.000000e+00 : f32
    %80 = vector.broadcast %cst_63 : f32 to vector<22x128xf32>
    %81 = arith.maximumf %79, %80 : vector<22x128xf32>
    %82 = arith.mulf %81, %5 : vector<22x128xf32>
    %83 = arith.truncf %82 : vector<22x128xf32> to vector<22x128xbf16>
    %c7_64 = arith.constant 7 : index
    %c0_65 = arith.constant 0 : index
    %84 = vector.load %arg8[%c7_64, %c0_65] : memref<40x128xbf16, #tpu.memory_space<vmem>>, vector<22x128xbf16>
    tpu.vector_store %arg8[%c7_64, %c0_65], %83 {strides = array<i32>} : memref<40x128xbf16, #tpu.memory_space<vmem>>, vector<22x128xbf16>,
    %cst_66 = arith.constant 0.000000e+00 : f32
    %85 = vector.broadcast %cst_66 : f32 to vector<22x128xf32>
    %c0_67 = arith.constant 0 : index
    %c0_68 = arith.constant 0 : index
    %86 = vector.load %arg8[%c0_67, %c0_68] : memref<40x128xbf16, #tpu.memory_space<vmem>>, vector<22x128xbf16>
    %c9 = arith.constant 9 : index
    %c0_69 = arith.constant 0 : index
    %c0_70 = arith.constant 0 : index
    %87 = vector.load %arg2[%c9, %c0_69, %c0_70] : memref<72x128x128xbf16, #tpu.memory_space<vmem>>, vector<1x128x128xbf16>
    %88 = vector.shape_cast %87 : vector<1x128x128xbf16> to vector<128x128xbf16>
    %cst_71 = arith.constant dense<0.000000e+00> : vector<22x128xf32>
    %89 = tpu.matmul %86, %88, %cst_71 {dimension_numbers = #tpu.dot_dimension_numbers<[1], [0], [0], [1], [0, 0, 1, 1], [], []>} : vector<22x128xbf16>, vector<128x128xbf16>, vector<22x128xf32> -> vector<22x128xf32>
    %90 = arith.addf %85, %89 : vector<22x128xf32>
    %c1_72 = arith.constant 1 : index
    %c0_73 = arith.constant 0 : index
    %91 = vector.load %arg8[%c1_72, %c0_73] : memref<40x128xbf16, #tpu.memory_space<vmem>>, vector<22x128xbf16>
    %c10 = arith.constant 10 : index
    %c0_74 = arith.constant 0 : index
    %c0_75 = arith.constant 0 : index
    %92 = vector.load %arg2[%c10, %c0_74, %c0_75] : memref<72x128x128xbf16, #tpu.memory_space<vmem>>, vector<1x128x128xbf16>
    %93 = vector.shape_cast %92 : vector<1x128x128xbf16> to vector<128x128xbf16>
    %cst_76 = arith.constant dense<0.000000e+00> : vector<22x128xf32>
    %94 = tpu.matmul %91, %93, %cst_76 {dimension_numbers = #tpu.dot_dimension_numbers<[1], [0], [0], [1], [0, 0, 1, 1], [], []>} : vector<22x128xbf16>, vector<128x128xbf16>, vector<22x128xf32> -> vector<22x128xf32>
    %95 = arith.addf %90, %94 : vector<22x128xf32>
    %c2_77 = arith.constant 2 : index
    %c0_78 = arith.constant 0 : index
    %96 = vector.load %arg8[%c2_77, %c0_78] : memref<40x128xbf16, #tpu.memory_space<vmem>>, vector<22x128xbf16>
    %c11 = arith.constant 11 : index
    %c0_79 = arith.constant 0 : index
    %c0_80 = arith.constant 0 : index
    %97 = vector.load %arg2[%c11, %c0_79, %c0_80] : memref<72x128x128xbf16, #tpu.memory_space<vmem>>, vector<1x128x128xbf16>
    %98 = vector.shape_cast %97 : vector<1x128x128xbf16> to vector<128x128xbf16>
    %cst_81 = arith.constant dense<0.000000e+00> : vector<22x128xf32>
    %99 = tpu.matmul %96, %98, %cst_81 {dimension_numbers = #tpu.dot_dimension_numbers<[1], [0], [0], [1], [0, 0, 1, 1], [], []>} : vector<22x128xbf16>, vector<128x128xbf16>, vector<22x128xf32> -> vector<22x128xf32>
    %100 = arith.addf %95, %99 : vector<22x128xf32>
    %c6_82 = arith.constant 6 : index
    %c0_83 = arith.constant 0 : index
    %101 = vector.load %arg8[%c6_82, %c0_83] : memref<40x128xbf16, #tpu.memory_space<vmem>>, vector<22x128xbf16>
    %c12_84 = arith.constant 12 : index
    %c0_85 = arith.constant 0 : index
    %c0_86 = arith.constant 0 : index
    %102 = vector.load %arg2[%c12_84, %c0_85, %c0_86] : memref<72x128x128xbf16, #tpu.memory_space<vmem>>, vector<1x128x128xbf16>
    %103 = vector.shape_cast %102 : vector<1x128x128xbf16> to vector<128x128xbf16>
    %cst_87 = arith.constant dense<0.000000e+00> : vector<22x128xf32>
    %104 = tpu.matmul %101, %103, %cst_87 {dimension_numbers = #tpu.dot_dimension_numbers<[1], [0], [0], [1], [0, 0, 1, 1], [], []>} : vector<22x128xbf16>, vector<128x128xbf16>, vector<22x128xf32> -> vector<22x128xf32>
    %105 = arith.addf %100, %104 : vector<22x128xf32>
    %c7_88 = arith.constant 7 : index
    %c0_89 = arith.constant 0 : index
    %106 = vector.load %arg8[%c7_88, %c0_89] : memref<40x128xbf16, #tpu.memory_space<vmem>>, vector<22x128xbf16>
    %c13_90 = arith.constant 13 : index
    %c0_91 = arith.constant 0 : index
    %c0_92 = arith.constant 0 : index
    %107 = vector.load %arg2[%c13_90, %c0_91, %c0_92] : memref<72x128x128xbf16, #tpu.memory_space<vmem>>, vector<1x128x128xbf16>
    %108 = vector.shape_cast %107 : vector<1x128x128xbf16> to vector<128x128xbf16>
    %cst_93 = arith.constant dense<0.000000e+00> : vector<22x128xf32>
    %109 = tpu.matmul %106, %108, %cst_93 {dimension_numbers = #tpu.dot_dimension_numbers<[1], [0], [0], [1], [0, 0, 1, 1], [], []>} : vector<22x128xbf16>, vector<128x128xbf16>, vector<22x128xf32> -> vector<22x128xf32>
    %110 = arith.addf %105, %109 : vector<22x128xf32>
    %c8_94 = arith.constant 8 : index
    %c0_95 = arith.constant 0 : index
    %111 = vector.load %arg8[%c8_94, %c0_95] : memref<40x128xbf16, #tpu.memory_space<vmem>>, vector<22x128xbf16>
    %c14_96 = arith.constant 14 : index
    %c0_97 = arith.constant 0 : index
    %c0_98 = arith.constant 0 : index
    %112 = vector.load %arg2[%c14_96, %c0_97, %c0_98] : memref<72x128x128xbf16, #tpu.memory_space<vmem>>, vector<1x128x128xbf16>
    %113 = vector.shape_cast %112 : vector<1x128x128xbf16> to vector<128x128xbf16>
    %cst_99 = arith.constant dense<0.000000e+00> : vector<22x128xf32>
    %114 = tpu.matmul %111, %113, %cst_99 {dimension_numbers = #tpu.dot_dimension_numbers<[1], [0], [0], [1], [0, 0, 1, 1], [], []>} : vector<22x128xbf16>, vector<128x128xbf16>, vector<22x128xf32> -> vector<22x128xf32>
    %115 = arith.addf %110, %114 : vector<22x128xf32>
    %c12_100 = arith.constant 12 : index
    %c0_101 = arith.constant 0 : index
    %116 = vector.load %arg8[%c12_100, %c0_101] : memref<40x128xbf16, #tpu.memory_space<vmem>>, vector<22x128xbf16>
    %c15 = arith.constant 15 : index
    %c0_102 = arith.constant 0 : index
    %c0_103 = arith.constant 0 : index
    %117 = vector.load %arg2[%c15, %c0_102, %c0_103] : memref<72x128x128xbf16, #tpu.memory_space<vmem>>, vector<1x128x128xbf16>
    %118 = vector.shape_cast %117 : vector<1x128x128xbf16> to vector<128x128xbf16>
    %cst_104 = arith.constant dense<0.000000e+00> : vector<22x128xf32>
    %119 = tpu.matmul %116, %118, %cst_104 {dimension_numbers = #tpu.dot_dimension_numbers<[1], [0], [0], [1], [0, 0, 1, 1], [], []>} : vector<22x128xbf16>, vector<128x128xbf16>, vector<22x128xf32> -> vector<22x128xf32>
    %120 = arith.addf %115, %119 : vector<22x128xf32>
    %c13_105 = arith.constant 13 : index
    %c0_106 = arith.constant 0 : index
    %121 = vector.load %arg8[%c13_105, %c0_106] : memref<40x128xbf16, #tpu.memory_space<vmem>>, vector<22x128xbf16>
    %c16 = arith.constant 16 : index
    %c0_107 = arith.constant 0 : index
    %c0_108 = arith.constant 0 : index
    %122 = vector.load %arg2[%c16, %c0_107, %c0_108] : memref<72x128x128xbf16, #tpu.memory_space<vmem>>, vector<1x128x128xbf16>
    %123 = vector.shape_cast %122 : vector<1x128x128xbf16> to vector<128x128xbf16>
    %cst_109 = arith.constant dense<0.000000e+00> : vector<22x128xf32>
    %124 = tpu.matmul %121, %123, %cst_109 {dimension_numbers = #tpu.dot_dimension_numbers<[1], [0], [0], [1], [0, 0, 1, 1], [], []>} : vector<22x128xbf16>, vector<128x128xbf16>, vector<22x128xf32> -> vector<22x128xf32>
    %125 = arith.addf %120, %124 : vector<22x128xf32>
    %c14_110 = arith.constant 14 : index
    %c0_111 = arith.constant 0 : index
    %126 = vector.load %arg8[%c14_110, %c0_111] : memref<40x128xbf16, #tpu.memory_space<vmem>>, vector<22x128xbf16>
    %c17 = arith.constant 17 : index
    %c0_112 = arith.constant 0 : index
    %c0_113 = arith.constant 0 : index
    %127 = vector.load %arg2[%c17, %c0_112, %c0_113] : memref<72x128x128xbf16, #tpu.memory_space<vmem>>, vector<1x128x128xbf16>
    %128 = vector.shape_cast %127 : vector<1x128x128xbf16> to vector<128x128xbf16>
    %cst_114 = arith.constant dense<0.000000e+00> : vector<22x128xf32>
    %129 = tpu.matmul %126, %128, %cst_114 {dimension_numbers = #tpu.dot_dimension_numbers<[1], [0], [0], [1], [0, 0, 1, 1], [], []>} : vector<22x128xbf16>, vector<128x128xbf16>, vector<22x128xf32> -> vector<22x128xf32>
    %130 = arith.addf %125, %129 : vector<22x128xf32>
    %131 = arith.mulf %130, %5 : vector<22x128xf32>
    %cst_115 = arith.constant dense<0.000000e+00> : vector<128xf32>
    %132 = vector.multi_reduction <add>, %131, %cst_115 [0] : vector<22x128xf32> to vector<128xf32>
    %133 = vector.shape_cast %132 : vector<128xf32> to vector<1x128xf32>
    %134 = arith.mulf %130, %130 : vector<22x128xf32>
    %135 = arith.mulf %134, %5 : vector<22x128xf32>
    %cst_116 = arith.constant dense<0.000000e+00> : vector<128xf32>
    %136 = vector.multi_reduction <add>, %135, %cst_116 [0] : vector<22x128xf32> to vector<128xf32>
    %137 = vector.shape_cast %136 : vector<128xf32> to vector<1x128xf32>
    %cst_117 = arith.constant 6.250000e-02 : f32
    %138 = vector.broadcast %cst_117 : f32 to vector<1x128xf32>
    %139 = arith.mulf %133, %138 : vector<1x128xf32>
    %cst_118 = arith.constant 6.250000e-02 : f32
    %140 = vector.broadcast %cst_118 : f32 to vector<1x128xf32>
    %141 = arith.mulf %137, %140 : vector<1x128xf32>
    %142 = arith.mulf %139, %139 : vector<1x128xf32>
    %143 = arith.subf %141, %142 : vector<1x128xf32>
    %144 = vector.broadcast %139 : vector<1x128xf32> to vector<22x128xf32>
    %145 = arith.subf %130, %144 : vector<22x128xf32>
    %cst_119 = arith.constant 9.99999974E-6 : f32
    %146 = vector.broadcast %cst_119 : f32 to vector<1x128xf32>
    %147 = arith.addf %143, %146 : vector<1x128xf32>
    %148 = math.rsqrt %147 : vector<1x128xf32>
    %149 = vector.broadcast %148 : vector<1x128xf32> to vector<22x128xf32>
    %150 = arith.mulf %145, %149 : vector<22x128xf32>
    %c1_120 = arith.constant 1 : index
    %c0_121 = arith.constant 0 : index
    %c0_122 = arith.constant 0 : index
    %151 = vector.load %arg3[%c1_120, %c0_121, %c0_122] : memref<8x1x128xf32, #tpu.memory_space<vmem>>, vector<1x1x128xf32>
    %152 = vector.shape_cast %151 : vector<1x1x128xf32> to vector<1x128xf32>
    %153 = vector.broadcast %152 : vector<1x128xf32> to vector<22x128xf32>
    %154 = arith.mulf %150, %153 : vector<22x128xf32>
    %c1_123 = arith.constant 1 : index
    %c0_124 = arith.constant 0 : index
    %c0_125 = arith.constant 0 : index
    %155 = vector.load %arg4[%c1_123, %c0_124, %c0_125] : memref<8x1x128xf32, #tpu.memory_space<vmem>>, vector<1x1x128xf32>
    %156 = vector.shape_cast %155 : vector<1x1x128xf32> to vector<1x128xf32>
    %157 = vector.broadcast %156 : vector<1x128xf32> to vector<22x128xf32>
    %158 = arith.addf %154, %157 : vector<22x128xf32>
    %c7_126 = arith.constant 7 : index
    %c0_127 = arith.constant 0 : index
    %159 = vector.load %arg7[%c7_126, %c0_127] : memref<40x128xbf16, #tpu.memory_space<vmem>>, vector<22x128xbf16>
    %160 = arith.extf %159 : vector<22x128xbf16> to vector<22x128xf32>
    %161 = arith.addf %160, %158 : vector<22x128xf32>
    %162 = arith.mulf %161, %5 : vector<22x128xf32>
    %163 = arith.truncf %162 : vector<22x128xf32> to vector<22x128xbf16>
    %c7_128 = arith.constant 7 : index
    %c0_129 = arith.constant 0 : index
    %164 = vector.load %arg7[%c7_128, %c0_129] : memref<40x128xbf16, #tpu.memory_space<vmem>>, vector<22x128xbf16>
    tpu.vector_store %arg7[%c7_128, %c0_129], %163 {strides = array<i32>} : memref<40x128xbf16, #tpu.memory_space<vmem>>, vector<22x128xbf16>,
    %cst_130 = arith.constant 0.000000e+00 : f32
    %165 = vector.broadcast %cst_130 : f32 to vector<22x128xf32>
    %c0_131 = arith.constant 0 : index
    %c0_132 = arith.constant 0 : index
    %166 = vector.load %arg7[%c0_131, %c0_132] : memref<40x128xbf16, #tpu.memory_space<vmem>>, vector<22x128xbf16>
    %c18 = arith.constant 18 : index
    %c0_133 = arith.constant 0 : index
    %c0_134 = arith.constant 0 : index
    %167 = vector.load %arg2[%c18, %c0_133, %c0_134] : memref<72x128x128xbf16, #tpu.memory_space<vmem>>, vector<1x128x128xbf16>
    %168 = vector.shape_cast %167 : vector<1x128x128xbf16> to vector<128x128xbf16>
    %cst_135 = arith.constant dense<0.000000e+00> : vector<22x128xf32>
    %169 = tpu.matmul %166, %168, %cst_135 {dimension_numbers = #tpu.dot_dimension_numbers<[1], [0], [0], [1], [0, 0, 1, 1], [], []>} : vector<22x128xbf16>, vector<128x128xbf16>, vector<22x128xf32> -> vector<22x128xf32>
    %170 = arith.addf %165, %169 : vector<22x128xf32>
    %c1_136 = arith.constant 1 : index
    %c0_137 = arith.constant 0 : index
    %171 = vector.load %arg7[%c1_136, %c0_137] : memref<40x128xbf16, #tpu.memory_space<vmem>>, vector<22x128xbf16>
    %c19 = arith.constant 19 : index
    %c0_138 = arith.constant 0 : index
    %c0_139 = arith.constant 0 : index
    %172 = vector.load %arg2[%c19, %c0_138, %c0_139] : memref<72x128x128xbf16, #tpu.memory_space<vmem>>, vector<1x128x128xbf16>
    %173 = vector.shape_cast %172 : vector<1x128x128xbf16> to vector<128x128xbf16>
    %cst_140 = arith.constant dense<0.000000e+00> : vector<22x128xf32>
    %174 = tpu.matmul %171, %173, %cst_140 {dimension_numbers = #tpu.dot_dimension_numbers<[1], [0], [0], [1], [0, 0, 1, 1], [], []>} : vector<22x128xbf16>, vector<128x128xbf16>, vector<22x128xf32> -> vector<22x128xf32>
    %175 = arith.addf %170, %174 : vector<22x128xf32>
    %c2_141 = arith.constant 2 : index
    %c0_142 = arith.constant 0 : index
    %176 = vector.load %arg7[%c2_141, %c0_142] : memref<40x128xbf16, #tpu.memory_space<vmem>>, vector<22x128xbf16>
    %c20 = arith.constant 20 : index
    %c0_143 = arith.constant 0 : index
    %c0_144 = arith.constant 0 : index
    %177 = vector.load %arg2[%c20, %c0_143, %c0_144] : memref<72x128x128xbf16, #tpu.memory_space<vmem>>, vector<1x128x128xbf16>
    %178 = vector.shape_cast %177 : vector<1x128x128xbf16> to vector<128x128xbf16>
    %cst_145 = arith.constant dense<0.000000e+00> : vector<22x128xf32>
    %179 = tpu.matmul %176, %178, %cst_145 {dimension_numbers = #tpu.dot_dimension_numbers<[1], [0], [0], [1], [0, 0, 1, 1], [], []>} : vector<22x128xbf16>, vector<128x128xbf16>, vector<22x128xf32> -> vector<22x128xf32>
    %180 = arith.addf %175, %179 : vector<22x128xf32>
    %c6_146 = arith.constant 6 : index
    %c0_147 = arith.constant 0 : index
    %181 = vector.load %arg7[%c6_146, %c0_147] : memref<40x128xbf16, #tpu.memory_space<vmem>>, vector<22x128xbf16>
    %c21 = arith.constant 21 : index
    %c0_148 = arith.constant 0 : index
    %c0_149 = arith.constant 0 : index
    %182 = vector.load %arg2[%c21, %c0_148, %c0_149] : memref<72x128x128xbf16, #tpu.memory_space<vmem>>, vector<1x128x128xbf16>
    %183 = vector.shape_cast %182 : vector<1x128x128xbf16> to vector<128x128xbf16>
    %cst_150 = arith.constant dense<0.000000e+00> : vector<22x128xf32>
    %184 = tpu.matmul %181, %183, %cst_150 {dimension_numbers = #tpu.dot_dimension_numbers<[1], [0], [0], [1], [0, 0, 1, 1], [], []>} : vector<22x128xbf16>, vector<128x128xbf16>, vector<22x128xf32> -> vector<22x128xf32>
    %185 = arith.addf %180, %184 : vector<22x128xf32>
    %c7_151 = arith.constant 7 : index
    %c0_152 = arith.constant 0 : index
    %186 = vector.load %arg7[%c7_151, %c0_152] : memref<40x128xbf16, #tpu.memory_space<vmem>>, vector<22x128xbf16>
    %c22 = arith.constant 22 : index
    %c0_153 = arith.constant 0 : index
    %c0_154 = arith.constant 0 : index
    %187 = vector.load %arg2[%c22, %c0_153, %c0_154] : memref<72x128x128xbf16, #tpu.memory_space<vmem>>, vector<1x128x128xbf16>
    %188 = vector.shape_cast %187 : vector<1x128x128xbf16> to vector<128x128xbf16>
    %cst_155 = arith.constant dense<0.000000e+00> : vector<22x128xf32>
    %189 = tpu.matmul %186, %188, %cst_155 {dimension_numbers = #tpu.dot_dimension_numbers<[1], [0], [0], [1], [0, 0, 1, 1], [], []>} : vector<22x128xbf16>, vector<128x128xbf16>, vector<22x128xf32> -> vector<22x128xf32>
    %190 = arith.addf %185, %189 : vector<22x128xf32>
    %c8_156 = arith.constant 8 : index
    %c0_157 = arith.constant 0 : index
    %191 = vector.load %arg7[%c8_156, %c0_157] : memref<40x128xbf16, #tpu.memory_space<vmem>>, vector<22x128xbf16>
    %c23 = arith.constant 23 : index
    %c0_158 = arith.constant 0 : index
    %c0_159 = arith.constant 0 : index
    %192 = vector.load %arg2[%c23, %c0_158, %c0_159] : memref<72x128x128xbf16, #tpu.memory_space<vmem>>, vector<1x128x128xbf16>
    %193 = vector.shape_cast %192 : vector<1x128x128xbf16> to vector<128x128xbf16>
    %cst_160 = arith.constant dense<0.000000e+00> : vector<22x128xf32>
    %194 = tpu.matmul %191, %193, %cst_160 {dimension_numbers = #tpu.dot_dimension_numbers<[1], [0], [0], [1], [0, 0, 1, 1], [], []>} : vector<22x128xbf16>, vector<128x128xbf16>, vector<22x128xf32> -> vector<22x128xf32>
    %195 = arith.addf %190, %194 : vector<22x128xf32>
    %c12_161 = arith.constant 12 : index
    %c0_162 = arith.constant 0 : index
    %196 = vector.load %arg7[%c12_161, %c0_162] : memref<40x128xbf16, #tpu.memory_space<vmem>>, vector<22x128xbf16>
    %c24 = arith.constant 24 : index
    %c0_163 = arith.constant 0 : index
    %c0_164 = arith.constant 0 : index
    %197 = vector.load %arg2[%c24, %c0_163, %c0_164] : memref<72x128x128xbf16, #tpu.memory_space<vmem>>, vector<1x128x128xbf16>
    %198 = vector.shape_cast %197 : vector<1x128x128xbf16> to vector<128x128xbf16>
    %cst_165 = arith.constant dense<0.000000e+00> : vector<22x128xf32>
    %199 = tpu.matmul %196, %198, %cst_165 {dimension_numbers = #tpu.dot_dimension_numbers<[1], [0], [0], [1], [0, 0, 1, 1], [], []>} : vector<22x128xbf16>, vector<128x128xbf16>, vector<22x128xf32> -> vector<22x128xf32>
    %200 = arith.addf %195, %199 : vector<22x128xf32>
    %c13_166 = arith.constant 13 : index
    %c0_167 = arith.constant 0 : index
    %201 = vector.load %arg7[%c13_166, %c0_167] : memref<40x128xbf16, #tpu.memory_space<vmem>>, vector<22x128xbf16>
    %c25 = arith.constant 25 : index
    %c0_168 = arith.constant 0 : index
    %c0_169 = arith.constant 0 : index
    %202 = vector.load %arg2[%c25, %c0_168, %c0_169] : memref<72x128x128xbf16, #tpu.memory_space<vmem>>, vector<1x128x128xbf16>
    %203 = vector.shape_cast %202 : vector<1x128x128xbf16> to vector<128x128xbf16>
    %cst_170 = arith.constant dense<0.000000e+00> : vector<22x128xf32>
    %204 = tpu.matmul %201, %203, %cst_170 {dimension_numbers = #tpu.dot_dimension_numbers<[1], [0], [0], [1], [0, 0, 1, 1], [], []>} : vector<22x128xbf16>, vector<128x128xbf16>, vector<22x128xf32> -> vector<22x128xf32>
    %205 = arith.addf %200, %204 : vector<22x128xf32>
    %c14_171 = arith.constant 14 : index
    %c0_172 = arith.constant 0 : index
    %206 = vector.load %arg7[%c14_171, %c0_172] : memref<40x128xbf16, #tpu.memory_space<vmem>>, vector<22x128xbf16>
    %c26 = arith.constant 26 : index
    %c0_173 = arith.constant 0 : index
    %c0_174 = arith.constant 0 : index
    %207 = vector.load %arg2[%c26, %c0_173, %c0_174] : memref<72x128x128xbf16, #tpu.memory_space<vmem>>, vector<1x128x128xbf16>
    %208 = vector.shape_cast %207 : vector<1x128x128xbf16> to vector<128x128xbf16>
    %cst_175 = arith.constant dense<0.000000e+00> : vector<22x128xf32>
    %209 = tpu.matmul %206, %208, %cst_175 {dimension_numbers = #tpu.dot_dimension_numbers<[1], [0], [0], [1], [0, 0, 1, 1], [], []>} : vector<22x128xbf16>, vector<128x128xbf16>, vector<22x128xf32> -> vector<22x128xf32>
    %210 = arith.addf %205, %209 : vector<22x128xf32>
    %211 = arith.mulf %210, %5 : vector<22x128xf32>
    %cst_176 = arith.constant dense<0.000000e+00> : vector<128xf32>
    %212 = vector.multi_reduction <add>, %211, %cst_176 [0] : vector<22x128xf32> to vector<128xf32>
    %213 = vector.shape_cast %212 : vector<128xf32> to vector<1x128xf32>
    %214 = arith.mulf %210, %210 : vector<22x128xf32>
    %215 = arith.mulf %214, %5 : vector<22x128xf32>
    %cst_177 = arith.constant dense<0.000000e+00> : vector<128xf32>
    %216 = vector.multi_reduction <add>, %215, %cst_177 [0] : vector<22x128xf32> to vector<128xf32>
    %217 = vector.shape_cast %216 : vector<128xf32> to vector<1x128xf32>
    %cst_178 = arith.constant 6.250000e-02 : f32
    %218 = vector.broadcast %cst_178 : f32 to vector<1x128xf32>
    %219 = arith.mulf %213, %218 : vector<1x128xf32>
    %cst_179 = arith.constant 6.250000e-02 : f32
    %220 = vector.broadcast %cst_179 : f32 to vector<1x128xf32>
    %221 = arith.mulf %217, %220 : vector<1x128xf32>
    %222 = arith.mulf %219, %219 : vector<1x128xf32>
    %223 = arith.subf %221, %222 : vector<1x128xf32>
    %224 = vector.broadcast %219 : vector<1x128xf32> to vector<22x128xf32>
    %225 = arith.subf %210, %224 : vector<22x128xf32>
    %cst_180 = arith.constant 9.99999974E-6 : f32
    %226 = vector.broadcast %cst_180 : f32 to vector<1x128xf32>
    %227 = arith.addf %223, %226 : vector<1x128xf32>
    %228 = math.rsqrt %227 : vector<1x128xf32>
    %229 = vector.broadcast %228 : vector<1x128xf32> to vector<22x128xf32>
    %230 = arith.mulf %225, %229 : vector<22x128xf32>
    %c2_181 = arith.constant 2 : index
    %c0_182 = arith.constant 0 : index
    %c0_183 = arith.constant 0 : index
    %231 = vector.load %arg3[%c2_181, %c0_182, %c0_183] : memref<8x1x128xf32, #tpu.memory_space<vmem>>, vector<1x1x128xf32>
    %232 = vector.shape_cast %231 : vector<1x1x128xf32> to vector<1x128xf32>
    %233 = vector.broadcast %232 : vector<1x128xf32> to vector<22x128xf32>
    %234 = arith.mulf %230, %233 : vector<22x128xf32>
    %c2_184 = arith.constant 2 : index
    %c0_185 = arith.constant 0 : index
    %c0_186 = arith.constant 0 : index
    %235 = vector.load %arg4[%c2_184, %c0_185, %c0_186] : memref<8x1x128xf32, #tpu.memory_space<vmem>>, vector<1x1x128xf32>
    %236 = vector.shape_cast %235 : vector<1x1x128xf32> to vector<1x128xf32>
    %237 = vector.broadcast %236 : vector<1x128xf32> to vector<22x128xf32>
    %238 = arith.addf %234, %237 : vector<22x128xf32>
    %cst_187 = arith.constant 0.000000e+00 : f32
    %239 = vector.broadcast %cst_187 : f32 to vector<22x128xf32>
    %240 = arith.maximumf %238, %239 : vector<22x128xf32>
    %241 = arith.mulf %240, %5 : vector<22x128xf32>
    %242 = arith.truncf %241 : vector<22x128xf32> to vector<22x128xbf16>
    %c7_188 = arith.constant 7 : index
    %c0_189 = arith.constant 0 : index
    %243 = vector.load %arg8[%c7_188, %c0_189] : memref<40x128xbf16, #tpu.memory_space<vmem>>, vector<22x128xbf16>
    tpu.vector_store %arg8[%c7_188, %c0_189], %242 {strides = array<i32>} : memref<40x128xbf16, #tpu.memory_space<vmem>>, vector<22x128xbf16>,
    %cst_190 = arith.constant 0.000000e+00 : f32
    %244 = vector.broadcast %cst_190 : f32 to vector<22x128xf32>
    %c0_191 = arith.constant 0 : index
    %c0_192 = arith.constant 0 : index
    %245 = vector.load %arg8[%c0_191, %c0_192] : memref<40x128xbf16, #tpu.memory_space<vmem>>, vector<22x128xbf16>
    %c27 = arith.constant 27 : index
    %c0_193 = arith.constant 0 : index
    %c0_194 = arith.constant 0 : index
    %246 = vector.load %arg2[%c27, %c0_193, %c0_194] : memref<72x128x128xbf16, #tpu.memory_space<vmem>>, vector<1x128x128xbf16>
    %247 = vector.shape_cast %246 : vector<1x128x128xbf16> to vector<128x128xbf16>
    %cst_195 = arith.constant dense<0.000000e+00> : vector<22x128xf32>
    %248 = tpu.matmul %245, %247, %cst_195 {dimension_numbers = #tpu.dot_dimension_numbers<[1], [0], [0], [1], [0, 0, 1, 1], [], []>} : vector<22x128xbf16>, vector<128x128xbf16>, vector<22x128xf32> -> vector<22x128xf32>
    %249 = arith.addf %244, %248 : vector<22x128xf32>
    %c1_196 = arith.constant 1 : index
    %c0_197 = arith.constant 0 : index
    %250 = vector.load %arg8[%c1_196, %c0_197] : memref<40x128xbf16, #tpu.memory_space<vmem>>, vector<22x128xbf16>
    %c28 = arith.constant 28 : index
    %c0_198 = arith.constant 0 : index
    %c0_199 = arith.constant 0 : index
    %251 = vector.load %arg2[%c28, %c0_198, %c0_199] : memref<72x128x128xbf16, #tpu.memory_space<vmem>>, vector<1x128x128xbf16>
    %252 = vector.shape_cast %251 : vector<1x128x128xbf16> to vector<128x128xbf16>
    %cst_200 = arith.constant dense<0.000000e+00> : vector<22x128xf32>
    %253 = tpu.matmul %250, %252, %cst_200 {dimension_numbers = #tpu.dot_dimension_numbers<[1], [0], [0], [1], [0, 0, 1, 1], [], []>} : vector<22x128xbf16>, vector<128x128xbf16>, vector<22x128xf32> -> vector<22x128xf32>
    %254 = arith.addf %249, %253 : vector<22x128xf32>
    %c2_201 = arith.constant 2 : index
    %c0_202 = arith.constant 0 : index
    %255 = vector.load %arg8[%c2_201, %c0_202] : memref<40x128xbf16, #tpu.memory_space<vmem>>, vector<22x128xbf16>
    %c29 = arith.constant 29 : index
    %c0_203 = arith.constant 0 : index
    %c0_204 = arith.constant 0 : index
    %256 = vector.load %arg2[%c29, %c0_203, %c0_204] : memref<72x128x128xbf16, #tpu.memory_space<vmem>>, vector<1x128x128xbf16>
    %257 = vector.shape_cast %256 : vector<1x128x128xbf16> to vector<128x128xbf16>
    %cst_205 = arith.constant dense<0.000000e+00> : vector<22x128xf32>
    %258 = tpu.matmul %255, %257, %cst_205 {dimension_numbers = #tpu.dot_dimension_numbers<[1], [0], [0], [1], [0, 0, 1, 1], [], []>} : vector<22x128xbf16>, vector<128x128xbf16>, vector<22x128xf32> -> vector<22x128xf32>
    %259 = arith.addf %254, %258 : vector<22x128xf32>
    %c6_206 = arith.constant 6 : index
    %c0_207 = arith.constant 0 : index
    %260 = vector.load %arg8[%c6_206, %c0_207] : memref<40x128xbf16, #tpu.memory_space<vmem>>, vector<22x128xbf16>
    %c30 = arith.constant 30 : index
    %c0_208 = arith.constant 0 : index
    %c0_209 = arith.constant 0 : index
    %261 = vector.load %arg2[%c30, %c0_208, %c0_209] : memref<72x128x128xbf16, #tpu.memory_space<vmem>>, vector<1x128x128xbf16>
    %262 = vector.shape_cast %261 : vector<1x128x128xbf16> to vector<128x128xbf16>
    %cst_210 = arith.constant dense<0.000000e+00> : vector<22x128xf32>
    %263 = tpu.matmul %260, %262, %cst_210 {dimension_numbers = #tpu.dot_dimension_numbers<[1], [0], [0], [1], [0, 0, 1, 1], [], []>} : vector<22x128xbf16>, vector<128x128xbf16>, vector<22x128xf32> -> vector<22x128xf32>
    %264 = arith.addf %259, %263 : vector<22x128xf32>
    %c7_211 = arith.constant 7 : index
    %c0_212 = arith.constant 0 : index
    %265 = vector.load %arg8[%c7_211, %c0_212] : memref<40x128xbf16, #tpu.memory_space<vmem>>, vector<22x128xbf16>
    %c31 = arith.constant 31 : index
    %c0_213 = arith.constant 0 : index
    %c0_214 = arith.constant 0 : index
    %266 = vector.load %arg2[%c31, %c0_213, %c0_214] : memref<72x128x128xbf16, #tpu.memory_space<vmem>>, vector<1x128x128xbf16>
    %267 = vector.shape_cast %266 : vector<1x128x128xbf16> to vector<128x128xbf16>
    %cst_215 = arith.constant dense<0.000000e+00> : vector<22x128xf32>
    %268 = tpu.matmul %265, %267, %cst_215 {dimension_numbers = #tpu.dot_dimension_numbers<[1], [0], [0], [1], [0, 0, 1, 1], [], []>} : vector<22x128xbf16>, vector<128x128xbf16>, vector<22x128xf32> -> vector<22x128xf32>
    %269 = arith.addf %264, %268 : vector<22x128xf32>
    %c8_216 = arith.constant 8 : index
    %c0_217 = arith.constant 0 : index
    %270 = vector.load %arg8[%c8_216, %c0_217] : memref<40x128xbf16, #tpu.memory_space<vmem>>, vector<22x128xbf16>
    %c32 = arith.constant 32 : index
    %c0_218 = arith.constant 0 : index
    %c0_219 = arith.constant 0 : index
    %271 = vector.load %arg2[%c32, %c0_218, %c0_219] : memref<72x128x128xbf16, #tpu.memory_space<vmem>>, vector<1x128x128xbf16>
    %272 = vector.shape_cast %271 : vector<1x128x128xbf16> to vector<128x128xbf16>
    %cst_220 = arith.constant dense<0.000000e+00> : vector<22x128xf32>
    %273 = tpu.matmul %270, %272, %cst_220 {dimension_numbers = #tpu.dot_dimension_numbers<[1], [0], [0], [1], [0, 0, 1, 1], [], []>} : vector<22x128xbf16>, vector<128x128xbf16>, vector<22x128xf32> -> vector<22x128xf32>
    %274 = arith.addf %269, %273 : vector<22x128xf32>
    %c12_221 = arith.constant 12 : index
    %c0_222 = arith.constant 0 : index
    %275 = vector.load %arg8[%c12_221, %c0_222] : memref<40x128xbf16, #tpu.memory_space<vmem>>, vector<22x128xbf16>
    %c33 = arith.constant 33 : index
    %c0_223 = arith.constant 0 : index
    %c0_224 = arith.constant 0 : index
    %276 = vector.load %arg2[%c33, %c0_223, %c0_224] : memref<72x128x128xbf16, #tpu.memory_space<vmem>>, vector<1x128x128xbf16>
    %277 = vector.shape_cast %276 : vector<1x128x128xbf16> to vector<128x128xbf16>
    %cst_225 = arith.constant dense<0.000000e+00> : vector<22x128xf32>
    %278 = tpu.matmul %275, %277, %cst_225 {dimension_numbers = #tpu.dot_dimension_numbers<[1], [0], [0], [1], [0, 0, 1, 1], [], []>} : vector<22x128xbf16>, vector<128x128xbf16>, vector<22x128xf32> -> vector<22x128xf32>
    %279 = arith.addf %274, %278 : vector<22x128xf32>
    %c13_226 = arith.constant 13 : index
    %c0_227 = arith.constant 0 : index
    %280 = vector.load %arg8[%c13_226, %c0_227] : memref<40x128xbf16, #tpu.memory_space<vmem>>, vector<22x128xbf16>
    %c34 = arith.constant 34 : index
    %c0_228 = arith.constant 0 : index
    %c0_229 = arith.constant 0 : index
    %281 = vector.load %arg2[%c34, %c0_228, %c0_229] : memref<72x128x128xbf16, #tpu.memory_space<vmem>>, vector<1x128x128xbf16>
    %282 = vector.shape_cast %281 : vector<1x128x128xbf16> to vector<128x128xbf16>
    %cst_230 = arith.constant dense<0.000000e+00> : vector<22x128xf32>
    %283 = tpu.matmul %280, %282, %cst_230 {dimension_numbers = #tpu.dot_dimension_numbers<[1], [0], [0], [1], [0, 0, 1, 1], [], []>} : vector<22x128xbf16>, vector<128x128xbf16>, vector<22x128xf32> -> vector<22x128xf32>
    %284 = arith.addf %279, %283 : vector<22x128xf32>
    %c14_231 = arith.constant 14 : index
    %c0_232 = arith.constant 0 : index
    %285 = vector.load %arg8[%c14_231, %c0_232] : memref<40x128xbf16, #tpu.memory_space<vmem>>, vector<22x128xbf16>
    %c35 = arith.constant 35 : index
    %c0_233 = arith.constant 0 : index
    %c0_234 = arith.constant 0 : index
    %286 = vector.load %arg2[%c35, %c0_233, %c0_234] : memref<72x128x128xbf16, #tpu.memory_space<vmem>>, vector<1x128x128xbf16>
    %287 = vector.shape_cast %286 : vector<1x128x128xbf16> to vector<128x128xbf16>
    %cst_235 = arith.constant dense<0.000000e+00> : vector<22x128xf32>
    %288 = tpu.matmul %285, %287, %cst_235 {dimension_numbers = #tpu.dot_dimension_numbers<[1], [0], [0], [1], [0, 0, 1, 1], [], []>} : vector<22x128xbf16>, vector<128x128xbf16>, vector<22x128xf32> -> vector<22x128xf32>
    %289 = arith.addf %284, %288 : vector<22x128xf32>
    %290 = arith.mulf %289, %5 : vector<22x128xf32>
    %cst_236 = arith.constant dense<0.000000e+00> : vector<128xf32>
    %291 = vector.multi_reduction <add>, %290, %cst_236 [0] : vector<22x128xf32> to vector<128xf32>
    %292 = vector.shape_cast %291 : vector<128xf32> to vector<1x128xf32>
    %293 = arith.mulf %289, %289 : vector<22x128xf32>
    %294 = arith.mulf %293, %5 : vector<22x128xf32>
    %cst_237 = arith.constant dense<0.000000e+00> : vector<128xf32>
    %295 = vector.multi_reduction <add>, %294, %cst_237 [0] : vector<22x128xf32> to vector<128xf32>
    %296 = vector.shape_cast %295 : vector<128xf32> to vector<1x128xf32>
    %cst_238 = arith.constant 6.250000e-02 : f32
    %297 = vector.broadcast %cst_238 : f32 to vector<1x128xf32>
    %298 = arith.mulf %292, %297 : vector<1x128xf32>
    %cst_239 = arith.constant 6.250000e-02 : f32
    %299 = vector.broadcast %cst_239 : f32 to vector<1x128xf32>
    %300 = arith.mulf %296, %299 : vector<1x128xf32>
    %301 = arith.mulf %298, %298 : vector<1x128xf32>
    %302 = arith.subf %300, %301 : vector<1x128xf32>
    %303 = vector.broadcast %298 : vector<1x128xf32> to vector<22x128xf32>
    %304 = arith.subf %289, %303 : vector<22x128xf32>
    %cst_240 = arith.constant 9.99999974E-6 : f32
    %305 = vector.broadcast %cst_240 : f32 to vector<1x128xf32>
    %306 = arith.addf %302, %305 : vector<1x128xf32>
    %307 = math.rsqrt %306 : vector<1x128xf32>
    %308 = vector.broadcast %307 : vector<1x128xf32> to vector<22x128xf32>
    %309 = arith.mulf %304, %308 : vector<22x128xf32>
    %c3_241 = arith.constant 3 : index
    %c0_242 = arith.constant 0 : index
    %c0_243 = arith.constant 0 : index
    %310 = vector.load %arg3[%c3_241, %c0_242, %c0_243] : memref<8x1x128xf32, #tpu.memory_space<vmem>>, vector<1x1x128xf32>
    %311 = vector.shape_cast %310 : vector<1x1x128xf32> to vector<1x128xf32>
    %312 = vector.broadcast %311 : vector<1x128xf32> to vector<22x128xf32>
    %313 = arith.mulf %309, %312 : vector<22x128xf32>
    %c3_244 = arith.constant 3 : index
    %c0_245 = arith.constant 0 : index
    %c0_246 = arith.constant 0 : index
    %314 = vector.load %arg4[%c3_244, %c0_245, %c0_246] : memref<8x1x128xf32, #tpu.memory_space<vmem>>, vector<1x1x128xf32>
    %315 = vector.shape_cast %314 : vector<1x1x128xf32> to vector<1x128xf32>
    %316 = vector.broadcast %315 : vector<1x128xf32> to vector<22x128xf32>
    %317 = arith.addf %313, %316 : vector<22x128xf32>
    %c7_247 = arith.constant 7 : index
    %c0_248 = arith.constant 0 : index
    %318 = vector.load %arg7[%c7_247, %c0_248] : memref<40x128xbf16, #tpu.memory_space<vmem>>, vector<22x128xbf16>
    %319 = arith.extf %318 : vector<22x128xbf16> to vector<22x128xf32>
    %320 = arith.addf %319, %317 : vector<22x128xf32>
    %321 = arith.mulf %320, %5 : vector<22x128xf32>
    %322 = arith.truncf %321 : vector<22x128xf32> to vector<22x128xbf16>
    %c7_249 = arith.constant 7 : index
    %c0_250 = arith.constant 0 : index
    %323 = vector.load %arg7[%c7_249, %c0_250] : memref<40x128xbf16, #tpu.memory_space<vmem>>, vector<22x128xbf16>
    tpu.vector_store %arg7[%c7_249, %c0_250], %322 {strides = array<i32>} : memref<40x128xbf16, #tpu.memory_space<vmem>>, vector<22x128xbf16>,
    %cst_251 = arith.constant 0.000000e+00 : f32
    %324 = vector.broadcast %cst_251 : f32 to vector<22x128xf32>
    %c0_252 = arith.constant 0 : index
    %c0_253 = arith.constant 0 : index
    %325 = vector.load %arg7[%c0_252, %c0_253] : memref<40x128xbf16, #tpu.memory_space<vmem>>, vector<22x128xbf16>
    %c36 = arith.constant 36 : index
    %c0_254 = arith.constant 0 : index
    %c0_255 = arith.constant 0 : index
    %326 = vector.load %arg2[%c36, %c0_254, %c0_255] : memref<72x128x128xbf16, #tpu.memory_space<vmem>>, vector<1x128x128xbf16>
    %327 = vector.shape_cast %326 : vector<1x128x128xbf16> to vector<128x128xbf16>
    %cst_256 = arith.constant dense<0.000000e+00> : vector<22x128xf32>
    %328 = tpu.matmul %325, %327, %cst_256 {dimension_numbers = #tpu.dot_dimension_numbers<[1], [0], [0], [1], [0, 0, 1, 1], [], []>} : vector<22x128xbf16>, vector<128x128xbf16>, vector<22x128xf32> -> vector<22x128xf32>
    %329 = arith.addf %324, %328 : vector<22x128xf32>
    %c1_257 = arith.constant 1 : index
    %c0_258 = arith.constant 0 : index
    %330 = vector.load %arg7[%c1_257, %c0_258] : memref<40x128xbf16, #tpu.memory_space<vmem>>, vector<22x128xbf16>
    %c37 = arith.constant 37 : index
    %c0_259 = arith.constant 0 : index
    %c0_260 = arith.constant 0 : index
    %331 = vector.load %arg2[%c37, %c0_259, %c0_260] : memref<72x128x128xbf16, #tpu.memory_space<vmem>>, vector<1x128x128xbf16>
    %332 = vector.shape_cast %331 : vector<1x128x128xbf16> to vector<128x128xbf16>
    %cst_261 = arith.constant dense<0.000000e+00> : vector<22x128xf32>
    %333 = tpu.matmul %330, %332, %cst_261 {dimension_numbers = #tpu.dot_dimension_numbers<[1], [0], [0], [1], [0, 0, 1, 1], [], []>} : vector<22x128xbf16>, vector<128x128xbf16>, vector<22x128xf32> -> vector<22x128xf32>
    %334 = arith.addf %329, %333 : vector<22x128xf32>
    %c2_262 = arith.constant 2 : index
    %c0_263 = arith.constant 0 : index
    %335 = vector.load %arg7[%c2_262, %c0_263] : memref<40x128xbf16, #tpu.memory_space<vmem>>, vector<22x128xbf16>
    %c38 = arith.constant 38 : index
    %c0_264 = arith.constant 0 : index
    %c0_265 = arith.constant 0 : index
    %336 = vector.load %arg2[%c38, %c0_264, %c0_265] : memref<72x128x128xbf16, #tpu.memory_space<vmem>>, vector<1x128x128xbf16>
    %337 = vector.shape_cast %336 : vector<1x128x128xbf16> to vector<128x128xbf16>
    %cst_266 = arith.constant dense<0.000000e+00> : vector<22x128xf32>
    %338 = tpu.matmul %335, %337, %cst_266 {dimension_numbers = #tpu.dot_dimension_numbers<[1], [0], [0], [1], [0, 0, 1, 1], [], []>} : vector<22x128xbf16>, vector<128x128xbf16>, vector<22x128xf32> -> vector<22x128xf32>
    %339 = arith.addf %334, %338 : vector<22x128xf32>
    %c6_267 = arith.constant 6 : index
    %c0_268 = arith.constant 0 : index
    %340 = vector.load %arg7[%c6_267, %c0_268] : memref<40x128xbf16, #tpu.memory_space<vmem>>, vector<22x128xbf16>
    %c39 = arith.constant 39 : index
    %c0_269 = arith.constant 0 : index
    %c0_270 = arith.constant 0 : index
    %341 = vector.load %arg2[%c39, %c0_269, %c0_270] : memref<72x128x128xbf16, #tpu.memory_space<vmem>>, vector<1x128x128xbf16>
    %342 = vector.shape_cast %341 : vector<1x128x128xbf16> to vector<128x128xbf16>
    %cst_271 = arith.constant dense<0.000000e+00> : vector<22x128xf32>
    %343 = tpu.matmul %340, %342, %cst_271 {dimension_numbers = #tpu.dot_dimension_numbers<[1], [0], [0], [1], [0, 0, 1, 1], [], []>} : vector<22x128xbf16>, vector<128x128xbf16>, vector<22x128xf32> -> vector<22x128xf32>
    %344 = arith.addf %339, %343 : vector<22x128xf32>
    %c7_272 = arith.constant 7 : index
    %c0_273 = arith.constant 0 : index
    %345 = vector.load %arg7[%c7_272, %c0_273] : memref<40x128xbf16, #tpu.memory_space<vmem>>, vector<22x128xbf16>
    %c40 = arith.constant 40 : index
    %c0_274 = arith.constant 0 : index
    %c0_275 = arith.constant 0 : index
    %346 = vector.load %arg2[%c40, %c0_274, %c0_275] : memref<72x128x128xbf16, #tpu.memory_space<vmem>>, vector<1x128x128xbf16>
    %347 = vector.shape_cast %346 : vector<1x128x128xbf16> to vector<128x128xbf16>
    %cst_276 = arith.constant dense<0.000000e+00> : vector<22x128xf32>
    %348 = tpu.matmul %345, %347, %cst_276 {dimension_numbers = #tpu.dot_dimension_numbers<[1], [0], [0], [1], [0, 0, 1, 1], [], []>} : vector<22x128xbf16>, vector<128x128xbf16>, vector<22x128xf32> -> vector<22x128xf32>
    %349 = arith.addf %344, %348 : vector<22x128xf32>
    %c8_277 = arith.constant 8 : index
    %c0_278 = arith.constant 0 : index
    %350 = vector.load %arg7[%c8_277, %c0_278] : memref<40x128xbf16, #tpu.memory_space<vmem>>, vector<22x128xbf16>
    %c41 = arith.constant 41 : index
    %c0_279 = arith.constant 0 : index
    %c0_280 = arith.constant 0 : index
    %351 = vector.load %arg2[%c41, %c0_279, %c0_280] : memref<72x128x128xbf16, #tpu.memory_space<vmem>>, vector<1x128x128xbf16>
    %352 = vector.shape_cast %351 : vector<1x128x128xbf16> to vector<128x128xbf16>
    %cst_281 = arith.constant dense<0.000000e+00> : vector<22x128xf32>
    %353 = tpu.matmul %350, %352, %cst_281 {dimension_numbers = #tpu.dot_dimension_numbers<[1], [0], [0], [1], [0, 0, 1, 1], [], []>} : vector<22x128xbf16>, vector<128x128xbf16>, vector<22x128xf32> -> vector<22x128xf32>
    %354 = arith.addf %349, %353 : vector<22x128xf32>
    %c12_282 = arith.constant 12 : index
    %c0_283 = arith.constant 0 : index
    %355 = vector.load %arg7[%c12_282, %c0_283] : memref<40x128xbf16, #tpu.memory_space<vmem>>, vector<22x128xbf16>
    %c42 = arith.constant 42 : index
    %c0_284 = arith.constant 0 : index
    %c0_285 = arith.constant 0 : index
    %356 = vector.load %arg2[%c42, %c0_284, %c0_285] : memref<72x128x128xbf16, #tpu.memory_space<vmem>>, vector<1x128x128xbf16>
    %357 = vector.shape_cast %356 : vector<1x128x128xbf16> to vector<128x128xbf16>
    %cst_286 = arith.constant dense<0.000000e+00> : vector<22x128xf32>
    %358 = tpu.matmul %355, %357, %cst_286 {dimension_numbers = #tpu.dot_dimension_numbers<[1], [0], [0], [1], [0, 0, 1, 1], [], []>} : vector<22x128xbf16>, vector<128x128xbf16>, vector<22x128xf32> -> vector<22x128xf32>
    %359 = arith.addf %354, %358 : vector<22x128xf32>
    %c13_287 = arith.constant 13 : index
    %c0_288 = arith.constant 0 : index
    %360 = vector.load %arg7[%c13_287, %c0_288] : memref<40x128xbf16, #tpu.memory_space<vmem>>, vector<22x128xbf16>
    %c43 = arith.constant 43 : index
    %c0_289 = arith.constant 0 : index
    %c0_290 = arith.constant 0 : index
    %361 = vector.load %arg2[%c43, %c0_289, %c0_290] : memref<72x128x128xbf16, #tpu.memory_space<vmem>>, vector<1x128x128xbf16>
    %362 = vector.shape_cast %361 : vector<1x128x128xbf16> to vector<128x128xbf16>
    %cst_291 = arith.constant dense<0.000000e+00> : vector<22x128xf32>
    %363 = tpu.matmul %360, %362, %cst_291 {dimension_numbers = #tpu.dot_dimension_numbers<[1], [0], [0], [1], [0, 0, 1, 1], [], []>} : vector<22x128xbf16>, vector<128x128xbf16>, vector<22x128xf32> -> vector<22x128xf32>
    %364 = arith.addf %359, %363 : vector<22x128xf32>
    %c14_292 = arith.constant 14 : index
    %c0_293 = arith.constant 0 : index
    %365 = vector.load %arg7[%c14_292, %c0_293] : memref<40x128xbf16, #tpu.memory_space<vmem>>, vector<22x128xbf16>
    %c44 = arith.constant 44 : index
    %c0_294 = arith.constant 0 : index
    %c0_295 = arith.constant 0 : index
    %366 = vector.load %arg2[%c44, %c0_294, %c0_295] : memref<72x128x128xbf16, #tpu.memory_space<vmem>>, vector<1x128x128xbf16>
    %367 = vector.shape_cast %366 : vector<1x128x128xbf16> to vector<128x128xbf16>
    %cst_296 = arith.constant dense<0.000000e+00> : vector<22x128xf32>
    %368 = tpu.matmul %365, %367, %cst_296 {dimension_numbers = #tpu.dot_dimension_numbers<[1], [0], [0], [1], [0, 0, 1, 1], [], []>} : vector<22x128xbf16>, vector<128x128xbf16>, vector<22x128xf32> -> vector<22x128xf32>
    %369 = arith.addf %364, %368 : vector<22x128xf32>
    %370 = arith.mulf %369, %5 : vector<22x128xf32>
    %cst_297 = arith.constant dense<0.000000e+00> : vector<128xf32>
    %371 = vector.multi_reduction <add>, %370, %cst_297 [0] : vector<22x128xf32> to vector<128xf32>
    %372 = vector.shape_cast %371 : vector<128xf32> to vector<1x128xf32>
    %373 = arith.mulf %369, %369 : vector<22x128xf32>
    %374 = arith.mulf %373, %5 : vector<22x128xf32>
    %cst_298 = arith.constant dense<0.000000e+00> : vector<128xf32>
    %375 = vector.multi_reduction <add>, %374, %cst_298 [0] : vector<22x128xf32> to vector<128xf32>
    %376 = vector.shape_cast %375 : vector<128xf32> to vector<1x128xf32>
    %cst_299 = arith.constant 6.250000e-02 : f32
    %377 = vector.broadcast %cst_299 : f32 to vector<1x128xf32>
    %378 = arith.mulf %372, %377 : vector<1x128xf32>
    %cst_300 = arith.constant 6.250000e-02 : f32
    %379 = vector.broadcast %cst_300 : f32 to vector<1x128xf32>
    %380 = arith.mulf %376, %379 : vector<1x128xf32>
    %381 = arith.mulf %378, %378 : vector<1x128xf32>
    %382 = arith.subf %380, %381 : vector<1x128xf32>
    %383 = vector.broadcast %378 : vector<1x128xf32> to vector<22x128xf32>
    %384 = arith.subf %369, %383 : vector<22x128xf32>
    %cst_301 = arith.constant 9.99999974E-6 : f32
    %385 = vector.broadcast %cst_301 : f32 to vector<1x128xf32>
    %386 = arith.addf %382, %385 : vector<1x128xf32>
    %387 = math.rsqrt %386 : vector<1x128xf32>
    %388 = vector.broadcast %387 : vector<1x128xf32> to vector<22x128xf32>
    %389 = arith.mulf %384, %388 : vector<22x128xf32>
    %c4_302 = arith.constant 4 : index
    %c0_303 = arith.constant 0 : index
    %c0_304 = arith.constant 0 : index
    %390 = vector.load %arg3[%c4_302, %c0_303, %c0_304] : memref<8x1x128xf32, #tpu.memory_space<vmem>>, vector<1x1x128xf32>
    %391 = vector.shape_cast %390 : vector<1x1x128xf32> to vector<1x128xf32>
    %392 = vector.broadcast %391 : vector<1x128xf32> to vector<22x128xf32>
    %393 = arith.mulf %389, %392 : vector<22x128xf32>
    %c4_305 = arith.constant 4 : index
    %c0_306 = arith.constant 0 : index
    %c0_307 = arith.constant 0 : index
    %394 = vector.load %arg4[%c4_305, %c0_306, %c0_307] : memref<8x1x128xf32, #tpu.memory_space<vmem>>, vector<1x1x128xf32>
    %395 = vector.shape_cast %394 : vector<1x1x128xf32> to vector<1x128xf32>
    %396 = vector.broadcast %395 : vector<1x128xf32> to vector<22x128xf32>
    %397 = arith.addf %393, %396 : vector<22x128xf32>
    %cst_308 = arith.constant 0.000000e+00 : f32
    %398 = vector.broadcast %cst_308 : f32 to vector<22x128xf32>
    %399 = arith.maximumf %397, %398 : vector<22x128xf32>
    %400 = arith.mulf %399, %5 : vector<22x128xf32>
    %401 = arith.truncf %400 : vector<22x128xf32> to vector<22x128xbf16>
    %c7_309 = arith.constant 7 : index
    %c0_310 = arith.constant 0 : index
    %402 = vector.load %arg8[%c7_309, %c0_310] : memref<40x128xbf16, #tpu.memory_space<vmem>>, vector<22x128xbf16>
    tpu.vector_store %arg8[%c7_309, %c0_310], %401 {strides = array<i32>} : memref<40x128xbf16, #tpu.memory_space<vmem>>, vector<22x128xbf16>,
    %cst_311 = arith.constant 0.000000e+00 : f32
    %403 = vector.broadcast %cst_311 : f32 to vector<22x128xf32>
    %c0_312 = arith.constant 0 : index
    %c0_313 = arith.constant 0 : index
    %404 = vector.load %arg8[%c0_312, %c0_313] : memref<40x128xbf16, #tpu.memory_space<vmem>>, vector<22x128xbf16>
    %c45 = arith.constant 45 : index
    %c0_314 = arith.constant 0 : index
    %c0_315 = arith.constant 0 : index
    %405 = vector.load %arg2[%c45, %c0_314, %c0_315] : memref<72x128x128xbf16, #tpu.memory_space<vmem>>, vector<1x128x128xbf16>
    %406 = vector.shape_cast %405 : vector<1x128x128xbf16> to vector<128x128xbf16>
    %cst_316 = arith.constant dense<0.000000e+00> : vector<22x128xf32>
    %407 = tpu.matmul %404, %406, %cst_316 {dimension_numbers = #tpu.dot_dimension_numbers<[1], [0], [0], [1], [0, 0, 1, 1], [], []>} : vector<22x128xbf16>, vector<128x128xbf16>, vector<22x128xf32> -> vector<22x128xf32>
    %408 = arith.addf %403, %407 : vector<22x128xf32>
    %c1_317 = arith.constant 1 : index
    %c0_318 = arith.constant 0 : index
    %409 = vector.load %arg8[%c1_317, %c0_318] : memref<40x128xbf16, #tpu.memory_space<vmem>>, vector<22x128xbf16>
    %c46 = arith.constant 46 : index
    %c0_319 = arith.constant 0 : index
    %c0_320 = arith.constant 0 : index
    %410 = vector.load %arg2[%c46, %c0_319, %c0_320] : memref<72x128x128xbf16, #tpu.memory_space<vmem>>, vector<1x128x128xbf16>
    %411 = vector.shape_cast %410 : vector<1x128x128xbf16> to vector<128x128xbf16>
    %cst_321 = arith.constant dense<0.000000e+00> : vector<22x128xf32>
    %412 = tpu.matmul %409, %411, %cst_321 {dimension_numbers = #tpu.dot_dimension_numbers<[1], [0], [0], [1], [0, 0, 1, 1], [], []>} : vector<22x128xbf16>, vector<128x128xbf16>, vector<22x128xf32> -> vector<22x128xf32>
    %413 = arith.addf %408, %412 : vector<22x128xf32>
    %c2_322 = arith.constant 2 : index
    %c0_323 = arith.constant 0 : index
    %414 = vector.load %arg8[%c2_322, %c0_323] : memref<40x128xbf16, #tpu.memory_space<vmem>>, vector<22x128xbf16>
    %c47 = arith.constant 47 : index
    %c0_324 = arith.constant 0 : index
    %c0_325 = arith.constant 0 : index
    %415 = vector.load %arg2[%c47, %c0_324, %c0_325] : memref<72x128x128xbf16, #tpu.memory_space<vmem>>, vector<1x128x128xbf16>
    %416 = vector.shape_cast %415 : vector<1x128x128xbf16> to vector<128x128xbf16>
    %cst_326 = arith.constant dense<0.000000e+00> : vector<22x128xf32>
    %417 = tpu.matmul %414, %416, %cst_326 {dimension_numbers = #tpu.dot_dimension_numbers<[1], [0], [0], [1], [0, 0, 1, 1], [], []>} : vector<22x128xbf16>, vector<128x128xbf16>, vector<22x128xf32> -> vector<22x128xf32>
    %418 = arith.addf %413, %417 : vector<22x128xf32>
    %c6_327 = arith.constant 6 : index
    %c0_328 = arith.constant 0 : index
    %419 = vector.load %arg8[%c6_327, %c0_328] : memref<40x128xbf16, #tpu.memory_space<vmem>>, vector<22x128xbf16>
    %c48 = arith.constant 48 : index
    %c0_329 = arith.constant 0 : index
    %c0_330 = arith.constant 0 : index
    %420 = vector.load %arg2[%c48, %c0_329, %c0_330] : memref<72x128x128xbf16, #tpu.memory_space<vmem>>, vector<1x128x128xbf16>
    %421 = vector.shape_cast %420 : vector<1x128x128xbf16> to vector<128x128xbf16>
    %cst_331 = arith.constant dense<0.000000e+00> : vector<22x128xf32>
    %422 = tpu.matmul %419, %421, %cst_331 {dimension_numbers = #tpu.dot_dimension_numbers<[1], [0], [0], [1], [0, 0, 1, 1], [], []>} : vector<22x128xbf16>, vector<128x128xbf16>, vector<22x128xf32> -> vector<22x128xf32>
    %423 = arith.addf %418, %422 : vector<22x128xf32>
    %c7_332 = arith.constant 7 : index
    %c0_333 = arith.constant 0 : index
    %424 = vector.load %arg8[%c7_332, %c0_333] : memref<40x128xbf16, #tpu.memory_space<vmem>>, vector<22x128xbf16>
    %c49 = arith.constant 49 : index
    %c0_334 = arith.constant 0 : index
    %c0_335 = arith.constant 0 : index
    %425 = vector.load %arg2[%c49, %c0_334, %c0_335] : memref<72x128x128xbf16, #tpu.memory_space<vmem>>, vector<1x128x128xbf16>
    %426 = vector.shape_cast %425 : vector<1x128x128xbf16> to vector<128x128xbf16>
    %cst_336 = arith.constant dense<0.000000e+00> : vector<22x128xf32>
    %427 = tpu.matmul %424, %426, %cst_336 {dimension_numbers = #tpu.dot_dimension_numbers<[1], [0], [0], [1], [0, 0, 1, 1], [], []>} : vector<22x128xbf16>, vector<128x128xbf16>, vector<22x128xf32> -> vector<22x128xf32>
    %428 = arith.addf %423, %427 : vector<22x128xf32>
    %c8_337 = arith.constant 8 : index
    %c0_338 = arith.constant 0 : index
    %429 = vector.load %arg8[%c8_337, %c0_338] : memref<40x128xbf16, #tpu.memory_space<vmem>>, vector<22x128xbf16>
    %c50 = arith.constant 50 : index
    %c0_339 = arith.constant 0 : index
    %c0_340 = arith.constant 0 : index
    %430 = vector.load %arg2[%c50, %c0_339, %c0_340] : memref<72x128x128xbf16, #tpu.memory_space<vmem>>, vector<1x128x128xbf16>
    %431 = vector.shape_cast %430 : vector<1x128x128xbf16> to vector<128x128xbf16>
    %cst_341 = arith.constant dense<0.000000e+00> : vector<22x128xf32>
    %432 = tpu.matmul %429, %431, %cst_341 {dimension_numbers = #tpu.dot_dimension_numbers<[1], [0], [0], [1], [0, 0, 1, 1], [], []>} : vector<22x128xbf16>, vector<128x128xbf16>, vector<22x128xf32> -> vector<22x128xf32>
    %433 = arith.addf %428, %432 : vector<22x128xf32>
    %c12_342 = arith.constant 12 : index
    %c0_343 = arith.constant 0 : index
    %434 = vector.load %arg8[%c12_342, %c0_343] : memref<40x128xbf16, #tpu.memory_space<vmem>>, vector<22x128xbf16>
    %c51 = arith.constant 51 : index
    %c0_344 = arith.constant 0 : index
    %c0_345 = arith.constant 0 : index
    %435 = vector.load %arg2[%c51, %c0_344, %c0_345] : memref<72x128x128xbf16, #tpu.memory_space<vmem>>, vector<1x128x128xbf16>
    %436 = vector.shape_cast %435 : vector<1x128x128xbf16> to vector<128x128xbf16>
    %cst_346 = arith.constant dense<0.000000e+00> : vector<22x128xf32>
    %437 = tpu.matmul %434, %436, %cst_346 {dimension_numbers = #tpu.dot_dimension_numbers<[1], [0], [0], [1], [0, 0, 1, 1], [], []>} : vector<22x128xbf16>, vector<128x128xbf16>, vector<22x128xf32> -> vector<22x128xf32>
    %438 = arith.addf %433, %437 : vector<22x128xf32>
    %c13_347 = arith.constant 13 : index
    %c0_348 = arith.constant 0 : index
    %439 = vector.load %arg8[%c13_347, %c0_348] : memref<40x128xbf16, #tpu.memory_space<vmem>>, vector<22x128xbf16>
    %c52 = arith.constant 52 : index
    %c0_349 = arith.constant 0 : index
    %c0_350 = arith.constant 0 : index
    %440 = vector.load %arg2[%c52, %c0_349, %c0_350] : memref<72x128x128xbf16, #tpu.memory_space<vmem>>, vector<1x128x128xbf16>
    %441 = vector.shape_cast %440 : vector<1x128x128xbf16> to vector<128x128xbf16>
    %cst_351 = arith.constant dense<0.000000e+00> : vector<22x128xf32>
    %442 = tpu.matmul %439, %441, %cst_351 {dimension_numbers = #tpu.dot_dimension_numbers<[1], [0], [0], [1], [0, 0, 1, 1], [], []>} : vector<22x128xbf16>, vector<128x128xbf16>, vector<22x128xf32> -> vector<22x128xf32>
    %443 = arith.addf %438, %442 : vector<22x128xf32>
    %c14_352 = arith.constant 14 : index
    %c0_353 = arith.constant 0 : index
    %444 = vector.load %arg8[%c14_352, %c0_353] : memref<40x128xbf16, #tpu.memory_space<vmem>>, vector<22x128xbf16>
    %c53 = arith.constant 53 : index
    %c0_354 = arith.constant 0 : index
    %c0_355 = arith.constant 0 : index
    %445 = vector.load %arg2[%c53, %c0_354, %c0_355] : memref<72x128x128xbf16, #tpu.memory_space<vmem>>, vector<1x128x128xbf16>
    %446 = vector.shape_cast %445 : vector<1x128x128xbf16> to vector<128x128xbf16>
    %cst_356 = arith.constant dense<0.000000e+00> : vector<22x128xf32>
    %447 = tpu.matmul %444, %446, %cst_356 {dimension_numbers = #tpu.dot_dimension_numbers<[1], [0], [0], [1], [0, 0, 1, 1], [], []>} : vector<22x128xbf16>, vector<128x128xbf16>, vector<22x128xf32> -> vector<22x128xf32>
    %448 = arith.addf %443, %447 : vector<22x128xf32>
    %449 = arith.mulf %448, %5 : vector<22x128xf32>
    %cst_357 = arith.constant dense<0.000000e+00> : vector<128xf32>
    %450 = vector.multi_reduction <add>, %449, %cst_357 [0] : vector<22x128xf32> to vector<128xf32>
    %451 = vector.shape_cast %450 : vector<128xf32> to vector<1x128xf32>
    %452 = arith.mulf %448, %448 : vector<22x128xf32>
    %453 = arith.mulf %452, %5 : vector<22x128xf32>
    %cst_358 = arith.constant dense<0.000000e+00> : vector<128xf32>
    %454 = vector.multi_reduction <add>, %453, %cst_358 [0] : vector<22x128xf32> to vector<128xf32>
    %455 = vector.shape_cast %454 : vector<128xf32> to vector<1x128xf32>
    %cst_359 = arith.constant 6.250000e-02 : f32
    %456 = vector.broadcast %cst_359 : f32 to vector<1x128xf32>
    %457 = arith.mulf %451, %456 : vector<1x128xf32>
    %cst_360 = arith.constant 6.250000e-02 : f32
    %458 = vector.broadcast %cst_360 : f32 to vector<1x128xf32>
    %459 = arith.mulf %455, %458 : vector<1x128xf32>
    %460 = arith.mulf %457, %457 : vector<1x128xf32>
    %461 = arith.subf %459, %460 : vector<1x128xf32>
    %462 = vector.broadcast %457 : vector<1x128xf32> to vector<22x128xf32>
    %463 = arith.subf %448, %462 : vector<22x128xf32>
    %cst_361 = arith.constant 9.99999974E-6 : f32
    %464 = vector.broadcast %cst_361 : f32 to vector<1x128xf32>
    %465 = arith.addf %461, %464 : vector<1x128xf32>
    %466 = math.rsqrt %465 : vector<1x128xf32>
    %467 = vector.broadcast %466 : vector<1x128xf32> to vector<22x128xf32>
    %468 = arith.mulf %463, %467 : vector<22x128xf32>
    %c5_362 = arith.constant 5 : index
    %c0_363 = arith.constant 0 : index
    %c0_364 = arith.constant 0 : index
    %469 = vector.load %arg3[%c5_362, %c0_363, %c0_364] : memref<8x1x128xf32, #tpu.memory_space<vmem>>, vector<1x1x128xf32>
    %470 = vector.shape_cast %469 : vector<1x1x128xf32> to vector<1x128xf32>
    %471 = vector.broadcast %470 : vector<1x128xf32> to vector<22x128xf32>
    %472 = arith.mulf %468, %471 : vector<22x128xf32>
    %c5_365 = arith.constant 5 : index
    %c0_366 = arith.constant 0 : index
    %c0_367 = arith.constant 0 : index
    %473 = vector.load %arg4[%c5_365, %c0_366, %c0_367] : memref<8x1x128xf32, #tpu.memory_space<vmem>>, vector<1x1x128xf32>
    %474 = vector.shape_cast %473 : vector<1x1x128xf32> to vector<1x128xf32>
    %475 = vector.broadcast %474 : vector<1x128xf32> to vector<22x128xf32>
    %476 = arith.addf %472, %475 : vector<22x128xf32>
    %c7_368 = arith.constant 7 : index
    %c0_369 = arith.constant 0 : index
    %477 = vector.load %arg7[%c7_368, %c0_369] : memref<40x128xbf16, #tpu.memory_space<vmem>>, vector<22x128xbf16>
    %478 = arith.extf %477 : vector<22x128xbf16> to vector<22x128xf32>
    %479 = arith.addf %478, %476 : vector<22x128xf32>
    %480 = arith.mulf %479, %5 : vector<22x128xf32>
    %481 = arith.truncf %480 : vector<22x128xf32> to vector<22x128xbf16>
    %c7_370 = arith.constant 7 : index
    %c0_371 = arith.constant 0 : index
    %482 = vector.load %arg7[%c7_370, %c0_371] : memref<40x128xbf16, #tpu.memory_space<vmem>>, vector<22x128xbf16>
    tpu.vector_store %arg7[%c7_370, %c0_371], %481 {strides = array<i32>} : memref<40x128xbf16, #tpu.memory_space<vmem>>, vector<22x128xbf16>,
    %cst_372 = arith.constant 0.000000e+00 : f32
    %483 = vector.broadcast %cst_372 : f32 to vector<22x128xf32>
    %c0_373 = arith.constant 0 : index
    %c0_374 = arith.constant 0 : index
    %484 = vector.load %arg7[%c0_373, %c0_374] : memref<40x128xbf16, #tpu.memory_space<vmem>>, vector<22x128xbf16>
    %c54 = arith.constant 54 : index
    %c0_375 = arith.constant 0 : index
    %c0_376 = arith.constant 0 : index
    %485 = vector.load %arg2[%c54, %c0_375, %c0_376] : memref<72x128x128xbf16, #tpu.memory_space<vmem>>, vector<1x128x128xbf16>
    %486 = vector.shape_cast %485 : vector<1x128x128xbf16> to vector<128x128xbf16>
    %cst_377 = arith.constant dense<0.000000e+00> : vector<22x128xf32>
    %487 = tpu.matmul %484, %486, %cst_377 {dimension_numbers = #tpu.dot_dimension_numbers<[1], [0], [0], [1], [0, 0, 1, 1], [], []>} : vector<22x128xbf16>, vector<128x128xbf16>, vector<22x128xf32> -> vector<22x128xf32>
    %488 = arith.addf %483, %487 : vector<22x128xf32>
    %c1_378 = arith.constant 1 : index
    %c0_379 = arith.constant 0 : index
    %489 = vector.load %arg7[%c1_378, %c0_379] : memref<40x128xbf16, #tpu.memory_space<vmem>>, vector<22x128xbf16>
    %c55 = arith.constant 55 : index
    %c0_380 = arith.constant 0 : index
    %c0_381 = arith.constant 0 : index
    %490 = vector.load %arg2[%c55, %c0_380, %c0_381] : memref<72x128x128xbf16, #tpu.memory_space<vmem>>, vector<1x128x128xbf16>
    %491 = vector.shape_cast %490 : vector<1x128x128xbf16> to vector<128x128xbf16>
    %cst_382 = arith.constant dense<0.000000e+00> : vector<22x128xf32>
    %492 = tpu.matmul %489, %491, %cst_382 {dimension_numbers = #tpu.dot_dimension_numbers<[1], [0], [0], [1], [0, 0, 1, 1], [], []>} : vector<22x128xbf16>, vector<128x128xbf16>, vector<22x128xf32> -> vector<22x128xf32>
    %493 = arith.addf %488, %492 : vector<22x128xf32>
    %c2_383 = arith.constant 2 : index
    %c0_384 = arith.constant 0 : index
    %494 = vector.load %arg7[%c2_383, %c0_384] : memref<40x128xbf16, #tpu.memory_space<vmem>>, vector<22x128xbf16>
    %c56 = arith.constant 56 : index
    %c0_385 = arith.constant 0 : index
    %c0_386 = arith.constant 0 : index
    %495 = vector.load %arg2[%c56, %c0_385, %c0_386] : memref<72x128x128xbf16, #tpu.memory_space<vmem>>, vector<1x128x128xbf16>
    %496 = vector.shape_cast %495 : vector<1x128x128xbf16> to vector<128x128xbf16>
    %cst_387 = arith.constant dense<0.000000e+00> : vector<22x128xf32>
    %497 = tpu.matmul %494, %496, %cst_387 {dimension_numbers = #tpu.dot_dimension_numbers<[1], [0], [0], [1], [0, 0, 1, 1], [], []>} : vector<22x128xbf16>, vector<128x128xbf16>, vector<22x128xf32> -> vector<22x128xf32>
    %498 = arith.addf %493, %497 : vector<22x128xf32>
    %c6_388 = arith.constant 6 : index
    %c0_389 = arith.constant 0 : index
    %499 = vector.load %arg7[%c6_388, %c0_389] : memref<40x128xbf16, #tpu.memory_space<vmem>>, vector<22x128xbf16>
    %c57 = arith.constant 57 : index
    %c0_390 = arith.constant 0 : index
    %c0_391 = arith.constant 0 : index
    %500 = vector.load %arg2[%c57, %c0_390, %c0_391] : memref<72x128x128xbf16, #tpu.memory_space<vmem>>, vector<1x128x128xbf16>
    %501 = vector.shape_cast %500 : vector<1x128x128xbf16> to vector<128x128xbf16>
    %cst_392 = arith.constant dense<0.000000e+00> : vector<22x128xf32>
    %502 = tpu.matmul %499, %501, %cst_392 {dimension_numbers = #tpu.dot_dimension_numbers<[1], [0], [0], [1], [0, 0, 1, 1], [], []>} : vector<22x128xbf16>, vector<128x128xbf16>, vector<22x128xf32> -> vector<22x128xf32>
    %503 = arith.addf %498, %502 : vector<22x128xf32>
    %c7_393 = arith.constant 7 : index
    %c0_394 = arith.constant 0 : index
    %504 = vector.load %arg7[%c7_393, %c0_394] : memref<40x128xbf16, #tpu.memory_space<vmem>>, vector<22x128xbf16>
    %c58 = arith.constant 58 : index
    %c0_395 = arith.constant 0 : index
    %c0_396 = arith.constant 0 : index
    %505 = vector.load %arg2[%c58, %c0_395, %c0_396] : memref<72x128x128xbf16, #tpu.memory_space<vmem>>, vector<1x128x128xbf16>
    %506 = vector.shape_cast %505 : vector<1x128x128xbf16> to vector<128x128xbf16>
    %cst_397 = arith.constant dense<0.000000e+00> : vector<22x128xf32>
    %507 = tpu.matmul %504, %506, %cst_397 {dimension_numbers = #tpu.dot_dimension_numbers<[1], [0], [0], [1], [0, 0, 1, 1], [], []>} : vector<22x128xbf16>, vector<128x128xbf16>, vector<22x128xf32> -> vector<22x128xf32>
    %508 = arith.addf %503, %507 : vector<22x128xf32>
    %c8_398 = arith.constant 8 : index
    %c0_399 = arith.constant 0 : index
    %509 = vector.load %arg7[%c8_398, %c0_399] : memref<40x128xbf16, #tpu.memory_space<vmem>>, vector<22x128xbf16>
    %c59 = arith.constant 59 : index
    %c0_400 = arith.constant 0 : index
    %c0_401 = arith.constant 0 : index
    %510 = vector.load %arg2[%c59, %c0_400, %c0_401] : memref<72x128x128xbf16, #tpu.memory_space<vmem>>, vector<1x128x128xbf16>
    %511 = vector.shape_cast %510 : vector<1x128x128xbf16> to vector<128x128xbf16>
    %cst_402 = arith.constant dense<0.000000e+00> : vector<22x128xf32>
    %512 = tpu.matmul %509, %511, %cst_402 {dimension_numbers = #tpu.dot_dimension_numbers<[1], [0], [0], [1], [0, 0, 1, 1], [], []>} : vector<22x128xbf16>, vector<128x128xbf16>, vector<22x128xf32> -> vector<22x128xf32>
    %513 = arith.addf %508, %512 : vector<22x128xf32>
    %c12_403 = arith.constant 12 : index
    %c0_404 = arith.constant 0 : index
    %514 = vector.load %arg7[%c12_403, %c0_404] : memref<40x128xbf16, #tpu.memory_space<vmem>>, vector<22x128xbf16>
    %c60 = arith.constant 60 : index
    %c0_405 = arith.constant 0 : index
    %c0_406 = arith.constant 0 : index
    %515 = vector.load %arg2[%c60, %c0_405, %c0_406] : memref<72x128x128xbf16, #tpu.memory_space<vmem>>, vector<1x128x128xbf16>
    %516 = vector.shape_cast %515 : vector<1x128x128xbf16> to vector<128x128xbf16>
    %cst_407 = arith.constant dense<0.000000e+00> : vector<22x128xf32>
    %517 = tpu.matmul %514, %516, %cst_407 {dimension_numbers = #tpu.dot_dimension_numbers<[1], [0], [0], [1], [0, 0, 1, 1], [], []>} : vector<22x128xbf16>, vector<128x128xbf16>, vector<22x128xf32> -> vector<22x128xf32>
    %518 = arith.addf %513, %517 : vector<22x128xf32>
    %c13_408 = arith.constant 13 : index
    %c0_409 = arith.constant 0 : index
    %519 = vector.load %arg7[%c13_408, %c0_409] : memref<40x128xbf16, #tpu.memory_space<vmem>>, vector<22x128xbf16>
    %c61 = arith.constant 61 : index
    %c0_410 = arith.constant 0 : index
    %c0_411 = arith.constant 0 : index
    %520 = vector.load %arg2[%c61, %c0_410, %c0_411] : memref<72x128x128xbf16, #tpu.memory_space<vmem>>, vector<1x128x128xbf16>
    %521 = vector.shape_cast %520 : vector<1x128x128xbf16> to vector<128x128xbf16>
    %cst_412 = arith.constant dense<0.000000e+00> : vector<22x128xf32>
    %522 = tpu.matmul %519, %521, %cst_412 {dimension_numbers = #tpu.dot_dimension_numbers<[1], [0], [0], [1], [0, 0, 1, 1], [], []>} : vector<22x128xbf16>, vector<128x128xbf16>, vector<22x128xf32> -> vector<22x128xf32>
    %523 = arith.addf %518, %522 : vector<22x128xf32>
    %c14_413 = arith.constant 14 : index
    %c0_414 = arith.constant 0 : index
    %524 = vector.load %arg7[%c14_413, %c0_414] : memref<40x128xbf16, #tpu.memory_space<vmem>>, vector<22x128xbf16>
    %c62 = arith.constant 62 : index
    %c0_415 = arith.constant 0 : index
    %c0_416 = arith.constant 0 : index
    %525 = vector.load %arg2[%c62, %c0_415, %c0_416] : memref<72x128x128xbf16, #tpu.memory_space<vmem>>, vector<1x128x128xbf16>
    %526 = vector.shape_cast %525 : vector<1x128x128xbf16> to vector<128x128xbf16>
    %cst_417 = arith.constant dense<0.000000e+00> : vector<22x128xf32>
    %527 = tpu.matmul %524, %526, %cst_417 {dimension_numbers = #tpu.dot_dimension_numbers<[1], [0], [0], [1], [0, 0, 1, 1], [], []>} : vector<22x128xbf16>, vector<128x128xbf16>, vector<22x128xf32> -> vector<22x128xf32>
    %528 = arith.addf %523, %527 : vector<22x128xf32>
    %529 = arith.mulf %528, %5 : vector<22x128xf32>
    %cst_418 = arith.constant dense<0.000000e+00> : vector<128xf32>
    %530 = vector.multi_reduction <add>, %529, %cst_418 [0] : vector<22x128xf32> to vector<128xf32>
    %531 = vector.shape_cast %530 : vector<128xf32> to vector<1x128xf32>
    %532 = arith.mulf %528, %528 : vector<22x128xf32>
    %533 = arith.mulf %532, %5 : vector<22x128xf32>
    %cst_419 = arith.constant dense<0.000000e+00> : vector<128xf32>
    %534 = vector.multi_reduction <add>, %533, %cst_419 [0] : vector<22x128xf32> to vector<128xf32>
    %535 = vector.shape_cast %534 : vector<128xf32> to vector<1x128xf32>
    %cst_420 = arith.constant 6.250000e-02 : f32
    %536 = vector.broadcast %cst_420 : f32 to vector<1x128xf32>
    %537 = arith.mulf %531, %536 : vector<1x128xf32>
    %cst_421 = arith.constant 6.250000e-02 : f32
    %538 = vector.broadcast %cst_421 : f32 to vector<1x128xf32>
    %539 = arith.mulf %535, %538 : vector<1x128xf32>
    %540 = arith.mulf %537, %537 : vector<1x128xf32>
    %541 = arith.subf %539, %540 : vector<1x128xf32>
    %542 = vector.broadcast %537 : vector<1x128xf32> to vector<22x128xf32>
    %543 = arith.subf %528, %542 : vector<22x128xf32>
    %cst_422 = arith.constant 9.99999974E-6 : f32
    %544 = vector.broadcast %cst_422 : f32 to vector<1x128xf32>
    %545 = arith.addf %541, %544 : vector<1x128xf32>
    %546 = math.rsqrt %545 : vector<1x128xf32>
    %547 = vector.broadcast %546 : vector<1x128xf32> to vector<22x128xf32>
    %548 = arith.mulf %543, %547 : vector<22x128xf32>
    %c6_423 = arith.constant 6 : index
    %c0_424 = arith.constant 0 : index
    %c0_425 = arith.constant 0 : index
    %549 = vector.load %arg3[%c6_423, %c0_424, %c0_425] : memref<8x1x128xf32, #tpu.memory_space<vmem>>, vector<1x1x128xf32>
    %550 = vector.shape_cast %549 : vector<1x1x128xf32> to vector<1x128xf32>
    %551 = vector.broadcast %550 : vector<1x128xf32> to vector<22x128xf32>
    %552 = arith.mulf %548, %551 : vector<22x128xf32>
    %c6_426 = arith.constant 6 : index
    %c0_427 = arith.constant 0 : index
    %c0_428 = arith.constant 0 : index
    %553 = vector.load %arg4[%c6_426, %c0_427, %c0_428] : memref<8x1x128xf32, #tpu.memory_space<vmem>>, vector<1x1x128xf32>
    %554 = vector.shape_cast %553 : vector<1x1x128xf32> to vector<1x128xf32>
    %555 = vector.broadcast %554 : vector<1x128xf32> to vector<22x128xf32>
    %556 = arith.addf %552, %555 : vector<22x128xf32>
    %cst_429 = arith.constant 0.000000e+00 : f32
    %557 = vector.broadcast %cst_429 : f32 to vector<22x128xf32>
    %558 = arith.maximumf %556, %557 : vector<22x128xf32>
    %559 = arith.mulf %558, %5 : vector<22x128xf32>
    %560 = arith.truncf %559 : vector<22x128xf32> to vector<22x128xbf16>
    %c7_430 = arith.constant 7 : index
    %c0_431 = arith.constant 0 : index
    %561 = vector.load %arg8[%c7_430, %c0_431] : memref<40x128xbf16, #tpu.memory_space<vmem>>, vector<22x128xbf16>
    tpu.vector_store %arg8[%c7_430, %c0_431], %560 {strides = array<i32>} : memref<40x128xbf16, #tpu.memory_space<vmem>>, vector<22x128xbf16>,
    %cst_432 = arith.constant 0.000000e+00 : f32
    %562 = vector.broadcast %cst_432 : f32 to vector<22x128xf32>
    %c0_433 = arith.constant 0 : index
    %c0_434 = arith.constant 0 : index
    %563 = vector.load %arg8[%c0_433, %c0_434] : memref<40x128xbf16, #tpu.memory_space<vmem>>, vector<22x128xbf16>
    %c63 = arith.constant 63 : index
    %c0_435 = arith.constant 0 : index
    %c0_436 = arith.constant 0 : index
    %564 = vector.load %arg2[%c63, %c0_435, %c0_436] : memref<72x128x128xbf16, #tpu.memory_space<vmem>>, vector<1x128x128xbf16>
    %565 = vector.shape_cast %564 : vector<1x128x128xbf16> to vector<128x128xbf16>
    %cst_437 = arith.constant dense<0.000000e+00> : vector<22x128xf32>
    %566 = tpu.matmul %563, %565, %cst_437 {dimension_numbers = #tpu.dot_dimension_numbers<[1], [0], [0], [1], [0, 0, 1, 1], [], []>} : vector<22x128xbf16>, vector<128x128xbf16>, vector<22x128xf32> -> vector<22x128xf32>
    %567 = arith.addf %562, %566 : vector<22x128xf32>
    %c1_438 = arith.constant 1 : index
    %c0_439 = arith.constant 0 : index
    %568 = vector.load %arg8[%c1_438, %c0_439] : memref<40x128xbf16, #tpu.memory_space<vmem>>, vector<22x128xbf16>
    %c64 = arith.constant 64 : index
    %c0_440 = arith.constant 0 : index
    %c0_441 = arith.constant 0 : index
    %569 = vector.load %arg2[%c64, %c0_440, %c0_441] : memref<72x128x128xbf16, #tpu.memory_space<vmem>>, vector<1x128x128xbf16>
    %570 = vector.shape_cast %569 : vector<1x128x128xbf16> to vector<128x128xbf16>
    %cst_442 = arith.constant dense<0.000000e+00> : vector<22x128xf32>
    %571 = tpu.matmul %568, %570, %cst_442 {dimension_numbers = #tpu.dot_dimension_numbers<[1], [0], [0], [1], [0, 0, 1, 1], [], []>} : vector<22x128xbf16>, vector<128x128xbf16>, vector<22x128xf32> -> vector<22x128xf32>
    %572 = arith.addf %567, %571 : vector<22x128xf32>
    %c2_443 = arith.constant 2 : index
    %c0_444 = arith.constant 0 : index
    %573 = vector.load %arg8[%c2_443, %c0_444] : memref<40x128xbf16, #tpu.memory_space<vmem>>, vector<22x128xbf16>
    %c65 = arith.constant 65 : index
    %c0_445 = arith.constant 0 : index
    %c0_446 = arith.constant 0 : index
    %574 = vector.load %arg2[%c65, %c0_445, %c0_446] : memref<72x128x128xbf16, #tpu.memory_space<vmem>>, vector<1x128x128xbf16>
    %575 = vector.shape_cast %574 : vector<1x128x128xbf16> to vector<128x128xbf16>
    %cst_447 = arith.constant dense<0.000000e+00> : vector<22x128xf32>
    %576 = tpu.matmul %573, %575, %cst_447 {dimension_numbers = #tpu.dot_dimension_numbers<[1], [0], [0], [1], [0, 0, 1, 1], [], []>} : vector<22x128xbf16>, vector<128x128xbf16>, vector<22x128xf32> -> vector<22x128xf32>
    %577 = arith.addf %572, %576 : vector<22x128xf32>
    %c6_448 = arith.constant 6 : index
    %c0_449 = arith.constant 0 : index
    %578 = vector.load %arg8[%c6_448, %c0_449] : memref<40x128xbf16, #tpu.memory_space<vmem>>, vector<22x128xbf16>
    %c66 = arith.constant 66 : index
    %c0_450 = arith.constant 0 : index
    %c0_451 = arith.constant 0 : index
    %579 = vector.load %arg2[%c66, %c0_450, %c0_451] : memref<72x128x128xbf16, #tpu.memory_space<vmem>>, vector<1x128x128xbf16>
    %580 = vector.shape_cast %579 : vector<1x128x128xbf16> to vector<128x128xbf16>
    %cst_452 = arith.constant dense<0.000000e+00> : vector<22x128xf32>
    %581 = tpu.matmul %578, %580, %cst_452 {dimension_numbers = #tpu.dot_dimension_numbers<[1], [0], [0], [1], [0, 0, 1, 1], [], []>} : vector<22x128xbf16>, vector<128x128xbf16>, vector<22x128xf32> -> vector<22x128xf32>
    %582 = arith.addf %577, %581 : vector<22x128xf32>
    %c7_453 = arith.constant 7 : index
    %c0_454 = arith.constant 0 : index
    %583 = vector.load %arg8[%c7_453, %c0_454] : memref<40x128xbf16, #tpu.memory_space<vmem>>, vector<22x128xbf16>
    %c67 = arith.constant 67 : index
    %c0_455 = arith.constant 0 : index
    %c0_456 = arith.constant 0 : index
    %584 = vector.load %arg2[%c67, %c0_455, %c0_456] : memref<72x128x128xbf16, #tpu.memory_space<vmem>>, vector<1x128x128xbf16>
    %585 = vector.shape_cast %584 : vector<1x128x128xbf16> to vector<128x128xbf16>
    %cst_457 = arith.constant dense<0.000000e+00> : vector<22x128xf32>
    %586 = tpu.matmul %583, %585, %cst_457 {dimension_numbers = #tpu.dot_dimension_numbers<[1], [0], [0], [1], [0, 0, 1, 1], [], []>} : vector<22x128xbf16>, vector<128x128xbf16>, vector<22x128xf32> -> vector<22x128xf32>
    %587 = arith.addf %582, %586 : vector<22x128xf32>
    %c8_458 = arith.constant 8 : index
    %c0_459 = arith.constant 0 : index
    %588 = vector.load %arg8[%c8_458, %c0_459] : memref<40x128xbf16, #tpu.memory_space<vmem>>, vector<22x128xbf16>
    %c68 = arith.constant 68 : index
    %c0_460 = arith.constant 0 : index
    %c0_461 = arith.constant 0 : index
    %589 = vector.load %arg2[%c68, %c0_460, %c0_461] : memref<72x128x128xbf16, #tpu.memory_space<vmem>>, vector<1x128x128xbf16>
    %590 = vector.shape_cast %589 : vector<1x128x128xbf16> to vector<128x128xbf16>
    %cst_462 = arith.constant dense<0.000000e+00> : vector<22x128xf32>
    %591 = tpu.matmul %588, %590, %cst_462 {dimension_numbers = #tpu.dot_dimension_numbers<[1], [0], [0], [1], [0, 0, 1, 1], [], []>} : vector<22x128xbf16>, vector<128x128xbf16>, vector<22x128xf32> -> vector<22x128xf32>
    %592 = arith.addf %587, %591 : vector<22x128xf32>
    %c12_463 = arith.constant 12 : index
    %c0_464 = arith.constant 0 : index
    %593 = vector.load %arg8[%c12_463, %c0_464] : memref<40x128xbf16, #tpu.memory_space<vmem>>, vector<22x128xbf16>
    %c69 = arith.constant 69 : index
    %c0_465 = arith.constant 0 : index
    %c0_466 = arith.constant 0 : index
    %594 = vector.load %arg2[%c69, %c0_465, %c0_466] : memref<72x128x128xbf16, #tpu.memory_space<vmem>>, vector<1x128x128xbf16>
    %595 = vector.shape_cast %594 : vector<1x128x128xbf16> to vector<128x128xbf16>
    %cst_467 = arith.constant dense<0.000000e+00> : vector<22x128xf32>
    %596 = tpu.matmul %593, %595, %cst_467 {dimension_numbers = #tpu.dot_dimension_numbers<[1], [0], [0], [1], [0, 0, 1, 1], [], []>} : vector<22x128xbf16>, vector<128x128xbf16>, vector<22x128xf32> -> vector<22x128xf32>
    %597 = arith.addf %592, %596 : vector<22x128xf32>
    %c13_468 = arith.constant 13 : index
    %c0_469 = arith.constant 0 : index
    %598 = vector.load %arg8[%c13_468, %c0_469] : memref<40x128xbf16, #tpu.memory_space<vmem>>, vector<22x128xbf16>
    %c70 = arith.constant 70 : index
    %c0_470 = arith.constant 0 : index
    %c0_471 = arith.constant 0 : index
    %599 = vector.load %arg2[%c70, %c0_470, %c0_471] : memref<72x128x128xbf16, #tpu.memory_space<vmem>>, vector<1x128x128xbf16>
    %600 = vector.shape_cast %599 : vector<1x128x128xbf16> to vector<128x128xbf16>
    %cst_472 = arith.constant dense<0.000000e+00> : vector<22x128xf32>
    %601 = tpu.matmul %598, %600, %cst_472 {dimension_numbers = #tpu.dot_dimension_numbers<[1], [0], [0], [1], [0, 0, 1, 1], [], []>} : vector<22x128xbf16>, vector<128x128xbf16>, vector<22x128xf32> -> vector<22x128xf32>
    %602 = arith.addf %597, %601 : vector<22x128xf32>
    %c14_473 = arith.constant 14 : index
    %c0_474 = arith.constant 0 : index
    %603 = vector.load %arg8[%c14_473, %c0_474] : memref<40x128xbf16, #tpu.memory_space<vmem>>, vector<22x128xbf16>
    %c71 = arith.constant 71 : index
    %c0_475 = arith.constant 0 : index
    %c0_476 = arith.constant 0 : index
    %604 = vector.load %arg2[%c71, %c0_475, %c0_476] : memref<72x128x128xbf16, #tpu.memory_space<vmem>>, vector<1x128x128xbf16>
    %605 = vector.shape_cast %604 : vector<1x128x128xbf16> to vector<128x128xbf16>
    %cst_477 = arith.constant dense<0.000000e+00> : vector<22x128xf32>
    %606 = tpu.matmul %603, %605, %cst_477 {dimension_numbers = #tpu.dot_dimension_numbers<[1], [0], [0], [1], [0, 0, 1, 1], [], []>} : vector<22x128xbf16>, vector<128x128xbf16>, vector<22x128xf32> -> vector<22x128xf32>
    %607 = arith.addf %602, %606 : vector<22x128xf32>
    %608 = arith.mulf %607, %5 : vector<22x128xf32>
    %cst_478 = arith.constant dense<0.000000e+00> : vector<128xf32>
    %609 = vector.multi_reduction <add>, %608, %cst_478 [0] : vector<22x128xf32> to vector<128xf32>
    %610 = vector.shape_cast %609 : vector<128xf32> to vector<1x128xf32>
    %611 = arith.mulf %607, %607 : vector<22x128xf32>
    %612 = arith.mulf %611, %5 : vector<22x128xf32>
    %cst_479 = arith.constant dense<0.000000e+00> : vector<128xf32>
    %613 = vector.multi_reduction <add>, %612, %cst_479 [0] : vector<22x128xf32> to vector<128xf32>
    %614 = vector.shape_cast %613 : vector<128xf32> to vector<1x128xf32>
    %cst_480 = arith.constant 6.250000e-02 : f32
    %615 = vector.broadcast %cst_480 : f32 to vector<1x128xf32>
    %616 = arith.mulf %610, %615 : vector<1x128xf32>
    %cst_481 = arith.constant 6.250000e-02 : f32
    %617 = vector.broadcast %cst_481 : f32 to vector<1x128xf32>
    %618 = arith.mulf %614, %617 : vector<1x128xf32>
    %619 = arith.mulf %616, %616 : vector<1x128xf32>
    %620 = arith.subf %618, %619 : vector<1x128xf32>
    %621 = vector.broadcast %616 : vector<1x128xf32> to vector<22x128xf32>
    %622 = arith.subf %607, %621 : vector<22x128xf32>
    %cst_482 = arith.constant 9.99999974E-6 : f32
    %623 = vector.broadcast %cst_482 : f32 to vector<1x128xf32>
    %624 = arith.addf %620, %623 : vector<1x128xf32>
    %625 = math.rsqrt %624 : vector<1x128xf32>
    %626 = vector.broadcast %625 : vector<1x128xf32> to vector<22x128xf32>
    %627 = arith.mulf %622, %626 : vector<22x128xf32>
    %c7_483 = arith.constant 7 : index
    %c0_484 = arith.constant 0 : index
    %c0_485 = arith.constant 0 : index
    %628 = vector.load %arg3[%c7_483, %c0_484, %c0_485] : memref<8x1x128xf32, #tpu.memory_space<vmem>>, vector<1x1x128xf32>
    %629 = vector.shape_cast %628 : vector<1x1x128xf32> to vector<1x128xf32>
    %630 = vector.broadcast %629 : vector<1x128xf32> to vector<22x128xf32>
    %631 = arith.mulf %627, %630 : vector<22x128xf32>
    %c7_486 = arith.constant 7 : index
    %c0_487 = arith.constant 0 : index
    %c0_488 = arith.constant 0 : index
    %632 = vector.load %arg4[%c7_486, %c0_487, %c0_488] : memref<8x1x128xf32, #tpu.memory_space<vmem>>, vector<1x1x128xf32>
    %633 = vector.shape_cast %632 : vector<1x1x128xf32> to vector<1x128xf32>
    %634 = vector.broadcast %633 : vector<1x128xf32> to vector<22x128xf32>
    %635 = arith.addf %631, %634 : vector<22x128xf32>
    %c7_489 = arith.constant 7 : index
    %c0_490 = arith.constant 0 : index
    %636 = vector.load %arg7[%c7_489, %c0_490] : memref<40x128xbf16, #tpu.memory_space<vmem>>, vector<22x128xbf16>
    %637 = arith.extf %636 : vector<22x128xbf16> to vector<22x128xf32>
    %638 = arith.addf %637, %635 : vector<22x128xf32>
    %639 = arith.mulf %638, %5 : vector<22x128xf32>
    %640 = arith.truncf %639 : vector<22x128xf32> to vector<22x128xbf16>
    %c7_491 = arith.constant 7 : index
    %c0_492 = arith.constant 0 : index
    %641 = vector.load %arg7[%c7_491, %c0_492] : memref<40x128xbf16, #tpu.memory_space<vmem>>, vector<22x128xbf16>
    tpu.vector_store %arg7[%c7_491, %c0_492], %640 {strides = array<i32>} : memref<40x128xbf16, #tpu.memory_space<vmem>>, vector<22x128xbf16>,
    %c0_493 = arith.constant 0 : index
    %c0_494 = arith.constant 0 : index
    %642 = vector.load %arg7[%c0_493, %c0_494] : memref<40x128xbf16, #tpu.memory_space<vmem>>, vector<40x128xbf16>
    %c0_495 = arith.constant 0 : index
    %c0_496 = arith.constant 0 : index
    %c0_497 = arith.constant 0 : index
    %643 = vector.load %arg6[%c0_495, %c0_496, %c0_497] : memref<1x40x128xbf16, #tpu.memory_space<vmem>>, vector<1x40x128xbf16>
    %644 = vector.shape_cast %643 : vector<1x40x128xbf16> to vector<40x128xbf16>
    %645 = vector.shape_cast %642 : vector<40x128xbf16> to vector<1x40x128xbf16>
    tpu.vector_store %arg6[%c0_495, %c0_496, %c0_497], %645 {strides = array<i32>} : memref<1x40x128xbf16, #tpu.memory_space<vmem>>, vector<1x40x128xbf16>,
    return
  }
  func.func @transform_0(%arg0: i32) -> (i32, i32, i32) {
    %c0_i32 = arith.constant 0 : i32
    %c0_i32_0 = arith.constant 0 : i32
    %c0_i32_1 = arith.constant 0 : i32
    return %arg0, %c0_i32, %c0_i32_0 : i32, i32, i32
  }
  func.func @transform_1(%arg0: i32) -> (i32, i32, i32) {
    %c0_i32 = arith.constant 0 : i32
    %c0_i32_0 = arith.constant 0 : i32
    %c0_i32_1 = arith.constant 0 : i32
    %c0_i32_2 = arith.constant 0 : i32
    return %c0_i32, %c0_i32_0, %c0_i32_1 : i32, i32, i32
  }
  func.func @transform_2(%arg0: i32) -> (i32, i32, i32) {
    %c0_i32 = arith.constant 0 : i32
    %c0_i32_0 = arith.constant 0 : i32
    %c0_i32_1 = arith.constant 0 : i32
    %c0_i32_2 = arith.constant 0 : i32
    return %c0_i32, %c0_i32_0, %c0_i32_1 : i32, i32, i32
  }
  func.func @transform_3(%arg0: i32) -> (i32, i32, i32) {
    %c0_i32 = arith.constant 0 : i32
    %c0_i32_0 = arith.constant 0 : i32
    %c0_i32_1 = arith.constant 0 : i32
    %c0_i32_2 = arith.constant 0 : i32
    return %c0_i32, %c0_i32_0, %c0_i32_1 : i32, i32, i32
  }
  func.func @transform_4(%arg0: i32) -> (i32, i32) {
    %c0_i32 = arith.constant 0 : i32
    %c0_i32_0 = arith.constant 0 : i32
    %c0_i32_1 = arith.constant 0 : i32
    return %c0_i32, %c0_i32_0 : i32, i32
  }
  func.func @transform_5(%arg0: i32) -> (i32, i32, i32) {
    %c0_i32 = arith.constant 0 : i32
    %c0_i32_0 = arith.constant 0 : i32
    %c0_i32_1 = arith.constant 0 : i32
    return %arg0, %c0_i32, %c0_i32_0 : i32, i32, i32
  }
}

</mosaic_0001>

<bundles_post_ra>
// kernel: _lambda_.4
= control target key start
LH: loop header
LB: loop body
LE: loop exit
PB: predicated region body
PF: predicated region fallthrough
CT: control target
= control target key end

     0   :  { %s1208_s12 = smov 0   ;;  %s1210_s13 = smov 0   ;;  %s1466_s0 = inlined_call_operand.vmem [shape: bf16[2,256,256], index: 0, kind: input, shape index: {}]   ;;  %s1467_s1 = inlined_call_operand.vmem [shape: bf16[256,8], index: 1, kind: input, shape index: {}]   ;;  %s1468_s2 = inlined_call_operand.vmem [shape: f32[1,8], index: 2, kind: input, shape index: {}]   ;;  %s1469_s3 = inlined_call_operand.vmem [shape: bf16[2,256,8], index: 3, kind: output, shape index: {}]  }
   0x1   :  { %s1212_s14 = smov 0  }
   0x2 LB: > { %s25_s15 = sadd.s32 1, %s1182_s13  ;;  %p874_p0 = scmp.ge.s32.totalorder %s1186_s14, 1  ;;  %s1186_s14 = sphi %s1212_s14, %s13_s14   ;;  %s1182_s13 = sphi %s1210_s13, %s1471_s13   ;;  %s1178_s12 = sphi %s1208_s12, %s1470_s12  }
   0x3   : > { %p27_p1 = scmp.ge.s32.totalorder %s25_s15, 2  ;;  %p159_p2 = scmp.lt.s32.totalorder %s1186_s14, 3 }
   0x5   : > { %s1473_s15 = smov (%p27_p1, %s25_s15), 0  ;;  %p160_p3 = pnand %p874_p0, %p159_p2 }
   0x6   : > { %p193_p4 = scmp.lt.s32.totalorder (!%p160_p3), %s1178_s12, 1 }
   0x7   : > { %163 = sbr.rel (%p160_p3) target bundleno = 303 (0x12f), region = 32 }
   0xc   : > { %v1114_v0 = vld [vmem:[%s1467_s1 + $0x38] sm:$0xff]  ;;  %v1113_v2 = vld [vmem:[%s1467_s1 + $0x30] sm:$0xff]  ;;  %v1112_v4 = vld [vmem:[%s1467_s1 + $0x28] sm:$0xff]  ;;  %s1475_s12 = smov (!%p193_p4, %s1178_s12), 1  ;;  %vm747_vm0 = vcmask 60416  }
   0xd   : > { %v1122_v1 = vld [vmem:[%s1467_s1 + $0x78] sm:$0xff]  ;;  %537 = vmatpush.bf16.msra.mxu0 %v1114_v0  ;;  %1123 = vmatpush.bf16.msra.mxu2 %v1114_v0  ;;  %v1121_v3 = vld [vmem:[%s1467_s1 + $0x70] sm:$0xff]  ;;  %v1120_v5 = vld [vmem:[%s1467_s1 + $0x68] sm:$0xff]  ;;  %s1073_s17 = sshll.u32 %s1475_s12, 8  ;;  %s1074_s4 = sshll.u32 %s1475_s12, 7 }
   0xe   : > { %626 = vmatpush.bf16.msra.mxu1 %v1122_v1  ;;  %1131 = vmatpush.bf16.msra.mxu3 %v1122_v1  ;;  %v1111_v6 = vld [vmem:[%s1467_s1 + $0x20] sm:$0xff]  ;;  %v1110_v8 = vld [vmem:[%s1467_s1 + $0x18] sm:$0xff]  ;;  %v1109_v10 = vld [vmem:[%s1467_s1 + $0x10] sm:$0xff]  ;;  %s1275_s22 = scalar_lea.vmem %s1466_s0, %s1073_s17  ;;  %s1360_s7 = scalar_lea.vmem %s1469_s3, %s1074_s4 }
   0xf   : > { %v1119_v7 = vld [vmem:[%s1467_s1 + $0x60] sm:$0xff]  ;;  %v1118_v9 = vld [vmem:[%s1467_s1 + $0x58] sm:$0xff]  ;;  %v1117_v11 = vld [vmem:[%s1467_s1 + $0x50] sm:$0xff] }
  0x10   : > { %v1108_v12 = vld [vmem:[%s1467_s1 + $0x8] sm:$0xff]  ;;  %v1107_v14 = vld [vmem:[%s1467_s1] sm:$0xff]  ;;  %v889_v28 = vld [vmem:[%s1275_s22 + $0x10] sm:$0xf] }
  0x11   : > { %538 = vmatpush.bf16.msra.mxu0 %v1113_v2  ;;  %1124 = vmatpush.bf16.msra.mxu2 %v1113_v2  ;;  %v1116_v13 = vld [vmem:[%s1467_s1 + $0x48] sm:$0xff]  ;;  %v1115_v15 = vld [vmem:[%s1467_s1 + $0x40] sm:$0xff]  ;;  %v1078_v29 = vld [vmem:[%s1275_s22 + $0x14] sm:$0xf0] }
  0x12   : > { %627 = vmatpush.bf16.msra.mxu1 %v1121_v3  ;;  %1132 = vmatpush.bf16.msra.mxu3 %v1121_v3  ;;  %v881_v16 = vld [vmem:[%s1275_s22] sm:$0xf]  ;;  %v1076_v17 = vld [vmem:[%s1275_s22 + $0x4] sm:$0xf0]  ;;  %v1075_v20 = vld [vmem:[%s1275_s22 + $0x4] sm:$0xf]  ;;  %v890_v36 = vor.u32 %v1078_v29, %v889_v28 }
  0x13   : > { %v945_v18 = vld [vmem:[%s1275_s22 + $0x80] sm:$0xf]  ;;  %v1092_v19 = vld [vmem:[%s1275_s22 + $0x84] sm:$0xf0]  ;;  %v883_v21 = vld [vmem:[%s1275_s22 + $0x8] sm:$0xf0]  ;;  %v882_v24 = vor.u32 %v1076_v17, %v881_v16 }
  0x14   : > { %v1091_v22 = vld [vmem:[%s1275_s22 + $0x84] sm:$0xf]  ;;  %v947_v23 = vld [vmem:[%s1275_s22 + $0x88] sm:$0xf0]  ;;  %v946_v25 = vor.u32 %v1092_v19, %v945_v18  ;;  %v886_v26 = vor.u32 %v1075_v20, %v883_v21  ;;  %v953_v30 = vld [vmem:[%s1275_s22 + $0x90] sm:$0xf] }
  0x15   : > { %539 = vmatpush.bf16.msra.mxu0 %v1112_v4  ;;  %1125 = vmatpush.bf16.msra.mxu2 %v1112_v4  ;;  %v950_v27 = vor.u32 %v1091_v22, %v947_v23  ;;  %v1094_v31 = vld [vmem:[%s1275_s22 + $0x94] sm:$0xf0]  ;;  %v1077_v32 = vld [vmem:[%s1275_s22 + $0x14] sm:$0xf]  ;;  %v891_v33 = vld [vmem:[%s1275_s22 + $0x18] sm:$0xf0] }
  0x16   : > { %628 = vmatpush.bf16.msra.mxu1 %v1120_v5  ;;  %1133 = vmatpush.bf16.msra.mxu3 %v1120_v5  ;;  %v1093_v34 = vld [vmem:[%s1275_s22 + $0x94] sm:$0xf]  ;;  %v955_v35 = vld [vmem:[%s1275_s22 + $0x98] sm:$0xf0]  ;;  %v954_v37 = vor.u32 %v1094_v31, %v953_v30  ;;  %v894_v38 = vor.u32 %v1077_v32, %v891_v33  ;;  %v897_v40 = vld [vmem:[%s1275_s22 + $0x20] sm:$0xf] }
  0x17   : > { %v958_v39 = vor.u32 %v1093_v34, %v955_v35  ;;  %v1080_v41 = vld [vmem:[%s1275_s22 + $0x24] sm:$0xf0]  ;;  %v961_v42 = vld [vmem:[%s1275_s22 + $0xa0] sm:$0xf]  ;;  %v1079_v44 = vld [vmem:[%s1275_s22 + $0x24] sm:$0xf] }
  0x18   : > { %v1096_v43 = vld [vmem:[%s1275_s22 + $0xa4] sm:$0xf0]  ;;  %v899_v45 = vld [vmem:[%s1275_s22 + $0x28] sm:$0xf0]  ;;  %v1095_v46 = vld [vmem:[%s1275_s22 + $0xa4] sm:$0xf]  ;;  %v898_v48 = vor.u32 %v1080_v41, %v897_v40 }
  0x19   : > { %540 = vmatpush.bf16.msra.mxu0 %v1111_v6  ;;  %1126 = vmatpush.bf16.msra.mxu2 %v1111_v6  ;;  %v963_v47 = vld [vmem:[%s1275_s22 + $0xa8] sm:$0xf0]  ;;  %v962_v49 = vor.u32 %v1096_v43, %v961_v42  ;;  %v902_v50 = vor.u32 %v1079_v44, %v899_v45  ;;  %v905_v52 = vld [vmem:[%s1275_s22 + $0x30] sm:$0xf]  ;;  %v1082_v53 = vld [vmem:[%s1275_s22 + $0x34] sm:$0xf0] }
  0x1a   : > { %629 = vmatpush.bf16.msra.mxu1 %v1119_v7  ;;  %1134 = vmatpush.bf16.msra.mxu3 %v1119_v7  ;;  %v966_v51 = vor.u32 %v1095_v46, %v963_v47  ;;  %v969_v54 = vld [vmem:[%s1275_s22 + $0xb0] sm:$0xf]  ;;  %v1098_v55 = vld [vmem:[%s1275_s22 + $0xb4] sm:$0xf0]  ;;  %v1081_v56 = vld [vmem:[%s1275_s22 + $0x34] sm:$0xf]  ;;  %v906_v60 = vor.u32 %v1082_v53, %v905_v52 }
  0x1b   : > { %v907_v57 = vld [vmem:[%s1275_s22 + $0x38] sm:$0xf0]  ;;  %v1097_v58 = vld [vmem:[%s1275_s22 + $0xb4] sm:$0xf]  ;;  %v970_v61 = vor.u32 %v1098_v55, %v969_v54  ;;  %v913_v0 = vld [vmem:[%s1275_s22 + $0x40] sm:$0xf] }
  0x1c   : > { %v971_v59 = vld [vmem:[%s1275_s22 + $0xb8] sm:$0xf0]  ;;  %v910_v62 = vor.u32 %v1081_v56, %v907_v57  ;;  %v1084_v1 = vld [vmem:[%s1275_s22 + $0x44] sm:$0xf0]  ;;  %v977_v2 = vld [vmem:[%s1275_s22 + $0xc0] sm:$0xf] }
  0x1d   : > { %541 = vmatpush.bf16.msra.mxu0 %v1110_v8  ;;  %1127 = vmatpush.bf16.msra.mxu2 %v1110_v8  ;;  %v974_v63 = vor.u32 %v1097_v58, %v971_v59  ;;  %v1100_v3 = vld [vmem:[%s1275_s22 + $0xc4] sm:$0xf0]  ;;  %v1083_v4 = vld [vmem:[%s1275_s22 + $0x44] sm:$0xf]  ;;  %v915_v5 = vld [vmem:[%s1275_s22 + $0x48] sm:$0xf0]  ;;  %v914_v8 = vor.u32 %v1084_v1, %v913_v0 }
  0x1e   : > { %630 = vmatpush.bf16.msra.mxu1 %v1118_v9  ;;  %1135 = vmatpush.bf16.msra.mxu3 %v1118_v9  ;;  %v1099_v6 = vld [vmem:[%s1275_s22 + $0xc4] sm:$0xf]  ;;  %v979_v7 = vld [vmem:[%s1275_s22 + $0xc8] sm:$0xf0]  ;;  %v978_v9 = vor.u32 %v1100_v3, %v977_v2  ;;  %v1085_v16 = vld [vmem:[%s1275_s22 + $0x54] sm:$0xf] }
  0x1f   : > { %v923_v17 = vld [vmem:[%s1275_s22 + $0x58] sm:$0xf0]  ;;  %v1101_v18 = vld [vmem:[%s1275_s22 + $0xd4] sm:$0xf]  ;;  %v1087_v28 = vld [vmem:[%s1275_s22 + $0x64] sm:$0xf] }
  0x20   : > { %v987_v19 = vld [vmem:[%s1275_s22 + $0xd8] sm:$0xf0]  ;;  %v926_v22 = vor.u32 %v1085_v16, %v923_v17  ;;  %v931_v29 = vld [vmem:[%s1275_s22 + $0x68] sm:$0xf0]  ;;  %v1103_v30 = vld [vmem:[%s1275_s22 + $0xe4] sm:$0xf] }
  0x21   : > { %542 = vmatpush.bf16.msra.mxu0 %v1109_v10  ;;  %1128 = vmatpush.bf16.msra.mxu2 %v1109_v10  ;;  %v918_v10 = vor.u32 %v1083_v4, %v915_v5  ;;  %v990_v23 = vor.u32 %v1101_v18, %v987_v19  ;;  %v995_v31 = vld [vmem:[%s1275_s22 + $0xe8] sm:$0xf0]  ;;  %v934_v34 = vor.u32 %v1087_v28, %v931_v29  ;;  %v1089_v40 = vld [vmem:[%s1275_s22 + $0x74] sm:$0xf]  ;;  %v939_v41 = vld [vmem:[%s1275_s22 + $0x78] sm:$0xf0] }
  0x22   : > { %631 = vmatpush.bf16.msra.mxu1 %v1117_v11  ;;  %1136 = vmatpush.bf16.msra.mxu3 %v1117_v11  ;;  %v982_v11 = vor.u32 %v1099_v6, %v979_v7  ;;  %v998_v35 = vor.u32 %v1103_v30, %v995_v31  ;;  %v1105_v42 = vld [vmem:[%s1275_s22 + $0xf4] sm:$0xf]  ;;  %v1003_v43 = vld [vmem:[%s1275_s22 + $0xf8] sm:$0xf0]  ;;  %v942_v46 = vor.u32 %v1089_v40, %v939_v41 }
  0x23   : > { %v1006_v47 = vor.u32 %v1105_v42, %v1003_v43 }
  0x25   : > { %543 = vmatpush.bf16.msra.mxu0 %v1108_v12  ;;  %1129 = vmatpush.bf16.msra.mxu2 %v1108_v12  ;;  %v921_v12 = vld [vmem:[%s1275_s22 + $0x50] sm:$0xf] }
  0x26   : > { %632 = vmatpush.bf16.msra.mxu1 %v1116_v13  ;;  %1137 = vmatpush.bf16.msra.mxu3 %v1116_v13  ;;  %v1086_v13 = vld [vmem:[%s1275_s22 + $0x54] sm:$0xf0] }
  0x27   : > { %v922_v20 = vor.u32 %v1086_v13, %v921_v12 }
  0x29   : > { %544 = vmatpush.bf16.msra.mxu0 %v1107_v14  ;;  %1130 = vmatpush.bf16.msra.mxu2 %v1107_v14  ;;  %v985_v14 = vld [vmem:[%s1275_s22 + $0xd0] sm:$0xf] }
  0x2a   : > { %633 = vmatpush.bf16.msra.mxu1 %v1115_v15  ;;  %1138 = vmatpush.bf16.msra.mxu3 %v1115_v15  ;;  %v1102_v15 = vld [vmem:[%s1275_s22 + $0xd4] sm:$0xf0] }
  0x2b   : > { %v986_v21 = vor.u32 %v1102_v15, %v985_v14 }
  0x2c   : > { %545 = vmatmul.bf16.vlgmr.msra.gmra.mxu0 %v882_v24  ;;  %585 = vmatmul.bf16.vlgmr.msra.gmra.mxu2 %v946_v25  ;;  %v929_v24 = vld [vmem:[%s1275_s22 + $0x60] sm:$0xf]  ;;  %v1088_v25 = vld [vmem:[%s1275_s22 + $0x64] sm:$0xf0] }
  0x2d   : > { %634 = vmatmul.bf16.vlgmr.msra.gmra.mxu1 %v886_v26  ;;  %674 = vmatmul.bf16.vlgmr.msra.gmra.mxu3 %v950_v27  ;;  %v993_v26 = vld [vmem:[%s1275_s22 + $0xe0] sm:$0xf]  ;;  %v1104_v27 = vld [vmem:[%s1275_s22 + $0xe4] sm:$0xf0]  ;;  %v930_v32 = vor.u32 %v1088_v25, %v929_v24 }
  0x2e   : > { %v994_v33 = vor.u32 %v1104_v27, %v993_v26 }
  0x3c   : > { %550 = vmatmul.bf16.gmra.mxu0 %v890_v36  ;;  %590 = vmatmul.bf16.gmra.mxu2 %v954_v37  ;;  %v937_v36 = vld [vmem:[%s1275_s22 + $0x70] sm:$0xf]  ;;  %v1090_v37 = vld [vmem:[%s1275_s22 + $0x74] sm:$0xf0] }
  0x3d   : > { %639 = vmatmul.bf16.gmra.mxu1 %v894_v38  ;;  %679 = vmatmul.bf16.gmra.mxu3 %v958_v39  ;;  %v1001_v38 = vld [vmem:[%s1275_s22 + $0xf0] sm:$0xf]  ;;  %v1106_v39 = vld [vmem:[%s1275_s22 + $0xf4] sm:$0xf0]  ;;  %v938_v44 = vor.u32 %v1090_v37, %v937_v36 }
  0x3e   : > { %v1002_v45 = vor.u32 %v1106_v39, %v1001_v38 }
  0x4c   : > { %555 = vmatmul.bf16.gmra.mxu0 %v898_v48  ;;  %595 = vmatmul.bf16.gmra.mxu2 %v962_v49  ;;  %v1353_v48 = vld [vmem:[%s1468_s2] ss:$0 sm:$0xff] }
  0x4d   : > { %644 = vmatmul.bf16.gmra.mxu1 %v902_v50  ;;  %684 = vmatmul.bf16.gmra.mxu3 %v966_v51 }
  0x5c   : > { %560 = vmatmul.bf16.gmra.mxu0 %v906_v60  ;;  %600 = vmatmul.bf16.gmra.mxu2 %v970_v61 }
  0x5d   : > { %649 = vmatmul.bf16.gmra.mxu1 %v910_v62  ;;  %689 = vmatmul.bf16.gmra.mxu3 %v974_v63 }
  0x6c   : > { %565 = vmatmul.bf16.gmra.mxu0 %v914_v8  ;;  %605 = vmatmul.bf16.gmra.mxu2 %v978_v9 }
  0x6d   : > { %654 = vmatmul.bf16.gmra.mxu1 %v918_v10  ;;  %694 = vmatmul.bf16.gmra.mxu3 %v982_v11 }
  0x7c   : > { %570 = vmatmul.bf16.gmra.mxu0 %v922_v20  ;;  %610 = vmatmul.bf16.gmra.mxu2 %v986_v21 }
  0x7d   : > { %659 = vmatmul.bf16.gmra.mxu1 %v926_v22  ;;  %699 = vmatmul.bf16.gmra.mxu3 %v990_v23 }
  0x8c   : > { %575 = vmatmul.bf16.gmra.mxu0 %v930_v32  ;;  %615 = vmatmul.bf16.gmra.mxu2 %v994_v33 }
  0x8d   : > { %664 = vmatmul.bf16.gmra.mxu1 %v934_v34  ;;  %704 = vmatmul.bf16.gmra.mxu3 %v998_v35 }
  0x9c   : > { %580 = vmatmul.bf16.gmra.mxu0 %v938_v44  ;;  %620 = vmatmul.bf16.gmra.mxu2 %v1002_v45 }
  0x9d   : > { %669 = vmatmul.bf16.gmra.mxu1 %v942_v46  ;;  %709 = vmatmul.bf16.gmra.mxu3 %v1006_v47 }
  0xa9   : > { %v546_v49 = vpop.f32.mrf.mxu0 }
  0xaa   : > { %v547_v50 = vadd.f32 %v1353_v48, %v546_v49  ;;  %v635_v51 = vpop.f32.mrf.mxu1 }
  0xac   : > { %v636_v52 = vadd.f32 %v635_v51, %v547_v50 }
  0xae   : > { %v715_v53 = vpack.c.bf16 %v636_v52, %v636_v52 }
  0xaf   : > { %v586_v54 = vpop.f32.mrf.mxu2 }
  0xb0   : > { %748 = vst.msk [vmem:[%s1360_s7] sm:$0xf] %vm747_vm0, %v715_v53  ;;  %v587_v55 = vadd.f32 %v1353_v48, %v586_v54  ;;  %v675_v56 = vpop.f32.mrf.mxu3 }
  0xb1   : > { %v548_v57 = vpop.f32.mrf.mxu0 }
  0xb2   : > { %v676_v58 = vadd.f32 %v675_v56, %v587_v55  ;;  %v549_v59 = vadd.f32 %v1353_v48, %v548_v57  ;;  %v637_v60 = vpop.f32.mrf.mxu1 }
  0xb4   : > { %v731_v61 = vpack.c.bf16 %v676_v58, %v676_v58  ;;  %v638_v62 = vadd.f32 %v637_v60, %v549_v59 }
  0xb6   : > { %764 = vst.msk [vmem:[%s1360_s7 + $0x40] sm:$0xf] %vm747_vm0, %v731_v61  ;;  %v716_v63 = vpack.c.bf16 %v638_v62, %v638_v62 }
  0xb7   : > { %v588_v0 = vpop.f32.mrf.mxu2 }
  0xb8   : > { %749 = vst.msk [vmem:[%s1360_s7 + $0x4] sm:$0xf] %vm747_vm0, %v716_v63  ;;  %v589_v1 = vadd.f32 %v1353_v48, %v588_v0  ;;  %v677_v2 = vpop.f32.mrf.mxu3 }
  0xb9   : > { %v551_v3 = vpop.f32.mrf.mxu0 }
  0xba   : > { %v678_v4 = vadd.f32 %v677_v2, %v589_v1  ;;  %v552_v5 = vadd.f32 %v1353_v48, %v551_v3  ;;  %v640_v6 = vpop.f32.mrf.mxu1 }
  0xbc   : > { %v732_v7 = vpack.c.bf16 %v678_v4, %v678_v4  ;;  %v641_v8 = vadd.f32 %v640_v6, %v552_v5 }
  0xbe   : > { %765 = vst.msk [vmem:[%s1360_s7 + $0x44] sm:$0xf] %vm747_vm0, %v732_v7  ;;  %v717_v9 = vpack.c.bf16 %v641_v8, %v641_v8 }
  0xbf   : > { %v591_v10 = vpop.f32.mrf.mxu2 }
  0xc0   : > { %750 = vst.msk [vmem:[%s1360_s7 + $0x8] sm:$0xf] %vm747_vm0, %v717_v9  ;;  %v592_v11 = vadd.f32 %v1353_v48, %v591_v10  ;;  %v680_v12 = vpop.f32.mrf.mxu3 }
  0xc1   : > { %v553_v13 = vpop.f32.mrf.mxu0 }
  0xc2   : > { %v681_v14 = vadd.f32 %v680_v12, %v592_v11  ;;  %v554_v15 = vadd.f32 %v1353_v48, %v553_v13  ;;  %v642_v16 = vpop.f32.mrf.mxu1 }
  0xc4   : > { %v733_v17 = vpack.c.bf16 %v681_v14, %v681_v14  ;;  %v643_v18 = vadd.f32 %v642_v16, %v554_v15 }
  0xc6   : > { %766 = vst.msk [vmem:[%s1360_s7 + $0x48] sm:$0xf] %vm747_vm0, %v733_v17  ;;  %v718_v19 = vpack.c.bf16 %v643_v18, %v643_v18 }
  0xc7   : > { %v593_v20 = vpop.f32.mrf.mxu2 }
  0xc8   : > { %751 = vst.msk [vmem:[%s1360_s7 + $0xc] sm:$0xf] %vm747_vm0, %v718_v19  ;;  %v594_v21 = vadd.f32 %v1353_v48, %v593_v20  ;;  %v682_v22 = vpop.f32.mrf.mxu3 }
  0xc9   : > { %v556_v23 = vpop.f32.mrf.mxu0 }
  0xca   : > { %v683_v24 = vadd.f32 %v682_v22, %v594_v21  ;;  %v557_v25 = vadd.f32 %v1353_v48, %v556_v23  ;;  %v645_v26 = vpop.f32.mrf.mxu1 }
  0xcc   : > { %v734_v27 = vpack.c.bf16 %v683_v24, %v683_v24  ;;  %v646_v28 = vadd.f32 %v645_v26, %v557_v25 }
  0xce   : > { %767 = vst.msk [vmem:[%s1360_s7 + $0x4c] sm:$0xf] %vm747_vm0, %v734_v27  ;;  %v719_v29 = vpack.c.bf16 %v646_v28, %v646_v28 }
  0xcf   : > { %v596_v30 = vpop.f32.mrf.mxu2 }
  0xd0   : > { %752 = vst.msk [vmem:[%s1360_s7 + $0x10] sm:$0xf] %vm747_vm0, %v719_v29  ;;  %v597_v31 = vadd.f32 %v1353_v48, %v596_v30  ;;  %v685_v32 = vpop.f32.mrf.mxu3 }
  0xd1   : > { %v558_v33 = vpop.f32.mrf.mxu0 }
  0xd2   : > { %v686_v34 = vadd.f32 %v685_v32, %v597_v31  ;;  %v559_v35 = vadd.f32 %v1353_v48, %v558_v33  ;;  %v647_v36 = vpop.f32.mrf.mxu1 }
  0xd4   : > { %v735_v37 = vpack.c.bf16 %v686_v34, %v686_v34  ;;  %v648_v38 = vadd.f32 %v647_v36, %v559_v35 }
  0xd6   : > { %768 = vst.msk [vmem:[%s1360_s7 + $0x50] sm:$0xf] %vm747_vm0, %v735_v37  ;;  %v720_v39 = vpack.c.bf16 %v648_v38, %v648_v38 }
  0xd7   : > { %v598_v40 = vpop.f32.mrf.mxu2 }
  0xd8   : > { %753 = vst.msk [vmem:[%s1360_s7 + $0x14] sm:$0xf] %vm747_vm0, %v720_v39  ;;  %v599_v41 = vadd.f32 %v1353_v48, %v598_v40  ;;  %v687_v42 = vpop.f32.mrf.mxu3 }
  0xd9   : > { %v561_v43 = vpop.f32.mrf.mxu0 }
  0xda   : > { %v688_v44 = vadd.f32 %v687_v42, %v599_v41  ;;  %v562_v45 = vadd.f32 %v1353_v48, %v561_v43  ;;  %v650_v46 = vpop.f32.mrf.mxu1 }
  0xdc   : > { %v736_v47 = vpack.c.bf16 %v688_v44, %v688_v44  ;;  %v651_v49 = vadd.f32 %v650_v46, %v562_v45 }
  0xde   : > { %769 = vst.msk [vmem:[%s1360_s7 + $0x54] sm:$0xf] %vm747_vm0, %v736_v47  ;;  %v721_v50 = vpack.c.bf16 %v651_v49, %v651_v49 }
  0xdf   : > { %v601_v51 = vpop.f32.mrf.mxu2 }
  0xe0   : > { %754 = vst.msk [vmem:[%s1360_s7 + $0x18] sm:$0xf] %vm747_vm0, %v721_v50  ;;  %v602_v52 = vadd.f32 %v1353_v48, %v601_v51  ;;  %v690_v53 = vpop.f32.mrf.mxu3 }
  0xe1   : > { %v563_v54 = vpop.f32.mrf.mxu0 }
  0xe2   : > { %v691_v55 = vadd.f32 %v690_v53, %v602_v52  ;;  %v564_v56 = vadd.f32 %v1353_v48, %v563_v54  ;;  %v652_v57 = vpop.f32.mrf.mxu1 }
  0xe4   : > { %v737_v58 = vpack.c.bf16 %v691_v55, %v691_v55  ;;  %v653_v59 = vadd.f32 %v652_v57, %v564_v56 }
  0xe6   : > { %770 = vst.msk [vmem:[%s1360_s7 + $0x58] sm:$0xf] %vm747_vm0, %v737_v58  ;;  %v722_v60 = vpack.c.bf16 %v653_v59, %v653_v59 }
  0xe7   : > { %v603_v61 = vpop.f32.mrf.mxu2 }
  0xe8   : > { %755 = vst.msk [vmem:[%s1360_s7 + $0x1c] sm:$0xf] %vm747_vm0, %v722_v60  ;;  %v604_v62 = vadd.f32 %v1353_v48, %v603_v61  ;;  %v692_v63 = vpop.f32.mrf.mxu3 }
  0xe9   : > { %v566_v0 = vpop.f32.mrf.mxu0 }
  0xea   : > { %v693_v1 = vadd.f32 %v692_v63, %v604_v62  ;;  %v567_v2 = vadd.f32 %v1353_v48, %v566_v0  ;;  %v655_v3 = vpop.f32.mrf.mxu1 }
  0xec   : > { %v738_v4 = vpack.c.bf16 %v693_v1, %v693_v1  ;;  %v656_v5 = vadd.f32 %v655_v3, %v567_v2 }
  0xee   : > { %771 = vst.msk [vmem:[%s1360_s7 + $0x5c] sm:$0xf] %vm747_vm0, %v738_v4  ;;  %v723_v6 = vpack.c.bf16 %v656_v5, %v656_v5 }
  0xef   : > { %v606_v7 = vpop.f32.mrf.mxu2 }
  0xf0   : > { %756 = vst.msk [vmem:[%s1360_s7 + $0x20] sm:$0xf] %vm747_vm0, %v723_v6  ;;  %v607_v8 = vadd.f32 %v1353_v48, %v606_v7  ;;  %v695_v9 = vpop.f32.mrf.mxu3 }
  0xf1   : > { %v568_v10 = vpop.f32.mrf.mxu0 }
  0xf2   : > { %v696_v11 = vadd.f32 %v695_v9, %v607_v8  ;;  %v569_v12 = vadd.f32 %v1353_v48, %v568_v10  ;;  %v657_v13 = vpop.f32.mrf.mxu1 }
  0xf4   : > { %v739_v14 = vpack.c.bf16 %v696_v11, %v696_v11  ;;  %v658_v15 = vadd.f32 %v657_v13, %v569_v12 }
  0xf6   : > { %772 = vst.msk [vmem:[%s1360_s7 + $0x60] sm:$0xf] %vm747_vm0, %v739_v14  ;;  %v724_v16 = vpack.c.bf16 %v658_v15, %v658_v15 }
  0xf7   : > { %v608_v17 = vpop.f32.mrf.mxu2 }
  0xf8   : > { %757 = vst.msk [vmem:[%s1360_s7 + $0x24] sm:$0xf] %vm747_vm0, %v724_v16  ;;  %v609_v18 = vadd.f32 %v1353_v48, %v608_v17  ;;  %v697_v19 = vpop.f32.mrf.mxu3 }
  0xf9   : > { %v571_v20 = vpop.f32.mrf.mxu0 }
  0xfa   : > { %v698_v21 = vadd.f32 %v697_v19, %v609_v18  ;;  %v572_v22 = vadd.f32 %v1353_v48, %v571_v20  ;;  %v660_v23 = vpop.f32.mrf.mxu1 }
  0xfc   : > { %v740_v24 = vpack.c.bf16 %v698_v21, %v698_v21  ;;  %v661_v25 = vadd.f32 %v660_v23, %v572_v22 }
  0xfe   : > { %773 = vst.msk [vmem:[%s1360_s7 + $0x64] sm:$0xf] %vm747_vm0, %v740_v24  ;;  %v725_v26 = vpack.c.bf16 %v661_v25, %v661_v25 }
  0xff   : > { %v611_v27 = vpop.f32.mrf.mxu2 }
 0x100   : > { %758 = vst.msk [vmem:[%s1360_s7 + $0x28] sm:$0xf] %vm747_vm0, %v725_v26  ;;  %v612_v28 = vadd.f32 %v1353_v48, %v611_v27  ;;  %v700_v29 = vpop.f32.mrf.mxu3 }
 0x101   : > { %v573_v30 = vpop.f32.mrf.mxu0 }
 0x102   : > { %v701_v31 = vadd.f32 %v700_v29, %v612_v28  ;;  %v574_v32 = vadd.f32 %v1353_v48, %v573_v30  ;;  %v662_v33 = vpop.f32.mrf.mxu1 }
 0x104   : > { %v741_v34 = vpack.c.bf16 %v701_v31, %v701_v31  ;;  %v663_v35 = vadd.f32 %v662_v33, %v574_v32 }
 0x106   : > { %774 = vst.msk [vmem:[%s1360_s7 + $0x68] sm:$0xf] %vm747_vm0, %v741_v34  ;;  %v726_v36 = vpack.c.bf16 %v663_v35, %v663_v35 }
 0x107   : > { %v613_v37 = vpop.f32.mrf.mxu2 }
 0x108   : > { %759 = vst.msk [vmem:[%s1360_s7 + $0x2c] sm:$0xf] %vm747_vm0, %v726_v36  ;;  %v614_v38 = vadd.f32 %v1353_v48, %v613_v37  ;;  %v702_v39 = vpop.f32.mrf.mxu3 }
 0x109   : > { %v576_v40 = vpop.f32.mrf.mxu0 }
 0x10a   : > { %v703_v41 = vadd.f32 %v702_v39, %v614_v38  ;;  %v577_v42 = vadd.f32 %v1353_v48, %v576_v40  ;;  %v665_v43 = vpop.f32.mrf.mxu1 }
 0x10c   : > { %v742_v44 = vpack.c.bf16 %v703_v41, %v703_v41  ;;  %v666_v45 = vadd.f32 %v665_v43, %v577_v42 }
 0x10e   : > { %775 = vst.msk [vmem:[%s1360_s7 + $0x6c] sm:$0xf] %vm747_vm0, %v742_v44  ;;  %v727_v46 = vpack.c.bf16 %v666_v45, %v666_v45 }
 0x10f   : > { %v616_v47 = vpop.f32.mrf.mxu2 }
 0x110   : > { %760 = vst.msk [vmem:[%s1360_s7 + $0x30] sm:$0xf] %vm747_vm0, %v727_v46  ;;  %v617_v49 = vadd.f32 %v1353_v48, %v616_v47  ;;  %v705_v50 = vpop.f32.mrf.mxu3 }
 0x111   : > { %v578_v51 = vpop.f32.mrf.mxu0 }
 0x112   : > { %v706_v52 = vadd.f32 %v705_v50, %v617_v49  ;;  %v579_v53 = vadd.f32 %v1353_v48, %v578_v51  ;;  %v667_v54 = vpop.f32.mrf.mxu1 }
 0x114   : > { %v743_v55 = vpack.c.bf16 %v706_v52, %v706_v52  ;;  %v668_v56 = vadd.f32 %v667_v54, %v579_v53 }
 0x116   : > { %776 = vst.msk [vmem:[%s1360_s7 + $0x70] sm:$0xf] %vm747_vm0, %v743_v55  ;;  %v728_v57 = vpack.c.bf16 %v668_v56, %v668_v56 }
 0x117   : > { %v618_v58 = vpop.f32.mrf.mxu2 }
 0x118   : > { %761 = vst.msk [vmem:[%s1360_s7 + $0x34] sm:$0xf] %vm747_vm0, %v728_v57  ;;  %v619_v59 = vadd.f32 %v1353_v48, %v618_v58  ;;  %v707_v60 = vpop.f32.mrf.mxu3 }
 0x119   : > { %v581_v61 = vpop.f32.mrf.mxu0 }
 0x11a   : > { %v708_v62 = vadd.f32 %v707_v60, %v619_v59  ;;  %v582_v63 = vadd.f32 %v1353_v48, %v581_v61  ;;  %v670_v0 = vpop.f32.mrf.mxu1 }
 0x11c   : > { %v744_v1 = vpack.c.bf16 %v708_v62, %v708_v62  ;;  %v671_v2 = vadd.f32 %v670_v0, %v582_v63 }
 0x11e   : > { %777 = vst.msk [vmem:[%s1360_s7 + $0x74] sm:$0xf] %vm747_vm0, %v744_v1  ;;  %v729_v3 = vpack.c.bf16 %v671_v2, %v671_v2 }
 0x11f   : > { %v621_v4 = vpop.f32.mrf.mxu2 }
 0x120   : > { %762 = vst.msk [vmem:[%s1360_s7 + $0x38] sm:$0xf] %vm747_vm0, %v729_v3  ;;  %v622_v5 = vadd.f32 %v1353_v48, %v621_v4  ;;  %v710_v6 = vpop.f32.mrf.mxu3 }
 0x121   : > { %v583_v7 = vpop.f32.mrf.mxu0 }
 0x122   : > { %v711_v8 = vadd.f32 %v710_v6, %v622_v5  ;;  %v584_v9 = vadd.f32 %v1353_v48, %v583_v7  ;;  %v672_v10 = vpop.f32.mrf.mxu1 }
 0x124   : > { %v745_v11 = vpack.c.bf16 %v711_v8, %v711_v8  ;;  %v673_v12 = vadd.f32 %v672_v10, %v584_v9 }
 0x126   : > { %778 = vst.msk [vmem:[%s1360_s7 + $0x78] sm:$0xf] %vm747_vm0, %v745_v11  ;;  %v730_v13 = vpack.c.bf16 %v673_v12, %v673_v12 }
 0x127   : > { %v623_v14 = vpop.f32.mrf.mxu2 }
 0x128   : > { %763 = vst.msk [vmem:[%s1360_s7 + $0x3c] sm:$0xf] %vm747_vm0, %v730_v13  ;;  %v624_v15 = vadd.f32 %v1353_v48, %v623_v14  ;;  %v712_v16 = vpop.f32.mrf.mxu3 }
 0x12a   : > { %v713_v17 = vadd.f32 %v712_v16, %v624_v15 }
 0x12c   : > { %v746_v18 = vpack.c.bf16 %v713_v17, %v713_v17 }
 0x12e   : > { %779 = vst.msk [vmem:[%s1360_s7 + $0x7c] sm:$0xf] %vm747_vm0, %v746_v18 }
 0x12f PF: > { %s13_s14 = sadd.s32 1, %s1186_s14   ;;  %s1470_s12 = smov %s1182_s13 }
 0x130   : > { %p10_p5 = scmp.ge.s32.totalorder %s13_s14, 4   ;;  %s1471_s13 = smov %s1473_s15 }
 0x132   :  { %12 = sbr.rel (!%p10_p5) target bundleno = 2 (0x2), region = 62 }

// kernel: _lambda_.5
= control target key start
LH: loop header
LB: loop body
LE: loop exit
PB: predicated region body
PF: predicated region fallthrough
CT: control target
= control target key end

     0   :  { %s765_s15 = smov 0   ;;  %s767_s16 = smov 0   ;;  %s911_s0 = inlined_call_operand.vmem [shape: bf16[2,64,128], index: 0, kind: input, shape index: {}]   ;;  %s912_s1 = inlined_call_operand.vmem [shape: bf16[128,16], index: 1, kind: input, shape index: {}]   ;;  %s913_s2 = inlined_call_operand.vmem [shape: f32[1,16], index: 2, kind: input, shape index: {}]   ;;  %s914_s3 = inlined_call_operand.vmem [shape: f32[1,16], index: 3, kind: input, shape index: {}]   ;;  %s915_s4 = inlined_call_operand.vmem [shape: bf16[2,64,16], index: 4, kind: output, shape index: {}]  }
   0x1   :  { %s769_s17 = smov 0  }
   0x2 LB: > { %s26_s18 = sadd.s32 1, %s733_s16  ;;  %p591_p0 = scmp.ge.s32.totalorder %s737_s17, 1  ;;  %s737_s17 = sphi %s769_s17, %s14_s17   ;;  %s733_s16 = sphi %s767_s16, %s917_s16   ;;  %s729_s15 = sphi %s765_s15, %s916_s15  }
   0x3   : > { %p28_p1 = scmp.ge.s32.totalorder %s26_s18, 2  ;;  %p183_p2 = scmp.lt.s32.totalorder %s737_s17, 3 }
   0x5   : > { %s919_s18 = smov (%p28_p1, %s26_s18), 0  ;;  %p184_p3 = pnand %p591_p0, %p183_p2 }
   0x6   : > { %p218_p4 = scmp.lt.s32.totalorder (!%p184_p3), %s729_s15, 1 }
   0x7   : > { %187 = sbr.rel (%p184_p3) target bundleno = 249 (0xf9), region = 36 }
   0xc   : > { %v659_v0 = vld [vmem:[%s912_s1 + $0x38] sm:$0xff]  ;;  %v658_v1 = vld [vmem:[%s912_s1 + $0x30] sm:$0xff]  ;;  %v657_v2 = vld [vmem:[%s912_s1 + $0x28] sm:$0xff]  ;;  %s921_s15 = smov (!%p218_p4, %s729_s15), 1  ;;  %vm362_vm0 = vcmask 130048   ;;  %v739_v19 = vmov 64.0  }
   0xd   : > { %333 = vmatpush.bf16.msra.mxu0 %v659_v0  ;;  %660 = vmatpush.bf16.msra.mxu1 %v659_v0  ;;  %v656_v3 = vld [vmem:[%s912_s1 + $0x20] sm:$0xff]  ;;  %v655_v4 = vld [vmem:[%s912_s1 + $0x18] sm:$0xff]  ;;  %v654_v5 = vld [vmem:[%s912_s1 + $0x10] sm:$0xff]  ;;  %s646_s7 = sshll.u32 %s921_s15, 5  ;;  %711 = vrcp.f32 %v739_v19  ;;  %vm491_vm5 = vcmask 125952  }
   0xe   : > { %661 = vmatpush.bf16.msra.mxu2 %v659_v0  ;;  %662 = vmatpush.bf16.msra.mxu3 %v659_v0  ;;  %v653_v6 = vld [vmem:[%s912_s1 + $0x8] sm:$0xff]  ;;  %v652_v7 = vld [vmem:[%s912_s1] sm:$0xff]  ;;  %s225_s12 = scalar_lea.vmem %s911_s0, %s646_s7  ;;  %s235_s23 = scalar_lea.vmem %s915_s4, %s646_s7 }
   0xf   : > { %v648_v8 = vld [vmem:[%s225_s12] sm:$0xff]  ;;  %v649_v9 = vld [vmem:[%s225_s12 + $0x8] sm:$0xff]  ;;  %v650_v10 = vld [vmem:[%s225_s12 + $0x10] sm:$0xff] }
  0x10   : > { %v651_v11 = vld [vmem:[%s225_s12 + $0x18] sm:$0xff] }
  0x11   : > { %334 = vmatpush.bf16.msra.mxu0 %v658_v1  ;;  %663 = vmatpush.bf16.msra.mxu1 %v658_v1 }
  0x12   : > { %664 = vmatpush.bf16.msra.mxu2 %v658_v1  ;;  %665 = vmatpush.bf16.msra.mxu3 %v658_v1 }
  0x13   : > { %v712_v34 = vpop.eup %711 }
  0x14   : > { %v414_v47 = vmul.f32 64.0, %v712_v34  ;;  %vm418_vm1 = vweird.f32 %v712_v34 }
  0x15   : > { %335 = vmatpush.bf16.msra.mxu0 %v657_v2  ;;  %666 = vmatpush.bf16.msra.mxu1 %v657_v2 }
  0x16   : > { %667 = vmatpush.bf16.msra.mxu2 %v657_v2  ;;  %668 = vmatpush.bf16.msra.mxu3 %v657_v2  ;;  %v415_v57 = vsub.f32 1.0, %v414_v47 }
  0x18   : > { %v416_v63 = vmul.f32 %v712_v34, %v415_v57 }
  0x19   : > { %336 = vmatpush.bf16.msra.mxu0 %v656_v3  ;;  %669 = vmatpush.bf16.msra.mxu1 %v656_v3 }
  0x1a   : > { %670 = vmatpush.bf16.msra.mxu2 %v656_v3  ;;  %671 = vmatpush.bf16.msra.mxu3 %v656_v3 }
  0x1d   : > { %337 = vmatpush.bf16.msra.mxu0 %v655_v4  ;;  %672 = vmatpush.bf16.msra.mxu1 %v655_v4 }
  0x1e   : > { %673 = vmatpush.bf16.msra.mxu2 %v655_v4  ;;  %674 = vmatpush.bf16.msra.mxu3 %v655_v4  ;;  %v417_v4 = vadd.f32 %v712_v34, %v416_v63 }
  0x21   : > { %338 = vmatpush.bf16.msra.mxu0 %v654_v5  ;;  %675 = vmatpush.bf16.msra.mxu1 %v654_v5 }
  0x22   : > { %676 = vmatpush.bf16.msra.mxu2 %v654_v5  ;;  %677 = vmatpush.bf16.msra.mxu3 %v654_v5 }
  0x25   : > { %339 = vmatpush.bf16.msra.mxu0 %v653_v6  ;;  %678 = vmatpush.bf16.msra.mxu1 %v653_v6 }
  0x26   : > { %679 = vmatpush.bf16.msra.mxu2 %v653_v6  ;;  %680 = vmatpush.bf16.msra.mxu3 %v653_v6 }
  0x29   : > { %340 = vmatpush.bf16.msra.mxu0 %v652_v7  ;;  %681 = vmatpush.bf16.msra.mxu1 %v652_v7 }
  0x2a   : > { %682 = vmatpush.bf16.msra.mxu2 %v652_v7  ;;  %683 = vmatpush.bf16.msra.mxu3 %v652_v7 }
  0x2c   : > { %341 = vmatmul.bf16.vlgmr.msra.gmra.mxu0 %v648_v8  ;;  %346 = vmatmul.bf16.vlgmr.msra.gmra.mxu1 %v649_v9  ;;  %v419_v9 = vsel %vm418_vm1, %v712_v34, %v417_v4 }
  0x2d   : > { %351 = vmatmul.bf16.vlgmr.msra.gmra.mxu2 %v650_v10  ;;  %356 = vmatmul.bf16.vlgmr.msra.gmra.mxu3 %v651_v11 }
  0xa9   : > { %v819_v12 = vpop.f32.mrf.mxu0  ;;  %v821_v13 = vpop.f32.mrf.mxu1 }
  0xaa   : > { %v384_v14 = vmul.f32 %v819_v12, %v819_v12  ;;  %v363_v20 = vsel %vm362_vm0, %v819_v12, 0.0  ;;  %v386_v21 = vmul.f32 %v821_v13, %v821_v13  ;;  %v366_v26 = vsel %vm362_vm0, %v821_v13, 0.0 }
  0xac   : > { %v392_v25 = vsel %vm362_vm0, %v384_v14, 0.0  ;;  %v395_v31 = vsel %vm362_vm0, %v386_v21, 0.0 }
  0xb0   : > { %v825_v15 = vpop.f32.mrf.mxu2  ;;  %v827_v16 = vpop.f32.mrf.mxu3 }
  0xb1   : > { %v829_v17 = vpop.f32.mrf.mxu0  ;;  %v831_v18 = vpop.f32.mrf.mxu1  ;;  %v388_v32 = vmul.f32 %v825_v15, %v825_v15  ;;  %v370_v37 = vsel %vm362_vm0, %v825_v15, 0.0  ;;  %v390_v45 = vmul.f32 %v827_v16, %v827_v16  ;;  %v374_v50 = vsel %vm362_vm0, %v827_v16, 0.0 }
  0xb2   : > { %v364_v22 = vsel %vm362_vm0, %v829_v17, 0.0  ;;  %v385_v23 = vmul.f32 %v829_v17, %v829_v17  ;;  %v387_v28 = vmul.f32 %v831_v18, %v831_v18  ;;  %v368_v33 = vsel %vm362_vm0, %v831_v18, 0.0 }
  0xb3   : > { %v365_v24 = vadd.f32 %v364_v22, %v363_v20  ;;  %v399_v44 = vsel %vm362_vm0, %v388_v32, 0.0  ;;  %v403_v55 = vsel %vm362_vm0, %v390_v45, 0.0 }
  0xb4   : > { %v393_v27 = vsel %vm362_vm0, %v385_v23, 0.0  ;;  %v397_v38 = vsel %vm362_vm0, %v387_v28, 0.0 }
  0xb5   : > { %v394_v29 = vadd.f32 %v393_v27, %v392_v25  ;;  %v367_v30 = vadd.f32 %v366_v26, %v365_v24 }
  0xb7   : > { %v369_v35 = vadd.f32 %v368_v33, %v367_v30  ;;  %v396_v36 = vadd.f32 %v395_v31, %v394_v29 }
  0xb8   : > { %v855_v39 = vpop.f32.mrf.mxu2  ;;  %v859_v43 = vpop.f32.mrf.mxu3 }
  0xb9   : > { %v398_v40 = vadd.f32 %v397_v38, %v396_v36  ;;  %v371_v41 = vadd.f32 %v370_v37, %v369_v35  ;;  %v389_v42 = vmul.f32 %v855_v39, %v855_v39  ;;  %v372_v46 = vsel %vm362_vm0, %v855_v39, 0.0  ;;  %v709_v35 = vld [vmem:[%s913_s2] ss:$0 sm:$0xff] }
  0xba   : > { %v391_v52 = vmul.f32 %v859_v43, %v859_v43  ;;  %v376_v56 = vsel %vm362_vm0, %v859_v43, 0.0 }
  0xbb   : > { %v373_v48 = vadd.f32 %v372_v46, %v371_v41  ;;  %v400_v49 = vadd.f32 %v399_v44, %v398_v40  ;;  %v401_v51 = vsel %vm362_vm0, %v389_v42, 0.0 }
  0xbc   : > { %v405_v60 = vsel %vm362_vm0, %v391_v52, 0.0 }
  0xbd   : > { %v402_v53 = vadd.f32 %v401_v51, %v400_v49  ;;  %v375_v54 = vadd.f32 %v374_v50, %v373_v48 }
  0xbf   : > { %v377_v58 = vadd.f32 %v376_v56, %v375_v54  ;;  %v404_v59 = vadd.f32 %v403_v55, %v402_v53 }
  0xc1   : > { %v378_v61 = vrot.slane %v377_v58, 4  ;;  %v406_v62 = vadd.f32 %v405_v60, %v404_v59 }
  0xc3   : > { %v379_v0 = vadd.f32 %v378_v61, %v377_v58  ;;  %v407_v1 = vrot.slane %v406_v62, 4 }
  0xc5   : > { %v380_v2 = vrot.slane %v379_v0, 2  ;;  %v408_v3 = vadd.f32 %v407_v1, %v406_v62 }
  0xc7   : > { %v381_v5 = vadd.f32 %v380_v2, %v379_v0  ;;  %v409_v6 = vrot.slane %v408_v3, 2 }
  0xc9   : > { %v382_v7 = vrot.slane %v381_v5, 1  ;;  %v410_v8 = vadd.f32 %v409_v6, %v408_v3 }
  0xcb   : > { %v383_v10 = vadd.f32 %v382_v7, %v381_v5  ;;  %v411_v11 = vrot.slane %v410_v8, 1 }
  0xcd   : > { %v412_v14 = vadd.f32 %v411_v11, %v410_v8  ;;  %v420_v19 = vmul.f32 %v419_v9, %v383_v10 }
  0xcf   : > { %v421_v20 = vmul.f32 %v419_v9, %v412_v14  ;;  %v422_v21 = vmul.f32 %v420_v19, %v420_v19  ;;  %v424_v29 = vsub.f32 %v819_v12, %v420_v19  ;;  %v425_v31 = vsub.f32 %v829_v17, %v420_v19 }
  0xd0   : > { %v426_v32 = vsub.f32 %v821_v13, %v420_v19  ;;  %v427_v33 = vsub.f32 %v831_v18, %v420_v19  ;;  %v428_v34 = vsub.f32 %v825_v15, %v420_v19  ;;  %v429_v36 = vsub.f32 %v855_v39, %v420_v19  ;;  %v710_v15 = vld [vmem:[%s914_s3] ss:$0 sm:$0xff] }
  0xd1   : > { %v423_v22 = vsub.f32 %v421_v20, %v422_v21  ;;  %v430_v37 = vsub.f32 %v827_v16, %v420_v19  ;;  %v431_v12 = vsub.f32 %v859_v43, %v420_v19 }
  0xd3   : > { %v432_v23 = vadd.f32 1e-05, %v423_v22 }
  0xd5   : > { %713 = vrsqrt.f32 %v432_v23  ;;  %vm439_vm3 = vweird.f32 %v432_v23 }
  0xdb   : > { %v714_v24 = vpop.eup %713 }
  0xdc   : > { %v434_v25 = vmul.f32 %v714_v24, %v432_v23  ;;  %vm440_vm2 = vweird.f32 %v714_v24 }
  0xdd   : > { %vm441_vm4 = vmor %vm439_vm3, %vm440_vm2 }
  0xde   : > { %v435_v26 = vmul.f32 %v714_v24, %v434_v25 }
  0xe0   : > { %v436_v27 = vmul.f32 0.5, %v435_v26 }
  0xe2   : > { %v437_v28 = vsub.f32 1.5, %v436_v27 }
  0xe4   : > { %v438_v30 = vmul.f32 %v714_v24, %v437_v28 }
  0xe6   : > { %v442_v38 = vsel %vm441_vm4, %v714_v24, %v438_v30 }
  0xe7   : > { %v443_v40 = vmul.f32 %v442_v38, %v424_v29  ;;  %v444_v17 = vmul.f32 %v442_v38, %v425_v31  ;;  %v445_v41 = vmul.f32 %v442_v38, %v426_v32  ;;  %v446_v13 = vmul.f32 %v442_v38, %v427_v33 }
  0xe8   : > { %v447_v18 = vmul.f32 %v442_v38, %v428_v34  ;;  %v448_v42 = vmul.f32 %v442_v38, %v429_v36  ;;  %v449_v44 = vmul.f32 %v442_v38, %v430_v37  ;;  %v450_v45 = vmul.f32 %v442_v38, %v431_v12 }
  0xe9   : > { %v455_v46 = vmul.f32 %v709_v35, %v443_v40  ;;  %v456_v47 = vmul.f32 %v709_v35, %v444_v17  ;;  %v457_v39 = vmul.f32 %v709_v35, %v445_v41  ;;  %v458_v48 = vmul.f32 %v709_v35, %v446_v13 }
  0xea   : > { %v459_v16 = vmul.f32 %v709_v35, %v447_v18  ;;  %v460_v43 = vmul.f32 %v709_v35, %v448_v42  ;;  %v461_v49 = vmul.f32 %v709_v35, %v449_v44  ;;  %v462_v50 = vmul.f32 %v709_v35, %v450_v45 }
  0xeb   : > { %v467_v51 = vadd.f32 %v710_v15, %v455_v46  ;;  %v468_v52 = vadd.f32 %v710_v15, %v456_v47  ;;  %v469_v53 = vadd.f32 %v710_v15, %v457_v39  ;;  %v470_v54 = vadd.f32 %v710_v15, %v458_v48 }
  0xec   : > { %v471_v55 = vadd.f32 %v710_v15, %v459_v16  ;;  %v472_v56 = vadd.f32 %v710_v15, %v460_v43  ;;  %v473_v57 = vadd.f32 %v710_v15, %v461_v49  ;;  %v474_v58 = vadd.f32 %v710_v15, %v462_v50 }
  0xed   : > { %v475_v59 = vmax.f32 %v467_v51, 0.0  ;;  %v476_v60 = vmax.f32 %v468_v52, 0.0  ;;  %v477_v61 = vmax.f32 %v469_v53, 0.0  ;;  %v478_v62 = vmax.f32 %v470_v54, 0.0 }
  0xee   : > { %v479_v63 = vmax.f32 %v471_v55, 0.0  ;;  %v480_v0 = vmax.f32 %v472_v56, 0.0  ;;  %v481_v1 = vmax.f32 %v473_v57, 0.0  ;;  %v482_v5 = vmax.f32 %v474_v58, 0.0 }
  0xef   : > { %v483_v2 = vpack.c.bf16 %v475_v59, %v475_v59  ;;  %v484_v3 = vpack.c.bf16 %v476_v60, %v476_v60  ;;  %v485_v4 = vpack.c.bf16 %v477_v61, %v477_v61  ;;  %v486_v6 = vpack.c.bf16 %v478_v62, %v478_v62 }
  0xf0   : > { %v487_v7 = vpack.c.bf16 %v479_v63, %v479_v63  ;;  %v488_v8 = vpack.c.bf16 %v480_v0, %v480_v0  ;;  %v489_v9 = vpack.c.bf16 %v481_v1, %v481_v1  ;;  %v490_v10 = vpack.c.bf16 %v482_v5, %v482_v5 }
  0xf1   : > { %492 = vst.msk [vmem:[%s235_s23] sm:$0xf] %vm491_vm5, %v483_v2 }
  0xf2   : > { %493 = vst.msk [vmem:[%s235_s23 + $0x4] sm:$0xf] %vm491_vm5, %v484_v3 }
  0xf3   : > { %494 = vst.msk [vmem:[%s235_s23 + $0x8] sm:$0xf] %vm491_vm5, %v485_v4 }
  0xf4   : > { %495 = vst.msk [vmem:[%s235_s23 + $0xc] sm:$0xf] %vm491_vm5, %v486_v6 }
  0xf5   : > { %496 = vst.msk [vmem:[%s235_s23 + $0x10] sm:$0xf] %vm491_vm5, %v487_v7 }
  0xf6   : > { %497 = vst.msk [vmem:[%s235_s23 + $0x14] sm:$0xf] %vm491_vm5, %v488_v8 }
  0xf7   : > { %498 = vst.msk [vmem:[%s235_s23 + $0x18] sm:$0xf] %vm491_vm5, %v489_v9 }
  0xf8   : > { %499 = vst.msk [vmem:[%s235_s23 + $0x1c] sm:$0xf] %vm491_vm5, %v490_v10 }
  0xf9 PF: > { %s14_s17 = sadd.s32 1, %s737_s17   ;;  %s916_s15 = smov %s733_s16 }
  0xfa   : > { %p11_p5 = scmp.ge.s32.totalorder %s14_s17, 4   ;;  %s917_s16 = smov %s919_s18 }
  0xfc   :  { %13 = sbr.rel (!%p11_p5) target bundleno = 2 (0x2), region = 66 }

// kernel: _lambda_.6
= control target key start
LH: loop header
LB: loop body
LE: loop exit
PB: predicated region body
PF: predicated region fallthrough
CT: control target
= control target key end

     0   :  { %s747_s15 = smov 0   ;;  %s749_s16 = smov 0   ;;  %s838_s0 = inlined_call_operand.vmem [shape: bf16[2,16,256], index: 0, kind: input, shape index: {}]   ;;  %s839_s1 = inlined_call_operand.vmem [shape: bf16[256,128], index: 1, kind: input, shape index: {}]   ;;  %s840_s2 = inlined_call_operand.vmem [shape: f32[1,128], index: 2, kind: input, shape index: {}]   ;;  %s841_s3 = inlined_call_operand.vmem [shape: f32[1,128], index: 3, kind: input, shape index: {}]   ;;  %s842_s4 = inlined_call_operand.vmem [shape: bf16[2,16,128], index: 4, kind: output, shape index: {}]  }
   0x1   :  { %s751_s17 = smov 0  }
   0x2 LB: > { %s26_s18 = sadd.s32 1, %s715_s16  ;;  %p562_p0 = scmp.ge.s32.totalorder %s719_s17, 1  ;;  %s719_s17 = sphi %s751_s17, %s14_s17   ;;  %s715_s16 = sphi %s749_s16, %s844_s16   ;;  %s711_s15 = sphi %s747_s15, %s843_s15  }
   0x3   : > { %p28_p1 = scmp.ge.s32.totalorder %s26_s18, 2  ;;  %p184_p2 = scmp.lt.s32.totalorder %s719_s17, 3 }
   0x5   : > { %s846_s18 = smov (%p28_p1, %s26_s18), 0  ;;  %p185_p3 = pnand %p562_p0, %p184_p2 }
   0x6   : > { %p220_p4 = scmp.lt.s32.totalorder (!%p185_p3), %s711_s15, 1 }
   0x7   : > { %188 = sbr.rel (%p185_p3) target bundleno = 232 (0xe8), region = 36 }
   0xc   : > { %v652_v0 = vld [vmem:[%s839_s1 + $0x38] sm:$0xff]  ;;  %v651_v2 = vld [vmem:[%s839_s1 + $0x30] sm:$0xff]  ;;  %v650_v4 = vld [vmem:[%s839_s1 + $0x28] sm:$0xff]  ;;  %s848_s15 = smov (!%p220_p4, %s711_s15), 1  ;;  %v721_v22 = vmov 16.0  }
   0xd   : > { %v660_v1 = vld [vmem:[%s839_s1 + $0x78] sm:$0xff]  ;;  %380 = vmatpush.bf16.msra.mxu0 %v652_v0  ;;  %v659_v3 = vld [vmem:[%s839_s1 + $0x70] sm:$0xff]  ;;  %v658_v5 = vld [vmem:[%s839_s1 + $0x68] sm:$0xff]  ;;  %s641_s21 = sshll.u32 %s848_s15, 4  ;;  %693 = vrcp.f32 %v721_v22  ;;  %s642_s11 = sshll.u32 %s848_s15, 3 }
   0xe   : > { %394 = vmatpush.bf16.msra.mxu1 %v660_v1  ;;  %v649_v6 = vld [vmem:[%s839_s1 + $0x20] sm:$0xff]  ;;  %v648_v8 = vld [vmem:[%s839_s1 + $0x18] sm:$0xff]  ;;  %v647_v10 = vld [vmem:[%s839_s1 + $0x10] sm:$0xff]  ;;  %s228_s28 = scalar_lea.vmem %s838_s0, %s641_s21  ;;  %s238_s14 = scalar_lea.vmem %s842_s4, %s642_s11 }
   0xf   : > { %v657_v7 = vld [vmem:[%s839_s1 + $0x60] sm:$0xff]  ;;  %v656_v9 = vld [vmem:[%s839_s1 + $0x58] sm:$0xff]  ;;  %v655_v11 = vld [vmem:[%s839_s1 + $0x50] sm:$0xff] }
  0x10   : > { %v646_v12 = vld [vmem:[%s839_s1 + $0x8] sm:$0xff]  ;;  %v645_v14 = vld [vmem:[%s839_s1] sm:$0xff] }
  0x11   : > { %381 = vmatpush.bf16.msra.mxu0 %v651_v2  ;;  %v654_v13 = vld [vmem:[%s839_s1 + $0x48] sm:$0xff]  ;;  %v653_v15 = vld [vmem:[%s839_s1 + $0x40] sm:$0xff] }
  0x12   : > { %395 = vmatpush.bf16.msra.mxu1 %v659_v3  ;;  %v569_v16 = vld [vmem:[%s228_s28] sm:$0xf]  ;;  %v644_v17 = vld [vmem:[%s228_s28 + $0x4] sm:$0xf0]  ;;  %v643_v18 = vld [vmem:[%s228_s28 + $0x4] sm:$0xf] }
  0x13   : > { %v571_v19 = vld [vmem:[%s228_s28 + $0x8] sm:$0xf0]  ;;  %v570_v20 = vor.u32 %v644_v17, %v569_v16  ;;  %v694_v25 = vpop.eup %693  ;;  %v691_v0 = vld [vmem:[%s840_s2] ss:$0 sm:$0xff] }
  0x14   : > { %v574_v21 = vor.u32 %v643_v18, %v571_v19  ;;  %v425_v26 = vmul.f32 16.0, %v694_v25  ;;  %vm429_vm0 = vweird.f32 %v694_v25 }
  0x15   : > { %382 = vmatpush.bf16.msra.mxu0 %v650_v4  ;;  %v692_v4 = vld [vmem:[%s841_s3] ss:$0 sm:$0xff] }
  0x16   : > { %396 = vmatpush.bf16.msra.mxu1 %v658_v5  ;;  %v426_v31 = vsub.f32 1.0, %v425_v26 }
  0x18   : > { %v427_v37 = vmul.f32 %v694_v25, %v426_v31 }
  0x19   : > { %383 = vmatpush.bf16.msra.mxu0 %v649_v6 }
  0x1a   : > { %397 = vmatpush.bf16.msra.mxu1 %v657_v7  ;;  %v428_v42 = vadd.f32 %v694_v25, %v427_v37 }
  0x1c   : > { %v430_v47 = vsel %vm429_vm0, %v694_v25, %v428_v42 }
  0x1d   : > { %384 = vmatpush.bf16.msra.mxu0 %v648_v8 }
  0x1e   : > { %398 = vmatpush.bf16.msra.mxu1 %v656_v9 }
  0x21   : > { %385 = vmatpush.bf16.msra.mxu0 %v647_v10 }
  0x22   : > { %399 = vmatpush.bf16.msra.mxu1 %v655_v11 }
  0x25   : > { %386 = vmatpush.bf16.msra.mxu0 %v646_v12 }
  0x26   : > { %400 = vmatpush.bf16.msra.mxu1 %v654_v13 }
  0x29   : > { %387 = vmatpush.bf16.msra.mxu0 %v645_v14 }
  0x2a   : > { %401 = vmatpush.bf16.msra.mxu1 %v653_v15 }
  0x2c   : > { %388 = vmatmul.bf16.vlgmr.msra.gmra.mxu0 %v570_v20 }
  0x2d   : > { %402 = vmatmul.bf16.vlgmr.msra.gmra.mxu1 %v574_v21 }
  0xa9   : > { %v389_v23 = vpop.f32.mrf.mxu0 }
  0xaa   : > { %v403_v24 = vpop.f32.mrf.mxu1 }
  0xab   : > { %v404_v27 = vadd.f32 %v403_v24, %v389_v23 }
  0xad   : > { %v415_v32 = vmul.f32 %v404_v27, %v404_v27 }
  0xb1   : > { %v391_v28 = vpop.f32.mrf.mxu0 }
  0xb2   : > { %v405_v29 = vpop.f32.mrf.mxu1 }
  0xb3   : > { %v406_v30 = vadd.f32 %v405_v29, %v391_v28 }
  0xb5   : > { %v408_v33 = vadd.f32 %v406_v30, %v404_v27  ;;  %v416_v34 = vmul.f32 %v406_v30, %v406_v30 }
  0xb7   : > { %v409_v35 = vrot.slane %v408_v33, 4  ;;  %v417_v36 = vadd.f32 %v416_v34, %v415_v32 }
  0xb9   : > { %v410_v38 = vadd.f32 %v409_v35, %v408_v33  ;;  %v418_v39 = vrot.slane %v417_v36, 4 }
  0xbb   : > { %v411_v40 = vrot.slane %v410_v38, 2  ;;  %v419_v41 = vadd.f32 %v418_v39, %v417_v36 }
  0xbd   : > { %v412_v43 = vadd.f32 %v411_v40, %v410_v38  ;;  %v420_v44 = vrot.slane %v419_v41, 2 }
  0xbf   : > { %v413_v45 = vrot.slane %v412_v43, 1  ;;  %v421_v46 = vadd.f32 %v420_v44, %v419_v41 }
  0xc1   : > { %v414_v48 = vadd.f32 %v413_v45, %v412_v43  ;;  %v422_v49 = vrot.slane %v421_v46, 1 }
  0xc3   : > { %v423_v50 = vadd.f32 %v422_v49, %v421_v46  ;;  %v431_v51 = vmul.f32 %v430_v47, %v414_v48 }
  0xc5   : > { %v432_v52 = vmul.f32 %v430_v47, %v423_v50  ;;  %v433_v53 = vmul.f32 %v431_v51, %v431_v51  ;;  %v435_v62 = vsub.f32 %v404_v27, %v431_v51  ;;  %v436_v63 = vsub.f32 %v406_v30, %v431_v51 }
  0xc7   : > { %v434_v54 = vsub.f32 %v432_v52, %v433_v53 }
  0xc9   : > { %v437_v55 = vadd.f32 1e-05, %v434_v54 }
  0xcb   : > { %695 = vrsqrt.f32 %v437_v55  ;;  %vm444_vm2 = vweird.f32 %v437_v55 }
  0xd1   : > { %v696_v56 = vpop.eup %695 }
  0xd2   : > { %v439_v57 = vmul.f32 %v696_v56, %v437_v55  ;;  %vm445_vm1 = vweird.f32 %v696_v56 }
  0xd3   : > { %vm446_vm3 = vmor %vm444_vm2, %vm445_vm1 }
  0xd4   : > { %v440_v58 = vmul.f32 %v696_v56, %v439_v57 }
  0xd6   : > { %v441_v59 = vmul.f32 0.5, %v440_v58 }
  0xd8   : > { %v442_v60 = vsub.f32 1.5, %v441_v59 }
  0xda   : > { %v443_v61 = vmul.f32 %v696_v56, %v442_v60 }
  0xdc   : > { %v447_v1 = vsel %vm446_vm3, %v696_v56, %v443_v61 }
  0xdd   : > { %v448_v2 = vmul.f32 %v447_v1, %v435_v62  ;;  %v449_v3 = vmul.f32 %v447_v1, %v436_v63 }
  0xdf   : > { %v454_v5 = vmul.f32 %v691_v0, %v448_v2  ;;  %v455_v6 = vmul.f32 %v691_v0, %v449_v3 }
  0xe1   : > { %v460_v7 = vadd.f32 %v692_v4, %v454_v5  ;;  %v461_v8 = vadd.f32 %v692_v4, %v455_v6 }
  0xe3   : > { %v462_v9 = vmax.f32 %v460_v7, 0.0  ;;  %v463_v10 = vmax.f32 %v461_v8, 0.0 }
  0xe5   : > { %v664_v11 = vpack.c.bf16 %v463_v10, %v462_v9 }
  0xe7   : > { %665 = vst [vmem:[%s238_s14] sm:$0xff] %v664_v11  }
  0xe8 PF: > { %s14_s17 = sadd.s32 1, %s719_s17   ;;  %s843_s15 = smov %s715_s16 }
  0xe9   : > { %p11_p5 = scmp.ge.s32.totalorder %s14_s17, 4   ;;  %s844_s16 = smov %s846_s18 }
  0xeb   :  { %13 = sbr.rel (!%p11_p5) target bundleno = 2 (0x2), region = 66 }

// kernel: _lambda_.7
= control target key start
LH: loop header
LB: loop body
LE: loop exit
PB: predicated region body
PF: predicated region fallthrough
CT: control target
= control target key end

     0   :  { %s12695_s18 = smov 0   ;;  %s15211_s0 = inlined_call_operand.vmem [shape: bf16[2,40,128], index: 0, kind: input, shape index: {}]   ;;  %s15212_s1 = inlined_call_operand.vmem [shape: bf16[72,128,128], index: 1, kind: input, shape index: {}]   ;;  %s15213_s2 = inlined_call_operand.vmem [shape: f32[8,1,128], index: 2, kind: input, shape index: {}]   ;;  %s15214_s3 = inlined_call_operand.vmem [shape: f32[8,1,128], index: 3, kind: input, shape index: {}]   ;;  %s15215_s4 = inlined_call_operand.vmem [shape: f32[22,128], index: 4, kind: input, shape index: {}]   ;;  %s15216_s5 = inlined_call_operand.vmem [shape: bf16[2,40,128], index: 5, kind: output, shape index: {}]  }
   0x1 LB: > { %s8467_s19 = sadd.s32 4294967295, %s12662_s18   ;;  %p8471_p0 = scmp.ge.s32.totalorder %s12662_s18, 1  ;;  %s12662_s18 = sphi %s12695_s18, %s15_s18  }
   0x2   : > { %p187_p1 = scmp.lt.s32.totalorder %s12662_s18, 3 }
   0x4   : > { %p188_p2 = pnand %p8471_p0, %p187_p1 }
   0x5   : > { %p215_p3 = scmp.lt.s32.totalorder (!%p188_p2), %s8467_s19, 1 }
   0x6   : > { %191 = sbr.rel (%p188_p2) target bundleno = 2368 (0x940), region = 40 }
   0xb   : > { %v11945_v0 = vld [vmem:[%s15212_s1 + $0x78] sm:$0xff]  ;;  %v11944_v4 = vld [vmem:[%s15212_s1 + $0x70] sm:$0xff]  ;;  %s15224_s19 = smov (!%p215_p3, %s8467_s19), 1  ;;  %v11943_v8 = vld [vmem:[%s15212_s1 + $0x68] sm:$0xff]  ;;  %vm289_vm0 = vsmask.f32 7424 }
   0xc   : > { %v11937_v1 = vld [vmem:[%s15212_s1 + $0x38] sm:$0xff]  ;;  %355 = vmatpush.bf16.msra.mxu0 %v11945_v0  ;;  %v11936_v5 = vld [vmem:[%s15212_s1 + $0x30] sm:$0xff]  ;;  %s12602_s11 = smul.u32 20, %s15224_s19  ;;  %v11935_v9 = vld [vmem:[%s15212_s1 + $0x28] sm:$0xff]  ;;  %vm465_vm1 = vcmask 1046528   ;;  %vm571_vm2 = vcmask 1044480  }
   0xd   : > { %v11953_v2 = vld [vmem:[%s15212_s1 + $0xb8] sm:$0xff]  ;;  %426 = vmatpush.bf16.msra.mxu1 %v11937_v1  ;;  %v11952_v6 = vld [vmem:[%s15212_s1 + $0xb0] sm:$0xff]  ;;  %v11951_v10 = vld [vmem:[%s15212_s1 + $0xa8] sm:$0xff]  ;;  %vm667_vm3 = vsmask.f32 4352  ;;  %vm877_vm4 = vcmask 1045504  }
   0xe   : > { %v11961_v3 = vld [vmem:[%s15212_s1 + $0xf8] sm:$0xff]  ;;  %519 = vmatpush.bf16.msra.mxu2 %v11953_v2  ;;  %v11960_v7 = vld [vmem:[%s15212_s1 + $0xf0] sm:$0xff]  ;;  %v11959_v11 = vld [vmem:[%s15212_s1 + $0xe8] sm:$0xff]  ;;  %s219_s24 = scalar_lea.vmem %s15211_s0, %s12602_s11  ;;  %s12860_s8 = scalar_lea.vmem %s15216_s5, %s12602_s11  ;;  %vm973_vm5 = vsmask.f32 5376  ;;  %vm1265_vm9 = vcmask 1043459  }
   0xf   : > { %625 = vmatpush.bf16.msra.mxu3 %v11961_v3  ;;  %v11942_v12 = vld [vmem:[%s15212_s1 + $0x60] sm:$0xff]  ;;  %v228_v17 = vld [vmem:[%s219_s24 + $0x8] sm:$0xff]   ;;  %v11941_v18 = vld [vmem:[%s15212_s1 + $0x58] sm:$0xff]  ;;  %vm1266_vm10 = vsmask.f32 7950  ;;  %vm1273_vm14 = vcmask 1042432  }
  0x10   : > { %356 = vmatpush.bf16.msra.mxu0 %v11944_v4  ;;  %v11934_v13 = vld [vmem:[%s15212_s1 + $0x20] sm:$0xff]  ;;  %233 = vst [vmem:[#allocation2 + $0x8] sm:$0xff] %v228_v17   ;;  %v11933_v19 = vld [vmem:[%s15212_s1 + $0x18] sm:$0xff]  ;;  %v230_v22 = vld [vmem:[%s219_s24 + $0x10] sm:$0xf] }
  0x11   : > { %427 = vmatpush.bf16.msra.mxu1 %v11936_v5  ;;  %v226_v14 = vld [vmem:[%s219_s24] sm:$0xff]   ;;  %v11949_v20 = vld [vmem:[%s15212_s1 + $0x98] sm:$0xff]  ;;  %v11940_v23 = vld [vmem:[%s15212_s1 + $0x50] sm:$0xff]  ;;  %235 = vst [vmem:[#allocation2 + $0x10] sm:$0xf] %v230_v22 }
  0x12   : > { %520 = vmatpush.bf16.msra.mxu2 %v11952_v6  ;;  %v11950_v15 = vld [vmem:[%s15212_s1 + $0xa0] sm:$0xff]  ;;  %231 = vst [vmem:[#allocation2] sm:$0xff] %v226_v14   ;;  %v11957_v21 = vld [vmem:[%s15212_s1 + $0xd8] sm:$0xff]  ;;  %v11932_v24 = vld [vmem:[%s15212_s1 + $0x10] sm:$0xff]  ;;  %vm1229_vm11 = vsmask.f32 3328 }
  0x13   : > { %626 = vmatpush.bf16.msra.mxu3 %v11960_v7  ;;  %v11958_v16 = vld [vmem:[%s15212_s1 + $0xe0] sm:$0xff]  ;;  %v11948_v25 = vld [vmem:[%s15212_s1 + $0x90] sm:$0xff]  ;;  %v11939_v40 = vld [vmem:[%s15212_s1 + $0x48] sm:$0xff]  ;;  %vm1230_vm12 = vsmask.f32 7440 }
  0x14   : > { %357 = vmatpush.bf16.msra.mxu0 %v11943_v8  ;;  %v11956_v26 = vld [vmem:[%s15212_s1 + $0xd0] sm:$0xff]  ;;  %v11931_v41 = vld [vmem:[%s15212_s1 + $0x8] sm:$0xff]  ;;  %v11938_v51 = vld [vmem:[%s15212_s1 + $0x40] sm:$0xff]  ;;  %vm1274_vm15 = vsmask.f32 2304 }
  0x15   : > { %428 = vmatpush.bf16.msra.mxu1 %v11935_v9  ;;  %v11947_v45 = vld [vmem:[%s15212_s1 + $0x88] sm:$0xff]  ;;  %v11930_v52 = vld [vmem:[%s15212_s1] sm:$0xff]  ;;  %v11969_v61 = vld [vmem:[%s15212_s1 + $0x138] sm:$0xff] }
  0x16   : > { %521 = vmatpush.bf16.msra.mxu2 %v11951_v10  ;;  %v11955_v46 = vld [vmem:[%s15212_s1 + $0xc8] sm:$0xff]  ;;  %v11946_v55 = vld [vmem:[%s15212_s1 + $0x80] sm:$0xff]  ;;  %v11985_v62 = vld [vmem:[%s15212_s1 + $0x1b8] sm:$0xff] }
  0x17   : > { %627 = vmatpush.bf16.msra.mxu3 %v11959_v11  ;;  %v542_v34 = vld [vmem:[#allocation2 + $0x8] sm:$0xf]  ;;  %v543_v35 = vld [vmem:[#allocation2 + $0xc] sm:$0x3]  ;;  %v11954_v56 = vld [vmem:[%s15212_s1 + $0xc0] sm:$0xff] }
  0x18   : > { %358 = vmatpush.bf16.msra.mxu0 %v11942_v12  ;;  %v12790_v38 = vunpack.c.l.b16 %v542_v34  ;;  %v568_v39 = vunpack.c.l.b16 %v543_v35  ;;  %v11977_v0 = vld [vmem:[%s15212_s1 + $0x178] sm:$0xff]  ;;  %v11968_v4 = vld [vmem:[%s15212_s1 + $0x130] sm:$0xff]  ;;  %v8406_v6 = vld [vmem:[#allocation2 + $0x10] sm:$0xf] }
  0x19   : > { %429 = vmatpush.bf16.msra.mxu1 %v11934_v13  ;;  %v12783_v27 = vld [vmem:[#allocation2] sm:$0xff]   ;;  %v11993_v3 = vld [vmem:[%s15212_s1 + $0x1f8] sm:$0xff]  ;;  %v11967_v9 = vld [vmem:[%s15212_s1 + $0x128] sm:$0xff]  ;;  %8411 = vst [vmem:[%s12860_s8 + $0x10] sm:$0xf] %v8406_v6 }
  0x1a   : > { %522 = vmatpush.bf16.msra.mxu2 %v11950_v15  ;;  %v12785_v28 = vld [vmem:[#allocation2 + $0x4] sm:$0xff]   ;;  %v293_v29 = vshll.u32 %v12783_v27, 16  ;;  %v540_v31 = vld [vmem:[#allocation2] sm:$0x8]  ;;  %v291_v43 = vshrl.u32 %v12783_v27, 16  ;;  %v12812_v49 = vpack.c.b16 %v568_v39, %v12790_v38  ;;  %v11983_v10 = vld [vmem:[%s15212_s1 + $0x1a8] sm:$0xff] }
  0x1b   : > { %628 = vmatpush.bf16.msra.mxu3 %v11958_v16  ;;  %v12570_v30 = vld [vmem:[#allocation2] sm:$0xf0]  ;;  %v286_v32 = vunpack.c.h.b16 %v12785_v28  ;;  %v12571_v33 = vld [vmem:[#allocation2] sm:$0xe]  ;;  %v565_v36 = vunpack.c.l.b16 %v540_v31  ;;  %v566_v37 = vunpack.c.l.b16 %v12785_v28  ;;  %v246_v11 = vld [vmem:[#allocation2 + $0x8] sm:$0x7] }
  0x1c   : > { %359 = vmatpush.bf16.msra.mxu0 %v11941_v18  ;;  %v295_v44 = vrot.slane %v293_v29, 1  ;;  %v12572_v47 = vor.u32 %v12571_v33, %v12570_v30  ;;  %v573_v60 = vrot.slane %v12812_v49, 3  ;;  %v11984_v5 = vld [vmem:[%s15212_s1 + $0x1b0] sm:$0xff]  ;;  %v11975_v12 = vld [vmem:[%s15212_s1 + $0x168] sm:$0xff]  ;;  %v646_v14 = vld [vmem:[#allocation2 + $0xc] sm:$0x7]  ;;  %v374_v18 = vunpack.c.l.b16 %v246_v11 }
  0x1d   : > { %430 = vmatpush.bf16.msra.mxu1 %v11933_v19  ;;  %v12798_v42 = vpack.c.b16 %v286_v32, %v286_v32  ;;  %v12809_v48 = vpack.c.b16 %v566_v37, %v565_v36  ;;  %v11976_v7 = vld [vmem:[%s15212_s1 + $0x170] sm:$0xff]  ;;  %v11991_v13 = vld [vmem:[%s15212_s1 + $0x1e8] sm:$0xff]  ;;  %v11966_v15 = vld [vmem:[%s15212_s1 + $0x120] sm:$0xff]  ;;  %v12894_v22 = vunpack.c.l.b16 %v646_v14 }
  0x1e   : > { %523 = vmatpush.bf16.msra.mxu2 %v11949_v20  ;;  %v296_v53 = vor.u32 %v295_v44, %v291_v43  ;;  %v466_v57 = vrot.slane %v12572_v47, 1  ;;  %v11992_v8 = vld [vmem:[%s15212_s1 + $0x1f0] sm:$0xff]  ;;  %v11982_v16 = vld [vmem:[%s15212_s1 + $0x1a0] sm:$0xff]  ;;  %v12892_v20 = vld [vmem:[#allocation2 + $0x8] sm:$0xff]   ;;  %v375_v33 = vpack.c.b16 %v374_v18, %v374_v18 }
  0x1f   : > { %629 = vmatpush.bf16.msra.mxu3 %v11957_v21  ;;  %v298_v50 = vshll.u32 %v12798_v42, 16  ;;  %v467_v58 = vrot.slane %v12798_v42, 1  ;;  %v572_v59 = vrot.slane %v12809_v48, 3  ;;  %v302_v17 = vshrl.u32 %v12798_v42, 16  ;;  %v846_v19 = vld [vmem:[#allocation2 + $0x4] sm:$0xc]  ;;  %vm13192_vm13 = vmand %vm1265_vm9, %vm1266_vm10 }
  0x20   : > { %360 = vmatpush.bf16.msra.mxu0 %v11940_v23  ;;  %v952_v21 = vld [vmem:[#allocation2 + $0x10] sm:$0x3]  ;;  %v12513_v29 = vunpack.c.h.b16 %v12892_v20  ;;  %v871_v30 = vunpack.c.l.b16 %v846_v19  ;;  %v666_v34 = vpack.c.b16 %v12894_v22, %v12790_v38  ;;  %v11973_v35 = vld [vmem:[%s15212_s1 + $0x158] sm:$0xff]  ;;  %v11964_v39 = vld [vmem:[%s15212_s1 + $0x110] sm:$0xff] }
  0x21   : > { %431 = vmatpush.bf16.msra.mxu1 %v11932_v24  ;;  %v12821_v54 = vrot.slane %v298_v50, 1  ;;  %v468_v1 = vsel %vm465_vm1, %v466_v57, %v467_v58  ;;  %v574_v2 = vsel %vm571_vm2, %v572_v59, %v573_v60  ;;  %v11974_v23 = vld [vmem:[%s15212_s1 + $0x160] sm:$0xff]  ;;  %v971_v31 = vunpack.c.l.b16 %v952_v21  ;;  %v11989_v36 = vld [vmem:[%s15212_s1 + $0x1d8] sm:$0xff]  ;;  %v11988_v42 = vld [vmem:[%s15212_s1 + $0x1d0] sm:$0xff] }
  0x22   : > { %524 = vmatpush.bf16.msra.mxu2 %v11948_v25  ;;  %v11990_v24 = vld [vmem:[%s15212_s1 + $0x1e0] sm:$0xff]  ;;  %v11965_v25 = vld [vmem:[%s15212_s1 + $0x118] sm:$0xff]  ;;  %v677_v47 = vshrl.u32 %v666_v34, 16  ;;  %v680_v50 = vshll.u32 %v666_v34, 16  ;;  %v11963_v49 = vld [vmem:[%s15212_s1 + $0x108] sm:$0xff]  ;;  %v774_v21 = vpack.c.b16 %v12894_v22, %v12894_v22 }
  0x23   : > { %630 = vmatpush.bf16.msra.mxu3 %v11956_v26  ;;  %v301_v63 = vsel %vm289_vm0, %v296_v53, %v12821_v54  ;;  %v11981_v26 = vld [vmem:[%s15212_s1 + $0x198] sm:$0xff]  ;;  %v304_v32 = vor.u32 %v302_v17, %v12821_v54  ;;  %v12929_v44 = vpack.c.b16 %v971_v31, %v12513_v29  ;;  %v12000_v18 = vld [vmem:[%s15212_s1 + $0x230] sm:$0xff]  ;;  %v11999_v28 = vld [vmem:[%s15212_s1 + $0x228] sm:$0xff] }
  0x24   : > { %361 = vmatpush.bf16.msra.mxu0 %v11939_v40  ;;  %v11980_v40 = vld [vmem:[%s15212_s1 + $0x190] sm:$0xff]  ;;  %v679_v59 = vrot.slane %v677_v47, 3  ;;  %v12001_v6 = vld [vmem:[%s15212_s1 + $0x238] sm:$0xff]  ;;  %v11994_v22 = vld [vmem:[%s15212_s1 + $0x200] sm:$0xff] }
  0x25   : > { %432 = vmatpush.bf16.msra.mxu1 %v11931_v41  ;;  %v849_v41 = vld [vmem:[#allocation2 + $0x10] sm:$0x1]  ;;  %v1084_v31 = vrot.slane %v12929_v44, 3 }
  0x26   : > { %525 = vmatpush.bf16.msra.mxu2 %v11947_v45  ;;  %v669_v45 = vshrl.u32 %v12809_v48, 16 }
  0x27   : > { %631 = vmatpush.bf16.msra.mxu3 %v11955_v46  ;;  %v672_v46 = vshll.u32 %v12809_v48, 16  ;;  %v11979_v48 = vld [vmem:[%s15212_s1 + $0x188] sm:$0xff] }
  0x28   : > { %362 = vmatpush.bf16.msra.mxu0 %v11938_v51  ;;  %v11972_v51 = vld [vmem:[%s15212_s1 + $0x150] sm:$0xff]  ;;  %v671_v57 = vrot.slane %v669_v45, 3 }
  0x29   : > { %433 = vmatpush.bf16.msra.mxu1 %v11930_v52  ;;  %v874_v52 = vunpack.c.l.b16 %v849_v41 }
  0x2a   : > { %526 = vmatpush.bf16.msra.mxu2 %v11946_v55  ;;  %v983_v55 = vshrl.u32 %v12929_v44, 16 }
  0x2b   : > { %632 = vmatpush.bf16.msra.mxu3 %v11954_v56  ;;  %363 = vmatmul.bf16.vlgmr.msra.gmra.mxu0 %v301_v63  ;;  %v986_v56 = vshll.u32 %v12929_v44, 16  ;;  %v876_v63 = vpack.c.b16 %v874_v52, %v12513_v29 }
  0x2c   : > { %735 = vmatpush.bf16.msrb.mxu0 %v11969_v61  ;;  %434 = vmatmul.bf16.vlgmr.msra.gmra.mxu1 %v12783_v27  ;;  %v12512_v27 = vunpack.c.l.b16 %v12892_v20  ;;  %v11971_v61 = vld [vmem:[%s15212_s1 + $0x148] sm:$0xff] }
  0x2d   : > { %527 = vmatmul.bf16.vlgmr.msra.gmra.mxu2 %v468_v1  ;;  %825 = vmatpush.bf16.msrb.mxu1 %v11977_v0  ;;  %v11962_v0 = vld [vmem:[%s15212_s1 + $0x100] sm:$0xff] }
  0x2e   : > { %931 = vmatpush.bf16.msrb.mxu2 %v11985_v62  ;;  %633 = vmatmul.bf16.vlgmr.msra.gmra.mxu3 %v574_v2  ;;  %v12927_v43 = vpack.c.b16 %v12512_v27, %v871_v30  ;;  %v11987_v62 = vld [vmem:[%s15212_s1 + $0x1c8] sm:$0xff]  ;;  %v11978_v1 = vld [vmem:[%s15212_s1 + $0x180] sm:$0xff] }
  0x2f   : > { %1041 = vmatpush.bf16.msrb.mxu3 %v11993_v3 }
  0x30   : > { %736 = vmatpush.bf16.msrb.mxu0 %v11968_v4  ;;  %v975_v53 = vshrl.u32 %v12927_v43, 16  ;;  %v978_v54 = vshll.u32 %v12927_v43, 16  ;;  %v985_v4 = vrot.slane %v983_v55, 2  ;;  %v878_v11 = vrot.slane %v12927_v43, 2 }
  0x31   : > { %826 = vmatpush.bf16.msrb.mxu1 %v11976_v7 }
  0x32   : > { %932 = vmatpush.bf16.msrb.mxu2 %v11984_v5  ;;  %v977_v2 = vrot.slane %v975_v53, 2  ;;  %v980_v3 = vrot.slane %v978_v54, 3  ;;  %v988_v5 = vrot.slane %v986_v56, 3 }
  0x33   : > { %1042 = vmatpush.bf16.msrb.mxu3 %v11992_v8 }
  0x34   : > { %737 = vmatpush.bf16.msrb.mxu0 %v11967_v9  ;;  %v11970_v9 = vld [vmem:[%s15212_s1 + $0x140] sm:$0xff]  ;;  %v989_v14 = vor.u32 %v988_v5, %v985_v4 }
  0x35   : > { %827 = vmatpush.bf16.msrb.mxu1 %v11975_v12  ;;  %v879_v12 = vrot.slane %v876_v63, 2 }
  0x36   : > { %933 = vmatpush.bf16.msrb.mxu2 %v11983_v10  ;;  %v11986_v10 = vld [vmem:[%s15212_s1 + $0x1c0] sm:$0xff] }
  0x37   : > { %1043 = vmatpush.bf16.msrb.mxu3 %v11991_v13  ;;  %v981_v13 = vor.u32 %v980_v3, %v977_v2  ;;  %v880_v17 = vsel %vm877_vm4, %v878_v11, %v879_v12 }
  0x38   : > { %738 = vmatpush.bf16.msrb.mxu0 %v11966_v15 }
  0x39   : > { %828 = vmatpush.bf16.msrb.mxu1 %v11974_v23  ;;  %v990_v19 = vsel %vm973_vm5, %v981_v13, %v989_v14  ;;  %v11996_v23 = vld [vmem:[%s15212_s1 + $0x210] sm:$0xff] }
  0x3a   : > { %934 = vmatpush.bf16.msrb.mxu2 %v11982_v16  ;;  %v773_v16 = vpack.c.b16 %v12790_v38, %v566_v37  ;;  %v11998_v37 = vld [vmem:[%s15212_s1 + $0x220] sm:$0xff]  ;;  %v11997_v38 = vld [vmem:[%s15212_s1 + $0x218] sm:$0xff] }
  0x3b   : > { %1044 = vmatpush.bf16.msrb.mxu3 %v11990_v24  ;;  %368 = vmatmul.bf16.gmra.mxu0 %v304_v32  ;;  %v1062_v24 = vld [vmem:[#allocation2 + $0x4] sm:$0x8] }
  0x3c   : > { %739 = vmatpush.bf16.msrb.mxu0 %v11965_v25  ;;  %439 = vmatmul.bf16.gmra.mxu1 %v375_v33  ;;  %v1081_v25 = vunpack.c.l.b16 %v1062_v24 }
  0x3d   : > { %532 = vmatmul.bf16.gmra.mxu2 %v467_v58  ;;  %829 = vmatpush.bf16.msrb.mxu1 %v11973_v35  ;;  %v674_v58 = vrot.slane %v672_v46, 4 }
  0x3e   : > { %935 = vmatpush.bf16.msrb.mxu2 %v11981_v26  ;;  %638 = vmatmul.bf16.gmra.mxu3 %v573_v60  ;;  %v682_v60 = vrot.slane %v680_v50, 4  ;;  %v11995_v26 = vld [vmem:[%s15212_s1 + $0x208] sm:$0xff]  ;;  %v1082_v29 = vpack.c.b16 %v12512_v27, %v1081_v25 }
  0x3f   : > { %1045 = vmatpush.bf16.msrb.mxu3 %v11989_v36  ;;  %v675_v7 = vor.u32 %v674_v58, %v671_v57  ;;  %v13015_v25 = vld [vmem:[%s15215_s4 + $0x8] sm:$0xff] }
  0x40   : > { %740 = vmatpush.bf16.msrb.mxu0 %v11964_v39  ;;  %v683_v8 = vor.u32 %v682_v60, %v679_v59  ;;  %v1083_v30 = vrot.slane %v1082_v29, 3  ;;  %v12664_v59 = vmov 0  }
  0x41   : > { %830 = vmatpush.bf16.msrb.mxu1 %v11972_v51  ;;  %236 = vst [vmem:[#allocation3] sm:$0xf] %v12664_v59 }
  0x42   : > { %936 = vmatpush.bf16.msrb.mxu2 %v11980_v40  ;;  %v684_v15 = vsel %vm667_vm3, %v675_v7, %v683_v8  ;;  %v1085_v32 = vsel %vm571_vm2, %v1083_v30, %v1084_v31  ;;  %237 = vst [vmem:[#allocation3 + $0x4] sm:$0xf] %v12664_v59 }
  0x43   : > { %1046 = vmatpush.bf16.msrb.mxu3 %v11988_v42  ;;  %238 = vst [vmem:[#allocation3 + $0x8] sm:$0xf] %v12664_v59 }
  0x44   : > { %741 = vmatpush.bf16.msrb.mxu0 %v11963_v49  ;;  %239 = vst [vmem:[#allocation3 + $0xc] sm:$0xf] %v12664_v59 }
  0x45   : > { %831 = vmatpush.bf16.msrb.mxu1 %v11971_v61  ;;  %240 = vst [vmem:[#allocation3 + $0x10] sm:$0xf] %v12664_v59 }
  0x46   : > { %937 = vmatpush.bf16.msrb.mxu2 %v11979_v48 }
  0x47   : > { %1047 = vmatpush.bf16.msrb.mxu3 %v11987_v62 }
  0x48   : > { %742 = vmatpush.bf16.msrb.mxu0 %v11962_v0 }
  0x49   : > { %832 = vmatpush.bf16.msrb.mxu1 %v11970_v9 }
  0x4a   : > { %938 = vmatpush.bf16.msrb.mxu2 %v11978_v1 }
  0x4b   : > { %1048 = vmatpush.bf16.msrb.mxu3 %v11986_v10  ;;  %743 = vmatmul.bf16.vlgmr.msrb.gmra.mxu0 %v684_v15 }
  0x4c   : > { %1136 = vmatpush.bf16.msra.mxu0 %v12001_v6  ;;  %833 = vmatmul.bf16.vlgmr.msrb.gmra.mxu1 %v773_v16 }
  0x4d   : > { %939 = vmatmul.bf16.vlgmr.msrb.gmra.mxu2 %v880_v17 }
  0x4e   : > { %1049 = vmatmul.bf16.vlgmr.msrb.gmra.mxu3 %v990_v19 }
  0x50   : > { %1137 = vmatpush.bf16.msra.mxu0 %v12000_v18 }
  0x54   : > { %1138 = vmatpush.bf16.msra.mxu0 %v11999_v28 }
  0x58   : > { %1139 = vmatpush.bf16.msra.mxu0 %v11998_v37 }
  0x5b   : > { %748 = vmatmul.bf16.gmra.mxu0 %v683_v8 }
  0x5c   : > { %1140 = vmatpush.bf16.msra.mxu0 %v11997_v38  ;;  %838 = vmatmul.bf16.gmra.mxu1 %v774_v21 }
  0x5d   : > { %944 = vmatmul.bf16.gmra.mxu2 %v879_v12 }
  0x5e   : > { %1054 = vmatmul.bf16.gmra.mxu3 %v989_v14 }
  0x60   : > { %1141 = vmatpush.bf16.msra.mxu0 %v11996_v23 }
  0x64   : > { %1142 = vmatpush.bf16.msra.mxu0 %v11995_v26 }
  0x68   : > { %1143 = vmatpush.bf16.msra.mxu0 %v11994_v22  ;;  %v13022_v22 = vld [vmem:[%s15215_s4] sm:$0xff] }
  0x6b   : > { %1144 = vmatmul.bf16.vlgmr.msra.gmra.mxu0 %v1085_v32  ;;  %v13031_v32 = vld [vmem:[%s15215_s4 + $0x10] sm:$0x3f] }
  0x7b   : > { %1149 = vmatmul.bf16.gmra.mxu0 %v1084_v31 }
  0xa8   : > { %v364_v33 = vpop.f32.mrf.mxu0 }
  0xa9   : > { %v435_v34 = vpop.f32.mrf.mxu1 }
  0xaa   : > { %v436_v35 = vadd.f32 %v435_v34, %v364_v33 }
  0xb0   : > { %v528_v36 = vpop.f32.mrf.mxu2  ;;  %v366_v20 = vpop.f32.mrf.mxu0 }
  0xb1   : > { %v634_v39 = vpop.f32.mrf.mxu3  ;;  %v437_v27 = vpop.f32.mrf.mxu1  ;;  %v537_v3 = vadd.f32 %v528_v36, %v436_v35 }
  0xb2   : > { %v438_v61 = vadd.f32 %v437_v27, %v366_v20 }
  0xb3   : > { %v643_v6 = vadd.f32 %v634_v39, %v537_v3 }
  0xb8   : > { %v530_v40 = vpop.f32.mrf.mxu2  ;;  %v369_v43 = vpop.f32.mrf.mxu0 }
  0xb9   : > { %v636_v41 = vpop.f32.mrf.mxu3  ;;  %v440_v45 = vpop.f32.mrf.mxu1  ;;  %v538_v63 = vadd.f32 %v530_v40, %v438_v61  ;;  %v12025_v61 = vld [vmem:[%s15212_s1 + $0x2f8] sm:$0xff] }
  0xba   : > { %v441_v5 = vadd.f32 %v440_v45, %v369_v43  ;;  %1553 = vmatpush.bf16.msra.mxu3 %v12025_v61 }
  0xbb   : > { %v644_v4 = vadd.f32 %v636_v41, %v538_v63 }
  0xc0   : > { %v533_v46 = vpop.f32.mrf.mxu2  ;;  %v371_v50 = vpop.f32.mrf.mxu0 }
  0xc1   : > { %v639_v47 = vpop.f32.mrf.mxu3  ;;  %v442_v44 = vpop.f32.mrf.mxu1  ;;  %v539_v8 = vadd.f32 %v533_v46, %v441_v5  ;;  %v12024_v5 = vld [vmem:[%s15212_s1 + $0x2f0] sm:$0xff] }
  0xc2   : > { %1554 = vmatpush.bf16.msra.mxu3 %v12024_v5 }
  0xc3   : > { %v645_v14 = vadd.f32 %v639_v47, %v539_v8  ;;  %v12006_v8 = vld [vmem:[%s15212_s1 + $0x260] sm:$0xff] }
  0xc8   : > { %v535_v51 = vpop.f32.mrf.mxu2  ;;  %v744_v52 = vpop.f32.mrf.mxu0 }
  0xc9   : > { %v641_v42 = vpop.f32.mrf.mxu3  ;;  %v834_v49 = vpop.f32.mrf.mxu1  ;;  %v753_v10 = vadd.f32 %v744_v52, %v643_v6  ;;  %v12032_v6 = vld [vmem:[%s15212_s1 + $0x330] sm:$0xff] }
  0xcb   : > { %v843_v15 = vadd.f32 %v834_v49, %v753_v10 }
  0xd0   : > { %v940_v48 = vpop.f32.mrf.mxu2  ;;  %v746_v53 = vpop.f32.mrf.mxu0 }
  0xd1   : > { %v1050_v54 = vpop.f32.mrf.mxu3  ;;  %v836_v55 = vpop.f32.mrf.mxu1  ;;  %v754_v7 = vadd.f32 %v746_v53, %v644_v4  ;;  %v949_v18 = vadd.f32 %v940_v48, %v843_v15  ;;  %v12009_v53 = vld [vmem:[%s15212_s1 + $0x278] sm:$0xff]  ;;  %v12022_v15 = vld [vmem:[%s15212_s1 + $0x2e0] sm:$0xff] }
  0xd2   : > { %1461 = vmatpush.bf16.msra.mxu2 %v12009_v53 }
  0xd3   : > { %v844_v13 = vadd.f32 %v836_v55, %v754_v7  ;;  %v1059_v38 = vadd.f32 %v1050_v54, %v949_v18  ;;  %v12014_v18 = vld [vmem:[%s15212_s1 + $0x2a0] sm:$0xff] }
  0xd8   : > { %v942_v56 = vpop.f32.mrf.mxu2  ;;  %v749_v57 = vpop.f32.mrf.mxu0 }
  0xd9   : > { %v1052_v58 = vpop.f32.mrf.mxu3  ;;  %v839_v60 = vpop.f32.mrf.mxu1  ;;  %v950_v16 = vadd.f32 %v942_v56, %v844_v13  ;;  %v755_v17 = vadd.f32 %v749_v57, %v645_v14  ;;  %v12005_v13 = vld [vmem:[%s15212_s1 + $0x258] sm:$0xff]  ;;  %v12015_v14 = vld [vmem:[%s15212_s1 + $0x2a8] sm:$0xff] }
  0xdb   : > { %v1060_v19 = vadd.f32 %v1052_v58, %v950_v16  ;;  %v845_v37 = vadd.f32 %v839_v60, %v755_v17  ;;  %v12008_v58 = vld [vmem:[%s15212_s1 + $0x270] sm:$0xff]  ;;  %v12030_v16 = vld [vmem:[%s15212_s1 + $0x320] sm:$0xff] }
  0xdc   : > { %1462 = vmatpush.bf16.msra.mxu2 %v12008_v58  ;;  %v12004_v17 = vld [vmem:[%s15212_s1 + $0x250] sm:$0xff] }
  0xe0   : > { %v945_v62 = vpop.f32.mrf.mxu2  ;;  %v751_v0 = vpop.f32.mrf.mxu0 }
  0xe1   : > { %v1055_v1 = vpop.f32.mrf.mxu3  ;;  %v841_v2 = vpop.f32.mrf.mxu1  ;;  %v951_v23 = vadd.f32 %v945_v62, %v845_v37  ;;  %v12033_v62 = vld [vmem:[%s15212_s1 + $0x338] sm:$0xff] }
  0xe2   : > { %1658 = vmatpush.bf16.msrb.mxu0 %v12033_v62  ;;  %v12017_v2 = vld [vmem:[%s15212_s1 + $0x2b8] sm:$0xff] }
  0xe3   : > { %v1061_v29 = vadd.f32 %v1055_v1, %v951_v23  ;;  %v12007_v1 = vld [vmem:[%s15212_s1 + $0x268] sm:$0xff]  ;;  %1390 = vmatpush.bf16.msra.mxu1 %v12017_v2  ;;  %v12021_v37 = vld [vmem:[%s15212_s1 + $0x2d8] sm:$0xff]  ;;  %v12056_v2 = vld [vmem:[%s15212_s1 + $0x3f0] sm:$0xff] }
  0xe4   : > { %1463 = vmatpush.bf16.msra.mxu2 %v12007_v1  ;;  %v12003_v23 = vld [vmem:[%s15212_s1 + $0x248] sm:$0xff]  ;;  %v12041_v1 = vld [vmem:[%s15212_s1 + $0x378] sm:$0xff] }
  0xe6   : > { %1659 = vmatpush.bf16.msrb.mxu0 %v12032_v6 }
  0xe8   : > { %v947_v9 = vpop.f32.mrf.mxu2  ;;  %v1145_v11 = vpop.f32.mrf.mxu0  ;;  %1464 = vmatpush.bf16.msra.mxu2 %v12006_v8  ;;  %v12040_v8 = vld [vmem:[%s15212_s1 + $0x370] sm:$0xff] }
  0xe9   : > { %v1057_v12 = vpop.f32.mrf.mxu3  ;;  %v13010_v24 = vadd.f32 %v1145_v11, %v1059_v38  ;;  %v12016_v9 = vld [vmem:[%s15212_s1 + $0x2b0] sm:$0xff]  ;;  %v12023_v11 = vld [vmem:[%s15212_s1 + $0x2e8] sm:$0xff]  ;;  %v12029_v38 = vld [vmem:[%s15212_s1 + $0x318] sm:$0xff] }
  0xea   : > { %1391 = vmatpush.bf16.msra.mxu1 %v12016_v9  ;;  %v12031_v12 = vld [vmem:[%s15212_s1 + $0x328] sm:$0xff]  ;;  %1555 = vmatpush.bf16.msra.mxu3 %v12023_v11 }
  0xeb   : > { %v1170_v30 = vmul.f32 %v13010_v24, %v13010_v24  ;;  %v1157_v35 = vmul.f32 %v13010_v24, %v13022_v22  ;;  %1660 = vmatpush.bf16.msrb.mxu0 %v12031_v12 }
  0xec   : > { %1465 = vmatpush.bf16.msra.mxu2 %v12005_v13 }
  0xed   : > { %v1173_v27 = vmul.f32 %v1170_v30, %v13022_v22  ;;  %v12020_v30 = vld [vmem:[%s15212_s1 + $0x2d0] sm:$0xff] }
  0xee   : > { %1392 = vmatpush.bf16.msra.mxu1 %v12015_v14  ;;  %1556 = vmatpush.bf16.msra.mxu3 %v12022_v15 }
  0xef   : > { %1661 = vmatpush.bf16.msrb.mxu0 %v12030_v16 }
  0xf0   : > { %v1147_v28 = vpop.f32.mrf.mxu0  ;;  %1466 = vmatpush.bf16.msra.mxu2 %v12004_v17  ;;  %v1268_v17 = vld [vmem:[#allocation3] sm:$0x8] }
  0xf1   : > { %v13008_v21 = vadd.f32 %v1147_v28, %v1060_v19 }
  0xf2   : > { %1393 = vmatpush.bf16.msra.mxu1 %v12014_v18  ;;  %1557 = vmatpush.bf16.msra.mxu3 %v12021_v37  ;;  %v12063_v37 = vld [vmem:[%s15212_s1 + $0x428] sm:$0xff] }
  0xf3   : > { %v1171_v26 = vmul.f32 %v13008_v21, %v13008_v21  ;;  %v1158_v31 = vmul.f32 %v13008_v21, %v13015_v25  ;;  %1662 = vmatpush.bf16.msrb.mxu0 %v12029_v38  ;;  %v12039_v38 = vld [vmem:[%s15212_s1 + $0x368] sm:$0xff] }
  0xf4   : > { %1467 = vmatpush.bf16.msra.mxu2 %v12003_v23 }
  0xf5   : > { %v1174_v36 = vmul.f32 %v1171_v26, %v13015_v25  ;;  %v1160_v40 = vadd.f32 %v1158_v31, %v1157_v35  ;;  %v12028_v31 = vld [vmem:[%s15212_s1 + $0x310] sm:$0xff] }
  0xf6   : > { %1558 = vmatpush.bf16.msra.mxu3 %v12020_v30 }
  0xf7   : > { %v1176_v45 = vadd.f32 %v1174_v36, %v1173_v27  ;;  %v12012_v36 = vld [vmem:[%s15212_s1 + $0x290] sm:$0xff]  ;;  %1663 = vmatpush.bf16.msrb.mxu0 %v12028_v31  ;;  %v12019_v27 = vld [vmem:[%s15212_s1 + $0x2c8] sm:$0xff]  ;;  %v12045_v31 = vld [vmem:[%s15212_s1 + $0x398] sm:$0xff] }
  0xf8   : > { %v1150_v33 = vpop.f32.mrf.mxu0 }
  0xf9   : > { %v13033_v34 = vadd.f32 %v1150_v33, %v1061_v29  ;;  %v12013_v29 = vld [vmem:[%s15212_s1 + $0x298] sm:$0xff]  ;;  %v12002_v33 = vld [vmem:[%s15212_s1 + $0x240] sm:$0xff] }
  0xfa   : > { %1394 = vmatpush.bf16.msra.mxu1 %v12013_v29  ;;  %1468 = vmatpush.bf16.msra.mxu2 %v12002_v33 }
  0xfb   : > { %v1159_v39 = vmul.f32 %v13033_v34, %v13031_v32  ;;  %v1172_v20 = vmul.f32 %v13033_v34, %v13033_v34  ;;  %1559 = vmatpush.bf16.msra.mxu3 %v12019_v27 }
  0xfd   : > { %v1162_v41 = vsel %vm877_vm4, %v1159_v39, 0.0  ;;  %v1175_v43 = vmul.f32 %v1172_v20, %v13031_v32 }
  0xfe   : > { %v1163_v46 = vadd.f32 %v1162_v41, %v1160_v40  ;;  %1395 = vmatpush.bf16.msra.mxu1 %v12012_v36  ;;  %v12027_v40 = vld [vmem:[%s15212_s1 + $0x308] sm:$0xff]  ;;  %v12054_v36 = vld [vmem:[%s15212_s1 + $0x3e0] sm:$0xff] }
  0xff   : > { %v1177_v47 = vsel %vm877_vm4, %v1175_v43, 0.0  ;;  %v12011_v41 = vld [vmem:[%s15212_s1 + $0x288] sm:$0xff]  ;;  %1664 = vmatpush.bf16.msrb.mxu0 %v12027_v40 }
 0x100   : > { %v1164_v50 = vrot.slane %v1163_v46, 4  ;;  %v1178_v44 = vadd.f32 %v1177_v47, %v1176_v45  ;;  %v1152_v51 = vpop.f32.mrf.mxu0  ;;  %v12612_v47 = vld [vmem:[%s15213_s2] ss:$0 sm:$0xff] }
 0x102   : > { %v1165_v42 = vadd.f32 %v1164_v50, %v1163_v46  ;;  %v1179_v52 = vrot.slane %v1178_v44, 4  ;;  %v12049_v50 = vld [vmem:[%s15212_s1 + $0x3b8] sm:$0xff]  ;;  %1396 = vmatpush.bf16.msra.mxu1 %v12011_v41  ;;  %v12044_v41 = vld [vmem:[%s15212_s1 + $0x390] sm:$0xff] }
 0x103   : > { %1857 = vmatpush.bf16.msrb.mxu2 %v12049_v50 }
 0x104   : > { %v1166_v49 = vrot.slane %v1165_v42, 2  ;;  %v1180_v48 = vadd.f32 %v1179_v52, %v1178_v44  ;;  %v12613_v52 = vld [vmem:[%s15214_s3] ss:$0 sm:$0xff] }
 0x106   : > { %v1167_v54 = vadd.f32 %v1166_v49, %v1165_v42  ;;  %v1181_v55 = vrot.slane %v1180_v48, 2  ;;  %v12048_v49 = vld [vmem:[%s15212_s1 + $0x3b0] sm:$0xff] }
 0x107   : > { %1858 = vmatpush.bf16.msrb.mxu2 %v12048_v49  ;;  %v12061_v49 = vld [vmem:[%s15212_s1 + $0x418] sm:$0xff] }
 0x108   : > { %v1168_v56 = vrot.slane %v1167_v54, 1  ;;  %v1182_v57 = vadd.f32 %v1181_v55, %v1180_v48  ;;  %v12010_v48 = vld [vmem:[%s15212_s1 + $0x280] sm:$0xff] }
 0x109   : > { %1397 = vmatpush.bf16.msra.mxu1 %v12010_v48  ;;  %v12043_v48 = vld [vmem:[%s15212_s1 + $0x388] sm:$0xff] }
 0x10a   : > { %v1169_v59 = vadd.f32 %v1168_v56, %v1167_v54  ;;  %v1183_v60 = vrot.slane %v1182_v57, 1 }
 0x10c   : > { %v1184_v63 = vadd.f32 %v1183_v60, %v1182_v57  ;;  %v13058_v0 = vmul.f32 0.0625, %v1169_v59  ;;  %v12057_v59 = vld [vmem:[%s15212_s1 + $0x3f8] sm:$0xff] }
 0x10d   : > { %v12065_v60 = vld [vmem:[%s15212_s1 + $0x438] sm:$0xff]  ;;  %1767 = vmatpush.bf16.msrb.mxu1 %v12041_v1 }
 0x10e   : > { %v1186_v3 = vmul.f32 0.0625, %v1184_v63  ;;  %v1187_v4 = vmul.f32 %v13058_v0, %v13058_v0  ;;  %v1189_v43 = vsub.f32 %v13010_v24, %v13058_v0  ;;  %v1190_v45 = vsub.f32 %v13008_v21, %v13058_v0  ;;  %v12018_v24 = vld [vmem:[%s15212_s1 + $0x2c0] sm:$0xff] }
 0x10f   : > { %v1191_v46 = vsub.f32 %v13033_v34, %v13058_v0  ;;  %v12026_v21 = vld [vmem:[%s15212_s1 + $0x300] sm:$0xff]  ;;  %1560 = vmatpush.bf16.msra.mxu3 %v12018_v24  ;;  %v12047_v0 = vld [vmem:[%s15212_s1 + $0x3a8] sm:$0xff]  ;;  %v1276_v24 = vld [vmem:[#allocation3 + $0xc] sm:$0x7] }
 0x110   : > { %v1188_v7 = vsub.f32 %v1186_v3, %v1187_v4  ;;  %1665 = vmatpush.bf16.msrb.mxu0 %v12026_v21  ;;  %v12064_v3 = vld [vmem:[%s15212_s1 + $0x430] sm:$0xff]  ;;  %1859 = vmatpush.bf16.msrb.mxu2 %v12047_v0 }
 0x111   : > { %1768 = vmatpush.bf16.msrb.mxu1 %v12040_v8  ;;  %v12059_v8 = vld [vmem:[%s15212_s1 + $0x408] sm:$0xff] }
 0x112   : > { %v1192_v10 = vadd.f32 1e-05, %v1188_v7  ;;  %v12046_v7 = vld [vmem:[%s15212_s1 + $0x3a0] sm:$0xff] }
 0x113   : > { %1962 = vmatpush.bf16.msrb.mxu3 %v12057_v59 }
 0x114   : > { %12628 = vrsqrt.f32 %v1192_v10  ;;  %vm1199_vm7 = vweird.f32 %v1192_v10  ;;  %2071 = vmatpush.bf16.msra.mxu0 %v12065_v60  ;;  %1860 = vmatpush.bf16.msrb.mxu2 %v12046_v7 }
 0x115   : > { %1769 = vmatpush.bf16.msrb.mxu1 %v12039_v38 }
 0x117   : > { %1963 = vmatpush.bf16.msrb.mxu3 %v12056_v2  ;;  %v12051_v2 = vld [vmem:[%s15212_s1 + $0x3c8] sm:$0xff] }
 0x118   : > { %2072 = vmatpush.bf16.msra.mxu0 %v12064_v3  ;;  %1861 = vmatpush.bf16.msrb.mxu2 %v12045_v31 }
 0x11a   : > { %v12629_v19 = vpop.eup %12628 }
 0x11b   : > { %v1194_v28 = vmul.f32 %v12629_v19, %v1192_v10  ;;  %vm1200_vm6 = vweird.f32 %v12629_v19 }
 0x11c   : > { %vm1201_vm8 = vmor %vm1199_vm7, %vm1200_vm6  ;;  %2073 = vmatpush.bf16.msra.mxu0 %v12063_v37  ;;  %1862 = vmatpush.bf16.msrb.mxu2 %v12044_v41  ;;  %v12071_v41 = vld [vmem:[%s15212_s1 + $0x468] sm:$0xff] }
 0x11d   : > { %v1195_v26 = vmul.f32 %v12629_v19, %v1194_v28  ;;  %v12055_v28 = vld [vmem:[%s15212_s1 + $0x3e8] sm:$0xff]  ;;  %vm13221_vm6 = vmor %vm1229_vm11, %vm1230_vm12 }
 0x11e   : > { %1964 = vmatpush.bf16.msrb.mxu3 %v12055_v28  ;;  %vm13230_vm7 = vmand %vm1273_vm14, %vm1274_vm15 }
 0x11f   : > { %v1196_v35 = vmul.f32 0.5, %v1195_v26 }
 0x120   : > { %1863 = vmatpush.bf16.msrb.mxu2 %v12043_v48 }
 0x121   : > { %v1197_v39 = vsub.f32 1.5, %v1196_v35 }
 0x122   : > { %1965 = vmatpush.bf16.msrb.mxu3 %v12054_v36 }
 0x123   : > { %v1198_v20 = vmul.f32 %v12629_v19, %v1197_v39  ;;  %v12062_v39 = vld [vmem:[%s15212_s1 + $0x420] sm:$0xff] }
 0x124   : > { %2074 = vmatpush.bf16.msra.mxu0 %v12062_v39 }
 0x125   : > { %v1202_v44 = vsel %vm1201_vm8, %v12629_v19, %v1198_v20 }
 0x126   : > { %v1203_v34 = vmul.f32 %v1202_v44, %v1189_v43  ;;  %v1204_v51 = vmul.f32 %v1202_v44, %v1190_v45  ;;  %v1205_v42 = vmul.f32 %v1202_v44, %v1191_v46  ;;  %v12038_v46 = vld [vmem:[%s15212_s1 + $0x360] sm:$0xff] }
 0x127   : > { %1770 = vmatpush.bf16.msrb.mxu1 %v12038_v46  ;;  %v12486_v43 = vld [vmem:[%s15212_s1 + $0x1160] sm:$0xff] }
 0x128   : > { %v1210_v53 = vmul.f32 %v12612_v47, %v1203_v34  ;;  %v1211_v54 = vmul.f32 %v12612_v47, %v1204_v51  ;;  %v1212_v55 = vmul.f32 %v12612_v47, %v1205_v42  ;;  %2075 = vmatpush.bf16.msra.mxu0 %v12061_v49 }
 0x12a   : > { %v1217_v56 = vadd.f32 %v12613_v52, %v1210_v53  ;;  %v1218_v57 = vadd.f32 %v12613_v52, %v1211_v54  ;;  %v1219_v58 = vadd.f32 %v12613_v52, %v1212_v55  ;;  %v12053_v52 = vld [vmem:[%s15212_s1 + $0x3d8] sm:$0xff]  ;;  %v12052_v54 = vld [vmem:[%s15212_s1 + $0x3d0] sm:$0xff] }
 0x12b   : > { %1966 = vmatpush.bf16.msrb.mxu3 %v12053_v52  ;;  %v12037_v53 = vld [vmem:[%s15212_s1 + $0x358] sm:$0xff]  ;;  %v12060_v55 = vld [vmem:[%s15212_s1 + $0x410] sm:$0xff] }
 0x12c   : > { %v1220_v61 = vmax.f32 %v1217_v56, 0.0  ;;  %v1221_v62 = vmax.f32 %v1218_v57, 0.0  ;;  %v1222_v63 = vmax.f32 %v1219_v58, 0.0  ;;  %1771 = vmatpush.bf16.msrb.mxu1 %v12037_v53  ;;  %v12036_v56 = vld [vmem:[%s15212_s1 + $0x350] sm:$0xff]  ;;  %v12042_v57 = vld [vmem:[%s15212_s1 + $0x380] sm:$0xff]  ;;  %2076 = vmatpush.bf16.msra.mxu0 %v12060_v55 }
 0x12d   : > { %1864 = vmatpush.bf16.msrb.mxu2 %v12042_v57  ;;  %v1881_v53 = vld [vmem:[#allocation3 + $0x10] sm:$0x1]  ;;  %v12069_v57 = vld [vmem:[%s15212_s1 + $0x458] sm:$0xff] }
 0x12e   : > { %v1223_v4 = vmul.f32 %v1220_v61, %v13022_v22  ;;  %v1224_v5 = vmul.f32 %v1221_v62, %v13015_v25  ;;  %v1225_v6 = vmul.f32 %v1222_v63, %v13031_v32 }
 0x12f   : > { %1967 = vmatpush.bf16.msrb.mxu3 %v12052_v54 }
 0x130   : > { %v1226_v9 = vpack.c.bf16 %v1223_v4, %v1223_v4  ;;  %v1227_v10 = vpack.c.bf16 %v1224_v5, %v1224_v5  ;;  %v1228_v11 = vpack.c.bf16 %v1225_v6, %v1225_v6  ;;  %1772 = vmatpush.bf16.msrb.mxu1 %v12036_v56  ;;  %2077 = vmatpush.bf16.msra.mxu0 %v12059_v8 }
 0x132   : > { %v1233_v12 = vshll.u32 %v1226_v9, 16  ;;  %v1236_v13 = vshrl.u32 %v1226_v9, 16  ;;  %v1242_v14 = vshll.u32 %v1227_v10, 16  ;;  %v1246_v15 = vshrl.u32 %v1227_v10, 16  ;;  %v12035_v10 = vld [vmem:[%s15212_s1 + $0x348] sm:$0xff] }
 0x133   : > { %v1252_v18 = vshll.u32 %v1228_v11, 16  ;;  %v1256_v19 = vshrl.u32 %v1228_v11, 16  ;;  %1968 = vmatpush.bf16.msrb.mxu3 %v12051_v2  ;;  %v12050_v11 = vld [vmem:[%s15212_s1 + $0x3c0] sm:$0xff] }
 0x134   : > { %v1235_v23 = vrot.slane %v1233_v12, 5  ;;  %v1238_v26 = vrot.slane %v1236_v13, 4  ;;  %v1244_v29 = vrot.slane %v1242_v14, 5  ;;  %v1248_v30 = vrot.slane %v1246_v15, 4  ;;  %v12058_v15 = vld [vmem:[%s15212_s1 + $0x400] sm:$0xff]  ;;  %1773 = vmatpush.bf16.msrb.mxu1 %v12035_v10 }
 0x135   : > { %v1254_v33 = vrot.slane %v1252_v18, 5  ;;  %v1258_v35 = vrot.slane %v1256_v19, 4  ;;  %v12034_v19 = vld [vmem:[%s15212_s1 + $0x340] sm:$0xff]  ;;  %2078 = vmatpush.bf16.msra.mxu0 %v12058_v15 }
 0x136   : > { %v1239_v20 = vor.u32 %v1238_v26, %v1235_v23  ;;  %v1249_v27 = vor.u32 %v1248_v30, %v1244_v29  ;;  %v1269_v40 = vsel %vm13192_vm13, %v1235_v23, %v1268_v17 }
 0x137   : > { %v1259_v45 = vor.u32 %v1258_v35, %v1254_v33  ;;  %1270 = vst [vmem:[#allocation3] sm:$0x8] %v1269_v40  ;;  %1969 = vmatpush.bf16.msrb.mxu3 %v12050_v11 }
 0x138   : > { %v1240_v47 = vrot.slane %v1239_v20, 4  ;;  %v1250_v50 = vrot.slane %v1249_v27, 4  ;;  %1774 = vmatpush.bf16.msrb.mxu1 %v12034_v19  ;;  %v12073_v20 = vld [vmem:[%s15212_s1 + $0x478] sm:$0xff]  ;;  %v12072_v27 = vld [vmem:[%s15212_s1 + $0x470] sm:$0xff] }
 0x139   : > { %v1260_v21 = vrot.slane %v1259_v45, 4 }
 0x13a   : > { %v1245_v34 = vsel %vm13221_vm6, %v1240_v47, %v1244_v29  ;;  %v1255_v51 = vsel %vm13221_vm6, %v1250_v50, %v1254_v33  ;;  %v1983_v47 = vld [vmem:[#allocation3 + $0x10] sm:$0x3] }
 0x13b   : > { %1271 = vst [vmem:[#allocation3 + $0x4] sm:$0xf] %v1245_v34  ;;  %v1277_v42 = vsel %vm13230_vm7, %v1260_v21, %v1276_v24 }
 0x13c   : > { %1272 = vst [vmem:[#allocation3 + $0x8] sm:$0xf] %v1255_v51  ;;  %v2002_v51 = vunpack.c.l.b16 %v1983_v47 }
 0x13d   : > { %1278 = vst [vmem:[#allocation3 + $0xc] sm:$0x7] %v1277_v42  ;;  %v12070_v42 = vld [vmem:[%s15212_s1 + $0x460] sm:$0xff] }
 0x13e   : > { %v1574_v58 = vld [vmem:[#allocation3] sm:$0x8] }
 0x13f   : > { %v12575_v61 = vld [vmem:[#allocation3] sm:$0xe]  ;;  %v1599_v0 = vunpack.c.l.b16 %v1574_v58  ;;  %v1906_v58 = vunpack.c.l.b16 %v1881_v53 }
 0x142   : > { %v12515_v59 = vld [vmem:[#allocation3] sm:$0xff]  }
 0x143   : > { %v12574_v60 = vld [vmem:[#allocation3] sm:$0xf0]  ;;  %1469 = vmatmul.bf16.vlgmr.msra.gmra.mxu2 %v12515_v59  ;;  %v1576_v63 = vld [vmem:[#allocation3 + $0x8] sm:$0xf]  ;;  %v1328_v1 = vshll.u32 %v12515_v59, 16  ;;  %v1326_v18 = vshrl.u32 %v12515_v59, 16 }
 0x144   : > { %v13264_v62 = vld [vmem:[#allocation3 + $0x4] sm:$0xff]   ;;  %v12576_v4 = vor.u32 %v12575_v61, %v12574_v60  ;;  %v1577_v5 = vld [vmem:[#allocation3 + $0xc] sm:$0x3]  ;;  %v13271_v7 = vunpack.c.l.b16 %v1576_v63 }
 0x145   : > { %v1322_v3 = vunpack.c.h.b16 %v13264_v62  ;;  %v1600_v6 = vunpack.c.l.b16 %v13264_v62  ;;  %v1602_v9 = vunpack.c.l.b16 %v1577_v5  ;;  %v1330_v14 = vrot.slane %v1328_v1, 1  ;;  %v1281_v33 = vld [vmem:[#allocation3 + $0x8] sm:$0x7]  ;;  %v1878_v45 = vld [vmem:[#allocation3 + $0x4] sm:$0xc] }
 0x146   : > { %v1500_v28 = vrot.slane %v12576_v4, 1  ;;  %v1409_v39 = vunpack.c.l.b16 %v1281_v33  ;;  %v13306_v46 = vld [vmem:[#allocation3 + $0x8] sm:$0xff]   ;;  %v1903_v34 = vunpack.c.l.b16 %v1878_v45 }
 0x147   : > { %v1324_v12 = vpack.c.b16 %v1322_v3, %v1322_v3  ;;  %v13284_v13 = vpack.c.b16 %v1600_v6, %v1599_v0  ;;  %v1604_v17 = vpack.c.b16 %v1602_v9, %v13271_v7  ;;  %v1331_v30 = vor.u32 %v1330_v14, %v1326_v18  ;;  %v1679_v50 = vld [vmem:[#allocation3 + $0xc] sm:$0x7]  ;;  %v12067_v14 = vld [vmem:[%s15212_s1 + $0x448] sm:$0xff] }
 0x148   : > { %v1410_v40 = vpack.c.b16 %v1409_v39, %v1409_v39  ;;  %v12520_v24 = vunpack.c.l.b16 %v13306_v46  ;;  %v12521_v21 = vunpack.c.h.b16 %v13306_v46  ;;  %v1698_v52 = vunpack.c.l.b16 %v1679_v50  ;;  %v12068_v0 = vld [vmem:[%s15212_s1 + $0x450] sm:$0xff] }
 0x149   : > { %v1501_v37 = vrot.slane %v1324_v12, 1  ;;  %v1605_v38 = vrot.slane %v13284_v13, 3  ;;  %v1333_v23 = vshll.u32 %v1324_v12, 16  ;;  %v1606_v26 = vrot.slane %v1604_v17, 3 }
 0x14a   : > { %v1337_v49 = vshrl.u32 %v1324_v12, 16  ;;  %v1907_v54 = vpack.c.b16 %v12520_v24, %v1903_v34  ;;  %v2003_v55 = vpack.c.b16 %v2002_v51, %v12521_v21  ;;  %v1699_v56 = vpack.c.b16 %v1698_v52, %v13271_v7 }
 0x14b   : > { %v1502_v29 = vsel %vm465_vm1, %v1500_v28, %v1501_v37  ;;  %v1335_v31 = vrot.slane %v1333_v23, 1  ;;  %v1607_v35 = vsel %vm571_vm2, %v1605_v38, %v1606_v26  ;;  %v1701_v1 = vshrl.u32 %v13284_v13, 16 }
 0x14c   : > { %1561 = vmatmul.bf16.vlgmr.msra.gmra.mxu3 %v1502_v29  ;;  %1666 = vmatmul.bf16.vlgmr.msrb.gmra.mxu0 %v1607_v35  ;;  %v2005_v59 = vshrl.u32 %v1907_v54, 16  ;;  %v2008_v60 = vshll.u32 %v1907_v54, 16  ;;  %v2013_v61 = vshrl.u32 %v2003_v55, 16  ;;  %v2016_v63 = vshll.u32 %v2003_v55, 16 }
 0x14d   : > { %v1336_v36 = vsel %vm289_vm0, %v1331_v30, %v1335_v31  ;;  %v1339_v48 = vor.u32 %v1337_v49, %v1335_v31  ;;  %v1704_v2 = vshll.u32 %v13284_v13, 16  ;;  %v1709_v3 = vshrl.u32 %v1699_v56, 16  ;;  %v2092_v31 = vld [vmem:[#allocation3 + $0x4] sm:$0x8] }
 0x14e   : > { %1398 = vmatmul.bf16.vlgmr.msra.gmra.mxu1 %v1336_v36  ;;  %v1712_v4 = vshll.u32 %v1699_v56, 16  ;;  %v1805_v5 = vpack.c.b16 %v13271_v7, %v1600_v6  ;;  %v1908_v8 = vpack.c.b16 %v1906_v58, %v12521_v21  ;;  %v2007_v9 = vrot.slane %v2005_v59, 2  ;;  %v12066_v6 = vld [vmem:[%s15212_s1 + $0x440] sm:$0xff] }
 0x14f   : > { %2166 = vmatpush.bf16.msra.mxu1 %v12073_v20  ;;  %v2010_v10 = vrot.slane %v2008_v60, 3  ;;  %v2015_v11 = vrot.slane %v2013_v61, 2  ;;  %v2018_v12 = vrot.slane %v2016_v63, 3  ;;  %v1703_v15 = vrot.slane %v1701_v1, 3 }
 0x150   : > { %v1706_v17 = vrot.slane %v1704_v2, 4  ;;  %v1711_v13 = vrot.slane %v1709_v3, 3  ;;  %v1714_v18 = vrot.slane %v1712_v4, 4  ;;  %v1909_v19 = vrot.slane %v1907_v54, 2 }
 0x151   : > { %v1910_v28 = vrot.slane %v1908_v8, 2  ;;  %v2011_v62 = vor.u32 %v2010_v10, %v2007_v9  ;;  %v1806_v30 = vpack.c.b16 %v1698_v52, %v1698_v52  ;;  %v2111_v33 = vunpack.c.l.b16 %v2092_v31 }
 0x152   : > { %v1707_v7 = vor.u32 %v1706_v17, %v1703_v15  ;;  %v1715_v38 = vor.u32 %v1714_v18, %v1711_v13  ;;  %v2114_v39 = vrot.slane %v2003_v55, 3 }
 0x153   : > { %1474 = vmatmul.bf16.gmra.mxu2 %v1410_v40  ;;  %2167 = vmatpush.bf16.msra.mxu1 %v12072_v27  ;;  %v1911_v23 = vsel %vm877_vm4, %v1909_v19, %v1910_v28  ;;  %v2112_v35 = vpack.c.b16 %v12520_v24, %v2111_v33 }
 0x154   : > { %v1716_v29 = vsel %vm667_vm3, %v1707_v7, %v1715_v38 }
 0x155   : > { %v2113_v36 = vrot.slane %v2112_v35, 3 }
 0x157   : > { %2168 = vmatpush.bf16.msra.mxu1 %v12071_v41  ;;  %v2115_v20 = vsel %vm571_vm2, %v2113_v36, %v2114_v39 }
 0x15b   : > { %2169 = vmatpush.bf16.msra.mxu1 %v12070_v42 }
 0x15c   : > { %1566 = vmatmul.bf16.gmra.mxu3 %v1501_v37  ;;  %1671 = vmatmul.bf16.gmra.mxu0 %v1606_v26  ;;  %v2019_v37 = vor.u32 %v2018_v12, %v2015_v11 }
 0x15e   : > { %1403 = vmatmul.bf16.gmra.mxu1 %v1339_v48  ;;  %v2020_v26 = vsel %vm973_vm5, %v2011_v62, %v2019_v37 }
 0x15f   : > { %2170 = vmatpush.bf16.msra.mxu1 %v12069_v57 }
 0x163   : > { %1865 = vmatmul.bf16.vlgmr.msrb.gmra.mxu2 %v1805_v5  ;;  %2171 = vmatpush.bf16.msra.mxu1 %v12068_v0 }
 0x167   : > { %2172 = vmatpush.bf16.msra.mxu1 %v12067_v14 }
 0x16b   : > { %2173 = vmatpush.bf16.msra.mxu1 %v12066_v6 }
 0x16c   : > { %1970 = vmatmul.bf16.vlgmr.msrb.gmra.mxu3 %v1911_v23  ;;  %2079 = vmatmul.bf16.vlgmr.msra.gmra.mxu0 %v2020_v26 }
 0x16e   : > { %1775 = vmatmul.bf16.vlgmr.msrb.gmra.mxu1 %v1716_v29 }
 0x173   : > { %1870 = vmatmul.bf16.gmra.mxu2 %v1806_v30 }
 0x17c   : > { %1975 = vmatmul.bf16.gmra.mxu3 %v1910_v28  ;;  %2084 = vmatmul.bf16.gmra.mxu0 %v2019_v37 }
 0x17e   : > { %1780 = vmatmul.bf16.gmra.mxu1 %v1715_v38 }
 0x18e   : > { %2174 = vmatmul.bf16.vlgmr.msra.gmra.mxu1 %v2115_v20 }
 0x19e   : > { %2179 = vmatmul.bf16.gmra.mxu1 %v2114_v39 }
 0x1c6   : > { %v1470_v27 = vpop.f32.mrf.mxu2 }
 0x1c9   : > { %v1667_v40 = vpop.f32.mrf.mxu0 }
 0x1cb   : > { %v1399_v41 = vpop.f32.mrf.mxu1 }
 0x1cc   : > { %v1471_v45 = vadd.f32 %v1470_v27, %v1399_v41 }
 0x1ce   : > { %v1472_v50 = vpop.f32.mrf.mxu2 }
 0x1cf   : > { %v1562_v47 = vpop.f32.mrf.mxu3 }
 0x1d0   : > { %v1571_v21 = vadd.f32 %v1562_v47, %v1471_v45 }
 0x1d1   : > { %v1669_v34 = vpop.f32.mrf.mxu0 }
 0x1d2   : > { %v1676_v51 = vadd.f32 %v1667_v40, %v1571_v21 }
 0x1d3   : > { %v1401_v42 = vpop.f32.mrf.mxu1 }
 0x1d4   : > { %v1473_v5 = vadd.f32 %v1472_v50, %v1401_v42 }
 0x1d6   : > { %v1475_v49 = vpop.f32.mrf.mxu2 }
 0x1d7   : > { %v1564_v52 = vpop.f32.mrf.mxu3 }
 0x1d8   : > { %v1572_v10 = vadd.f32 %v1564_v52, %v1473_v5 }
 0x1d9   : > { %v1672_v46 = vpop.f32.mrf.mxu0 }
 0x1da   : > { %v1677_v14 = vadd.f32 %v1669_v34, %v1572_v10  ;;  %v12105_v10 = vld [vmem:[%s15212_s1 + $0x578] sm:$0xff] }
 0x1db   : > { %v1404_v24 = vpop.f32.mrf.mxu1  ;;  %2682 = vmatpush.bf16.msrb.mxu1 %v12105_v10  ;;  %v12090_v10 = vld [vmem:[%s15212_s1 + $0x500] sm:$0xff] }
 0x1dc   : > { %v1476_v15 = vadd.f32 %v1475_v49, %v1404_v24 }
 0x1de   : > { %v1477_v53 = vpop.f32.mrf.mxu2 }
 0x1df   : > { %v1567_v48 = vpop.f32.mrf.mxu3 }
 0x1e0   : > { %v1573_v18 = vadd.f32 %v1567_v48, %v1476_v15  ;;  %v12096_v15 = vld [vmem:[%s15212_s1 + $0x530] sm:$0xff] }
 0x1e1   : > { %v1674_v54 = vpop.f32.mrf.mxu0 }
 0x1e2   : > { %v1678_v37 = vadd.f32 %v1672_v46, %v1573_v18  ;;  %v12088_v18 = vld [vmem:[%s15212_s1 + $0x4f0] sm:$0xff] }
 0x1e3   : > { %v1406_v55 = vpop.f32.mrf.mxu1 }
 0x1e6   : > { %v1866_v57 = vpop.f32.mrf.mxu2 }
 0x1e7   : > { %v1569_v56 = vpop.f32.mrf.mxu3 }
 0x1e9   : > { %v2080_v58 = vpop.f32.mrf.mxu0 }
 0x1eb   : > { %v1776_v59 = vpop.f32.mrf.mxu1 }
 0x1ec   : > { %v1785_v19 = vadd.f32 %v1776_v59, %v1676_v51 }
 0x1ee   : > { %v1868_v61 = vpop.f32.mrf.mxu2  ;;  %v1875_v6 = vadd.f32 %v1866_v57, %v1785_v19  ;;  %v12095_v19 = vld [vmem:[%s15212_s1 + $0x528] sm:$0xff] }
 0x1ef   : > { %v1971_v60 = vpop.f32.mrf.mxu3 }
 0x1f0   : > { %v1980_v23 = vadd.f32 %v1971_v60, %v1875_v6 }
 0x1f1   : > { %v2082_v63 = vpop.f32.mrf.mxu0 }
 0x1f2   : > { %v2089_v31 = vadd.f32 %v2080_v58, %v1980_v23 }
 0x1f3   : > { %v1778_v0 = vpop.f32.mrf.mxu1 }
 0x1f4   : > { %v1786_v17 = vadd.f32 %v1778_v0, %v1677_v14  ;;  %v12089_v14 = vld [vmem:[%s15212_s1 + $0x4f8] sm:$0xff] }
 0x1f5   : > { %2414 = vmatpush.bf16.msra.mxu2 %v12089_v14  ;;  %v12098_v14 = vld [vmem:[%s15212_s1 + $0x540] sm:$0xff] }
 0x1f6   : > { %v1871_v2 = vpop.f32.mrf.mxu2  ;;  %v1876_v28 = vadd.f32 %v1868_v61, %v1786_v17  ;;  %v12104_v17 = vld [vmem:[%s15212_s1 + $0x570] sm:$0xff] }
 0x1f7   : > { %v1973_v1 = vpop.f32.mrf.mxu3  ;;  %2683 = vmatpush.bf16.msrb.mxu1 %v12104_v17 }
 0x1f8   : > { %v1981_v38 = vadd.f32 %v1973_v1, %v1876_v28  ;;  %v12103_v28 = vld [vmem:[%s15212_s1 + $0x568] sm:$0xff] }
 0x1f9   : > { %v2085_v3 = vpop.f32.mrf.mxu0  ;;  %2415 = vmatpush.bf16.msra.mxu2 %v12088_v18 }
 0x1fa   : > { %v2090_v29 = vadd.f32 %v2082_v63, %v1981_v38  ;;  %v12081_v63 = vld [vmem:[%s15212_s1 + $0x4b8] sm:$0xff]  ;;  %v12102_v38 = vld [vmem:[%s15212_s1 + $0x560] sm:$0xff] }
 0x1fb   : > { %v1781_v4 = vpop.f32.mrf.mxu1  ;;  %2485 = vmatpush.bf16.msra.mxu3 %v12081_v63  ;;  %2684 = vmatpush.bf16.msrb.mxu1 %v12103_v28  ;;  %v13477_v63 = vld [vmem:[%s15215_s4] sm:$0xff]  ;;  %v12137_v28 = vld [vmem:[%s15212_s1 + $0x678] sm:$0xff] }
 0x1fc   : > { %v1787_v7 = vadd.f32 %v1781_v4, %v1678_v37  ;;  %v12077_v37 = vld [vmem:[%s15212_s1 + $0x498] sm:$0xff] }
 0x1fe   : > { %v1873_v9 = vpop.f32.mrf.mxu2  ;;  %v1877_v26 = vadd.f32 %v1871_v2, %v1787_v7  ;;  %v12094_v7 = vld [vmem:[%s15212_s1 + $0x520] sm:$0xff] }
 0x1ff   : > { %v1976_v8 = vpop.f32.mrf.mxu3  ;;  %v12097_v9 = vld [vmem:[%s15212_s1 + $0x538] sm:$0xff]  ;;  %2685 = vmatpush.bf16.msrb.mxu1 %v12102_v38 }
 0x200   : > { %v1982_v35 = vadd.f32 %v1976_v8, %v1877_v26  ;;  %2577 = vmatpush.bf16.msrb.mxu0 %v12097_v9  ;;  %v12076_v26 = vld [vmem:[%s15212_s1 + $0x490] sm:$0xff] }
 0x201   : > { %v2087_v11 = vpop.f32.mrf.mxu0 }
 0x202   : > { %v2091_v20 = vadd.f32 %v2085_v3, %v1982_v35  ;;  %v12080_v3 = vld [vmem:[%s15212_s1 + $0x4b0] sm:$0xff]  ;;  %v12079_v11 = vld [vmem:[%s15212_s1 + $0x4a8] sm:$0xff]  ;;  %v12101_v35 = vld [vmem:[%s15212_s1 + $0x558] sm:$0xff] }
 0x203   : > { %v1783_v12 = vpop.f32.mrf.mxu1  ;;  %2486 = vmatpush.bf16.msra.mxu3 %v12080_v3  ;;  %2686 = vmatpush.bf16.msrb.mxu1 %v12101_v35  ;;  %v12128_v35 = vld [vmem:[%s15212_s1 + $0x630] sm:$0xff] }
 0x204   : > { %2578 = vmatpush.bf16.msrb.mxu0 %v12096_v15  ;;  %v12129_v15 = vld [vmem:[%s15212_s1 + $0x638] sm:$0xff] }
 0x207   : > { %v1978_v13 = vpop.f32.mrf.mxu3  ;;  %2487 = vmatpush.bf16.msra.mxu3 %v12079_v11 }
 0x208   : > { %v12078_v13 = vld [vmem:[%s15212_s1 + $0x4a0] sm:$0xff]  ;;  %2579 = vmatpush.bf16.msrb.mxu0 %v12095_v19 }
 0x209   : > { %v12082_v19 = vld [vmem:[%s15212_s1 + $0x4c0] sm:$0xff] }
 0x20b   : > { %v2175_v62 = vpop.f32.mrf.mxu1  ;;  %2488 = vmatpush.bf16.msra.mxu3 %v12078_v13 }
 0x20c   : > { %v13341_v36 = vadd.f32 %v2175_v62, %v2089_v31  ;;  %v12087_v62 = vld [vmem:[%s15212_s1 + $0x4e8] sm:$0xff]  ;;  %2580 = vmatpush.bf16.msrb.mxu0 %v12094_v7  ;;  %v12093_v31 = vld [vmem:[%s15212_s1 + $0x518] sm:$0xff] }
 0x20d   : > { %2416 = vmatpush.bf16.msra.mxu2 %v12087_v62  ;;  %v12119_v7 = vld [vmem:[%s15212_s1 + $0x5e8] sm:$0xff] }
 0x20e   : > { %v2199_v27 = vmul.f32 %v13341_v36, %v13341_v36  ;;  %v2187_v47 = vmul.f32 %v13341_v36, %v13022_v22 }
 0x20f   : > { %2489 = vmatpush.bf16.msra.mxu3 %v12077_v37 }
 0x210   : > { %v2202_v51 = vmul.f32 %v2199_v27, %v13022_v22  ;;  %v12085_v27 = vld [vmem:[%s15212_s1 + $0x4d8] sm:$0xff]  ;;  %2581 = vmatpush.bf16.msrb.mxu0 %v12093_v31 }
 0x213   : > { %v2177_v30 = vpop.f32.mrf.mxu1  ;;  %2490 = vmatpush.bf16.msra.mxu3 %v12076_v26 }
 0x214   : > { %v13339_v33 = vadd.f32 %v2177_v30, %v2090_v29  ;;  %v12086_v29 = vld [vmem:[%s15212_s1 + $0x4e0] sm:$0xff] }
 0x215   : > { %2417 = vmatpush.bf16.msra.mxu2 %v12086_v29 }
 0x216   : > { %v2200_v39 = vmul.f32 %v13339_v33, %v13339_v33  ;;  %v2188_v40 = vmul.f32 %v13339_v33, %v13015_v25 }
 0x218   : > { %v2203_v50 = vmul.f32 %v2200_v39, %v13015_v25  ;;  %v2190_v42 = vadd.f32 %v2188_v40, %v2187_v47  ;;  %v12100_v47 = vld [vmem:[%s15212_s1 + $0x550] sm:$0xff] }
 0x219   : > { %2418 = vmatpush.bf16.msra.mxu2 %v12085_v27  ;;  %2687 = vmatpush.bf16.msrb.mxu1 %v12100_v47  ;;  %v12136_v27 = vld [vmem:[%s15212_s1 + $0x670] sm:$0xff] }
 0x21a   : > { %v2205_v46 = vadd.f32 %v2203_v50, %v2202_v51  ;;  %v12112_v47 = vld [vmem:[%s15212_s1 + $0x5b0] sm:$0xff] }
 0x21b   : > { %v2180_v41 = vpop.f32.mrf.mxu1 }
 0x21c   : > { %v13349_v45 = vadd.f32 %v2180_v41, %v2091_v20  ;;  %v12075_v20 = vld [vmem:[%s15212_s1 + $0x488] sm:$0xff]  ;;  %v12092_v41 = vld [vmem:[%s15212_s1 + $0x510] sm:$0xff] }
 0x21d   : > { %2491 = vmatpush.bf16.msra.mxu3 %v12075_v20  ;;  %2582 = vmatpush.bf16.msrb.mxu0 %v12092_v41 }
 0x21e   : > { %v2189_v21 = vmul.f32 %v13349_v45, %v13031_v32  ;;  %v2201_v34 = vmul.f32 %v13349_v45, %v13349_v45 }
 0x220   : > { %v2191_v52 = vsel %vm877_vm4, %v2189_v21, 0.0  ;;  %v2204_v49 = vmul.f32 %v2201_v34, %v13031_v32  ;;  %v12614_v21 = vld [vmem:[%s15213_s2 + $0x1] ss:$0 sm:$0xff] }
 0x221   : > { %v2192_v24 = vadd.f32 %v2191_v52, %v2190_v42  ;;  %v12074_v34 = vld [vmem:[%s15212_s1 + $0x480] sm:$0xff] }
 0x222   : > { %v2206_v48 = vsel %vm877_vm4, %v2204_v49, 0.0  ;;  %v12084_v49 = vld [vmem:[%s15212_s1 + $0x4d0] sm:$0xff]  ;;  %2492 = vmatpush.bf16.msra.mxu3 %v12074_v34 }
 0x223   : > { %v2193_v53 = vrot.slane %v2192_v24, 4  ;;  %v2207_v54 = vadd.f32 %v2206_v48, %v2205_v46  ;;  %v2182_v25 = vpop.f32.mrf.mxu1  ;;  %v12121_v46 = vld [vmem:[%s15212_s1 + $0x5f8] sm:$0xff]  ;;  %2419 = vmatpush.bf16.msra.mxu2 %v12084_v49  ;;  %v12127_v49 = vld [vmem:[%s15212_s1 + $0x628] sm:$0xff] }
 0x224   : > { %v12099_v25 = vld [vmem:[%s15212_s1 + $0x548] sm:$0xff] }
 0x225   : > { %v2194_v55 = vadd.f32 %v2193_v53, %v2192_v24  ;;  %v2208_v56 = vrot.slane %v2207_v54, 4  ;;  %2688 = vmatpush.bf16.msrb.mxu1 %v12099_v25  ;;  %v12116_v25 = vld [vmem:[%s15212_s1 + $0x5d0] sm:$0xff] }
 0x226   : > { %2881 = vmatpush.bf16.msrb.mxu3 %v12121_v46 }
 0x227   : > { %v2195_v57 = vrot.slane %v2194_v55, 2  ;;  %v2209_v58 = vadd.f32 %v2208_v56, %v2207_v54  ;;  %v13459_v54 = vld [vmem:[#allocation2] sm:$0x8] }
 0x229   : > { %v2196_v59 = vadd.f32 %v2195_v57, %v2194_v55  ;;  %v2210_v60 = vrot.slane %v2209_v58, 2  ;;  %v2254_v55 = vld [vmem:[#allocation2 + $0xc] sm:$0x7]  ;;  %2689 = vmatpush.bf16.msrb.mxu1 %v12098_v14 }
 0x22a   : > { %v2258_v9 = vunpack.c.l.bf16 %v2254_v55  ;;  %v12125_v55 = vld [vmem:[%s15212_s1 + $0x618] sm:$0xff] }
 0x22b   : > { %v2197_v61 = vrot.slane %v2196_v59, 1  ;;  %v2211_v22 = vadd.f32 %v2210_v60, %v2209_v58  ;;  %v12083_v60 = vld [vmem:[%s15212_s1 + $0x4c8] sm:$0xff] }
 0x22c   : > { %2420 = vmatpush.bf16.msra.mxu2 %v12083_v60 }
 0x22d   : > { %v2198_v32 = vadd.f32 %v2197_v61, %v2196_v59  ;;  %v2212_v0 = vrot.slane %v2211_v22, 1  ;;  %v2252_v59 = vld [vmem:[#allocation2 + $0x4] sm:$0xff]   ;;  %3095 = vmatpush.bf16.msra.mxu1 %v12137_v28 }
 0x22e   : > { %v12120_v61 = vld [vmem:[%s15212_s1 + $0x5f0] sm:$0xff]  ;;  %v2256_v11 = vunpack.c.l.bf16 %v2252_v59 }
 0x22f   : > { %v2213_v1 = vadd.f32 %v2212_v0, %v2211_v22  ;;  %v13365_v2 = vmul.f32 0.0625, %v2198_v32  ;;  %v2255_v22 = vunpack.c.l.bf16 %v13459_v54  ;;  %v13480_v32 = vrot.slane %v13477_v63, 1  ;;  %v13485_v0 = vld [vmem:[%s15215_s4 + $0x8] sm:$0xff]  ;;  %2882 = vmatpush.bf16.msrb.mxu3 %v12120_v61 }
 0x230   : > { %2421 = vmatpush.bf16.msra.mxu2 %v12082_v19 }
 0x231   : > { %v2215_v4 = vmul.f32 0.0625, %v2213_v1  ;;  %v2216_v5 = vmul.f32 %v13365_v2, %v13365_v2  ;;  %v2218_v51 = vsub.f32 %v13341_v36, %v13365_v2  ;;  %v2219_v42 = vsub.f32 %v13339_v33, %v13365_v2  ;;  %v12615_v36 = vld [vmem:[%s15214_s3 + $0x1] ss:$0 sm:$0xff]  ;;  %3096 = vmatpush.bf16.msra.mxu1 %v12136_v27 }
 0x232   : > { %v2220_v52 = vsub.f32 %v13349_v45, %v13365_v2  ;;  %v12091_v45 = vld [vmem:[%s15212_s1 + $0x508] sm:$0xff]  ;;  %v2280_v1 = vrot.slane %v13485_v0, 1  ;;  %v13491_v2 = vld [vmem:[%s15215_s4 + $0x10] sm:$0x3f] }
 0x233   : > { %v2217_v8 = vsub.f32 %v2215_v4, %v2216_v5  ;;  %v13494_v3 = vrot.slane %v13491_v2, 1  ;;  %2583 = vmatpush.bf16.msrb.mxu0 %v12091_v45  ;;  %2883 = vmatpush.bf16.msrb.mxu3 %v12119_v7  ;;  %v12110_v45 = vld [vmem:[%s15212_s1 + $0x5a0] sm:$0xff] }
 0x234   : > { %v13513_v62 = vsel %vm465_vm1, %v13480_v32, %v2280_v1  ;;  %v12114_v7 = vld [vmem:[%s15212_s1 + $0x5c0] sm:$0xff] }
 0x235   : > { %v2221_v12 = vadd.f32 1e-05, %v2217_v8  ;;  %v13517_v37 = vsel %vm465_vm1, %v2280_v1, %v13494_v3  ;;  %v12115_v1 = vld [vmem:[%s15212_s1 + $0x5c8] sm:$0xff] }
 0x237   : > { %12630 = vrsqrt.f32 %v2221_v12  ;;  %vm2228_vm9 = vweird.f32 %v2221_v12  ;;  %2584 = vmatpush.bf16.msrb.mxu0 %v12090_v10 }
 0x23b   : > { %2986 = vmatpush.bf16.msra.mxu0 %v12129_v15  ;;  %v12124_v15 = vld [vmem:[%s15212_s1 + $0x610] sm:$0xff] }
 0x23d   : > { %v12631_v6 = vpop.eup %12630 }
 0x23e   : > { %v2223_v23 = vmul.f32 %v12631_v6, %v2221_v12  ;;  %vm2229_vm8 = vweird.f32 %v12631_v6  ;;  %v2257_v12 = vunpack.c.h.bf16 %v2252_v59  ;;  %v12109_v59 = vld [vmem:[%s15212_s1 + $0x598] sm:$0xff] }
 0x23f   : > { %vm2230_vm10 = vmor %vm2228_vm9, %vm2229_vm8  ;;  %2987 = vmatpush.bf16.msra.mxu0 %v12128_v35  ;;  %v12123_v35 = vld [vmem:[%s15212_s1 + $0x608] sm:$0xff] }
 0x240   : > { %v2224_v30 = vmul.f32 %v12631_v6, %v2223_v23 }
 0x242   : > { %v2225_v39 = vmul.f32 0.5, %v2224_v30 }
 0x243   : > { %2988 = vmatpush.bf16.msra.mxu0 %v12127_v49  ;;  %v12106_v49 = vld [vmem:[%s15212_s1 + $0x580] sm:$0xff] }
 0x244   : > { %v2226_v40 = vsub.f32 1.5, %v2225_v39 }
 0x246   : > { %v2227_v50 = vmul.f32 %v12631_v6, %v2226_v40 }
 0x248   : > { %v2231_v24 = vsel %vm2230_vm10, %v12631_v6, %v2227_v50  ;;  %v12113_v6 = vld [vmem:[%s15212_s1 + $0x5b8] sm:$0xff]  ;;  %v12118_v50 = vld [vmem:[%s15212_s1 + $0x5e0] sm:$0xff] }
 0x249   : > { %v2232_v48 = vmul.f32 %v2231_v24, %v2218_v51  ;;  %v2233_v33 = vmul.f32 %v2231_v24, %v2219_v42  ;;  %v2234_v53 = vmul.f32 %v2231_v24, %v2220_v52  ;;  %2791 = vmatpush.bf16.msrb.mxu2 %v12113_v6  ;;  %v2300_v51 = vld [vmem:[#allocation2 + $0xc] sm:$0x7]  ;;  %v12135_v24 = vld [vmem:[%s15212_s1 + $0x668] sm:$0xff]  ;;  %2884 = vmatpush.bf16.msrb.mxu3 %v12118_v50  ;;  %v12108_v6 = vld [vmem:[%s15212_s1 + $0x590] sm:$0xff] }
 0x24a   : > { %3097 = vmatpush.bf16.msra.mxu1 %v12135_v24  ;;  %v12107_v50 = vld [vmem:[%s15212_s1 + $0x588] sm:$0xff] }
 0x24b   : > { %v2240_v56 = vmul.f32 %v12614_v21, %v2232_v48  ;;  %v2241_v57 = vmul.f32 %v12614_v21, %v2233_v33  ;;  %v2242_v58 = vmul.f32 %v12614_v21, %v2234_v53  ;;  %v12111_v48 = vld [vmem:[%s15212_s1 + $0x5a8] sm:$0xff]  ;;  %v12117_v33 = vld [vmem:[%s15212_s1 + $0x5d8] sm:$0xff]  ;;  %v12126_v53 = vld [vmem:[%s15212_s1 + $0x620] sm:$0xff] }
 0x24c   : > { %2989 = vmatpush.bf16.msra.mxu0 %v12126_v53  ;;  %v3007_v53 = vld [vmem:[#allocation2 + $0x10] sm:$0x3] }
 0x24d   : > { %v2248_v4 = vadd.f32 %v12615_v36, %v2240_v56  ;;  %v2249_v5 = vadd.f32 %v12615_v36, %v2241_v57  ;;  %v2250_v8 = vadd.f32 %v12615_v36, %v2242_v58  ;;  %2792 = vmatpush.bf16.msrb.mxu2 %v12112_v47  ;;  %2885 = vmatpush.bf16.msrb.mxu3 %v12117_v33  ;;  %v12133_v56 = vld [vmem:[%s15212_s1 + $0x658] sm:$0xff] }
 0x24f   : > { %v2263_v17 = vrot.slane %v2248_v4, 1  ;;  %v2264_v13 = vrot.slane %v2249_v5, 1  ;;  %v2266_v18 = vrot.slane %v2250_v8, 1 }
 0x250   : > { %2990 = vmatpush.bf16.msra.mxu0 %v12125_v55 }
 0x251   : > { %v2265_v38 = vsel %vm465_vm1, %v2263_v17, %v2264_v13  ;;  %v2267_v23 = vsel %vm465_vm1, %v2264_v13, %v2266_v18  ;;  %v2272_v26 = vadd.f32 %v2263_v17, %v2255_v22  ;;  %v2275_v29 = vadd.f32 %v2266_v18, %v2258_v9  ;;  %2793 = vmatpush.bf16.msrb.mxu2 %v12111_v48  ;;  %v12132_v13 = vld [vmem:[%s15212_s1 + $0x650] sm:$0xff] }
 0x252   : > { %v2273_v30 = vadd.f32 %v2265_v38, %v2256_v11  ;;  %v2274_v31 = vadd.f32 %v2267_v23, %v2257_v12  ;;  %2886 = vmatpush.bf16.msrb.mxu3 %v12116_v25 }
 0x253   : > { %v2288_v39 = vmul.f32 %v13480_v32, %v2272_v26  ;;  %v2291_v20 = vmul.f32 %v13494_v3, %v2275_v29 }
 0x254   : > { %v2289_v40 = vmul.f32 %v13513_v62, %v2273_v30  ;;  %v2290_v41 = vmul.f32 %v13517_v37, %v2274_v31  ;;  %2991 = vmatpush.bf16.msra.mxu0 %v12124_v15 }
 0x255   : > { %v2292_v21 = vpack.c.bf16 %v2288_v39, %v2288_v39  ;;  %v2295_v34 = vpack.c.bf16 %v2291_v20, %v2291_v20  ;;  %2794 = vmatpush.bf16.msrb.mxu2 %v12110_v45  ;;  %v12131_v20 = vld [vmem:[%s15212_s1 + $0x648] sm:$0xff] }
 0x256   : > { %v2293_v42 = vpack.c.bf16 %v2289_v40, %v2289_v40  ;;  %v2294_v52 = vpack.c.bf16 %v2290_v41, %v2290_v41  ;;  %2887 = vmatpush.bf16.msrb.mxu3 %v12115_v1 }
 0x257   : > { %v2296_v46 = vsel %vm13192_vm13, %v2292_v21, %v13459_v54  ;;  %v2301_v36 = vsel %vm13230_vm7, %v2295_v34, %v2300_v51  ;;  %v12134_v54 = vld [vmem:[%s15212_s1 + $0x660] sm:$0xff] }
 0x258   : > { %2297 = vst [vmem:[#allocation2] sm:$0x8] %v2296_v46  ;;  %3098 = vmatpush.bf16.msra.mxu1 %v12134_v54  ;;  %2992 = vmatpush.bf16.msra.mxu0 %v12123_v35  ;;  %v12122_v51 = vld [vmem:[%s15212_s1 + $0x600] sm:$0xff]  ;;  %v12145_v46 = vld [vmem:[%s15212_s1 + $0x6b8] sm:$0xff]  ;;  %v12140_v35 = vld [vmem:[%s15212_s1 + $0x690] sm:$0xff] }
 0x259   : > { %2298 = vst [vmem:[#allocation2 + $0x4] sm:$0xf] %v2293_v42  ;;  %2795 = vmatpush.bf16.msrb.mxu2 %v12109_v59 }
 0x25a   : > { %2299 = vst [vmem:[#allocation2 + $0x8] sm:$0xf] %v2294_v52  ;;  %2888 = vmatpush.bf16.msrb.mxu3 %v12114_v7  ;;  %v12130_v52 = vld [vmem:[%s15212_s1 + $0x640] sm:$0xff] }
 0x25b   : > { %2302 = vst [vmem:[#allocation2 + $0xc] sm:$0x7] %v2301_v36  ;;  %v12144_v36 = vld [vmem:[%s15212_s1 + $0x6b0] sm:$0xff] }
 0x25c   : > { %3099 = vmatpush.bf16.msra.mxu1 %v12133_v56  ;;  %2993 = vmatpush.bf16.msra.mxu0 %v12122_v51  ;;  %v3026_v56 = vunpack.c.l.b16 %v3007_v53  ;;  %v12138_v51 = vld [vmem:[%s15212_s1 + $0x680] sm:$0xff] }
 0x25d   : > { %2796 = vmatpush.bf16.msrb.mxu2 %v12108_v6 }
 0x25f   : > { %v12579_v57 = vld [vmem:[#allocation2] sm:$0xe] }
 0x260   : > { %v2598_v58 = vld [vmem:[#allocation2] sm:$0x8]  ;;  %v12578_v61 = vld [vmem:[#allocation2] sm:$0xf0]  ;;  %3100 = vmatpush.bf16.msra.mxu1 %v12132_v13  ;;  %v12141_v13 = vld [vmem:[%s15212_s1 + $0x698] sm:$0xff] }
 0x261   : > { %v12523_v60 = vld [vmem:[#allocation2] sm:$0xff]   ;;  %v2623_v22 = vunpack.c.l.b16 %v2598_v58  ;;  %v2600_v5 = vld [vmem:[#allocation2 + $0x8] sm:$0xf]  ;;  %v12580_v10 = vor.u32 %v12579_v57, %v12578_v61  ;;  %2797 = vmatpush.bf16.msrb.mxu2 %v12107_v50  ;;  %v12143_v57 = vld [vmem:[%s15212_s1 + $0x6a8] sm:$0xff] }
 0x262   : > { %2493 = vmatmul.bf16.vlgmr.msra.gmra.mxu3 %v12523_v60  ;;  %v13584_v4 = vld [vmem:[#allocation2 + $0x4] sm:$0xff]   ;;  %v2352_v8 = vshll.u32 %v12523_v60, 16  ;;  %v2601_v11 = vld [vmem:[#allocation2 + $0xc] sm:$0x3]  ;;  %v13588_v14 = vunpack.c.l.b16 %v2600_v5  ;;  %v2350_v23 = vshrl.u32 %v12523_v60, 16  ;;  %v12142_v5 = vld [vmem:[%s15212_s1 + $0x6a0] sm:$0xff] }
 0x263   : > { %v2346_v9 = vunpack.c.h.b16 %v13584_v4  ;;  %v2624_v12 = vunpack.c.l.b16 %v13584_v4  ;;  %v2626_v17 = vunpack.c.l.b16 %v2601_v11  ;;  %v2524_v26 = vrot.slane %v12580_v10, 1  ;;  %v2305_v47 = vld [vmem:[#allocation2 + $0x8] sm:$0x7]  ;;  %v2902_v48 = vld [vmem:[#allocation2 + $0x4] sm:$0xc] }
 0x264   : > { %v2354_v28 = vrot.slane %v2352_v8, 1  ;;  %v2433_v42 = vunpack.c.l.b16 %v2305_v47  ;;  %3101 = vmatpush.bf16.msra.mxu1 %v12131_v20  ;;  %v13635_v33 = vld [vmem:[#allocation2 + $0x8] sm:$0xff]   ;;  %v2927_v55 = vunpack.c.l.b16 %v2902_v48  ;;  %v2905_v61 = vld [vmem:[#allocation2 + $0x10] sm:$0x1] }
 0x265   : > { %v2348_v18 = vpack.c.b16 %v2346_v9, %v2346_v9  ;;  %v13598_v19 = vpack.c.b16 %v2624_v12, %v2623_v22  ;;  %v2628_v38 = vpack.c.b16 %v2626_v17, %v13588_v14  ;;  %2798 = vmatpush.bf16.msrb.mxu2 %v12106_v49  ;;  %v2703_v54 = vld [vmem:[#allocation2 + $0xc] sm:$0x7]  ;;  %v12528_v45 = vunpack.c.l.b16 %v13635_v33  ;;  %v3116_v49 = vld [vmem:[#allocation2 + $0x4] sm:$0x8] }
 0x266   : > { %v2355_v40 = vor.u32 %v2354_v28, %v2350_v23  ;;  %v2434_v24 = vpack.c.b16 %v2433_v42, %v2433_v42  ;;  %v12529_v25 = vunpack.c.h.b16 %v13635_v33  ;;  %v2722_v58 = vunpack.c.l.b16 %v2703_v54 }
 0x267   : > { %v2525_v29 = vrot.slane %v2348_v18, 1  ;;  %v2629_v30 = vrot.slane %v13598_v19, 3  ;;  %v2357_v31 = vshll.u32 %v2348_v18, 16  ;;  %v2630_v39 = vrot.slane %v2628_v38, 3 }
 0x268   : > { %3102 = vmatpush.bf16.msra.mxu1 %v12130_v52  ;;  %v2361_v59 = vshrl.u32 %v2348_v18, 16  ;;  %v2931_v22 = vpack.c.b16 %v12528_v45, %v2927_v55  ;;  %v3027_v1 = vpack.c.b16 %v3026_v56, %v12529_v25  ;;  %v2723_v8 = vpack.c.b16 %v2722_v58, %v13588_v14 }
 0x269   : > { %v2526_v27 = vsel %vm465_vm1, %v2524_v26, %v2525_v29  ;;  %v2359_v41 = vrot.slane %v2357_v31, 1  ;;  %v2631_v21 = vsel %vm571_vm2, %v2629_v30, %v2630_v39  ;;  %v2930_v9 = vunpack.c.l.b16 %v2905_v61 }
 0x26a   : > { %2585 = vmatmul.bf16.vlgmr.msrb.gmra.mxu0 %v2526_v27  ;;  %2690 = vmatmul.bf16.vlgmr.msrb.gmra.mxu1 %v2631_v21  ;;  %v3029_v10 = vshrl.u32 %v2931_v22, 16  ;;  %v3032_v11 = vshll.u32 %v2931_v22, 16  ;;  %v3037_v15 = vshrl.u32 %v3027_v1, 16  ;;  %v3040_v17 = vshll.u32 %v3027_v1, 16 }
 0x26b   : > { %v2360_v34 = vsel %vm289_vm0, %v2355_v40, %v2359_v41  ;;  %v2363_v60 = vor.u32 %v2361_v59, %v2359_v41  ;;  %v2725_v18 = vshrl.u32 %v13598_v19, 16  ;;  %v2728_v28 = vshll.u32 %v13598_v19, 16 }
 0x26c   : > { %2422 = vmatmul.bf16.vlgmr.msra.gmra.mxu2 %v2360_v34  ;;  %v2733_v6 = vshrl.u32 %v2723_v8, 16  ;;  %v2736_v7 = vshll.u32 %v2723_v8, 16  ;;  %v2829_v38 = vpack.c.b16 %v13588_v14, %v2624_v12  ;;  %v2932_v23 = vpack.c.b16 %v2930_v9, %v12529_v25  ;;  %v12139_v12 = vld [vmem:[%s15212_s1 + $0x688] sm:$0xff] }
 0x26d   : > { %3190 = vmatpush.bf16.msra.mxu2 %v12145_v46  ;;  %v3031_v26 = vrot.slane %v3029_v10, 2  ;;  %v3039_v30 = vrot.slane %v3037_v15, 2  ;;  %v3042_v31 = vrot.slane %v3040_v17, 3  ;;  %v2730_v20 = vrot.slane %v2728_v28, 4 }
 0x26e   : > { %v2735_v19 = vrot.slane %v2733_v6, 3  ;;  %v2738_v27 = vrot.slane %v2736_v7, 4  ;;  %v2933_v40 = vrot.slane %v2931_v22, 2  ;;  %v2934_v41 = vrot.slane %v2932_v23, 2 }
 0x26f   : > { %v3043_v47 = vor.u32 %v3042_v31, %v3039_v30  ;;  %v2830_v52 = vpack.c.b16 %v2722_v58, %v2722_v58  ;;  %v3135_v46 = vunpack.c.l.b16 %v3116_v49  ;;  %v3138_v48 = vrot.slane %v3027_v1, 3 }
 0x270   : > { %v2739_v50 = vor.u32 %v2738_v27, %v2735_v19  ;;  %v2935_v21 = vsel %vm877_vm4, %v2933_v40, %v2934_v41 }
 0x271   : > { %3191 = vmatpush.bf16.msra.mxu2 %v12144_v36 }
 0x272   : > { %2498 = vmatmul.bf16.gmra.mxu3 %v2434_v24  ;;  %v3136_v24 = vpack.c.b16 %v12528_v45, %v3135_v46 }
 0x274   : > { %v3137_v36 = vrot.slane %v3136_v24, 3 }
 0x275   : > { %3192 = vmatpush.bf16.msra.mxu2 %v12143_v57 }
 0x276   : > { %v3139_v53 = vsel %vm571_vm2, %v3137_v36, %v3138_v48 }
 0x279   : > { %3193 = vmatpush.bf16.msra.mxu2 %v12142_v5 }
 0x27a   : > { %2590 = vmatmul.bf16.gmra.mxu0 %v2525_v29  ;;  %2695 = vmatmul.bf16.gmra.mxu1 %v2630_v39  ;;  %v3034_v29 = vrot.slane %v3032_v11, 3  ;;  %v2727_v39 = vrot.slane %v2725_v18, 3 }
 0x27c   : > { %2427 = vmatmul.bf16.gmra.mxu2 %v2363_v60  ;;  %v3035_v4 = vor.u32 %v3034_v29, %v3031_v26  ;;  %v2731_v14 = vor.u32 %v2730_v20, %v2727_v39 }
 0x27d   : > { %3194 = vmatpush.bf16.msra.mxu2 %v12141_v13 }
 0x27e   : > { %v3044_v34 = vsel %vm973_vm5, %v3035_v4, %v3043_v47  ;;  %v2740_v42 = vsel %vm667_vm3, %v2731_v14, %v2739_v50 }
 0x281   : > { %3195 = vmatpush.bf16.msra.mxu2 %v12140_v35 }
 0x282   : > { %2889 = vmatmul.bf16.vlgmr.msrb.gmra.mxu3 %v2829_v38 }
 0x285   : > { %3196 = vmatpush.bf16.msra.mxu2 %v12139_v12 }
 0x289   : > { %3197 = vmatpush.bf16.msra.mxu2 %v12138_v51 }
 0x28a   : > { %2994 = vmatmul.bf16.vlgmr.msra.gmra.mxu0 %v2935_v21  ;;  %3103 = vmatmul.bf16.vlgmr.msra.gmra.mxu1 %v3044_v34 }
 0x28c   : > { %2799 = vmatmul.bf16.vlgmr.msrb.gmra.mxu2 %v2740_v42 }
 0x292   : > { %2894 = vmatmul.bf16.gmra.mxu3 %v2830_v52 }
 0x29a   : > { %2999 = vmatmul.bf16.gmra.mxu0 %v2934_v41  ;;  %3108 = vmatmul.bf16.gmra.mxu1 %v3043_v47 }
 0x29c   : > { %2804 = vmatmul.bf16.gmra.mxu2 %v2739_v50 }
 0x2ac   : > { %3198 = vmatmul.bf16.vlgmr.msra.gmra.mxu2 %v3139_v53 }
 0x2bc   : > { %3203 = vmatmul.bf16.gmra.mxu2 %v3138_v48 }
 0x2e5   : > { %v2494_v54 = vpop.f32.mrf.mxu3 }
 0x2e7   : > { %v2586_v25 = vpop.f32.mrf.mxu0  ;;  %v2691_v55 = vpop.f32.mrf.mxu1 }
 0x2ed   : > { %v2496_v56 = vpop.f32.mrf.mxu3 }
 0x2ef   : > { %v2423_v57 = vpop.f32.mrf.mxu2  ;;  %v2588_v58 = vpop.f32.mrf.mxu0 }
 0x2f0   : > { %v2495_v59 = vadd.f32 %v2494_v54, %v2423_v57  ;;  %v2693_v60 = vpop.f32.mrf.mxu1 }
 0x2f2   : > { %v2595_v61 = vadd.f32 %v2586_v25, %v2495_v59 }
 0x2f4   : > { %v2700_v22 = vadd.f32 %v2691_v55, %v2595_v61 }
 0x2f5   : > { %v2499_v5 = vpop.f32.mrf.mxu3 }
 0x2f7   : > { %v2425_v8 = vpop.f32.mrf.mxu2  ;;  %v2591_v33 = vpop.f32.mrf.mxu0 }
 0x2f8   : > { %v2696_v45 = vpop.f32.mrf.mxu1  ;;  %v2497_v19 = vadd.f32 %v2496_v56, %v2425_v8 }
 0x2fa   : > { %v2596_v27 = vadd.f32 %v2588_v58, %v2497_v19 }
 0x2fc   : > { %v2701_v4 = vadd.f32 %v2693_v60, %v2596_v27 }
 0x2fd   : > { %v2501_v9 = vpop.f32.mrf.mxu3 }
 0x2ff   : > { %v2428_v1 = vpop.f32.mrf.mxu2  ;;  %v2593_v10 = vpop.f32.mrf.mxu0 }
 0x300   : > { %v2698_v11 = vpop.f32.mrf.mxu1  ;;  %v2500_v41 = vadd.f32 %v2499_v5, %v2428_v1 }
 0x302   : > { %v2597_v12 = vadd.f32 %v2591_v33, %v2500_v41 }
 0x304   : > { %v2702_v34 = vadd.f32 %v2696_v45, %v2597_v12  ;;  %v12169_v12 = vld [vmem:[%s15212_s1 + $0x778] sm:$0xff] }
 0x305   : > { %v2890_v15 = vpop.f32.mrf.mxu3  ;;  %3599 = vmatpush.bf16.msrb.mxu1 %v12169_v12  ;;  %v12155_v12 = vld [vmem:[%s15212_s1 + $0x708] sm:$0xff] }
 0x307   : > { %v2430_v17 = vpop.f32.mrf.mxu2  ;;  %v2995_v13 = vpop.f32.mrf.mxu0 }
 0x308   : > { %v3104_v18 = vpop.f32.mrf.mxu1 }
 0x30d   : > { %v2892_v28 = vpop.f32.mrf.mxu3 }
 0x30f   : > { %v2800_v6 = vpop.f32.mrf.mxu2  ;;  %v2997_v7 = vpop.f32.mrf.mxu0 }
 0x310   : > { %v3106_v38 = vpop.f32.mrf.mxu1  ;;  %v2809_v14 = vadd.f32 %v2800_v6, %v2700_v22 }
 0x312   : > { %v2899_v51 = vadd.f32 %v2890_v15, %v2809_v14  ;;  %v12177_v14 = vld [vmem:[%s15212_s1 + $0x7b8] sm:$0xff] }
 0x313   : > { %3704 = vmatpush.bf16.msrb.mxu2 %v12177_v14  ;;  %v12192_v14 = vld [vmem:[%s15212_s1 + $0x830] sm:$0xff] }
 0x314   : > { %v3004_v49 = vadd.f32 %v2995_v13, %v2899_v51  ;;  %v12168_v51 = vld [vmem:[%s15212_s1 + $0x770] sm:$0xff] }
 0x315   : > { %v2895_v23 = vpop.f32.mrf.mxu3  ;;  %3600 = vmatpush.bf16.msrb.mxu1 %v12168_v51  ;;  %v12209_v51 = vld [vmem:[%s15212_s1 + $0x8b8] sm:$0xff] }
 0x316   : > { %v3113_v48 = vadd.f32 %v3104_v18, %v3004_v49  ;;  %v12150_v49 = vld [vmem:[%s15212_s1 + $0x6e0] sm:$0xff] }
 0x317   : > { %v2802_v26 = vpop.f32.mrf.mxu2  ;;  %v3000_v29 = vpop.f32.mrf.mxu0 }
 0x318   : > { %v3109_v30 = vpop.f32.mrf.mxu1  ;;  %v2810_v47 = vadd.f32 %v2802_v26, %v2701_v4 }
 0x31a   : > { %v2900_v50 = vadd.f32 %v2892_v28, %v2810_v47  ;;  %v12152_v47 = vld [vmem:[%s15212_s1 + $0x6f0] sm:$0xff] }
 0x31c   : > { %v3005_v52 = vadd.f32 %v2997_v7, %v2900_v50  ;;  %v12151_v50 = vld [vmem:[%s15212_s1 + $0x6e8] sm:$0xff] }
 0x31d   : > { %v2897_v31 = vpop.f32.mrf.mxu3 }
 0x31e   : > { %v3114_v24 = vadd.f32 %v3106_v38, %v3005_v52 }
 0x31f   : > { %v2805_v35 = vpop.f32.mrf.mxu2  ;;  %v3002_v39 = vpop.f32.mrf.mxu0 }
 0x320   : > { %v3111_v20 = vpop.f32.mrf.mxu1  ;;  %v2811_v42 = vadd.f32 %v2805_v35, %v2702_v34 }
 0x322   : > { %v2901_v46 = vadd.f32 %v2895_v23, %v2811_v42  ;;  %v12176_v42 = vld [vmem:[%s15212_s1 + $0x7b0] sm:$0xff] }
 0x323   : > { %3705 = vmatpush.bf16.msrb.mxu2 %v12176_v42 }
 0x324   : > { %v3006_v54 = vadd.f32 %v3000_v29, %v2901_v46  ;;  %v12160_v46 = vld [vmem:[%s15212_s1 + $0x730] sm:$0xff] }
 0x326   : > { %v3115_v56 = vadd.f32 %v3109_v30, %v3006_v54  ;;  %v12159_v54 = vld [vmem:[%s15212_s1 + $0x728] sm:$0xff] }
 0x327   : > { %v2807_v40 = vpop.f32.mrf.mxu2 }
 0x328   : > { %v12153_v40 = vld [vmem:[%s15212_s1 + $0x6f8] sm:$0xff] }
 0x329   : > { %3507 = vmatpush.bf16.msrb.mxu0 %v12153_v40  ;;  %v12171_v40 = vld [vmem:[%s15212_s1 + $0x788] sm:$0xff] }
 0x32d   : > { %3508 = vmatpush.bf16.msrb.mxu0 %v12152_v47 }
 0x32f   : > { %v3199_v21 = vpop.f32.mrf.mxu2 }
 0x330   : > { %v13673_v25 = vadd.f32 %v3199_v21, %v3113_v48  ;;  %v12161_v21 = vld [vmem:[%s15212_s1 + $0x738] sm:$0xff]  ;;  %v12175_v48 = vld [vmem:[%s15212_s1 + $0x7a8] sm:$0xff] }
 0x331   : > { %3509 = vmatpush.bf16.msrb.mxu0 %v12151_v50  ;;  %3436 = vmatpush.bf16.msra.mxu3 %v12161_v21 }
 0x332   : > { %v3223_v57 = vmul.f32 %v13673_v25, %v13673_v25  ;;  %v3211_v61 = vmul.f32 %v13477_v63, %v13673_v25  ;;  %3706 = vmatpush.bf16.msrb.mxu2 %v12175_v48 }
 0x334   : > { %v3226_v33 = vmul.f32 %v13477_v63, %v3223_v57  ;;  %v12166_v57 = vld [vmem:[%s15212_s1 + $0x760] sm:$0xff] }
 0x335   : > { %3510 = vmatpush.bf16.msrb.mxu0 %v12150_v49  ;;  %3437 = vmatpush.bf16.msra.mxu3 %v12160_v46 }
 0x337   : > { %v3201_v36 = vpop.f32.mrf.mxu2 }
 0x338   : > { %v13671_v53 = vadd.f32 %v3201_v36, %v3114_v24  ;;  %v12167_v36 = vld [vmem:[%s15212_s1 + $0x768] sm:$0xff] }
 0x339   : > { %3601 = vmatpush.bf16.msrb.mxu1 %v12167_v36  ;;  %3438 = vmatpush.bf16.msra.mxu3 %v12159_v54  ;;  %v12191_v36 = vld [vmem:[%s15212_s1 + $0x828] sm:$0xff] }
 0x33a   : > { %v3224_v55 = vmul.f32 %v13671_v53, %v13671_v53  ;;  %v3212_v58 = vmul.f32 %v13485_v0, %v13671_v53 }
 0x33c   : > { %v3227_v22 = vmul.f32 %v13485_v0, %v3224_v55  ;;  %v3214_v45 = vadd.f32 %v3212_v58, %v3211_v61  ;;  %v12149_v55 = vld [vmem:[%s15212_s1 + $0x6d8] sm:$0xff]  ;;  %v12174_v58 = vld [vmem:[%s15212_s1 + $0x7a0] sm:$0xff]  ;;  %v12148_v61 = vld [vmem:[%s15212_s1 + $0x6d0] sm:$0xff] }
 0x33d   : > { %3511 = vmatpush.bf16.msrb.mxu0 %v12149_v55  ;;  %3602 = vmatpush.bf16.msrb.mxu1 %v12166_v57  ;;  %v12185_v55 = vld [vmem:[%s15212_s1 + $0x7f8] sm:$0xff] }
 0x33e   : > { %v3229_v10 = vadd.f32 %v3227_v22, %v3226_v33  ;;  %v12158_v22 = vld [vmem:[%s15212_s1 + $0x720] sm:$0xff]  ;;  %3707 = vmatpush.bf16.msrb.mxu2 %v12174_v58 }
 0x33f   : > { %v3204_v59 = vpop.f32.mrf.mxu2  ;;  %3439 = vmatpush.bf16.msra.mxu3 %v12158_v22 }
 0x340   : > { %v13681_v60 = vadd.f32 %v3204_v59, %v3115_v56 }
 0x341   : > { %3512 = vmatpush.bf16.msrb.mxu0 %v12148_v61 }
 0x342   : > { %v3213_v5 = vmul.f32 %v13491_v2, %v13681_v60  ;;  %v3225_v8 = vmul.f32 %v13681_v60, %v13681_v60 }
 0x344   : > { %v3215_v9 = vsel %vm877_vm4, %v3213_v5, 0.0  ;;  %v3228_v1 = vmul.f32 %v13491_v2, %v3225_v8  ;;  %v12616_v8 = vld [vmem:[%s15213_s2 + $0x2] ss:$0 sm:$0xff] }
 0x345   : > { %v3216_v11 = vadd.f32 %v3215_v9, %v3214_v45 }
 0x346   : > { %v3230_v15 = vsel %vm877_vm4, %v3228_v1, 0.0  ;;  %v12165_v1 = vld [vmem:[%s15212_s1 + $0x758] sm:$0xff] }
 0x347   : > { %v3217_v17 = vrot.slane %v3216_v11, 4  ;;  %v3231_v13 = vadd.f32 %v3230_v15, %v3229_v10  ;;  %v3206_v18 = vpop.f32.mrf.mxu2  ;;  %v12173_v10 = vld [vmem:[%s15212_s1 + $0x798] sm:$0xff]  ;;  %3603 = vmatpush.bf16.msrb.mxu1 %v12165_v1 }
 0x348   : > { %3708 = vmatpush.bf16.msrb.mxu2 %v12173_v10  ;;  %v12190_v10 = vld [vmem:[%s15212_s1 + $0x820] sm:$0xff] }
 0x349   : > { %v3218_v28 = vadd.f32 %v3217_v17, %v3216_v11  ;;  %v3232_v6 = vrot.slane %v3231_v13, 4  ;;  %v12617_v17 = vld [vmem:[%s15214_s3 + $0x2] ss:$0 sm:$0xff] }
 0x34b   : > { %v3219_v7 = vrot.slane %v3218_v28, 2  ;;  %v3233_v38 = vadd.f32 %v3232_v6, %v3231_v13  ;;  %v12157_v13 = vld [vmem:[%s15212_s1 + $0x718] sm:$0xff] }
 0x34c   : > { %3440 = vmatpush.bf16.msra.mxu3 %v12157_v13  ;;  %v12207_v13 = vld [vmem:[%s15212_s1 + $0x8a8] sm:$0xff] }
 0x34d   : > { %v3220_v23 = vadd.f32 %v3219_v7, %v3218_v28  ;;  %v3234_v26 = vrot.slane %v3233_v38, 2  ;;  %v12164_v7 = vld [vmem:[%s15212_s1 + $0x750] sm:$0xff] }
 0x34e   : > { %3604 = vmatpush.bf16.msrb.mxu1 %v12164_v7  ;;  %v12189_v7 = vld [vmem:[%s15212_s1 + $0x818] sm:$0xff] }
 0x34f   : > { %v3221_v29 = vrot.slane %v3220_v23, 1  ;;  %v3235_v30 = vadd.f32 %v3234_v26, %v3233_v38  ;;  %v12172_v38 = vld [vmem:[%s15212_s1 + $0x790] sm:$0xff] }
 0x350   : > { %3709 = vmatpush.bf16.msrb.mxu2 %v12172_v38 }
 0x351   : > { %v3222_v31 = vadd.f32 %v3221_v29, %v3220_v23  ;;  %v3236_v35 = vrot.slane %v3235_v30, 1  ;;  %v12146_v23 = vld [vmem:[%s15212_s1 + $0x6c0] sm:$0xff] }
 0x353   : > { %v3237_v39 = vadd.f32 %v3236_v35, %v3235_v30  ;;  %v3238_v20 = vmul.f32 0.0625, %v3222_v31  ;;  %v12156_v31 = vld [vmem:[%s15212_s1 + $0x710] sm:$0xff]  ;;  %v12193_v35 = vld [vmem:[%s15212_s1 + $0x838] sm:$0xff] }
 0x354   : > { %3441 = vmatpush.bf16.msra.mxu3 %v12156_v31  ;;  %3710 = vmatpush.bf16.msrb.mxu2 %v12171_v40  ;;  %v12182_v31 = vld [vmem:[%s15212_s1 + $0x7e0] sm:$0xff] }
 0x355   : > { %v3239_v19 = vmul.f32 0.0625, %v3237_v39  ;;  %v3240_v27 = vmul.f32 %v3238_v20, %v3238_v20  ;;  %v3242_v33 = vsub.f32 %v13673_v25, %v3238_v20  ;;  %v3243_v45 = vsub.f32 %v13671_v53, %v3238_v20  ;;  %v12147_v25 = vld [vmem:[%s15212_s1 + $0x6c8] sm:$0xff] }
 0x356   : > { %v3244_v9 = vsub.f32 %v13681_v60, %v3238_v20  ;;  %3513 = vmatpush.bf16.msrb.mxu0 %v12147_v25  ;;  %v12184_v25 = vld [vmem:[%s15212_s1 + $0x7f0] sm:$0xff] }
 0x357   : > { %v3241_v41 = vsub.f32 %v3239_v19, %v3240_v27  ;;  %v12163_v27 = vld [vmem:[%s15212_s1 + $0x748] sm:$0xff] }
 0x358   : > { %3605 = vmatpush.bf16.msrb.mxu1 %v12163_v27  ;;  %3442 = vmatpush.bf16.msra.mxu3 %v12155_v12 }
 0x359   : > { %v3245_v4 = vadd.f32 1e-05, %v3241_v41 }
 0x35a   : > { %3514 = vmatpush.bf16.msrb.mxu0 %v12146_v23  ;;  %v12183_v23 = vld [vmem:[%s15212_s1 + $0x7e8] sm:$0xff] }
 0x35b   : > { %12632 = vrsqrt.f32 %v3245_v4  ;;  %vm3252_vm12 = vweird.f32 %v3245_v4 }
 0x35e   : > { %3903 = vmatpush.bf16.msra.mxu0 %v12193_v35 }
 0x361   : > { %v12633_v34 = vpop.eup %12632 }
 0x362   : > { %v3247_v52 = vmul.f32 %v12633_v34, %v3245_v4  ;;  %vm3253_vm11 = vweird.f32 %v12633_v34  ;;  %3904 = vmatpush.bf16.msra.mxu0 %v12192_v14 }
 0x363   : > { %vm3254_vm14 = vmor %vm3252_vm12, %vm3253_vm11 }
 0x364   : > { %v3248_v24 = vmul.f32 %v12633_v34, %v3247_v52 }
 0x366   : > { %v3249_v56 = vmul.f32 0.5, %v3248_v24  ;;  %v12154_v24 = vld [vmem:[%s15212_s1 + $0x700] sm:$0xff]  ;;  %3905 = vmatpush.bf16.msra.mxu0 %v12191_v36 }
 0x367   : > { %3443 = vmatpush.bf16.msra.mxu3 %v12154_v24  ;;  %v12186_v36 = vld [vmem:[%s15212_s1 + $0x800] sm:$0xff] }
 0x368   : > { %v3250_v59 = vsub.f32 1.5, %v3249_v56 }
 0x36a   : > { %v3251_v5 = vmul.f32 %v12633_v34, %v3250_v59  ;;  %3906 = vmatpush.bf16.msra.mxu0 %v12190_v10  ;;  %v12179_v10 = vld [vmem:[%s15212_s1 + $0x7c8] sm:$0xff] }
 0x36b   : > { %3813 = vmatpush.bf16.msrb.mxu3 %v12185_v55  ;;  %v12180_v55 = vld [vmem:[%s15212_s1 + $0x7d0] sm:$0xff] }
 0x36c   : > { %v3255_v11 = vsel %vm3254_vm14, %v12633_v34, %v3251_v5  ;;  %v3317_v5 = vld [vmem:[#allocation3] sm:$0x8] }
 0x36d   : > { %v3256_v53 = vmul.f32 %v3255_v11, %v3242_v33  ;;  %v3257_v15 = vmul.f32 %v3255_v11, %v3243_v45  ;;  %v3258_v60 = vmul.f32 %v3255_v11, %v3244_v9  ;;  %v12208_v33 = vld [vmem:[%s15212_s1 + $0x8b0] sm:$0xff] }
 0x36e   : > { %3907 = vmatpush.bf16.msra.mxu0 %v12189_v7  ;;  %v12216_v7 = vld [vmem:[%s15212_s1 + $0x8f0] sm:$0xff] }
 0x36f   : > { %v3264_v18 = vmul.f32 %v12616_v8, %v3256_v53  ;;  %v3265_v28 = vmul.f32 %v12616_v8, %v3257_v15  ;;  %v3266_v6 = vmul.f32 %v12616_v8, %v3258_v60  ;;  %v12200_v8 = vld [vmem:[%s15212_s1 + $0x870] sm:$0xff]  ;;  %3814 = vmatpush.bf16.msrb.mxu3 %v12184_v25 }
 0x371   : > { %v3272_v26 = vadd.f32 %v12617_v17, %v3264_v18  ;;  %v3273_v29 = vadd.f32 %v12617_v17, %v3265_v28  ;;  %v3274_v30 = vadd.f32 %v12617_v17, %v3266_v6  ;;  %v12199_v17 = vld [vmem:[%s15212_s1 + $0x868] sm:$0xff]  ;;  %v3322_v6 = vld [vmem:[#allocation3 + $0xc] sm:$0x7] }
 0x373   : > { %v3275_v39 = vmax.f32 %v3272_v26, 0.0  ;;  %v3276_v20 = vmax.f32 %v3273_v29, 0.0  ;;  %v3277_v19 = vmax.f32 %v3274_v30, 0.0  ;;  %v12198_v26 = vld [vmem:[%s15212_s1 + $0x860] sm:$0xff]  ;;  %v12188_v30 = vld [vmem:[%s15212_s1 + $0x810] sm:$0xff]  ;;  %3815 = vmatpush.bf16.msrb.mxu3 %v12183_v23 }
 0x374   : > { %v12206_v29 = vld [vmem:[%s15212_s1 + $0x8a0] sm:$0xff]  ;;  %3908 = vmatpush.bf16.msra.mxu0 %v12188_v30 }
 0x375   : > { %v3278_v41 = vmul.f32 %v13477_v63, %v3275_v39  ;;  %v3279_v4 = vmul.f32 %v13485_v0, %v3276_v20  ;;  %v3280_v47 = vmul.f32 %v13491_v2, %v3277_v19  ;;  %v12162_v63 = vld [vmem:[%s15212_s1 + $0x740] sm:$0xff]  ;;  %v12201_v2 = vld [vmem:[%s15212_s1 + $0x878] sm:$0xff] }
 0x376   : > { %v12170_v0 = vld [vmem:[%s15212_s1 + $0x780] sm:$0xff]  ;;  %3606 = vmatpush.bf16.msrb.mxu1 %v12162_v63  ;;  %v12197_v39 = vld [vmem:[%s15212_s1 + $0x858] sm:$0xff] }
 0x377   : > { %v3281_v50 = vpack.c.bf16 %v3278_v41, %v3278_v41  ;;  %v3282_v21 = vpack.c.bf16 %v3279_v4, %v3279_v4  ;;  %v3283_v34 = vpack.c.bf16 %v3280_v47, %v3280_v47  ;;  %3711 = vmatpush.bf16.msrb.mxu2 %v12170_v0  ;;  %v12205_v20 = vld [vmem:[%s15212_s1 + $0x898] sm:$0xff]  ;;  %v12187_v41 = vld [vmem:[%s15212_s1 + $0x808] sm:$0xff]  ;;  %3816 = vmatpush.bf16.msrb.mxu3 %v12182_v31 }
 0x378   : > { %v12181_v19 = vld [vmem:[%s15212_s1 + $0x7d8] sm:$0xff]  ;;  %3909 = vmatpush.bf16.msra.mxu0 %v12187_v41 }
 0x379   : > { %v3285_v42 = vshll.u32 %v3281_v50, 16  ;;  %v3288_v52 = vshrl.u32 %v3281_v50, 16  ;;  %v3294_v49 = vshll.u32 %v3282_v21, 16  ;;  %v3298_v46 = vshrl.u32 %v3282_v21, 16 }
 0x37a   : > { %v3304_v48 = vshll.u32 %v3283_v34, 16  ;;  %v3308_v54 = vshrl.u32 %v3283_v34, 16  ;;  %4008 = vmatpush.bf16.msra.mxu1 %v12201_v2 }
 0x37b   : > { %v3287_v56 = vrot.slane %v3285_v42, 5  ;;  %v3290_v57 = vrot.slane %v3288_v52, 4  ;;  %v3296_v58 = vrot.slane %v3294_v49, 5  ;;  %v3300_v59 = vrot.slane %v3298_v46, 4  ;;  %4117 = vmatpush.bf16.msra.mxu2 %v12209_v51  ;;  %v12196_v42 = vld [vmem:[%s15212_s1 + $0x850] sm:$0xff]  ;;  %3817 = vmatpush.bf16.msrb.mxu3 %v12181_v19 }
 0x37c   : > { %v3306_v61 = vrot.slane %v3304_v48, 5  ;;  %v3310_v22 = vrot.slane %v3308_v54, 4  ;;  %v12204_v52 = vld [vmem:[%s15212_s1 + $0x890] sm:$0xff]  ;;  %3910 = vmatpush.bf16.msra.mxu0 %v12186_v36 }
 0x37d   : > { %v3291_v45 = vor.u32 %v3290_v57, %v3287_v56  ;;  %v3301_v9 = vor.u32 %v3300_v59, %v3296_v58  ;;  %v3318_v1 = vsel %vm13192_vm13, %v3287_v56, %v3317_v5  ;;  %v3927_v19 = vld [vmem:[#allocation3 + $0x10] sm:$0x1] }
 0x37e   : > { %v3311_v11 = vor.u32 %v3310_v22, %v3306_v61  ;;  %3319 = vst [vmem:[#allocation3] sm:$0x8] %v3318_v1  ;;  %4009 = vmatpush.bf16.msra.mxu1 %v12200_v8  ;;  %v12195_v22 = vld [vmem:[%s15212_s1 + $0x848] sm:$0xff] }
 0x37f   : > { %v3292_v53 = vrot.slane %v3291_v45, 4  ;;  %v3302_v15 = vrot.slane %v3301_v9, 4  ;;  %4118 = vmatpush.bf16.msra.mxu2 %v12208_v33  ;;  %v12203_v9 = vld [vmem:[%s15212_s1 + $0x888] sm:$0xff]  ;;  %3818 = vmatpush.bf16.msrb.mxu3 %v12180_v55 }
 0x380   : > { %v3312_v60 = vrot.slane %v3311_v11, 4 }
 0x381   : > { %v3297_v18 = vsel %vm13221_vm6, %v3292_v53, %v3296_v58  ;;  %v3307_v28 = vsel %vm13221_vm6, %v3302_v15, %v3306_v61  ;;  %v12194_v53 = vld [vmem:[%s15212_s1 + $0x840] sm:$0xff] }
 0x382   : > { %3320 = vst [vmem:[#allocation3 + $0x4] sm:$0xf] %v3297_v18  ;;  %v3323_v38 = vsel %vm13230_vm7, %v3312_v60, %v3322_v6  ;;  %4010 = vmatpush.bf16.msra.mxu1 %v12199_v17  ;;  %v12202_v15 = vld [vmem:[%s15212_s1 + $0x880] sm:$0xff]  ;;  %v12217_v17 = vld [vmem:[%s15212_s1 + $0x8f8] sm:$0xff]  ;;  %v4029_v18 = vld [vmem:[#allocation3 + $0x10] sm:$0x3] }
 0x383   : > { %3321 = vst [vmem:[#allocation3 + $0x8] sm:$0xf] %v3307_v28  ;;  %4119 = vmatpush.bf16.msra.mxu2 %v12207_v13  ;;  %3819 = vmatpush.bf16.msrb.mxu3 %v12179_v10  ;;  %v12178_v60 = vld [vmem:[%s15212_s1 + $0x7c0] sm:$0xff]  ;;  %v4048_v30 = vunpack.c.l.b16 %v4029_v18 }
 0x384   : > { %3324 = vst [vmem:[#allocation3 + $0xc] sm:$0x7] %v3323_v38  ;;  %v12210_v10 = vld [vmem:[%s15212_s1 + $0x8c0] sm:$0xff] }
 0x385   : > { %v3620_v35 = vld [vmem:[#allocation3] sm:$0x8] }
 0x386   : > { %4011 = vmatpush.bf16.msra.mxu1 %v12198_v26  ;;  %v12583_v47 = vld [vmem:[#allocation3] sm:$0xe]  ;;  %v3645_v14 = vunpack.c.l.b16 %v3620_v35  ;;  %v12215_v35 = vld [vmem:[%s15212_s1 + $0x8e8] sm:$0xff] }
 0x387   : > { %4120 = vmatpush.bf16.msra.mxu2 %v12206_v29  ;;  %3820 = vmatpush.bf16.msrb.mxu3 %v12178_v60 }
 0x389   : > { %v12531_v27 = vld [vmem:[#allocation3] sm:$0xff]  }
 0x38a   : > { %v12582_v40 = vld [vmem:[#allocation3] sm:$0xf0]  ;;  %3515 = vmatmul.bf16.vlgmr.msrb.gmra.mxu0 %v12531_v27  ;;  %v3622_v12 = vld [vmem:[#allocation3 + $0x8] sm:$0xf]  ;;  %v3374_v50 = vshll.u32 %v12531_v27, 16  ;;  %4012 = vmatpush.bf16.msra.mxu1 %v12197_v39  ;;  %v3372_v54 = vshrl.u32 %v12531_v27, 16 }
 0x38b   : > { %v13876_v4 = vld [vmem:[#allocation3 + $0x4] sm:$0xff]   ;;  %v12584_v34 = vor.u32 %v12583_v47, %v12582_v40  ;;  %v3623_v63 = vld [vmem:[#allocation3 + $0xc] sm:$0x3]  ;;  %v13880_v2 = vunpack.c.l.b16 %v3622_v12  ;;  %4121 = vmatpush.bf16.msra.mxu2 %v12205_v20  ;;  %v12214_v47 = vld [vmem:[%s15212_s1 + $0x8e0] sm:$0xff]  ;;  %v3952_v12 = vunpack.c.l.b16 %v3927_v19 }
 0x38c   : > { %v3368_v21 = vunpack.c.h.b16 %v13876_v4  ;;  %v3646_v0 = vunpack.c.l.b16 %v13876_v4  ;;  %v3648_v51 = vunpack.c.l.b16 %v3623_v63  ;;  %v3376_v24 = vrot.slane %v3374_v50, 1  ;;  %v3327_v45 = vld [vmem:[#allocation3 + $0x8] sm:$0x7]  ;;  %v3924_v28 = vld [vmem:[#allocation3 + $0x4] sm:$0xc] }
 0x38d   : > { %v3546_v56 = vrot.slane %v12584_v34, 1  ;;  %v3455_v25 = vunpack.c.l.b16 %v3327_v45  ;;  %v13924_v6 = vld [vmem:[#allocation3 + $0x8] sm:$0xff]   ;;  %v3949_v29 = vunpack.c.l.b16 %v3924_v28 }
 0x38e   : > { %v3370_v49 = vpack.c.b16 %v3368_v21, %v3368_v21  ;;  %v13890_v46 = vpack.c.b16 %v3646_v0, %v3645_v14  ;;  %v3650_v48 = vpack.c.b16 %v3648_v51, %v13880_v2  ;;  %4013 = vmatpush.bf16.msra.mxu1 %v12196_v42  ;;  %v3377_v8 = vor.u32 %v3376_v24, %v3372_v54  ;;  %v3725_v38 = vld [vmem:[#allocation3 + $0xc] sm:$0x7] }
 0x38f   : > { %4122 = vmatpush.bf16.msra.mxu2 %v12204_v52  ;;  %v3456_v13 = vpack.c.b16 %v3455_v25, %v3455_v25  ;;  %v12536_v23 = vunpack.c.l.b16 %v13924_v6  ;;  %v12537_v26 = vunpack.c.h.b16 %v13924_v6  ;;  %v3744_v31 = vunpack.c.l.b16 %v3725_v38  ;;  %v4138_v25 = vld [vmem:[#allocation3 + $0x4] sm:$0x8] }
 0x390   : > { %v3547_v57 = vrot.slane %v3370_v49, 1  ;;  %v3651_v58 = vrot.slane %v13890_v46, 3  ;;  %v3379_v59 = vshll.u32 %v3370_v49, 16  ;;  %v3652_v61 = vrot.slane %v3650_v48, 3 }
 0x391   : > { %v3383_v39 = vshrl.u32 %v3370_v49, 16  ;;  %v3953_v27 = vpack.c.b16 %v12536_v23, %v3949_v29  ;;  %v4049_v40 = vpack.c.b16 %v4048_v30, %v12537_v26  ;;  %v3745_v41 = vpack.c.b16 %v3744_v31, %v13880_v2  ;;  %v12213_v49 = vld [vmem:[%s15212_s1 + $0x8d8] sm:$0xff] }
 0x392   : > { %v3548_v5 = vsel %vm465_vm1, %v3546_v56, %v3547_v57  ;;  %v3381_v33 = vrot.slane %v3379_v59, 1  ;;  %v3653_v1 = vsel %vm571_vm2, %v3651_v58, %v3652_v61  ;;  %4014 = vmatpush.bf16.msra.mxu1 %v12195_v22  ;;  %v3747_v63 = vshrl.u32 %v13890_v46, 16 }
 0x393   : > { %3607 = vmatmul.bf16.vlgmr.msrb.gmra.mxu1 %v3548_v5  ;;  %3712 = vmatmul.bf16.vlgmr.msrb.gmra.mxu2 %v3653_v1  ;;  %v4051_v14 = vshrl.u32 %v3953_v27, 16  ;;  %v4054_v50 = vshll.u32 %v3953_v27, 16  ;;  %v4059_v21 = vshrl.u32 %v4049_v40, 16  ;;  %v4062_v34 = vshll.u32 %v4049_v40, 16 }
 0x394   : > { %v3382_v11 = vsel %vm289_vm0, %v3377_v8, %v3381_v33  ;;  %4123 = vmatpush.bf16.msra.mxu2 %v12203_v9  ;;  %v3385_v20 = vor.u32 %v3383_v39, %v3381_v33  ;;  %v3750_v51 = vshll.u32 %v13890_v46, 16  ;;  %v3755_v42 = vshrl.u32 %v3745_v41, 16  ;;  %v12211_v33 = vld [vmem:[%s15212_s1 + $0x8c8] sm:$0xff] }
 0x395   : > { %3444 = vmatmul.bf16.vlgmr.msra.gmra.mxu3 %v3382_v11  ;;  %v3758_v52 = vshll.u32 %v3745_v41, 16  ;;  %v3851_v24 = vpack.c.b16 %v13880_v2, %v3646_v0  ;;  %v3954_v36 = vpack.c.b16 %v3952_v12, %v12537_v26  ;;  %v4053_v48 = vrot.slane %v4051_v14, 2 }
 0x396   : > { %4015 = vmatpush.bf16.msra.mxu1 %v12194_v53  ;;  %4212 = vmatpush.bf16.msra.mxu3 %v12217_v17  ;;  %v4056_v54 = vrot.slane %v4054_v50, 3  ;;  %v4061_v55 = vrot.slane %v4059_v21, 2  ;;  %v4064_v56 = vrot.slane %v4062_v34, 3  ;;  %v3752_v58 = vrot.slane %v3750_v51, 4 }
 0x397   : > { %v3757_v46 = vrot.slane %v3755_v42, 3  ;;  %v3760_v59 = vrot.slane %v3758_v52, 4  ;;  %v3955_v22 = vrot.slane %v3953_v27, 2  ;;  %v3956_v5 = vrot.slane %v3954_v36, 2 }
 0x398   : > { %4124 = vmatpush.bf16.msra.mxu2 %v12202_v15  ;;  %v4057_v4 = vor.u32 %v4056_v54, %v4053_v48  ;;  %v4065_v8 = vor.u32 %v4064_v56, %v4061_v55  ;;  %v3852_v11 = vpack.c.b16 %v3744_v31, %v3744_v31  ;;  %v4157_v53 = vunpack.c.l.b16 %v4138_v25 }
 0x399   : > { %v3761_v2 = vor.u32 %v3760_v59, %v3757_v46  ;;  %v3957_v45 = vsel %vm877_vm4, %v3955_v22, %v3956_v5  ;;  %v4160_v17 = vrot.slane %v4049_v40, 3 }
 0x39a   : > { %3520 = vmatmul.bf16.gmra.mxu0 %v3456_v13  ;;  %4213 = vmatpush.bf16.msra.mxu3 %v12216_v7  ;;  %v4066_v9 = vsel %vm973_vm5, %v4057_v4, %v4065_v8  ;;  %v4158_v15 = vpack.c.b16 %v12536_v23, %v4157_v53 }
 0x39c   : > { %v4159_v60 = vrot.slane %v4158_v15, 3 }
 0x39e   : > { %4214 = vmatpush.bf16.msra.mxu3 %v12215_v35  ;;  %v4161_v13 = vsel %vm571_vm2, %v4159_v60, %v4160_v17 }
 0x3a2   : > { %4215 = vmatpush.bf16.msra.mxu3 %v12214_v47 }
 0x3a3   : > { %3612 = vmatmul.bf16.gmra.mxu1 %v3547_v57  ;;  %3717 = vmatmul.bf16.gmra.mxu2 %v3652_v61  ;;  %v3749_v57 = vrot.slane %v3747_v63, 3  ;;  %v12212_v61 = vld [vmem:[%s15212_s1 + $0x8d0] sm:$0xff] }
 0x3a5   : > { %3449 = vmatmul.bf16.gmra.mxu3 %v3385_v20  ;;  %v3753_v0 = vor.u32 %v3752_v58, %v3749_v57 }
 0x3a6   : > { %4216 = vmatpush.bf16.msra.mxu3 %v12213_v49 }
 0x3a7   : > { %v3762_v1 = vsel %vm667_vm3, %v3753_v0, %v3761_v2 }
 0x3aa   : > { %3911 = vmatmul.bf16.vlgmr.msra.gmra.mxu0 %v3851_v24  ;;  %4217 = vmatpush.bf16.msra.mxu3 %v12212_v61 }
 0x3ae   : > { %4218 = vmatpush.bf16.msra.mxu3 %v12211_v33 }
 0x3b2   : > { %4219 = vmatpush.bf16.msra.mxu3 %v12210_v10 }
 0x3b3   : > { %4016 = vmatmul.bf16.vlgmr.msra.gmra.mxu1 %v3957_v45  ;;  %4125 = vmatmul.bf16.vlgmr.msra.gmra.mxu2 %v4066_v9 }
 0x3b5   : > { %3821 = vmatmul.bf16.vlgmr.msrb.gmra.mxu3 %v3762_v1 }
 0x3ba   : > { %3916 = vmatmul.bf16.gmra.mxu0 %v3852_v11 }
 0x3c3   : > { %4021 = vmatmul.bf16.gmra.mxu1 %v3956_v5  ;;  %4130 = vmatmul.bf16.gmra.mxu2 %v4065_v8 }
 0x3c5   : > { %3826 = vmatmul.bf16.gmra.mxu3 %v3761_v2 }
 0x3d5   : > { %4220 = vmatmul.bf16.vlgmr.msra.gmra.mxu3 %v4161_v13 }
 0x3e5   : > { %4225 = vmatmul.bf16.gmra.mxu3 %v4160_v17 }
 0x407   : > { %v3516_v18 = vpop.f32.mrf.mxu0 }
 0x40f   : > { %v3518_v7 = vpop.f32.mrf.mxu0 }
 0x410   : > { %v3608_v28 = vpop.f32.mrf.mxu1 }
 0x416   : > { %v3713_v38 = vpop.f32.mrf.mxu2 }
 0x417   : > { %v3521_v31 = vpop.f32.mrf.mxu0 }
 0x418   : > { %v3445_v26 = vpop.f32.mrf.mxu3  ;;  %v3610_v29 = vpop.f32.mrf.mxu1 }
 0x419   : > { %v3517_v30 = vadd.f32 %v3516_v18, %v3445_v26 }
 0x41b   : > { %v3617_v35 = vadd.f32 %v3608_v28, %v3517_v30  ;;  %v13983_v30 = vld [vmem:[%s15215_s4] sm:$0xff] }
 0x41d   : > { %v3722_v39 = vadd.f32 %v3713_v38, %v3617_v35 }
 0x41e   : > { %v3715_v20 = vpop.f32.mrf.mxu2 }
 0x41f   : > { %v3523_v23 = vpop.f32.mrf.mxu0 }
 0x420   : > { %v3447_v19 = vpop.f32.mrf.mxu3  ;;  %v3613_v6 = vpop.f32.mrf.mxu1 }
 0x421   : > { %v3519_v56 = vadd.f32 %v3518_v7, %v3447_v19  ;;  %v13974_v7 = vld [vmem:[%s15215_s4 + $0x8] sm:$0xff] }
 0x423   : > { %v3618_v57 = vadd.f32 %v3610_v29, %v3519_v56 }
 0x425   : > { %v3723_v61 = vadd.f32 %v3715_v20, %v3618_v57 }
 0x426   : > { %v3718_v27 = vpop.f32.mrf.mxu2 }
 0x427   : > { %v3912_v47 = vpop.f32.mrf.mxu0 }
 0x428   : > { %v3450_v40 = vpop.f32.mrf.mxu3  ;;  %v3615_v41 = vpop.f32.mrf.mxu1 }
 0x429   : > { %v3522_v59 = vadd.f32 %v3521_v31, %v3450_v40 }
 0x42b   : > { %v3619_v5 = vadd.f32 %v3613_v6, %v3522_v59 }
 0x42d   : > { %v3724_v2 = vadd.f32 %v3718_v27, %v3619_v5 }
 0x42e   : > { %v3720_v12 = vpop.f32.mrf.mxu2 }
 0x42f   : > { %v3914_v21 = vpop.f32.mrf.mxu0 }
 0x430   : > { %v3452_v14 = vpop.f32.mrf.mxu3  ;;  %v4017_v50 = vpop.f32.mrf.mxu1 }
 0x436   : > { %v4126_v34 = vpop.f32.mrf.mxu2 }
 0x437   : > { %v3917_v42 = vpop.f32.mrf.mxu0 }
 0x438   : > { %v3822_v63 = vpop.f32.mrf.mxu3  ;;  %v4019_v51 = vpop.f32.mrf.mxu1 }
 0x439   : > { %v3831_v4 = vadd.f32 %v3822_v63, %v3722_v39  ;;  %v13991_v39 = vld [vmem:[%s15215_s4 + $0x10] sm:$0x3f] }
 0x43b   : > { %v3921_v33 = vadd.f32 %v3912_v47, %v3831_v4  ;;  %v12241_v4 = vld [vmem:[%s15212_s1 + $0x9b8] sm:$0xff] }
 0x43c   : > { %4610 = vmatpush.bf16.msrb.mxu2 %v12241_v4  ;;  %v12242_v4 = vld [vmem:[%s15212_s1 + $0x9c0] sm:$0xff] }
 0x43d   : > { %v4026_v1 = vadd.f32 %v4017_v50, %v3921_v33  ;;  %v12233_v33 = vld [vmem:[%s15212_s1 + $0x978] sm:$0xff] }
 0x43e   : > { %v4128_v52 = vpop.f32.mrf.mxu2  ;;  %4447 = vmatpush.bf16.msrb.mxu0 %v12233_v33 }
 0x43f   : > { %v3919_v36 = vpop.f32.mrf.mxu0  ;;  %v4135_v53 = vadd.f32 %v4126_v34, %v4026_v1  ;;  %v12222_v1 = vld [vmem:[%s15212_s1 + $0x920] sm:$0xff] }
 0x440   : > { %v3824_v49 = vpop.f32.mrf.mxu3  ;;  %v4022_v24 = vpop.f32.mrf.mxu1 }
 0x441   : > { %v3832_v22 = vadd.f32 %v3824_v49, %v3723_v61 }
 0x443   : > { %v3922_v8 = vadd.f32 %v3914_v21, %v3832_v22 }
 0x445   : > { %v4027_v9 = vadd.f32 %v4019_v51, %v3922_v8  ;;  %v12249_v8 = vld [vmem:[%s15212_s1 + $0x9f8] sm:$0xff] }
 0x446   : > { %v4131_v48 = vpop.f32.mrf.mxu2  ;;  %4715 = vmatpush.bf16.msrb.mxu3 %v12249_v8  ;;  %v12273_v8 = vld [vmem:[%s15212_s1 + $0xab8] sm:$0xff] }
 0x447   : > { %v4136_v11 = vadd.f32 %v4128_v52, %v4027_v9  ;;  %v12248_v9 = vld [vmem:[%s15212_s1 + $0x9f0] sm:$0xff] }
 0x448   : > { %v3827_v54 = vpop.f32.mrf.mxu3  ;;  %v4024_v55 = vpop.f32.mrf.mxu1 }
 0x449   : > { %v3833_v45 = vadd.f32 %v3827_v54, %v3724_v2 }
 0x44a   : > { %4716 = vmatpush.bf16.msrb.mxu3 %v12248_v9  ;;  %v12226_v9 = vld [vmem:[%s15212_s1 + $0x940] sm:$0xff] }
 0x44b   : > { %v3923_v10 = vadd.f32 %v3917_v42, %v3833_v45  ;;  %v12240_v45 = vld [vmem:[%s15212_s1 + $0x9b0] sm:$0xff] }
 0x44c   : > { %4611 = vmatpush.bf16.msrb.mxu2 %v12240_v45 }
 0x44d   : > { %v4028_v60 = vadd.f32 %v4022_v24, %v3923_v10  ;;  %v12232_v10 = vld [vmem:[%s15212_s1 + $0x970] sm:$0xff] }
 0x44e   : > { %v4133_v58 = vpop.f32.mrf.mxu2  ;;  %4448 = vmatpush.bf16.msrb.mxu0 %v12232_v10 }
 0x44f   : > { %v4137_v18 = vadd.f32 %v4131_v48, %v4028_v60  ;;  %v12225_v48 = vld [vmem:[%s15212_s1 + $0x938] sm:$0xff]  ;;  %v12224_v58 = vld [vmem:[%s15212_s1 + $0x930] sm:$0xff] }
 0x450   : > { %v3829_v46 = vpop.f32.mrf.mxu3  ;;  %4518 = vmatpush.bf16.msrb.mxu1 %v12225_v48  ;;  %v12221_v60 = vld [vmem:[%s15212_s1 + $0x918] sm:$0xff] }
 0x454   : > { %4519 = vmatpush.bf16.msrb.mxu1 %v12224_v58 }
 0x458   : > { %v4221_v0 = vpop.f32.mrf.mxu3 }
 0x459   : > { %v13965_v17 = vadd.f32 %v4221_v0, %v4135_v53  ;;  %v12223_v0 = vld [vmem:[%s15212_s1 + $0x928] sm:$0xff] }
 0x45a   : > { %4520 = vmatpush.bf16.msrb.mxu1 %v12223_v0  ;;  %v12231_v53 = vld [vmem:[%s15212_s1 + $0x968] sm:$0xff] }
 0x45b   : > { %v4245_v28 = vmul.f32 %v13965_v17, %v13965_v17  ;;  %v4233_v31 = vmul.f32 %v13983_v30, %v13965_v17  ;;  %4449 = vmatpush.bf16.msrb.mxu0 %v12231_v53  ;;  %v12263_v53 = vld [vmem:[%s15212_s1 + $0xa68] sm:$0xff] }
 0x45d   : > { %v4248_v6 = vmul.f32 %v13983_v30, %v4245_v28  ;;  %v12246_v28 = vld [vmem:[%s15212_s1 + $0x9e0] sm:$0xff] }
 0x45e   : > { %4521 = vmatpush.bf16.msrb.mxu1 %v12222_v1  ;;  %v12281_v1 = vld [vmem:[%s15212_s1 + $0xaf8] sm:$0xff] }
 0x460   : > { %v4223_v25 = vpop.f32.mrf.mxu3 }
 0x461   : > { %v13963_v15 = vadd.f32 %v4223_v25, %v4136_v11  ;;  %v12239_v11 = vld [vmem:[%s15212_s1 + $0x9a8] sm:$0xff] }
 0x462   : > { %v12247_v25 = vld [vmem:[%s15212_s1 + $0x9e8] sm:$0xff]  ;;  %4612 = vmatpush.bf16.msrb.mxu2 %v12239_v11  ;;  %4522 = vmatpush.bf16.msrb.mxu1 %v12221_v60 }
 0x463   : > { %v4246_v13 = vmul.f32 %v13963_v15, %v13963_v15  ;;  %v4234_v38 = vmul.f32 %v13974_v7, %v13963_v15  ;;  %4717 = vmatpush.bf16.msrb.mxu3 %v12247_v25  ;;  %v12257_v25 = vld [vmem:[%s15212_s1 + $0xa38] sm:$0xff] }
 0x465   : > { %v4249_v35 = vmul.f32 %v13974_v7, %v4246_v13  ;;  %v4236_v23 = vadd.f32 %v4234_v38, %v4233_v31  ;;  %v12230_v31 = vld [vmem:[%s15212_s1 + $0x960] sm:$0xff] }
 0x466   : > { %4450 = vmatpush.bf16.msrb.mxu0 %v12230_v31  ;;  %v12272_v31 = vld [vmem:[%s15212_s1 + $0xab0] sm:$0xff] }
 0x467   : > { %v4251_v41 = vadd.f32 %v4249_v35, %v4248_v6  ;;  %4718 = vmatpush.bf16.msrb.mxu3 %v12246_v28 }
 0x468   : > { %v4226_v26 = vpop.f32.mrf.mxu3 }
 0x469   : > { %v13978_v29 = vadd.f32 %v4226_v26, %v4137_v18  ;;  %v12238_v18 = vld [vmem:[%s15212_s1 + $0x9a0] sm:$0xff]  ;;  %v12220_v26 = vld [vmem:[%s15212_s1 + $0x910] sm:$0xff] }
 0x46a   : > { %4613 = vmatpush.bf16.msrb.mxu2 %v12238_v18  ;;  %4523 = vmatpush.bf16.msrb.mxu1 %v12220_v26 }
 0x46b   : > { %v4235_v20 = vmul.f32 %v13991_v39, %v13978_v29  ;;  %v4247_v19 = vmul.f32 %v13978_v29, %v13978_v29 }
 0x46d   : > { %v4237_v27 = vsel %vm877_vm4, %v4235_v20, 0.0  ;;  %v4250_v40 = vmul.f32 %v13991_v39, %v4247_v19  ;;  %v12237_v20 = vld [vmem:[%s15212_s1 + $0x998] sm:$0xff] }
 0x46e   : > { %v4238_v47 = vadd.f32 %v4237_v27, %v4236_v23  ;;  %v12245_v19 = vld [vmem:[%s15212_s1 + $0x9d8] sm:$0xff]  ;;  %v12219_v23 = vld [vmem:[%s15212_s1 + $0x908] sm:$0xff]  ;;  %4614 = vmatpush.bf16.msrb.mxu2 %v12237_v20 }
 0x46f   : > { %v4252_v12 = vsel %vm877_vm4, %v4250_v40, 0.0  ;;  %v12229_v27 = vld [vmem:[%s15212_s1 + $0x958] sm:$0xff]  ;;  %4719 = vmatpush.bf16.msrb.mxu3 %v12245_v19  ;;  %4524 = vmatpush.bf16.msrb.mxu1 %v12219_v23  ;;  %v12280_v19 = vld [vmem:[%s15212_s1 + $0xaf0] sm:$0xff] }
 0x470   : > { %v4239_v14 = vrot.slane %v4238_v47, 4  ;;  %v4253_v50 = vadd.f32 %v4252_v12, %v4251_v41  ;;  %v4228_v21 = vpop.f32.mrf.mxu3  ;;  %v12236_v41 = vld [vmem:[%s15212_s1 + $0x990] sm:$0xff]  ;;  %4451 = vmatpush.bf16.msrb.mxu0 %v12229_v27 }
 0x471   : > { %v12256_v27 = vld [vmem:[%s15212_s1 + $0xa30] sm:$0xff] }
 0x472   : > { %v4240_v34 = vadd.f32 %v4239_v14, %v4238_v47  ;;  %v4254_v63 = vrot.slane %v4253_v50, 4  ;;  %v12244_v47 = vld [vmem:[%s15212_s1 + $0x9d0] sm:$0xff]  ;;  %v12618_v14 = vld [vmem:[%s15213_s2 + $0x3] ss:$0 sm:$0xff]  ;;  %4615 = vmatpush.bf16.msrb.mxu2 %v12236_v41 }
 0x473   : > { %4720 = vmatpush.bf16.msrb.mxu3 %v12244_v47 }
 0x474   : > { %v4241_v51 = vrot.slane %v4240_v34, 2  ;;  %v4255_v42 = vadd.f32 %v4254_v63, %v4253_v50  ;;  %v12218_v50 = vld [vmem:[%s15212_s1 + $0x900] sm:$0xff]  ;;  %v12265_v63 = vld [vmem:[%s15212_s1 + $0xa78] sm:$0xff] }
 0x475   : > { %4525 = vmatpush.bf16.msrb.mxu1 %v12218_v50  ;;  %v12271_v50 = vld [vmem:[%s15212_s1 + $0xaa8] sm:$0xff] }
 0x476   : > { %v4242_v52 = vadd.f32 %v4241_v51, %v4240_v34  ;;  %v4256_v49 = vrot.slane %v4255_v42, 2  ;;  %v12228_v34 = vld [vmem:[%s15212_s1 + $0x950] sm:$0xff] }
 0x477   : > { %4452 = vmatpush.bf16.msrb.mxu0 %v12228_v34  ;;  %v4333_v34 = vld [vmem:[#allocation2 + $0xc] sm:$0x7] }
 0x478   : > { %v4243_v24 = vrot.slane %v4242_v52, 1  ;;  %v4257_v36 = vadd.f32 %v4256_v49, %v4255_v42  ;;  %v12619_v49 = vld [vmem:[%s15214_s3 + $0x3] ss:$0 sm:$0xff] }
 0x479   : > { %4914 = vmatpush.bf16.msra.mxu1 %v12265_v63  ;;  %v12279_v63 = vld [vmem:[%s15212_s1 + $0xae8] sm:$0xff] }
 0x47a   : > { %v4244_v54 = vadd.f32 %v4243_v24, %v4242_v52  ;;  %v4258_v55 = vrot.slane %v4257_v36, 1  ;;  %v12235_v24 = vld [vmem:[%s15212_s1 + $0x988] sm:$0xff] }
 0x47b   : > { %4616 = vmatpush.bf16.msrb.mxu2 %v12235_v24  ;;  %v12254_v24 = vld [vmem:[%s15212_s1 + $0xa20] sm:$0xff] }
 0x47c   : > { %v4259_v56 = vadd.f32 %v4258_v55, %v4257_v36  ;;  %v14004_v57 = vmul.f32 0.0625, %v4244_v54  ;;  %v12227_v55 = vld [vmem:[%s15212_s1 + $0x948] sm:$0xff] }
 0x47d   : > { %4453 = vmatpush.bf16.msrb.mxu0 %v12227_v55  ;;  %v12253_v55 = vld [vmem:[%s15212_s1 + $0xa18] sm:$0xff] }
 0x47e   : > { %v4261_v46 = vmul.f32 0.0625, %v4259_v56  ;;  %v4262_v59 = vmul.f32 %v14004_v57, %v14004_v57  ;;  %v4264_v61 = vsub.f32 %v13965_v17, %v14004_v57  ;;  %v4266_v22 = vsub.f32 %v13978_v29, %v14004_v57  ;;  %v12243_v17 = vld [vmem:[%s15212_s1 + $0x9c8] sm:$0xff]  ;;  %v4297_v29 = vld [vmem:[#allocation2] sm:$0x8] }
 0x47f   : > { %v4265_v21 = vsub.f32 %v13963_v15, %v14004_v57  ;;  %v12264_v56 = vld [vmem:[%s15212_s1 + $0xa70] sm:$0xff]  ;;  %v4300_v57 = vld [vmem:[#allocation2 + $0xc] sm:$0x7]  ;;  %4721 = vmatpush.bf16.msrb.mxu3 %v12243_v17 }
 0x480   : > { %v4263_v5 = vsub.f32 %v4261_v46, %v4262_v59  ;;  %v4304_v0 = vunpack.c.l.bf16 %v4300_v57  ;;  %4915 = vmatpush.bf16.msra.mxu1 %v12264_v56  ;;  %v12260_v17 = vld [vmem:[%s15212_s1 + $0xa50] sm:$0xff] }
 0x481   : > { %4454 = vmatpush.bf16.msrb.mxu0 %v12226_v9  ;;  %v12276_v9 = vld [vmem:[%s15212_s1 + $0xad0] sm:$0xff] }
 0x482   : > { %v4267_v2 = vadd.f32 1e-05, %v4263_v5  ;;  %v4301_v5 = vunpack.c.l.bf16 %v4297_v29 }
 0x483   : > { %4722 = vmatpush.bf16.msrb.mxu3 %v12242_v4 }
 0x484   : > { %12634 = vrsqrt.f32 %v4267_v2  ;;  %vm4274_vm8 = vweird.f32 %v4267_v2  ;;  %4916 = vmatpush.bf16.msra.mxu1 %v12263_v53  ;;  %v12258_v53 = vld [vmem:[%s15212_s1 + $0xa40] sm:$0xff] }
 0x485   : > { %4824 = vmatpush.bf16.msra.mxu0 %v12257_v25  ;;  %v12252_v25 = vld [vmem:[%s15212_s1 + $0xa10] sm:$0xff] }
 0x487   : > { %5128 = vmatpush.bf16.msra.mxu3 %v12281_v1 }
 0x489   : > { %4825 = vmatpush.bf16.msra.mxu0 %v12256_v27 }
 0x48a   : > { %v12635_v13 = vpop.eup %12634 }
 0x48b   : > { %v4269_v38 = vmul.f32 %v12635_v13, %v4267_v2  ;;  %vm4275_vm15 = vweird.f32 %v12635_v13  ;;  %5129 = vmatpush.bf16.msra.mxu3 %v12280_v19 }
 0x48c   : > { %vm4276_vm9 = vmor %vm4274_vm8, %vm4275_vm15 }
 0x48d   : > { %v4270_v35 = vmul.f32 %v12635_v13, %v4269_v38 }
 0x48f   : > { %v4271_v6 = vmul.f32 0.5, %v4270_v35  ;;  %5130 = vmatpush.bf16.msra.mxu3 %v12279_v63 }
 0x491   : > { %v4272_v40 = vsub.f32 1.5, %v4271_v6 }
 0x493   : > { %v4273_v12 = vmul.f32 %v12635_v13, %v4272_v40  ;;  %v12262_v40 = vld [vmem:[%s15212_s1 + $0xa60] sm:$0xff] }
 0x494   : > { %4917 = vmatpush.bf16.msra.mxu1 %v12262_v40  ;;  %v12251_v40 = vld [vmem:[%s15212_s1 + $0xa08] sm:$0xff] }
 0x495   : > { %v4277_v51 = vsel %vm4276_vm9, %v12635_v13, %v4273_v12 }
 0x496   : > { %v4278_v42 = vmul.f32 %v4277_v51, %v4264_v61  ;;  %v4279_v52 = vmul.f32 %v4277_v51, %v4265_v21  ;;  %v4280_v15 = vmul.f32 %v4277_v51, %v4266_v22  ;;  %v4298_v61 = vld [vmem:[#allocation2 + $0x4] sm:$0xff]   ;;  %v12234_v22 = vld [vmem:[%s15212_s1 + $0x980] sm:$0xff] }
 0x497   : > { %v4302_v10 = vunpack.c.l.bf16 %v4298_v61  ;;  %v4303_v11 = vunpack.c.h.bf16 %v4298_v61  ;;  %4617 = vmatpush.bf16.msrb.mxu2 %v12234_v22 }
 0x498   : > { %v4286_v36 = vmul.f32 %v12618_v14, %v4278_v42  ;;  %v4287_v48 = vmul.f32 %v12618_v14, %v4279_v52  ;;  %v4288_v54 = vmul.f32 %v12618_v14, %v4280_v15  ;;  %v12255_v42 = vld [vmem:[%s15212_s1 + $0xa28] sm:$0xff]  ;;  %v12261_v52 = vld [vmem:[%s15212_s1 + $0xa58] sm:$0xff]  ;;  %v12270_v15 = vld [vmem:[%s15212_s1 + $0xaa0] sm:$0xff] }
 0x499   : > { %4826 = vmatpush.bf16.msra.mxu0 %v12255_v42  ;;  %4918 = vmatpush.bf16.msra.mxu1 %v12261_v52 }
 0x49a   : > { %v4294_v58 = vadd.f32 %v12619_v49, %v4286_v36  ;;  %v4295_v46 = vadd.f32 %v12619_v49, %v4287_v48  ;;  %v4296_v59 = vadd.f32 %v12619_v49, %v4288_v54  ;;  %v12278_v49 = vld [vmem:[%s15212_s1 + $0xae0] sm:$0xff]  ;;  %v12269_v36 = vld [vmem:[%s15212_s1 + $0xa98] sm:$0xff] }
 0x49b   : > { %5019 = vmatpush.bf16.msra.mxu2 %v12273_v8  ;;  %v12277_v48 = vld [vmem:[%s15212_s1 + $0xad8] sm:$0xff]  ;;  %5131 = vmatpush.bf16.msra.mxu3 %v12278_v49 }
 0x49c   : > { %v4308_v2 = vrot.slane %v4294_v58, 1  ;;  %v4309_v33 = vrot.slane %v4295_v46, 1  ;;  %v4311_v45 = vrot.slane %v4296_v59, 1  ;;  %v12259_v46 = vld [vmem:[%s15212_s1 + $0xa48] sm:$0xff] }
 0x49d   : > { %4827 = vmatpush.bf16.msra.mxu0 %v12254_v24  ;;  %4919 = vmatpush.bf16.msra.mxu1 %v12260_v17 }
 0x49e   : > { %v4310_v60 = vsel %vm465_vm1, %v4308_v2, %v4309_v33  ;;  %v4312_v13 = vsel %vm465_vm1, %v4309_v33, %v4311_v45  ;;  %v4317_v18 = vadd.f32 %v4308_v2, %v4301_v5  ;;  %v4320_v28 = vadd.f32 %v4311_v45, %v4304_v0  ;;  %v12268_v33 = vld [vmem:[%s15212_s1 + $0xa90] sm:$0xff] }
 0x49f   : > { %v4318_v38 = vadd.f32 %v4310_v60, %v4302_v10  ;;  %v4319_v26 = vadd.f32 %v4312_v13, %v4303_v11  ;;  %5020 = vmatpush.bf16.msra.mxu2 %v12272_v31  ;;  %5132 = vmatpush.bf16.msra.mxu3 %v12277_v48  ;;  %v12267_v31 = vld [vmem:[%s15212_s1 + $0xa88] sm:$0xff] }
 0x4a0   : > { %v4321_v35 = vmul.f32 %v4317_v18, %v13480_v32  ;;  %v4324_v20 = vmul.f32 %v4320_v28, %v13494_v3 }
 0x4a1   : > { %v4322_v6 = vmul.f32 %v4318_v38, %v13513_v62  ;;  %v4323_v23 = vmul.f32 %v4319_v26, %v13517_v37  ;;  %4828 = vmatpush.bf16.msra.mxu0 %v12253_v55  ;;  %4920 = vmatpush.bf16.msra.mxu1 %v12259_v46 }
 0x4a2   : > { %v4325_v41 = vpack.c.bf16 %v4321_v35, %v4321_v35  ;;  %v4328_v47 = vpack.c.bf16 %v4324_v20, %v4324_v20  ;;  %v12275_v20 = vld [vmem:[%s15212_s1 + $0xac8] sm:$0xff] }
 0x4a3   : > { %v4326_v12 = vpack.c.bf16 %v4322_v6, %v4322_v6  ;;  %v4327_v14 = vpack.c.bf16 %v4323_v23, %v4323_v23  ;;  %5021 = vmatpush.bf16.msra.mxu2 %v12271_v50  ;;  %5133 = vmatpush.bf16.msra.mxu3 %v12276_v9  ;;  %v12274_v50 = vld [vmem:[%s15212_s1 + $0xac0] sm:$0xff]  ;;  %v12285_v9 = vld [vmem:[%s15212_s1 + $0xb18] sm:$0xff] }
 0x4a4   : > { %v4329_v21 = vsel %vm13192_vm13, %v4325_v41, %v4297_v29  ;;  %v4334_v51 = vsel %vm13230_vm7, %v4328_v47, %v4333_v34  ;;  %v12289_v34 = vld [vmem:[%s15212_s1 + $0xb38] sm:$0xff] }
 0x4a5   : > { %4330 = vst [vmem:[#allocation2] sm:$0x8] %v4329_v21  ;;  %4829 = vmatpush.bf16.msra.mxu0 %v12252_v25  ;;  %4921 = vmatpush.bf16.msra.mxu1 %v12258_v53  ;;  %v12250_v21 = vld [vmem:[%s15212_s1 + $0xa00] sm:$0xff] }
 0x4a6   : > { %4331 = vst [vmem:[#allocation2 + $0x4] sm:$0xf] %v4326_v12  ;;  %v12266_v12 = vld [vmem:[%s15212_s1 + $0xa80] sm:$0xff] }
 0x4a7   : > { %4332 = vst [vmem:[#allocation2 + $0x8] sm:$0xf] %v4327_v14  ;;  %5022 = vmatpush.bf16.msra.mxu2 %v12270_v15  ;;  %5134 = vmatpush.bf16.msra.mxu3 %v12275_v20  ;;  %v5040_v15 = vld [vmem:[#allocation2 + $0x10] sm:$0x3] }
 0x4a8   : > { %4335 = vst [vmem:[#allocation2 + $0xc] sm:$0x7] %v4334_v51  ;;  %v12288_v51 = vld [vmem:[%s15212_s1 + $0xb30] sm:$0xff]  ;;  %v5059_v48 = vunpack.c.l.b16 %v5040_v15 }
 0x4a9   : > { %4830 = vmatpush.bf16.msra.mxu0 %v12251_v40 }
 0x4ab   : > { %5023 = vmatpush.bf16.msra.mxu2 %v12269_v36  ;;  %5135 = vmatpush.bf16.msra.mxu3 %v12274_v50 }
 0x4ac   : > { %v12587_v54 = vld [vmem:[#allocation2] sm:$0xe] }
 0x4ad   : > { %v4631_v29 = vld [vmem:[#allocation2] sm:$0x8]  ;;  %v12586_v57 = vld [vmem:[#allocation2] sm:$0xf0]  ;;  %4831 = vmatpush.bf16.msra.mxu0 %v12250_v21 }
 0x4ae   : > { %v12539_v56 = vld [vmem:[#allocation2] sm:$0xff]   ;;  %v4656_v58 = vunpack.c.l.b16 %v4631_v29  ;;  %v4633_v61 = vld [vmem:[#allocation2 + $0x8] sm:$0xf]  ;;  %v12588_v4 = vor.u32 %v12587_v54, %v12586_v57  ;;  %v12287_v54 = vld [vmem:[%s15212_s1 + $0xb28] sm:$0xff] }
 0x4af   : > { %4526 = vmatmul.bf16.vlgmr.msrb.gmra.mxu1 %v12539_v56  ;;  %v14195_v59 = vld [vmem:[#allocation2 + $0x4] sm:$0xff]   ;;  %v4385_v22 = vshll.u32 %v12539_v56, 16  ;;  %v4634_v8 = vld [vmem:[#allocation2 + $0xc] sm:$0x3]  ;;  %v14199_v2 = vunpack.c.l.b16 %v4633_v61  ;;  %v4383_v13 = vshrl.u32 %v12539_v56, 16  ;;  %5024 = vmatpush.bf16.msra.mxu2 %v12268_v33  ;;  %v12286_v61 = vld [vmem:[%s15212_s1 + $0xb20] sm:$0xff] }
 0x4b0   : > { %v4379_v5 = vunpack.c.h.b16 %v14195_v59  ;;  %v4657_v0 = vunpack.c.l.b16 %v14195_v59  ;;  %v4659_v45 = vunpack.c.l.b16 %v4634_v8  ;;  %v4557_v18 = vrot.slane %v12588_v4, 1  ;;  %v4338_v27 = vld [vmem:[#allocation2 + $0x8] sm:$0x7]  ;;  %v4935_v42 = vld [vmem:[#allocation2 + $0x4] sm:$0xc] }
 0x4b1   : > { %v4387_v11 = vrot.slane %v4385_v22, 1  ;;  %v4466_v14 = vunpack.c.l.b16 %v4338_v27  ;;  %v14246_v52 = vld [vmem:[#allocation2 + $0x8] sm:$0xff]   ;;  %v4960_v36 = vunpack.c.l.b16 %v4935_v42  ;;  %v4938_v57 = vld [vmem:[#allocation2 + $0x10] sm:$0x1]  ;;  %v5149_v21 = vld [vmem:[#allocation2 + $0x4] sm:$0x8] }
 0x4b2   : > { %v4381_v1 = vpack.c.b16 %v4379_v5, %v4379_v5  ;;  %v14209_v10 = vpack.c.b16 %v4657_v0, %v4656_v58  ;;  %v4661_v60 = vpack.c.b16 %v4659_v45, %v14199_v2  ;;  %v4736_v49 = vld [vmem:[#allocation2 + $0xc] sm:$0x7]  ;;  %v12544_v24 = vunpack.c.l.b16 %v14246_v52 }
 0x4b3   : > { %v4388_v6 = vor.u32 %v4387_v11, %v4383_v13  ;;  %5025 = vmatpush.bf16.msra.mxu2 %v12267_v31  ;;  %v4467_v63 = vpack.c.b16 %v4466_v14, %v4466_v14  ;;  %v12545_v17 = vunpack.c.h.b16 %v14246_v52  ;;  %v4755_v29 = vunpack.c.l.b16 %v4736_v49  ;;  %v12284_v31 = vld [vmem:[%s15212_s1 + $0xb10] sm:$0xff] }
 0x4b4   : > { %v4558_v28 = vrot.slane %v4381_v1, 1  ;;  %v4662_v38 = vrot.slane %v14209_v10, 3  ;;  %v4390_v26 = vshll.u32 %v4381_v1, 16  ;;  %v4663_v35 = vrot.slane %v4661_v60, 3 }
 0x4b5   : > { %v4394_v55 = vshrl.u32 %v4381_v1, 16  ;;  %v4964_v58 = vpack.c.b16 %v12544_v24, %v4960_v36  ;;  %v5060_v46 = vpack.c.b16 %v5059_v48, %v12545_v17  ;;  %v4756_v22 = vpack.c.b16 %v4755_v29, %v14199_v2 }
 0x4b6   : > { %v4559_v19 = vsel %vm465_vm1, %v4557_v18, %v4558_v28  ;;  %v4392_v23 = vrot.slane %v4390_v26, 1  ;;  %v4664_v41 = vsel %vm571_vm2, %v4662_v38, %v4663_v35  ;;  %v4963_v5 = vunpack.c.l.b16 %v4938_v57 }
 0x4b7   : > { %4618 = vmatmul.bf16.vlgmr.msrb.gmra.mxu2 %v4559_v19  ;;  %4723 = vmatmul.bf16.vlgmr.msrb.gmra.mxu3 %v4664_v41  ;;  %v5062_v4 = vshrl.u32 %v4964_v58, 16  ;;  %v5065_v8 = vshll.u32 %v4964_v58, 16  ;;  %v5070_v33 = vshrl.u32 %v5060_v46, 16  ;;  %v5073_v45 = vshll.u32 %v5060_v46, 16 }
 0x4b8   : > { %v4393_v47 = vsel %vm289_vm0, %v4388_v6, %v4392_v23  ;;  %5026 = vmatpush.bf16.msra.mxu2 %v12266_v12  ;;  %v4396_v56 = vor.u32 %v4394_v55, %v4392_v23  ;;  %v4758_v1 = vshrl.u32 %v14209_v10, 16  ;;  %v4761_v11 = vshll.u32 %v14209_v10, 16  ;;  %v12282_v12 = vld [vmem:[%s15212_s1 + $0xb00] sm:$0xff] }
 0x4b9   : > { %4455 = vmatmul.bf16.vlgmr.msrb.gmra.mxu0 %v4393_v47  ;;  %v4766_v25 = vshrl.u32 %v4756_v22, 16  ;;  %v4769_v53 = vshll.u32 %v4756_v22, 16  ;;  %v4862_v60 = vpack.c.b16 %v14199_v2, %v4657_v0  ;;  %v4965_v13 = vpack.c.b16 %v4963_v5, %v12545_v17  ;;  %v12283_v0 = vld [vmem:[%s15212_s1 + $0xb08] sm:$0xff] }
 0x4ba   : > { %5223 = vmatpush.bf16.msrb.mxu0 %v12289_v34  ;;  %v5064_v18 = vrot.slane %v5062_v4, 2  ;;  %v5072_v38 = vrot.slane %v5070_v33, 2  ;;  %v5075_v26 = vrot.slane %v5073_v45, 3  ;;  %v4763_v20 = vrot.slane %v4761_v11, 4 }
 0x4bb   : > { %v4768_v10 = vrot.slane %v4766_v25, 3  ;;  %v4771_v19 = vrot.slane %v4769_v53, 4  ;;  %v4966_v6 = vrot.slane %v4964_v58, 2  ;;  %v4967_v23 = vrot.slane %v4965_v13, 2 }
 0x4bc   : > { %v5076_v27 = vor.u32 %v5075_v26, %v5072_v38  ;;  %v4863_v50 = vpack.c.b16 %v4755_v29, %v4755_v29  ;;  %v5168_v34 = vunpack.c.l.b16 %v5149_v21  ;;  %v5171_v42 = vrot.slane %v5060_v46, 3 }
 0x4bd   : > { %v4772_v40 = vor.u32 %v4771_v19, %v4768_v10  ;;  %v4968_v41 = vsel %vm877_vm4, %v4966_v6, %v4967_v23 }
 0x4be   : > { %5224 = vmatpush.bf16.msrb.mxu0 %v12288_v51 }
 0x4bf   : > { %4531 = vmatmul.bf16.gmra.mxu1 %v4467_v63  ;;  %v5169_v63 = vpack.c.b16 %v12544_v24, %v5168_v34 }
 0x4c1   : > { %v5170_v51 = vrot.slane %v5169_v63, 3 }
 0x4c2   : > { %5225 = vmatpush.bf16.msrb.mxu0 %v12287_v54 }
 0x4c3   : > { %v5172_v15 = vsel %vm571_vm2, %v5170_v51, %v5171_v42 }
 0x4c6   : > { %5226 = vmatpush.bf16.msrb.mxu0 %v12286_v61 }
 0x4c7   : > { %4623 = vmatmul.bf16.gmra.mxu2 %v4558_v28  ;;  %4728 = vmatmul.bf16.gmra.mxu3 %v4663_v35  ;;  %v5067_v28 = vrot.slane %v5065_v8, 3  ;;  %v4760_v35 = vrot.slane %v4758_v1, 3 }
 0x4c9   : > { %4460 = vmatmul.bf16.gmra.mxu0 %v4396_v56  ;;  %v5068_v59 = vor.u32 %v5067_v28, %v5064_v18  ;;  %v4764_v2 = vor.u32 %v4763_v20, %v4760_v35 }
 0x4ca   : > { %5227 = vmatpush.bf16.msrb.mxu0 %v12285_v9 }
 0x4cb   : > { %v5077_v47 = vsel %vm973_vm5, %v5068_v59, %v5076_v27  ;;  %v4773_v14 = vsel %vm667_vm3, %v4764_v2, %v4772_v40 }
 0x4ce   : > { %5228 = vmatpush.bf16.msrb.mxu0 %v12284_v31 }
 0x4cf   : > { %4922 = vmatmul.bf16.vlgmr.msra.gmra.mxu1 %v4862_v60 }
 0x4d2   : > { %5229 = vmatpush.bf16.msrb.mxu0 %v12283_v0 }
 0x4d6   : > { %5230 = vmatpush.bf16.msrb.mxu0 %v12282_v12 }
 0x4d7   : > { %5027 = vmatmul.bf16.vlgmr.msra.gmra.mxu2 %v4968_v41  ;;  %5136 = vmatmul.bf16.vlgmr.msra.gmra.mxu3 %v5077_v47 }
 0x4d9   : > { %4832 = vmatmul.bf16.vlgmr.msra.gmra.mxu0 %v4773_v14 }
 0x4df   : > { %4927 = vmatmul.bf16.gmra.mxu1 %v4863_v50 }
 0x4e7   : > { %5032 = vmatmul.bf16.gmra.mxu2 %v4967_v23  ;;  %5141 = vmatmul.bf16.gmra.mxu3 %v5076_v27 }
 0x4e9   : > { %4837 = vmatmul.bf16.gmra.mxu0 %v4772_v40 }
 0x4f9   : > { %5231 = vmatmul.bf16.vlgmr.msrb.gmra.mxu0 %v5172_v15 }
 0x509   : > { %5236 = vmatmul.bf16.gmra.mxu0 %v5171_v42 }
 0x52c   : > { %v4527_v49 = vpop.f32.mrf.mxu1 }
 0x534   : > { %v4529_v17 = vpop.f32.mrf.mxu1 }
 0x536   : > { %v4456_v36 = vpop.f32.mrf.mxu0 }
 0x537   : > { %v4528_v48 = vadd.f32 %v4527_v49, %v4456_v36 }
 0x53a   : > { %v4619_v54 = vpop.f32.mrf.mxu2  ;;  %v4724_v55 = vpop.f32.mrf.mxu3 }
 0x53b   : > { %v4628_v29 = vadd.f32 %v4619_v54, %v4528_v48 }
 0x53c   : > { %v4532_v56 = vpop.f32.mrf.mxu1 }
 0x53d   : > { %v4733_v57 = vadd.f32 %v4724_v55, %v4628_v29 }
 0x53e   : > { %v4458_v58 = vpop.f32.mrf.mxu0 }
 0x53f   : > { %v4530_v26 = vadd.f32 %v4529_v17, %v4458_v58 }
 0x542   : > { %v4621_v61 = vpop.f32.mrf.mxu2  ;;  %v4726_v22 = vpop.f32.mrf.mxu3 }
 0x543   : > { %v4629_v20 = vadd.f32 %v4621_v61, %v4530_v26 }
 0x544   : > { %v4534_v52 = vpop.f32.mrf.mxu1 }
 0x545   : > { %v4734_v19 = vadd.f32 %v4726_v22, %v4629_v20 }
 0x546   : > { %v4461_v24 = vpop.f32.mrf.mxu0 }
 0x547   : > { %v4533_v6 = vadd.f32 %v4532_v56, %v4461_v24 }
 0x54a   : > { %v4624_v5 = vpop.f32.mrf.mxu2  ;;  %v4729_v46 = vpop.f32.mrf.mxu3 }
 0x54b   : > { %v4630_v27 = vadd.f32 %v4624_v5, %v4533_v6  ;;  %v12297_v6 = vld [vmem:[%s15212_s1 + $0xb78] sm:$0xff] }
 0x54c   : > { %v4923_v4 = vpop.f32.mrf.mxu1  ;;  %5540 = vmatpush.bf16.msrb.mxu2 %v12297_v6  ;;  %v12315_v6 = vld [vmem:[%s15212_s1 + $0xc08] sm:$0xff] }
 0x54d   : > { %v4735_v47 = vadd.f32 %v4729_v46, %v4630_v27  ;;  %v12296_v27 = vld [vmem:[%s15212_s1 + $0xb70] sm:$0xff] }
 0x54e   : > { %v4463_v8 = vpop.f32.mrf.mxu0 }
 0x550   : > { %5541 = vmatpush.bf16.msrb.mxu2 %v12296_v27 }
 0x552   : > { %v4626_v33 = vpop.f32.mrf.mxu2  ;;  %v4731_v45 = vpop.f32.mrf.mxu3 }
 0x554   : > { %v4925_v9 = vpop.f32.mrf.mxu1 }
 0x556   : > { %v4833_v1 = vpop.f32.mrf.mxu0 }
 0x557   : > { %v4842_v2 = vadd.f32 %v4833_v1, %v4733_v57 }
 0x559   : > { %v4932_v12 = vadd.f32 %v4923_v4, %v4842_v2  ;;  %v12321_v2 = vld [vmem:[%s15212_s1 + $0xc38] sm:$0xff] }
 0x55a   : > { %v5028_v11 = vpop.f32.mrf.mxu2  ;;  %v5137_v25 = vpop.f32.mrf.mxu3  ;;  %5737 = vmatpush.bf16.msra.mxu0 %v12321_v2  ;;  %v12336_v2 = vld [vmem:[%s15212_s1 + $0xcb0] sm:$0xff] }
 0x55b   : > { %v5037_v21 = vadd.f32 %v5028_v11, %v4932_v12  ;;  %v12312_v12 = vld [vmem:[%s15212_s1 + $0xbf0] sm:$0xff] }
 0x55c   : > { %v4928_v53 = vpop.f32.mrf.mxu1 }
 0x55d   : > { %v5146_v42 = vadd.f32 %v5137_v25, %v5037_v21  ;;  %v12294_v21 = vld [vmem:[%s15212_s1 + $0xb60] sm:$0xff] }
 0x55e   : > { %v4835_v60 = vpop.f32.mrf.mxu0 }
 0x55f   : > { %v4843_v23 = vadd.f32 %v4835_v60, %v4734_v19 }
 0x561   : > { %v4933_v40 = vadd.f32 %v4925_v9, %v4843_v23 }
 0x562   : > { %v5030_v13 = vpop.f32.mrf.mxu2  ;;  %v5139_v18 = vpop.f32.mrf.mxu3 }
 0x563   : > { %v5038_v50 = vadd.f32 %v5030_v13, %v4933_v40  ;;  %v12295_v40 = vld [vmem:[%s15212_s1 + $0xb68] sm:$0xff] }
 0x564   : > { %v4930_v28 = vpop.f32.mrf.mxu1  ;;  %5542 = vmatpush.bf16.msrb.mxu2 %v12295_v40 }
 0x565   : > { %v5147_v63 = vadd.f32 %v5139_v18, %v5038_v50 }
 0x566   : > { %v4838_v38 = vpop.f32.mrf.mxu0 }
 0x567   : > { %v4844_v14 = vadd.f32 %v4838_v38, %v4735_v47 }
 0x568   : > { %5543 = vmatpush.bf16.msrb.mxu2 %v12294_v21 }
 0x569   : > { %v4934_v34 = vadd.f32 %v4928_v53, %v4844_v14  ;;  %v12320_v14 = vld [vmem:[%s15212_s1 + $0xc30] sm:$0xff] }
 0x56a   : > { %v5033_v31 = vpop.f32.mrf.mxu2  ;;  %v5142_v35 = vpop.f32.mrf.mxu3  ;;  %5738 = vmatpush.bf16.msra.mxu0 %v12320_v14 }
 0x56b   : > { %v5039_v49 = vadd.f32 %v5033_v31, %v4934_v34  ;;  %v12304_v34 = vld [vmem:[%s15212_s1 + $0xbb0] sm:$0xff] }
 0x56d   : > { %v5148_v48 = vadd.f32 %v5142_v35, %v5039_v49  ;;  %v12303_v49 = vld [vmem:[%s15212_s1 + $0xba8] sm:$0xff] }
 0x56e   : > { %v4840_v10 = vpop.f32.mrf.mxu0 }
 0x572   : > { %v5035_v59 = vpop.f32.mrf.mxu2  ;;  %v5144_v0 = vpop.f32.mrf.mxu3 }
 0x573   : > { %v12313_v0 = vld [vmem:[%s15212_s1 + $0xbf8] sm:$0xff] }
 0x574   : > { %5632 = vmatpush.bf16.msrb.mxu3 %v12313_v0  ;;  %v12299_v0 = vld [vmem:[%s15212_s1 + $0xb88] sm:$0xff] }
 0x576   : > { %v5232_v41 = vpop.f32.mrf.mxu0 }
 0x577   : > { %v14284_v17 = vadd.f32 %v5232_v41, %v5146_v42  ;;  %v12305_v41 = vld [vmem:[%s15212_s1 + $0xbb8] sm:$0xff]  ;;  %v12319_v42 = vld [vmem:[%s15212_s1 + $0xc28] sm:$0xff] }
 0x578   : > { %5469 = vmatpush.bf16.msrb.mxu1 %v12305_v41  ;;  %5633 = vmatpush.bf16.msrb.mxu3 %v12312_v12  ;;  %v12353_v12 = vld [vmem:[%s15212_s1 + $0xd38] sm:$0xff] }
 0x579   : > { %v5256_v54 = vmul.f32 %v14284_v17, %v14284_v17  ;;  %v5244_v57 = vmul.f32 %v13983_v30, %v14284_v17  ;;  %5739 = vmatpush.bf16.msra.mxu0 %v12319_v42 }
 0x57b   : > { %v5259_v52 = vmul.f32 %v13983_v30, %v5256_v54  ;;  %v12310_v54 = vld [vmem:[%s15212_s1 + $0xbe0] sm:$0xff] }
 0x57c   : > { %5470 = vmatpush.bf16.msrb.mxu1 %v12304_v34 }
 0x57e   : > { %v5234_v51 = vpop.f32.mrf.mxu0 }
 0x57f   : > { %v14282_v15 = vadd.f32 %v5234_v51, %v5147_v63  ;;  %v12311_v51 = vld [vmem:[%s15212_s1 + $0xbe8] sm:$0xff] }
 0x580   : > { %5634 = vmatpush.bf16.msrb.mxu3 %v12311_v51  ;;  %5471 = vmatpush.bf16.msrb.mxu1 %v12303_v49  ;;  %v12335_v51 = vld [vmem:[%s15212_s1 + $0xca8] sm:$0xff] }
 0x581   : > { %v5257_v36 = vmul.f32 %v14282_v15, %v14282_v15  ;;  %v5245_v29 = vmul.f32 %v13974_v7, %v14282_v15 }
 0x583   : > { %v5260_v58 = vmul.f32 %v13974_v7, %v5257_v36  ;;  %v5247_v24 = vadd.f32 %v5245_v29, %v5244_v57  ;;  %v12293_v36 = vld [vmem:[%s15212_s1 + $0xb58] sm:$0xff]  ;;  %v12318_v29 = vld [vmem:[%s15212_s1 + $0xc20] sm:$0xff]  ;;  %v12292_v57 = vld [vmem:[%s15212_s1 + $0xb50] sm:$0xff] }
 0x584   : > { %5544 = vmatpush.bf16.msrb.mxu2 %v12293_v36  ;;  %5635 = vmatpush.bf16.msrb.mxu3 %v12310_v54  ;;  %v12329_v36 = vld [vmem:[%s15212_s1 + $0xc78] sm:$0xff] }
 0x585   : > { %v5262_v4 = vadd.f32 %v5260_v58, %v5259_v52  ;;  %v12302_v58 = vld [vmem:[%s15212_s1 + $0xba0] sm:$0xff]  ;;  %5740 = vmatpush.bf16.msra.mxu0 %v12318_v29 }
 0x586   : > { %v5237_v55 = vpop.f32.mrf.mxu0  ;;  %5472 = vmatpush.bf16.msrb.mxu1 %v12302_v58 }
 0x587   : > { %v14292_v56 = vadd.f32 %v5237_v55, %v5148_v48 }
 0x588   : > { %5545 = vmatpush.bf16.msrb.mxu2 %v12292_v57 }
 0x589   : > { %v5246_v61 = vmul.f32 %v13991_v39, %v14292_v56  ;;  %v5258_v22 = vmul.f32 %v14292_v56, %v14292_v56 }
 0x58b   : > { %v5248_v5 = vsel %vm877_vm4, %v5246_v61, 0.0  ;;  %v5261_v46 = vmul.f32 %v13991_v39, %v5258_v22  ;;  %v12620_v22 = vld [vmem:[%s15213_s2 + $0x4] ss:$0 sm:$0xff] }
 0x58c   : > { %v5249_v8 = vadd.f32 %v5248_v5, %v5247_v24 }
 0x58d   : > { %v5263_v33 = vsel %vm877_vm4, %v5261_v46, 0.0  ;;  %v12309_v46 = vld [vmem:[%s15212_s1 + $0xbd8] sm:$0xff] }
 0x58e   : > { %v5250_v45 = vrot.slane %v5249_v8, 4  ;;  %v5264_v9 = vadd.f32 %v5263_v33, %v5262_v4  ;;  %v5239_v1 = vpop.f32.mrf.mxu0  ;;  %v12317_v4 = vld [vmem:[%s15212_s1 + $0xc18] sm:$0xff]  ;;  %5636 = vmatpush.bf16.msrb.mxu3 %v12309_v46 }
 0x58f   : > { %5741 = vmatpush.bf16.msra.mxu0 %v12317_v4  ;;  %v12334_v4 = vld [vmem:[%s15212_s1 + $0xca0] sm:$0xff] }
 0x590   : > { %v5251_v11 = vadd.f32 %v5250_v45, %v5249_v8  ;;  %v5265_v25 = vrot.slane %v5264_v9, 4  ;;  %v12621_v45 = vld [vmem:[%s15214_s3 + $0x4] ss:$0 sm:$0xff] }
 0x592   : > { %v5252_v53 = vrot.slane %v5251_v11, 2  ;;  %v5266_v60 = vadd.f32 %v5265_v25, %v5264_v9  ;;  %v12301_v9 = vld [vmem:[%s15212_s1 + $0xb98] sm:$0xff] }
 0x593   : > { %5473 = vmatpush.bf16.msrb.mxu1 %v12301_v9  ;;  %v12351_v9 = vld [vmem:[%s15212_s1 + $0xd28] sm:$0xff] }
 0x594   : > { %v5253_v13 = vadd.f32 %v5252_v53, %v5251_v11  ;;  %v5267_v18 = vrot.slane %v5266_v60, 2  ;;  %v12308_v53 = vld [vmem:[%s15212_s1 + $0xbd0] sm:$0xff] }
 0x595   : > { %5637 = vmatpush.bf16.msrb.mxu3 %v12308_v53  ;;  %v12333_v53 = vld [vmem:[%s15212_s1 + $0xc98] sm:$0xff] }
 0x596   : > { %v5254_v28 = vrot.slane %v5253_v13, 1  ;;  %v5268_v38 = vadd.f32 %v5267_v18, %v5266_v60  ;;  %v12316_v60 = vld [vmem:[%s15212_s1 + $0xc10] sm:$0xff] }
 0x597   : > { %5742 = vmatpush.bf16.msra.mxu0 %v12316_v60 }
 0x598   : > { %v5255_v26 = vadd.f32 %v5254_v28, %v5253_v13  ;;  %v5269_v31 = vrot.slane %v5268_v38, 1  ;;  %v12290_v13 = vld [vmem:[%s15212_s1 + $0xb40] sm:$0xff] }
 0x59a   : > { %v5270_v35 = vadd.f32 %v5269_v31, %v5268_v38  ;;  %v5271_v20 = vmul.f32 0.0625, %v5255_v26  ;;  %v12300_v26 = vld [vmem:[%s15212_s1 + $0xb90] sm:$0xff]  ;;  %v12337_v31 = vld [vmem:[%s15212_s1 + $0xcb8] sm:$0xff] }
 0x59b   : > { %5474 = vmatpush.bf16.msrb.mxu1 %v12300_v26  ;;  %5743 = vmatpush.bf16.msra.mxu0 %v12315_v6  ;;  %v12326_v26 = vld [vmem:[%s15212_s1 + $0xc60] sm:$0xff] }
 0x59c   : > { %v5272_v10 = vmul.f32 0.0625, %v5270_v35  ;;  %v5273_v19 = vmul.f32 %v5271_v20, %v5271_v20  ;;  %v5275_v52 = vsub.f32 %v14284_v17, %v5271_v20  ;;  %v5276_v24 = vsub.f32 %v14282_v15, %v5271_v20  ;;  %v12291_v17 = vld [vmem:[%s15212_s1 + $0xb48] sm:$0xff] }
 0x59d   : > { %v5277_v5 = vsub.f32 %v14292_v56, %v5271_v20  ;;  %5546 = vmatpush.bf16.msrb.mxu2 %v12291_v17  ;;  %v12328_v17 = vld [vmem:[%s15212_s1 + $0xc70] sm:$0xff] }
 0x59e   : > { %v5274_v23 = vsub.f32 %v5272_v10, %v5273_v19  ;;  %v12307_v19 = vld [vmem:[%s15212_s1 + $0xbc8] sm:$0xff] }
 0x59f   : > { %5638 = vmatpush.bf16.msrb.mxu3 %v12307_v19  ;;  %5475 = vmatpush.bf16.msrb.mxu1 %v12299_v0 }
 0x5a0   : > { %v5278_v59 = vadd.f32 1e-05, %v5274_v23 }
 0x5a1   : > { %5547 = vmatpush.bf16.msrb.mxu2 %v12290_v13  ;;  %v12327_v13 = vld [vmem:[%s15212_s1 + $0xc68] sm:$0xff] }
 0x5a2   : > { %12636 = vrsqrt.f32 %v5278_v59  ;;  %vm5285_vm11 = vweird.f32 %v5278_v59 }
 0x5a5   : > { %5936 = vmatpush.bf16.msra.mxu2 %v12337_v31  ;;  %v12341_v31 = vld [vmem:[%s15212_s1 + $0xcd8] sm:$0xff] }
 0x5a8   : > { %v12637_v47 = vpop.eup %12636 }
 0x5a9   : > { %v5280_v50 = vmul.f32 %v12637_v47, %v5278_v59  ;;  %vm5286_vm10 = vweird.f32 %v12637_v47  ;;  %5937 = vmatpush.bf16.msra.mxu2 %v12336_v2 }
 0x5aa   : > { %vm5287_vm12 = vmor %vm5285_vm11, %vm5286_vm10 }
 0x5ab   : > { %v5281_v63 = vmul.f32 %v12637_v47, %v5280_v50 }
 0x5ad   : > { %v5282_v48 = vmul.f32 0.5, %v5281_v63  ;;  %v12298_v63 = vld [vmem:[%s15212_s1 + $0xb80] sm:$0xff]  ;;  %5938 = vmatpush.bf16.msra.mxu2 %v12335_v51 }
 0x5ae   : > { %5476 = vmatpush.bf16.msrb.mxu1 %v12298_v63  ;;  %v12330_v63 = vld [vmem:[%s15212_s1 + $0xc80] sm:$0xff] }
 0x5af   : > { %v5283_v55 = vsub.f32 1.5, %v5282_v48 }
 0x5b1   : > { %v5284_v61 = vmul.f32 %v12637_v47, %v5283_v55  ;;  %5939 = vmatpush.bf16.msra.mxu2 %v12334_v4  ;;  %v12323_v4 = vld [vmem:[%s15212_s1 + $0xc48] sm:$0xff] }
 0x5b2   : > { %5846 = vmatpush.bf16.msra.mxu1 %v12329_v36 }
 0x5b3   : > { %v5288_v8 = vsel %vm5287_vm12, %v12637_v47, %v5284_v61  ;;  %v5350_v61 = vld [vmem:[#allocation3] sm:$0x8] }
 0x5b4   : > { %v5289_v15 = vmul.f32 %v5288_v8, %v5275_v52  ;;  %v5290_v33 = vmul.f32 %v5288_v8, %v5276_v24  ;;  %v5291_v56 = vmul.f32 %v5288_v8, %v5277_v5  ;;  %v12352_v52 = vld [vmem:[%s15212_s1 + $0xd30] sm:$0xff] }
 0x5b5   : > { %5940 = vmatpush.bf16.msra.mxu2 %v12333_v53  ;;  %v12360_v53 = vld [vmem:[%s15212_s1 + $0xd70] sm:$0xff] }
 0x5b6   : > { %v5297_v1 = vmul.f32 %v12620_v22, %v5289_v15  ;;  %v5298_v11 = vmul.f32 %v12620_v22, %v5290_v33  ;;  %v5299_v25 = vmul.f32 %v12620_v22, %v5291_v56  ;;  %v12344_v22 = vld [vmem:[%s15212_s1 + $0xcf0] sm:$0xff]  ;;  %5847 = vmatpush.bf16.msra.mxu1 %v12328_v17  ;;  %v12338_v17 = vld [vmem:[%s15212_s1 + $0xcc0] sm:$0xff] }
 0x5b8   : > { %v5305_v18 = vadd.f32 %v12621_v45, %v5297_v1  ;;  %v5306_v28 = vadd.f32 %v12621_v45, %v5298_v11  ;;  %v5307_v38 = vadd.f32 %v12621_v45, %v5299_v25  ;;  %v12343_v45 = vld [vmem:[%s15212_s1 + $0xce8] sm:$0xff]  ;;  %v5355_v25 = vld [vmem:[#allocation3 + $0xc] sm:$0x7] }
 0x5ba   : > { %v5308_v35 = vmax.f32 %v5305_v18, 0.0  ;;  %v5309_v20 = vmax.f32 %v5306_v28, 0.0  ;;  %v5310_v10 = vmax.f32 %v5307_v38, 0.0  ;;  %v12342_v18 = vld [vmem:[%s15212_s1 + $0xce0] sm:$0xff]  ;;  %v12332_v38 = vld [vmem:[%s15212_s1 + $0xc90] sm:$0xff]  ;;  %5848 = vmatpush.bf16.msra.mxu1 %v12327_v13 }
 0x5bb   : > { %v12350_v28 = vld [vmem:[%s15212_s1 + $0xd20] sm:$0xff]  ;;  %5941 = vmatpush.bf16.msra.mxu2 %v12332_v38 }
 0x5bc   : > { %v5311_v23 = vmul.f32 %v13983_v30, %v5308_v35  ;;  %v5312_v59 = vmul.f32 %v13974_v7, %v5309_v20  ;;  %v5313_v27 = vmul.f32 %v13991_v39, %v5310_v10  ;;  %v12306_v7 = vld [vmem:[%s15212_s1 + $0xbc0] sm:$0xff]  ;;  %v12345_v39 = vld [vmem:[%s15212_s1 + $0xcf8] sm:$0xff]  ;;  %v12331_v10 = vld [vmem:[%s15212_s1 + $0xc88] sm:$0xff] }
 0x5bd   : > { %v12314_v30 = vld [vmem:[%s15212_s1 + $0xc00] sm:$0xff]  ;;  %5639 = vmatpush.bf16.msrb.mxu3 %v12306_v7  ;;  %v12349_v35 = vld [vmem:[%s15212_s1 + $0xd18] sm:$0xff] }
 0x5be   : > { %v5314_v40 = vpack.c.bf16 %v5311_v23, %v5311_v23  ;;  %v5315_v41 = vpack.c.bf16 %v5312_v59, %v5312_v59  ;;  %v5316_v47 = vpack.c.bf16 %v5313_v27, %v5313_v27  ;;  %5744 = vmatpush.bf16.msra.mxu0 %v12314_v30  ;;  %v12325_v20 = vld [vmem:[%s15212_s1 + $0xc58] sm:$0xff]  ;;  %5849 = vmatpush.bf16.msra.mxu1 %v12326_v26 }
 0x5bf   : > { %5942 = vmatpush.bf16.msra.mxu2 %v12331_v10  ;;  %v5960_v10 = vld [vmem:[#allocation3 + $0x10] sm:$0x1] }
 0x5c0   : > { %v5318_v14 = vshll.u32 %v5314_v40, 16  ;;  %v5321_v50 = vshrl.u32 %v5314_v40, 16  ;;  %v5327_v21 = vshll.u32 %v5315_v41, 16  ;;  %v5331_v34 = vshrl.u32 %v5315_v41, 16 }
 0x5c1   : > { %v5337_v42 = vshll.u32 %v5316_v47, 16  ;;  %v5341_v49 = vshrl.u32 %v5316_v47, 16  ;;  %6041 = vmatpush.bf16.msra.mxu3 %v12345_v39 }
 0x5c2   : > { %v5320_v48 = vrot.slane %v5318_v14, 5  ;;  %v5323_v54 = vrot.slane %v5321_v50, 4  ;;  %v5329_v29 = vrot.slane %v5327_v21, 5  ;;  %v5333_v55 = vrot.slane %v5331_v34, 4  ;;  %6150 = vmatpush.bf16.msrb.mxu0 %v12353_v12  ;;  %v12340_v14 = vld [vmem:[%s15212_s1 + $0xcd0] sm:$0xff]  ;;  %5850 = vmatpush.bf16.msra.mxu1 %v12325_v20 }
 0x5c3   : > { %v5339_v57 = vrot.slane %v5337_v42, 5  ;;  %v5343_v58 = vrot.slane %v5341_v49, 4  ;;  %v12348_v50 = vld [vmem:[%s15212_s1 + $0xd10] sm:$0xff]  ;;  %5943 = vmatpush.bf16.msra.mxu2 %v12330_v63 }
 0x5c4   : > { %v5324_v24 = vor.u32 %v5323_v54, %v5320_v48  ;;  %v5334_v5 = vor.u32 %v5333_v55, %v5329_v29  ;;  %v5351_v46 = vsel %vm13192_vm13, %v5320_v48, %v5350_v61  ;;  %v12324_v49 = vld [vmem:[%s15212_s1 + $0xc50] sm:$0xff] }
 0x5c5   : > { %v5344_v8 = vor.u32 %v5343_v58, %v5339_v57  ;;  %5352 = vst [vmem:[#allocation3] sm:$0x8] %v5351_v46  ;;  %6042 = vmatpush.bf16.msra.mxu3 %v12344_v22  ;;  %v12339_v58 = vld [vmem:[%s15212_s1 + $0xcc8] sm:$0xff] }
 0x5c6   : > { %v5325_v15 = vrot.slane %v5324_v24, 4  ;;  %v5335_v33 = vrot.slane %v5334_v5, 4  ;;  %6151 = vmatpush.bf16.msrb.mxu0 %v12352_v52  ;;  %v12347_v24 = vld [vmem:[%s15212_s1 + $0xd08] sm:$0xff]  ;;  %5851 = vmatpush.bf16.msra.mxu1 %v12324_v49 }
 0x5c7   : > { %v5345_v56 = vrot.slane %v5344_v8, 4 }
 0x5c8   : > { %v5330_v1 = vsel %vm13221_vm6, %v5325_v15, %v5329_v29  ;;  %v5340_v11 = vsel %vm13221_vm6, %v5335_v33, %v5339_v57  ;;  %v12346_v33 = vld [vmem:[%s15212_s1 + $0xd00] sm:$0xff] }
 0x5c9   : > { %5354 = vst [vmem:[#allocation3 + $0x8] sm:$0xf] %v5340_v11  ;;  %v5356_v60 = vsel %vm13230_vm7, %v5345_v56, %v5355_v25  ;;  %6043 = vmatpush.bf16.msra.mxu3 %v12343_v45  ;;  %v12322_v56 = vld [vmem:[%s15212_s1 + $0xc40] sm:$0xff]  ;;  %v12361_v45 = vld [vmem:[%s15212_s1 + $0xd78] sm:$0xff] }
 0x5ca   : > { %5353 = vst [vmem:[#allocation3 + $0x4] sm:$0xf] %v5330_v1  ;;  %6152 = vmatpush.bf16.msrb.mxu0 %v12351_v9  ;;  %5852 = vmatpush.bf16.msra.mxu1 %v12323_v4  ;;  %v6062_v1 = vld [vmem:[#allocation3 + $0x10] sm:$0x3]  ;;  %v12354_v4 = vld [vmem:[%s15212_s1 + $0xd40] sm:$0xff] }
 0x5cb   : > { %5357 = vst [vmem:[#allocation3 + $0xc] sm:$0x7] %v5356_v60  ;;  %v6081_v38 = vunpack.c.l.b16 %v6062_v1 }
 0x5cc   : > { %v12591_v19 = vld [vmem:[#allocation3] sm:$0xe] }
 0x5cd   : > { %6044 = vmatpush.bf16.msra.mxu3 %v12342_v18  ;;  %v5653_v6 = vld [vmem:[#allocation3] sm:$0x8] }
 0x5ce   : > { %6153 = vmatpush.bf16.msrb.mxu0 %v12350_v28  ;;  %v5678_v30 = vunpack.c.l.b16 %v5653_v6  ;;  %5853 = vmatpush.bf16.msra.mxu1 %v12322_v56 }
 0x5d0   : > { %v5655_v23 = vld [vmem:[#allocation3 + $0x8] sm:$0xf] }
 0x5d1   : > { %v12547_v59 = vld [vmem:[#allocation3] sm:$0xff]   ;;  %v14489_v2 = vunpack.c.l.b16 %v5655_v23  ;;  %6045 = vmatpush.bf16.msra.mxu3 %v12341_v31  ;;  %v5360_v46 = vld [vmem:[#allocation3 + $0x8] sm:$0x7] }
 0x5d2   : > { %v12590_v27 = vld [vmem:[#allocation3] sm:$0xf0]  ;;  %v5407_v40 = vshll.u32 %v12547_v59, 16  ;;  %5548 = vmatmul.bf16.vlgmr.msrb.gmra.mxu2 %v12547_v59  ;;  %v5656_v7 = vld [vmem:[#allocation3 + $0xc] sm:$0x3]  ;;  %6154 = vmatpush.bf16.msrb.mxu0 %v12349_v35  ;;  %v5405_v36 = vshrl.u32 %v12547_v59, 16  ;;  %v5488_v15 = vunpack.c.l.b16 %v5360_v46 }
 0x5d3   : > { %v14487_v0 = vld [vmem:[#allocation3 + $0x4] sm:$0xff]   ;;  %v12592_v47 = vor.u32 %v12591_v19, %v12590_v27  ;;  %v5681_v12 = vunpack.c.l.b16 %v5656_v7  ;;  %v5758_v60 = vld [vmem:[#allocation3 + $0xc] sm:$0x7]  ;;  %v12358_v59 = vld [vmem:[%s15212_s1 + $0xd60] sm:$0xff]  ;;  %v5985_v27 = vunpack.c.l.b16 %v5960_v10 }
 0x5d4   : > { %v5401_v41 = vunpack.c.h.b16 %v14487_v0  ;;  %v5679_v39 = vunpack.c.l.b16 %v14487_v0  ;;  %v5409_v34 = vrot.slane %v5407_v40, 1  ;;  %v5489_v9 = vpack.c.b16 %v5488_v15, %v5488_v15  ;;  %v5957_v11 = vld [vmem:[#allocation3 + $0x4] sm:$0xc]  ;;  %v14535_v25 = vld [vmem:[#allocation3 + $0x8] sm:$0xff]  }
 0x5d5   : > { %v5683_v42 = vpack.c.b16 %v5681_v12, %v14489_v2  ;;  %v5579_v48 = vrot.slane %v12592_v47, 1  ;;  %6046 = vmatpush.bf16.msra.mxu3 %v12340_v14  ;;  %v12552_v13 = vunpack.c.l.b16 %v14535_v25  ;;  %v12553_v18 = vunpack.c.h.b16 %v14535_v25  ;;  %v12359_v31 = vld [vmem:[%s15212_s1 + $0xd68] sm:$0xff] }
 0x5d6   : > { %v5403_v21 = vpack.c.b16 %v5401_v41, %v5401_v41  ;;  %v14504_v51 = vpack.c.b16 %v5679_v39, %v5678_v30  ;;  %6155 = vmatpush.bf16.msrb.mxu0 %v12348_v50  ;;  %v5410_v22 = vor.u32 %v5409_v34, %v5405_v36  ;;  %v5982_v28 = vunpack.c.l.b16 %v5957_v11 }
 0x5d7   : > { %v5685_v57 = vrot.slane %v5683_v42, 3  ;;  %v5777_v26 = vunpack.c.l.b16 %v5758_v60  ;;  %v6082_v6 = vpack.c.b16 %v6081_v38, %v12553_v18  ;;  %v5884_v34 = vpack.c.b16 %v14489_v2, %v5679_v39 }
 0x5d8   : > { %v5580_v54 = vrot.slane %v5403_v21, 1  ;;  %v5412_v29 = vshll.u32 %v5403_v21, 16  ;;  %v5684_v55 = vrot.slane %v14504_v51, 3  ;;  %v5416_v35 = vshrl.u32 %v5403_v21, 16  ;;  %v12357_v21 = vld [vmem:[%s15212_s1 + $0xd58] sm:$0xff] }
 0x5d9   : > { %6047 = vmatpush.bf16.msra.mxu3 %v12339_v58  ;;  %v5986_v19 = vpack.c.b16 %v12552_v13, %v5982_v28  ;;  %v5778_v23 = vpack.c.b16 %v5777_v26, %v14489_v2  ;;  %v6092_v47 = vshrl.u32 %v6082_v6, 16  ;;  %v6095_v7 = vshll.u32 %v6082_v6, 16 }
 0x5da   : > { %v5581_v61 = vsel %vm465_vm1, %v5579_v48, %v5580_v54  ;;  %v5414_v52 = vrot.slane %v5412_v29, 1  ;;  %v5686_v5 = vsel %vm571_vm2, %v5684_v55, %v5685_v57  ;;  %6156 = vmatpush.bf16.msrb.mxu0 %v12347_v24  ;;  %v5780_v30 = vshrl.u32 %v14504_v51, 16 }
 0x5db   : > { %5640 = vmatmul.bf16.vlgmr.msrb.gmra.mxu3 %v5581_v61  ;;  %5745 = vmatmul.bf16.vlgmr.msra.gmra.mxu0 %v5686_v5  ;;  %v6084_v40 = vshrl.u32 %v5986_v19, 16  ;;  %v6087_v41 = vshll.u32 %v5986_v19, 16  ;;  %v5783_v12 = vshll.u32 %v14504_v51, 16  ;;  %v5788_v14 = vshrl.u32 %v5778_v23, 16 }
 0x5dc   : > { %v5415_v8 = vsel %vm289_vm0, %v5410_v22, %v5414_v52  ;;  %v5418_v20 = vor.u32 %v5416_v35, %v5414_v52  ;;  %v5791_v50 = vshll.u32 %v5778_v23, 16  ;;  %v5987_v63 = vpack.c.b16 %v5985_v27, %v12553_v18  ;;  %v12355_v52 = vld [vmem:[%s15212_s1 + $0xd48] sm:$0xff] }
 0x5dd   : > { %5477 = vmatmul.bf16.vlgmr.msrb.gmra.mxu1 %v5415_v8  ;;  %6048 = vmatpush.bf16.msra.mxu3 %v12338_v17  ;;  %v6086_v42 = vrot.slane %v6084_v40, 2  ;;  %v6089_v49 = vrot.slane %v6087_v41, 3  ;;  %v6094_v36 = vrot.slane %v6092_v47, 2  ;;  %v6097_v48 = vrot.slane %v6095_v7, 3  ;;  %v6171_v17 = vld [vmem:[#allocation3 + $0x4] sm:$0x8] }
 0x5de   : > { %6157 = vmatpush.bf16.msrb.mxu0 %v12346_v33  ;;  %6245 = vmatpush.bf16.msrb.mxu1 %v12361_v45  ;;  %v5785_v29 = vrot.slane %v5783_v12, 4  ;;  %v5790_v51 = vrot.slane %v5788_v14, 3  ;;  %v5793_v55 = vrot.slane %v5791_v50, 4  ;;  %v5988_v58 = vrot.slane %v5986_v19, 2 }
 0x5df   : > { %v5989_v61 = vrot.slane %v5987_v63, 2  ;;  %v6090_v0 = vor.u32 %v6089_v49, %v6086_v42  ;;  %v6098_v22 = vor.u32 %v6097_v48, %v6094_v36  ;;  %v5885_v8 = vpack.c.b16 %v5777_v26, %v5777_v26 }
 0x5e0   : > { %v5794_v39 = vor.u32 %v5793_v55, %v5790_v51  ;;  %v6190_v15 = vunpack.c.l.b16 %v6171_v17  ;;  %v6193_v45 = vrot.slane %v6082_v6, 3 }
 0x5e1   : > { %v5990_v24 = vsel %vm877_vm4, %v5988_v58, %v5989_v61  ;;  %v6099_v5 = vsel %vm973_vm5, %v6090_v0, %v6098_v22 }
 0x5e2   : > { %5553 = vmatmul.bf16.gmra.mxu2 %v5489_v9  ;;  %6246 = vmatpush.bf16.msrb.mxu1 %v12360_v53  ;;  %v6191_v33 = vpack.c.b16 %v12552_v13, %v6190_v15 }
 0x5e4   : > { %v6192_v56 = vrot.slane %v6191_v33, 3 }
 0x5e6   : > { %6247 = vmatpush.bf16.msrb.mxu1 %v12359_v31  ;;  %v6194_v9 = vsel %vm571_vm2, %v6192_v56, %v6193_v45 }
 0x5ea   : > { %6248 = vmatpush.bf16.msrb.mxu1 %v12358_v59 }
 0x5eb   : > { %5645 = vmatmul.bf16.gmra.mxu3 %v5580_v54  ;;  %5750 = vmatmul.bf16.gmra.mxu0 %v5685_v57  ;;  %v5782_v54 = vrot.slane %v5780_v30, 3  ;;  %v12356_v57 = vld [vmem:[%s15212_s1 + $0xd50] sm:$0xff] }
 0x5ed   : > { %5482 = vmatmul.bf16.gmra.mxu1 %v5418_v20  ;;  %v5786_v2 = vor.u32 %v5785_v29, %v5782_v54 }
 0x5ee   : > { %6249 = vmatpush.bf16.msrb.mxu1 %v12357_v21 }
 0x5ef   : > { %v5795_v46 = vsel %vm667_vm3, %v5786_v2, %v5794_v39 }
 0x5f2   : > { %5944 = vmatmul.bf16.vlgmr.msra.gmra.mxu2 %v5884_v34  ;;  %6250 = vmatpush.bf16.msrb.mxu1 %v12356_v57 }
 0x5f6   : > { %6251 = vmatpush.bf16.msrb.mxu1 %v12355_v52 }
 0x5fa   : > { %6252 = vmatpush.bf16.msrb.mxu1 %v12354_v4 }
 0x5fb   : > { %6049 = vmatmul.bf16.vlgmr.msra.gmra.mxu3 %v5990_v24  ;;  %6158 = vmatmul.bf16.vlgmr.msrb.gmra.mxu0 %v6099_v5 }
 0x5fd   : > { %5854 = vmatmul.bf16.vlgmr.msra.gmra.mxu1 %v5795_v46 }
 0x602   : > { %5949 = vmatmul.bf16.gmra.mxu2 %v5885_v8 }
 0x60b   : > { %6054 = vmatmul.bf16.gmra.mxu3 %v5989_v61  ;;  %6163 = vmatmul.bf16.gmra.mxu0 %v6098_v22 }
 0x60d   : > { %5859 = vmatmul.bf16.gmra.mxu1 %v5794_v39 }
 0x61d   : > { %6253 = vmatmul.bf16.vlgmr.msrb.gmra.mxu1 %v6194_v9 }
 0x62d   : > { %6258 = vmatmul.bf16.gmra.mxu1 %v6193_v45 }
 0x655   : > { %v5549_v1 = vpop.f32.mrf.mxu2 }
 0x658   : > { %v5746_v11 = vpop.f32.mrf.mxu0 }
 0x65a   : > { %v5478_v53 = vpop.f32.mrf.mxu1 }
 0x65b   : > { %v5550_v60 = vadd.f32 %v5549_v1, %v5478_v53  ;;  %v14585_v53 = vld [vmem:[%s15215_s4 + $0x8] sm:$0xff] }
 0x65d   : > { %v5551_v38 = vpop.f32.mrf.mxu2 }
 0x65e   : > { %v5641_v18 = vpop.f32.mrf.mxu3 }
 0x65f   : > { %v5650_v28 = vadd.f32 %v5641_v18, %v5550_v60 }
 0x660   : > { %v5748_v26 = vpop.f32.mrf.mxu0 }
 0x661   : > { %v5755_v31 = vadd.f32 %v5746_v11, %v5650_v28 }
 0x662   : > { %v5480_v35 = vpop.f32.mrf.mxu1 }
 0x663   : > { %v5552_v42 = vadd.f32 %v5551_v38, %v5480_v35  ;;  %v14594_v38 = vld [vmem:[%s15215_s4] sm:$0xff]  ;;  %v14602_v35 = vld [vmem:[%s15215_s4 + $0x10] sm:$0x3f] }
 0x665   : > { %v5554_v10 = vpop.f32.mrf.mxu2 }
 0x666   : > { %v5643_v20 = vpop.f32.mrf.mxu3 }
 0x667   : > { %v5651_v48 = vadd.f32 %v5643_v20, %v5552_v42  ;;  %v12369_v42 = vld [vmem:[%s15212_s1 + $0xdb8] sm:$0xff] }
 0x668   : > { %v5751_v25 = vpop.f32.mrf.mxu0  ;;  %6551 = vmatpush.bf16.msrb.mxu3 %v12369_v42 }
 0x669   : > { %v5756_v51 = vadd.f32 %v5748_v26, %v5651_v48 }
 0x66a   : > { %v5483_v13 = vpop.f32.mrf.mxu1 }
 0x66b   : > { %v5555_v55 = vadd.f32 %v5554_v10, %v5483_v13 }
 0x66d   : > { %v5556_v6 = vpop.f32.mrf.mxu2 }
 0x66e   : > { %v5646_v19 = vpop.f32.mrf.mxu3 }
 0x66f   : > { %v5652_v61 = vadd.f32 %v5646_v19, %v5555_v55 }
 0x670   : > { %v5753_v23 = vpop.f32.mrf.mxu0 }
 0x671   : > { %v5757_v39 = vadd.f32 %v5751_v25, %v5652_v61  ;;  %v12393_v61 = vld [vmem:[%s15212_s1 + $0xe78] sm:$0xff] }
 0x672   : > { %v5485_v59 = vpop.f32.mrf.mxu1  ;;  %6748 = vmatpush.bf16.msra.mxu1 %v12393_v61 }
 0x675   : > { %v5945_v40 = vpop.f32.mrf.mxu2 }
 0x676   : > { %v5648_v27 = vpop.f32.mrf.mxu3 }
 0x678   : > { %v6159_v41 = vpop.f32.mrf.mxu0 }
 0x67a   : > { %v5855_v47 = vpop.f32.mrf.mxu1 }
 0x67b   : > { %v5864_v0 = vadd.f32 %v5855_v47, %v5755_v31 }
 0x67d   : > { %v5947_v30 = vpop.f32.mrf.mxu2  ;;  %v5954_v52 = vadd.f32 %v5945_v40, %v5864_v0  ;;  %v12367_v0 = vld [vmem:[%s15212_s1 + $0xda8] sm:$0xff] }
 0x67e   : > { %v6050_v7 = vpop.f32.mrf.mxu3 }
 0x67f   : > { %v6059_v46 = vadd.f32 %v6050_v7, %v5954_v52  ;;  %v12392_v52 = vld [vmem:[%s15212_s1 + $0xe70] sm:$0xff] }
 0x680   : > { %v6161_v12 = vpop.f32.mrf.mxu0  ;;  %6749 = vmatpush.bf16.msra.mxu1 %v12392_v52 }
 0x681   : > { %v6168_v15 = vadd.f32 %v6159_v41, %v6059_v46  ;;  %v12383_v46 = vld [vmem:[%s15212_s1 + $0xe28] sm:$0xff] }
 0x682   : > { %v5857_v14 = vpop.f32.mrf.mxu1 }
 0x683   : > { %v5865_v57 = vadd.f32 %v5857_v14, %v5756_v51 }
 0x685   : > { %v5950_v21 = vpop.f32.mrf.mxu2  ;;  %v5955_v22 = vadd.f32 %v5947_v30, %v5865_v57 }
 0x686   : > { %v6052_v50 = vpop.f32.mrf.mxu3 }
 0x687   : > { %v6060_v5 = vadd.f32 %v6052_v50, %v5955_v22 }
 0x688   : > { %v6164_v34 = vpop.f32.mrf.mxu0 }
 0x689   : > { %v6169_v8 = vadd.f32 %v6161_v12, %v6060_v5  ;;  %v12376_v5 = vld [vmem:[%s15212_s1 + $0xdf0] sm:$0xff] }
 0x68a   : > { %v5860_v63 = vpop.f32.mrf.mxu1 }
 0x68b   : > { %v5866_v24 = vadd.f32 %v5860_v63, %v5757_v39  ;;  %v12384_v39 = vld [vmem:[%s15212_s1 + $0xe30] sm:$0xff] }
 0x68d   : > { %v5952_v36 = vpop.f32.mrf.mxu2  ;;  %v5956_v4 = vadd.f32 %v5950_v21, %v5866_v24  ;;  %v12366_v24 = vld [vmem:[%s15212_s1 + $0xda0] sm:$0xff] }
 0x68e   : > { %v6055_v49 = vpop.f32.mrf.mxu3 }
 0x68f   : > { %v6061_v56 = vadd.f32 %v6055_v49, %v5956_v4  ;;  %v12391_v4 = vld [vmem:[%s15212_s1 + $0xe68] sm:$0xff] }
 0x690   : > { %v6166_v54 = vpop.f32.mrf.mxu0  ;;  %6750 = vmatpush.bf16.msra.mxu1 %v12391_v4 }
 0x691   : > { %v6170_v1 = vadd.f32 %v6164_v34, %v6061_v56  ;;  %v12382_v56 = vld [vmem:[%s15212_s1 + $0xe20] sm:$0xff] }
 0x692   : > { %v5862_v29 = vpop.f32.mrf.mxu1 }
 0x693   : > { %v12368_v29 = vld [vmem:[%s15212_s1 + $0xdb0] sm:$0xff] }
 0x694   : > { %6552 = vmatpush.bf16.msrb.mxu3 %v12368_v29 }
 0x696   : > { %v6057_v58 = vpop.f32.mrf.mxu3 }
 0x697   : > { %v12385_v58 = vld [vmem:[%s15212_s1 + $0xe38] sm:$0xff] }
 0x698   : > { %6643 = vmatpush.bf16.msra.mxu0 %v12385_v58  ;;  %6553 = vmatpush.bf16.msrb.mxu3 %v12367_v0  ;;  %v12378_v58 = vld [vmem:[%s15212_s1 + $0xe00] sm:$0xff] }
 0x699   : > { %v12386_v0 = vld [vmem:[%s15212_s1 + $0xe40] sm:$0xff] }
 0x69a   : > { %v6254_v2 = vpop.f32.mrf.mxu1 }
 0x69b   : > { %v14576_v45 = vadd.f32 %v6254_v2, %v6168_v15  ;;  %v12377_v2 = vld [vmem:[%s15212_s1 + $0xdf8] sm:$0xff] }
 0x69c   : > { %6480 = vmatpush.bf16.msrb.mxu2 %v12377_v2  ;;  %6644 = vmatpush.bf16.msra.mxu0 %v12384_v39 }
 0x69d   : > { %v6278_v11 = vmul.f32 %v14576_v45, %v14576_v45  ;;  %v6266_v26 = vmul.f32 %v14594_v38, %v14576_v45  ;;  %6554 = vmatpush.bf16.msrb.mxu3 %v12366_v24 }
 0x69f   : > { %v6281_v25 = vmul.f32 %v14594_v38, %v6278_v11  ;;  %v12364_v11 = vld [vmem:[%s15212_s1 + $0xd90] sm:$0xff] }
 0x6a0   : > { %6481 = vmatpush.bf16.msrb.mxu2 %v12376_v5  ;;  %6645 = vmatpush.bf16.msra.mxu0 %v12383_v46  ;;  %v12370_v5 = vld [vmem:[%s15212_s1 + $0xdc0] sm:$0xff]  ;;  %v12425_v46 = vld [vmem:[%s15212_s1 + $0xf78] sm:$0xff] }
 0x6a2   : > { %v6256_v17 = vpop.f32.mrf.mxu1 }
 0x6a3   : > { %v14574_v33 = vadd.f32 %v6256_v17, %v6169_v8  ;;  %v12375_v8 = vld [vmem:[%s15212_s1 + $0xde8] sm:$0xff]  ;;  %v12365_v17 = vld [vmem:[%s15212_s1 + $0xd98] sm:$0xff] }
 0x6a4   : > { %6555 = vmatpush.bf16.msrb.mxu3 %v12365_v17  ;;  %6482 = vmatpush.bf16.msrb.mxu2 %v12375_v8  ;;  %v12401_v17 = vld [vmem:[%s15212_s1 + $0xeb8] sm:$0xff] }
 0x6a5   : > { %v6279_v9 = vmul.f32 %v14574_v33, %v14574_v33  ;;  %v6267_v60 = vmul.f32 %v14585_v53, %v14574_v33  ;;  %6646 = vmatpush.bf16.msra.mxu0 %v12382_v56 }
 0x6a7   : > { %v6282_v31 = vmul.f32 %v14585_v53, %v6279_v9  ;;  %v6269_v13 = vadd.f32 %v6267_v60, %v6266_v26  ;;  %v12390_v9 = vld [vmem:[%s15212_s1 + $0xe60] sm:$0xff]  ;;  %v12381_v26 = vld [vmem:[%s15212_s1 + $0xe18] sm:$0xff] }
 0x6a8   : > { %v12374_v60 = vld [vmem:[%s15212_s1 + $0xde0] sm:$0xff]  ;;  %6751 = vmatpush.bf16.msra.mxu1 %v12390_v9  ;;  %6556 = vmatpush.bf16.msrb.mxu3 %v12364_v11 }
 0x6a9   : > { %v6284_v23 = vadd.f32 %v6282_v31, %v6281_v25  ;;  %v12389_v31 = vld [vmem:[%s15212_s1 + $0xe58] sm:$0xff]  ;;  %6483 = vmatpush.bf16.msrb.mxu2 %v12374_v60  ;;  %6647 = vmatpush.bf16.msra.mxu0 %v12381_v26  ;;  %v12416_v26 = vld [vmem:[%s15212_s1 + $0xf30] sm:$0xff] }
 0x6aa   : > { %v6259_v18 = vpop.f32.mrf.mxu1  ;;  %v12373_v25 = vld [vmem:[%s15212_s1 + $0xdd8] sm:$0xff] }
 0x6ab   : > { %v14589_v28 = vadd.f32 %v6259_v18, %v6170_v1 }
 0x6ac   : > { %6752 = vmatpush.bf16.msra.mxu1 %v12389_v31 }
 0x6ad   : > { %v6268_v20 = vmul.f32 %v14602_v35, %v14589_v28  ;;  %v6280_v10 = vmul.f32 %v14589_v28, %v14589_v28  ;;  %6484 = vmatpush.bf16.msrb.mxu2 %v12373_v25 }
 0x6af   : > { %v6270_v19 = vsel %vm877_vm4, %v6268_v20, 0.0  ;;  %v6283_v6 = vmul.f32 %v14602_v35, %v6280_v10  ;;  %v12363_v10 = vld [vmem:[%s15212_s1 + $0xd88] sm:$0xff] }
 0x6b0   : > { %v6271_v59 = vadd.f32 %v6270_v19, %v6269_v13  ;;  %v12380_v19 = vld [vmem:[%s15212_s1 + $0xe10] sm:$0xff]  ;;  %6557 = vmatpush.bf16.msrb.mxu3 %v12363_v10 }
 0x6b1   : > { %v6285_v27 = vsel %vm877_vm4, %v6283_v6, 0.0  ;;  %v12388_v6 = vld [vmem:[%s15212_s1 + $0xe50] sm:$0xff]  ;;  %6648 = vmatpush.bf16.msra.mxu0 %v12380_v19 }
 0x6b2   : > { %v6272_v40 = vrot.slane %v6271_v59, 4  ;;  %v6286_v41 = vadd.f32 %v6285_v27, %v6284_v23  ;;  %v6261_v47 = vpop.f32.mrf.mxu1  ;;  %v12362_v27 = vld [vmem:[%s15212_s1 + $0xd80] sm:$0xff]  ;;  %6753 = vmatpush.bf16.msra.mxu1 %v12388_v6  ;;  %v12424_v10 = vld [vmem:[%s15212_s1 + $0xf70] sm:$0xff] }
 0x6b3   : > { %v12400_v19 = vld [vmem:[%s15212_s1 + $0xeb0] sm:$0xff]  ;;  %v12406_v6 = vld [vmem:[%s15212_s1 + $0xee0] sm:$0xff] }
 0x6b4   : > { %v6273_v7 = vadd.f32 %v6272_v40, %v6271_v59  ;;  %v6287_v30 = vrot.slane %v6286_v41, 4  ;;  %v12622_v59 = vld [vmem:[%s15213_s2 + $0x5] ss:$0 sm:$0xff]  ;;  %6558 = vmatpush.bf16.msrb.mxu3 %v12362_v27 }
 0x6b6   : > { %v6274_v12 = vrot.slane %v6273_v7, 2  ;;  %v6288_v14 = vadd.f32 %v6287_v30, %v6286_v41  ;;  %v12409_v30 = vld [vmem:[%s15212_s1 + $0xef8] sm:$0xff] }
 0x6b8   : > { %v6275_v50 = vadd.f32 %v6274_v12, %v6273_v7  ;;  %v6289_v21 = vrot.slane %v6288_v14, 2  ;;  %v12372_v7 = vld [vmem:[%s15212_s1 + $0xdd0] sm:$0xff]  ;;  %6947 = vmatpush.bf16.msra.mxu3 %v12409_v30  ;;  %v12423_v30 = vld [vmem:[%s15212_s1 + $0xf68] sm:$0xff] }
 0x6b9   : > { %6485 = vmatpush.bf16.msrb.mxu2 %v12372_v7  ;;  %v6366_v7 = vld [vmem:[#allocation2 + $0xc] sm:$0x7] }
 0x6ba   : > { %v6276_v34 = vrot.slane %v6275_v50, 1  ;;  %v6290_v63 = vadd.f32 %v6289_v21, %v6288_v14  ;;  %v12387_v21 = vld [vmem:[%s15212_s1 + $0xe48] sm:$0xff] }
 0x6bb   : > { %6754 = vmatpush.bf16.msra.mxu1 %v12387_v21  ;;  %v12404_v21 = vld [vmem:[%s15212_s1 + $0xed0] sm:$0xff] }
 0x6bc   : > { %v6277_v49 = vadd.f32 %v6276_v34, %v6275_v50  ;;  %v6291_v36 = vrot.slane %v6290_v63, 1 }
 0x6be   : > { %v6292_v48 = vadd.f32 %v6291_v36, %v6290_v63  ;;  %v14615_v54 = vmul.f32 0.0625, %v6277_v49  ;;  %v6330_v49 = vld [vmem:[#allocation2] sm:$0x8]  ;;  %v12371_v36 = vld [vmem:[%s15212_s1 + $0xdc8] sm:$0xff] }
 0x6bf   : > { %v6334_v61 = vunpack.c.l.bf16 %v6330_v49  ;;  %6486 = vmatpush.bf16.msrb.mxu2 %v12371_v36  ;;  %6755 = vmatpush.bf16.msra.mxu1 %v12386_v0  ;;  %v12397_v36 = vld [vmem:[%s15212_s1 + $0xe98] sm:$0xff] }
 0x6c0   : > { %v6294_v51 = vmul.f32 0.0625, %v6292_v48  ;;  %v6295_v55 = vmul.f32 %v14615_v54, %v14615_v54  ;;  %v6297_v40 = vsub.f32 %v14576_v45, %v14615_v54  ;;  %v6298_v41 = vsub.f32 %v14574_v33, %v14615_v54  ;;  %v12623_v33 = vld [vmem:[%s15214_s3 + $0x5] ss:$0 sm:$0xff]  ;;  %v12408_v48 = vld [vmem:[%s15212_s1 + $0xef0] sm:$0xff] }
 0x6c1   : > { %v6299_v47 = vsub.f32 %v14589_v28, %v14615_v54  ;;  %v12379_v28 = vld [vmem:[%s15212_s1 + $0xe08] sm:$0xff]  ;;  %v6333_v54 = vld [vmem:[#allocation2 + $0xc] sm:$0x7]  ;;  %6948 = vmatpush.bf16.msra.mxu3 %v12408_v48 }
 0x6c2   : > { %v6296_v57 = vsub.f32 %v6294_v51, %v6295_v55  ;;  %6649 = vmatpush.bf16.msra.mxu0 %v12379_v28  ;;  %v6337_v2 = vunpack.c.l.bf16 %v6333_v54  ;;  %v12398_v28 = vld [vmem:[%s15212_s1 + $0xea0] sm:$0xff] }
 0x6c3   : > { %6487 = vmatpush.bf16.msrb.mxu2 %v12370_v5  ;;  %7161 = vmatpush.bf16.msrb.mxu1 %v12425_v46  ;;  %v12420_v5 = vld [vmem:[%s15212_s1 + $0xf50] sm:$0xff] }
 0x6c4   : > { %v6300_v22 = vadd.f32 1e-05, %v6296_v57  ;;  %v6331_v57 = vld [vmem:[#allocation2 + $0x4] sm:$0xff]  }
 0x6c5   : > { %v6335_v4 = vunpack.c.l.bf16 %v6331_v57  ;;  %v6336_v8 = vunpack.c.h.bf16 %v6331_v57 }
 0x6c6   : > { %12638 = vrsqrt.f32 %v6300_v22  ;;  %vm6307_vm15 = vweird.f32 %v6300_v22  ;;  %6650 = vmatpush.bf16.msra.mxu0 %v12378_v58 }
 0x6c7   : > { %6857 = vmatpush.bf16.msra.mxu2 %v12401_v17  ;;  %7162 = vmatpush.bf16.msrb.mxu1 %v12424_v10  ;;  %v12396_v17 = vld [vmem:[%s15212_s1 + $0xe90] sm:$0xff] }
 0x6cb   : > { %6858 = vmatpush.bf16.msra.mxu2 %v12400_v19  ;;  %7163 = vmatpush.bf16.msrb.mxu1 %v12423_v30 }
 0x6cc   : > { %v12639_v15 = vpop.eup %12638 }
 0x6cd   : > { %v6302_v1 = vmul.f32 %v12639_v15, %v6300_v22  ;;  %vm6308_vm14 = vweird.f32 %v12639_v15  ;;  %v12417_v22 = vld [vmem:[%s15212_s1 + $0xf38] sm:$0xff] }
 0x6ce   : > { %vm6309_vm8 = vmor %vm6307_vm15, %vm6308_vm14  ;;  %7052 = vmatpush.bf16.msrb.mxu0 %v12417_v22 }
 0x6cf   : > { %v6303_v18 = vmul.f32 %v12639_v15, %v6302_v1 }
 0x6d1   : > { %v6304_v20 = vmul.f32 0.5, %v6303_v18 }
 0x6d2   : > { %7053 = vmatpush.bf16.msrb.mxu0 %v12416_v26  ;;  %v12411_v26 = vld [vmem:[%s15212_s1 + $0xf08] sm:$0xff] }
 0x6d3   : > { %v6305_v13 = vsub.f32 1.5, %v6304_v20 }
 0x6d5   : > { %v6306_v23 = vmul.f32 %v12639_v15, %v6305_v13 }
 0x6d7   : > { %v6310_v12 = vsel %vm6309_vm8, %v12639_v15, %v6306_v23  ;;  %v12407_v15 = vld [vmem:[%s15212_s1 + $0xee8] sm:$0xff] }
 0x6d8   : > { %v6311_v14 = vmul.f32 %v6310_v12, %v6297_v40  ;;  %v6312_v50 = vmul.f32 %v6310_v12, %v6298_v41  ;;  %v6313_v45 = vmul.f32 %v6310_v12, %v6299_v47  ;;  %6949 = vmatpush.bf16.msra.mxu3 %v12407_v15  ;;  %v12415_v41 = vld [vmem:[%s15212_s1 + $0xf28] sm:$0xff]  ;;  %v12402_v15 = vld [vmem:[%s15212_s1 + $0xec0] sm:$0xff] }
 0x6d9   : > { %7054 = vmatpush.bf16.msrb.mxu0 %v12415_v41  ;;  %v12418_v41 = vld [vmem:[%s15212_s1 + $0xf40] sm:$0xff] }
 0x6da   : > { %v6319_v34 = vmul.f32 %v12622_v59, %v6311_v14  ;;  %v6320_v63 = vmul.f32 %v12622_v59, %v6312_v50  ;;  %v6321_v42 = vmul.f32 %v12622_v59, %v6313_v45  ;;  %v12399_v14 = vld [vmem:[%s15212_s1 + $0xea8] sm:$0xff]  ;;  %v12405_v50 = vld [vmem:[%s15212_s1 + $0xed8] sm:$0xff]  ;;  %v12414_v45 = vld [vmem:[%s15212_s1 + $0xf20] sm:$0xff] }
 0x6db   : > { %6859 = vmatpush.bf16.msra.mxu2 %v12399_v14 }
 0x6dc   : > { %v6327_v29 = vadd.f32 %v12623_v33, %v6319_v34  ;;  %v6328_v51 = vadd.f32 %v12623_v33, %v6320_v63  ;;  %v6329_v55 = vadd.f32 %v12623_v33, %v6321_v42  ;;  %6950 = vmatpush.bf16.msra.mxu3 %v12406_v6  ;;  %v12422_v33 = vld [vmem:[%s15212_s1 + $0xf60] sm:$0xff]  ;;  %v12413_v34 = vld [vmem:[%s15212_s1 + $0xf18] sm:$0xff]  ;;  %v12395_v6 = vld [vmem:[%s15212_s1 + $0xe88] sm:$0xff] }
 0x6dd   : > { %7055 = vmatpush.bf16.msrb.mxu0 %v12414_v45  ;;  %v12421_v63 = vld [vmem:[%s15212_s1 + $0xf58] sm:$0xff]  ;;  %7164 = vmatpush.bf16.msrb.mxu1 %v12422_v33  ;;  %v7073_v45 = vld [vmem:[#allocation2 + $0x10] sm:$0x3] }
 0x6de   : > { %v6341_v39 = vrot.slane %v6327_v29, 1  ;;  %v6342_v52 = vrot.slane %v6328_v51, 1  ;;  %v6344_v24 = vrot.slane %v6329_v55, 1  ;;  %v12403_v51 = vld [vmem:[%s15212_s1 + $0xec8] sm:$0xff] }
 0x6df   : > { %6860 = vmatpush.bf16.msra.mxu2 %v12398_v28 }
 0x6e0   : > { %v6343_v56 = vsel %vm465_vm1, %v6341_v39, %v6342_v52  ;;  %v6345_v9 = vsel %vm465_vm1, %v6342_v52, %v6344_v24  ;;  %v6350_v1 = vadd.f32 %v6341_v39, %v6334_v61  ;;  %v6353_v11 = vadd.f32 %v6344_v24, %v6337_v2  ;;  %6951 = vmatpush.bf16.msra.mxu3 %v12405_v50  ;;  %v12412_v52 = vld [vmem:[%s15212_s1 + $0xf10] sm:$0xff] }
 0x6e1   : > { %v6351_v60 = vadd.f32 %v6343_v56, %v6335_v4  ;;  %v6352_v18 = vadd.f32 %v6345_v9, %v6336_v8  ;;  %7056 = vmatpush.bf16.msrb.mxu0 %v12413_v34  ;;  %7165 = vmatpush.bf16.msrb.mxu1 %v12421_v63  ;;  %v7092_v63 = vunpack.c.l.b16 %v7073_v45 }
 0x6e2   : > { %v6354_v31 = vmul.f32 %v6350_v1, %v13480_v32  ;;  %v6357_v20 = vmul.f32 %v6353_v11, %v13494_v3 }
 0x6e3   : > { %v6355_v25 = vmul.f32 %v6351_v60, %v13513_v62  ;;  %v6356_v13 = vmul.f32 %v6352_v18, %v13517_v37  ;;  %6861 = vmatpush.bf16.msra.mxu2 %v12397_v36 }
 0x6e4   : > { %v6358_v23 = vpack.c.bf16 %v6354_v31, %v6354_v31  ;;  %v6361_v59 = vpack.c.bf16 %v6357_v20, %v6357_v20  ;;  %6952 = vmatpush.bf16.msra.mxu3 %v12404_v21  ;;  %v12419_v20 = vld [vmem:[%s15212_s1 + $0xf48] sm:$0xff] }
 0x6e5   : > { %v6359_v27 = vpack.c.bf16 %v6355_v25, %v6355_v25  ;;  %v6360_v40 = vpack.c.bf16 %v6356_v13, %v6356_v13  ;;  %7057 = vmatpush.bf16.msrb.mxu0 %v12412_v52  ;;  %7166 = vmatpush.bf16.msrb.mxu1 %v12420_v5  ;;  %v12429_v5 = vld [vmem:[%s15212_s1 + $0xf98] sm:$0xff] }
 0x6e6   : > { %v6362_v47 = vsel %vm13192_vm13, %v6358_v23, %v6330_v49  ;;  %v6367_v12 = vsel %vm13230_vm7, %v6361_v59, %v6366_v7  ;;  %v12433_v7 = vld [vmem:[%s15212_s1 + $0xfb8] sm:$0xff] }
 0x6e7   : > { %6363 = vst [vmem:[#allocation2] sm:$0x8] %v6362_v47  ;;  %6862 = vmatpush.bf16.msra.mxu2 %v12396_v17  ;;  %v12394_v47 = vld [vmem:[%s15212_s1 + $0xe80] sm:$0xff] }
 0x6e8   : > { %6364 = vst [vmem:[#allocation2 + $0x4] sm:$0xf] %v6359_v27  ;;  %6953 = vmatpush.bf16.msra.mxu3 %v12403_v51  ;;  %v12410_v27 = vld [vmem:[%s15212_s1 + $0xf00] sm:$0xff] }
 0x6e9   : > { %6365 = vst [vmem:[#allocation2 + $0x8] sm:$0xf] %v6360_v40  ;;  %7058 = vmatpush.bf16.msrb.mxu0 %v12411_v26  ;;  %7167 = vmatpush.bf16.msrb.mxu1 %v12419_v20  ;;  %v12428_v26 = vld [vmem:[%s15212_s1 + $0xf90] sm:$0xff] }
 0x6ea   : > { %6368 = vst [vmem:[#allocation2 + $0xc] sm:$0x7] %v6367_v12  ;;  %v12432_v12 = vld [vmem:[%s15212_s1 + $0xfb0] sm:$0xff] }
 0x6eb   : > { %6863 = vmatpush.bf16.msra.mxu2 %v12395_v6 }
 0x6ec   : > { %6954 = vmatpush.bf16.msra.mxu3 %v12402_v15 }
 0x6ed   : > { %7059 = vmatpush.bf16.msrb.mxu0 %v12410_v27  ;;  %7168 = vmatpush.bf16.msrb.mxu1 %v12418_v41  ;;  %v12426_v27 = vld [vmem:[%s15212_s1 + $0xf80] sm:$0xff] }
 0x6ee   : > { %v12595_v42 = vld [vmem:[#allocation2] sm:$0xe] }
 0x6ef   : > { %v6664_v49 = vld [vmem:[#allocation2] sm:$0x8]  ;;  %v12594_v54 = vld [vmem:[#allocation2] sm:$0xf0]  ;;  %6864 = vmatpush.bf16.msra.mxu2 %v12394_v47 }
 0x6f0   : > { %v12555_v48 = vld [vmem:[#allocation2] sm:$0xff]   ;;  %v6689_v29 = vunpack.c.l.b16 %v6664_v49  ;;  %v6666_v58 = vld [vmem:[#allocation2 + $0x8] sm:$0xf]  ;;  %v12596_v0 = vor.u32 %v12595_v42, %v12594_v54  ;;  %v12431_v42 = vld [vmem:[%s15212_s1 + $0xfa8] sm:$0xff] }
 0x6f1   : > { %v6418_v55 = vshll.u32 %v12555_v48, 16  ;;  %6559 = vmatmul.bf16.vlgmr.msrb.gmra.mxu3 %v12555_v48  ;;  %v14800_v57 = vld [vmem:[#allocation2 + $0x4] sm:$0xff]   ;;  %v6667_v22 = vld [vmem:[#allocation2 + $0xc] sm:$0x3]  ;;  %v14804_v39 = vunpack.c.l.b16 %v6666_v58  ;;  %v6416_v56 = vshrl.u32 %v12555_v48, 16 }
 0x6f2   : > { %v6412_v61 = vunpack.c.h.b16 %v14800_v57  ;;  %v6690_v2 = vunpack.c.l.b16 %v14800_v57  ;;  %v6692_v24 = vunpack.c.l.b16 %v6667_v22  ;;  %v6590_v1 = vrot.slane %v12596_v0, 1  ;;  %v6371_v19 = vld [vmem:[#allocation2 + $0x8] sm:$0x7]  ;;  %v6968_v14 = vld [vmem:[#allocation2 + $0x4] sm:$0xc] }
 0x6f3   : > { %v6420_v8 = vrot.slane %v6418_v55, 1  ;;  %v6499_v40 = vunpack.c.l.b16 %v6371_v19  ;;  %v14851_v50 = vld [vmem:[#allocation2 + $0x8] sm:$0xff]   ;;  %v6993_v34 = vunpack.c.l.b16 %v6968_v14  ;;  %v6971_v54 = vld [vmem:[#allocation2 + $0x10] sm:$0x1]  ;;  %v7182_v47 = vld [vmem:[#allocation2 + $0x4] sm:$0x8] }
 0x6f4   : > { %v6414_v46 = vpack.c.b16 %v6412_v61, %v6412_v61  ;;  %v14814_v4 = vpack.c.b16 %v6690_v2, %v6689_v29  ;;  %v6694_v9 = vpack.c.b16 %v6692_v24, %v14804_v39  ;;  %v6769_v33 = vld [vmem:[#allocation2 + $0xc] sm:$0x7]  ;;  %v12560_v28 = vunpack.c.l.b16 %v14851_v50  ;;  %v12430_v55 = vld [vmem:[%s15212_s1 + $0xfa0] sm:$0xff] }
 0x6f5   : > { %v6421_v25 = vor.u32 %v6420_v8, %v6416_v56  ;;  %v6500_v30 = vpack.c.b16 %v6499_v40, %v6499_v40  ;;  %v12561_v21 = vunpack.c.h.b16 %v14851_v50  ;;  %v6788_v49 = vunpack.c.l.b16 %v6769_v33 }
 0x6f6   : > { %v6591_v11 = vrot.slane %v6414_v46, 1  ;;  %v6695_v60 = vrot.slane %v14814_v4, 3  ;;  %v6423_v18 = vshll.u32 %v6414_v46, 16  ;;  %v6696_v31 = vrot.slane %v6694_v9, 3 }
 0x6f7   : > { %v6427_v36 = vshrl.u32 %v6414_v46, 16  ;;  %v6997_v29 = vpack.c.b16 %v12560_v28, %v6993_v34  ;;  %v7093_v51 = vpack.c.b16 %v7092_v63, %v12561_v21  ;;  %v6789_v58 = vpack.c.b16 %v6788_v49, %v14804_v39 }
 0x6f8   : > { %v6592_v10 = vsel %vm465_vm1, %v6590_v1, %v6591_v11  ;;  %v6425_v13 = vrot.slane %v6423_v18, 1  ;;  %v6697_v23 = vsel %vm571_vm2, %v6695_v60, %v6696_v31  ;;  %v6996_v61 = vunpack.c.l.b16 %v6971_v54 }
 0x6f9   : > { %6651 = vmatmul.bf16.vlgmr.msra.gmra.mxu0 %v6592_v10  ;;  %6756 = vmatmul.bf16.vlgmr.msra.gmra.mxu1 %v6697_v23  ;;  %v7095_v0 = vshrl.u32 %v6997_v29, 16  ;;  %v7098_v22 = vshll.u32 %v6997_v29, 16  ;;  %v7103_v52 = vshrl.u32 %v7093_v51, 16  ;;  %v7106_v24 = vshll.u32 %v7093_v51, 16 }
 0x6fa   : > { %v6426_v59 = vsel %vm289_vm0, %v6421_v25, %v6425_v13  ;;  %v6429_v48 = vor.u32 %v6427_v36, %v6425_v13  ;;  %v6791_v46 = vshrl.u32 %v14814_v4, 16  ;;  %v6794_v8 = vshll.u32 %v14814_v4, 16 }
 0x6fb   : > { %6488 = vmatmul.bf16.vlgmr.msrb.gmra.mxu2 %v6426_v59  ;;  %v6799_v17 = vshrl.u32 %v6789_v58, 16  ;;  %v6802_v15 = vshll.u32 %v6789_v58, 16  ;;  %v6895_v56 = vpack.c.b16 %v14804_v39, %v6690_v2  ;;  %v6998_v9 = vpack.c.b16 %v6996_v61, %v12561_v21  ;;  %v12427_v2 = vld [vmem:[%s15212_s1 + $0xf88] sm:$0xff] }
 0x6fc   : > { %7256 = vmatpush.bf16.msrb.mxu2 %v12433_v7  ;;  %v7097_v1 = vrot.slane %v7095_v0, 2  ;;  %v7105_v60 = vrot.slane %v7103_v52, 2  ;;  %v7108_v18 = vrot.slane %v7106_v24, 3  ;;  %v6796_v20 = vrot.slane %v6794_v8, 4 }
 0x6fd   : > { %v6801_v4 = vrot.slane %v6799_v17, 3  ;;  %v6804_v10 = vrot.slane %v6802_v15, 4  ;;  %v6999_v25 = vrot.slane %v6997_v29, 2  ;;  %v7000_v13 = vrot.slane %v6998_v9, 2 }
 0x6fe   : > { %v7109_v19 = vor.u32 %v7108_v18, %v7105_v60  ;;  %v6896_v41 = vpack.c.b16 %v6788_v49, %v6788_v49  ;;  %v7201_v7 = vunpack.c.l.b16 %v7182_v47  ;;  %v7204_v14 = vrot.slane %v7093_v51, 3 }
 0x6ff   : > { %v6805_v6 = vor.u32 %v6804_v10, %v6801_v4  ;;  %v7001_v23 = vsel %vm877_vm4, %v6999_v25, %v7000_v13 }
 0x700   : > { %7257 = vmatpush.bf16.msrb.mxu2 %v12432_v12 }
 0x701   : > { %6564 = vmatmul.bf16.gmra.mxu3 %v6500_v30  ;;  %v7202_v30 = vpack.c.b16 %v12560_v28, %v7201_v7 }
 0x703   : > { %v7203_v12 = vrot.slane %v7202_v30, 3 }
 0x704   : > { %7258 = vmatpush.bf16.msrb.mxu2 %v12431_v42 }
 0x705   : > { %v7205_v45 = vsel %vm571_vm2, %v7203_v12, %v7204_v14 }
 0x708   : > { %7259 = vmatpush.bf16.msrb.mxu2 %v12430_v55 }
 0x709   : > { %6656 = vmatmul.bf16.gmra.mxu0 %v6591_v11  ;;  %6761 = vmatmul.bf16.gmra.mxu1 %v6696_v31  ;;  %v7100_v11 = vrot.slane %v7098_v22, 3  ;;  %v6793_v31 = vrot.slane %v6791_v46, 3 }
 0x70b   : > { %6493 = vmatmul.bf16.gmra.mxu2 %v6429_v48  ;;  %v7101_v57 = vor.u32 %v7100_v11, %v7097_v1  ;;  %v6797_v39 = vor.u32 %v6796_v20, %v6793_v31 }
 0x70c   : > { %7260 = vmatpush.bf16.msrb.mxu2 %v12429_v5 }
 0x70d   : > { %v7110_v59 = vsel %vm973_vm5, %v7101_v57, %v7109_v19  ;;  %v6806_v40 = vsel %vm667_vm3, %v6797_v39, %v6805_v6 }
 0x710   : > { %7261 = vmatpush.bf16.msrb.mxu2 %v12428_v26 }
 0x711   : > { %6955 = vmatmul.bf16.vlgmr.msra.gmra.mxu3 %v6895_v56 }
 0x714   : > { %7262 = vmatpush.bf16.msrb.mxu2 %v12427_v2 }
 0x718   : > { %7263 = vmatpush.bf16.msrb.mxu2 %v12426_v27 }
 0x719   : > { %7060 = vmatmul.bf16.vlgmr.msrb.gmra.mxu0 %v7001_v23  ;;  %7169 = vmatmul.bf16.vlgmr.msrb.gmra.mxu1 %v7110_v59 }
 0x71b   : > { %6865 = vmatmul.bf16.vlgmr.msra.gmra.mxu2 %v6806_v40 }
 0x721   : > { %6960 = vmatmul.bf16.gmra.mxu3 %v6896_v41 }
 0x729   : > { %7065 = vmatmul.bf16.gmra.mxu0 %v7000_v13  ;;  %7174 = vmatmul.bf16.gmra.mxu1 %v7109_v19 }
 0x72b   : > { %6870 = vmatmul.bf16.gmra.mxu2 %v6805_v6 }
 0x73b   : > { %7264 = vmatmul.bf16.vlgmr.msrb.gmra.mxu2 %v7205_v45 }
 0x74b   : > { %7269 = vmatmul.bf16.gmra.mxu2 %v7204_v14 }
 0x774   : > { %v6560_v33 = vpop.f32.mrf.mxu3 }
 0x776   : > { %v6652_v21 = vpop.f32.mrf.mxu0  ;;  %v6757_v34 = vpop.f32.mrf.mxu1 }
 0x77c   : > { %v6562_v63 = vpop.f32.mrf.mxu3 }
 0x77e   : > { %v6489_v42 = vpop.f32.mrf.mxu2  ;;  %v6654_v49 = vpop.f32.mrf.mxu0 }
 0x77f   : > { %v6561_v36 = vadd.f32 %v6560_v33, %v6489_v42  ;;  %v6759_v48 = vpop.f32.mrf.mxu1 }
 0x781   : > { %v6661_v54 = vadd.f32 %v6652_v21, %v6561_v36 }
 0x783   : > { %v6766_v29 = vadd.f32 %v6757_v34, %v6661_v54 }
 0x784   : > { %v6565_v55 = vpop.f32.mrf.mxu3 }
 0x786   : > { %v6491_v58 = vpop.f32.mrf.mxu2  ;;  %v6657_v50 = vpop.f32.mrf.mxu0 }
 0x787   : > { %v6563_v28 = vadd.f32 %v6562_v63, %v6491_v58  ;;  %v6762_v61 = vpop.f32.mrf.mxu1 }
 0x789   : > { %v6662_v51 = vadd.f32 %v6654_v49, %v6563_v28 }
 0x78b   : > { %v6767_v0 = vadd.f32 %v6759_v48, %v6662_v51 }
 0x78c   : > { %v6567_v22 = vpop.f32.mrf.mxu3 }
 0x78e   : > { %v6494_v52 = vpop.f32.mrf.mxu2  ;;  %v6659_v24 = vpop.f32.mrf.mxu0 }
 0x78f   : > { %v6764_v5 = vpop.f32.mrf.mxu1  ;;  %v6566_v19 = vadd.f32 %v6565_v55, %v6494_v52 }
 0x791   : > { %v6663_v6 = vadd.f32 %v6657_v50, %v6566_v19 }
 0x793   : > { %v6768_v40 = vadd.f32 %v6762_v61, %v6663_v6  ;;  %v12457_v6 = vld [vmem:[%s15212_s1 + $0x1078] sm:$0xff] }
 0x794   : > { %v6956_v46 = vpop.f32.mrf.mxu3  ;;  %7665 = vmatpush.bf16.msra.mxu1 %v12457_v6 }
 0x796   : > { %v6496_v8 = vpop.f32.mrf.mxu2  ;;  %v7061_v17 = vpop.f32.mrf.mxu0 }
 0x797   : > { %v7170_v15 = vpop.f32.mrf.mxu1 }
 0x79c   : > { %v6958_v56 = vpop.f32.mrf.mxu3 }
 0x79e   : > { %v6866_v9 = vpop.f32.mrf.mxu2  ;;  %v7063_v1 = vpop.f32.mrf.mxu0 }
 0x79f   : > { %v7172_v11 = vpop.f32.mrf.mxu1  ;;  %v6875_v13 = vadd.f32 %v6866_v9, %v6766_v29 }
 0x7a1   : > { %v6965_v2 = vadd.f32 %v6956_v46, %v6875_v13 }
 0x7a3   : > { %v7070_v59 = vadd.f32 %v7061_v17, %v6965_v2 }
 0x7a4   : > { %v6961_v60 = vpop.f32.mrf.mxu3 }
 0x7a5   : > { %v7179_v47 = vadd.f32 %v7170_v15, %v7070_v59  ;;  %v12439_v59 = vld [vmem:[%s15212_s1 + $0xfe8] sm:$0xff] }
 0x7a6   : > { %v6868_v18 = vpop.f32.mrf.mxu2  ;;  %v7066_v26 = vpop.f32.mrf.mxu0 }
 0x7a7   : > { %v7175_v31 = vpop.f32.mrf.mxu1  ;;  %v6876_v39 = vadd.f32 %v6868_v18, %v6767_v0 }
 0x7a9   : > { %v6966_v23 = vadd.f32 %v6958_v56, %v6876_v39  ;;  %v12440_v39 = vld [vmem:[%s15212_s1 + $0xff0] sm:$0xff] }
 0x7ab   : > { %v7071_v7 = vadd.f32 %v7063_v1, %v6966_v23  ;;  %v12465_v23 = vld [vmem:[%s15212_s1 + $0x10b8] sm:$0xff] }
 0x7ac   : > { %v6963_v20 = vpop.f32.mrf.mxu3  ;;  %7770 = vmatpush.bf16.msra.mxu2 %v12465_v23 }
 0x7ad   : > { %v7180_v14 = vadd.f32 %v7172_v11, %v7071_v7 }
 0x7ae   : > { %v6871_v4 = vpop.f32.mrf.mxu2  ;;  %v7068_v10 = vpop.f32.mrf.mxu0 }
 0x7af   : > { %v7177_v25 = vpop.f32.mrf.mxu1  ;;  %v6877_v41 = vadd.f32 %v6871_v4, %v6768_v40 }
 0x7b1   : > { %v6967_v12 = vadd.f32 %v6961_v60, %v6877_v41  ;;  %v12456_v41 = vld [vmem:[%s15212_s1 + $0x1070] sm:$0xff] }
 0x7b2   : > { %7666 = vmatpush.bf16.msra.mxu1 %v12456_v41 }
 0x7b3   : > { %v7072_v49 = vadd.f32 %v7066_v26, %v6967_v12  ;;  %v12448_v12 = vld [vmem:[%s15212_s1 + $0x1030] sm:$0xff] }
 0x7b5   : > { %v7181_v55 = vadd.f32 %v7175_v31, %v7072_v49  ;;  %v12462_v49 = vld [vmem:[%s15212_s1 + $0x10a0] sm:$0xff] }
 0x7b6   : > { %v6873_v57 = vpop.f32.mrf.mxu2 }
 0x7b7   : > { %v12441_v57 = vld [vmem:[%s15212_s1 + $0xff8] sm:$0xff] }
 0x7b8   : > { %7573 = vmatpush.bf16.msra.mxu0 %v12441_v57 }
 0x7bc   : > { %7574 = vmatpush.bf16.msra.mxu0 %v12440_v39  ;;  %v12480_v39 = vld [vmem:[%s15212_s1 + $0x1130] sm:$0xff] }
 0x7be   : > { %v7265_v27 = vpop.f32.mrf.mxu2 }
 0x7bf   : > { %v14887_v30 = vadd.f32 %v7265_v27, %v7179_v47  ;;  %v12449_v27 = vld [vmem:[%s15212_s1 + $0x1038] sm:$0xff]  ;;  %v12464_v47 = vld [vmem:[%s15212_s1 + $0x10b0] sm:$0xff] }
 0x7c0   : > { %7575 = vmatpush.bf16.msra.mxu0 %v12439_v59  ;;  %7502 = vmatpush.bf16.msrb.mxu3 %v12449_v27  ;;  %v12497_v27 = vld [vmem:[%s15212_s1 + $0x11b8] sm:$0xff] }
 0x7c1   : > { %v7289_v33 = vmul.f32 %v14887_v30, %v14887_v30  ;;  %v7277_v34 = vmul.f32 %v14594_v38, %v14887_v30  ;;  %7771 = vmatpush.bf16.msra.mxu2 %v12464_v47 }
 0x7c3   : > { %v7292_v36 = vmul.f32 %v14594_v38, %v7289_v33  ;;  %v12463_v33 = vld [vmem:[%s15212_s1 + $0x10a8] sm:$0xff] }
 0x7c4   : > { %7503 = vmatpush.bf16.msrb.mxu3 %v12448_v12  ;;  %v12479_v12 = vld [vmem:[%s15212_s1 + $0x1128] sm:$0xff] }
 0x7c5   : > { %7772 = vmatpush.bf16.msra.mxu2 %v12463_v33  ;;  %v12473_v33 = vld [vmem:[%s15212_s1 + $0x10f8] sm:$0xff] }
 0x7c6   : > { %v7267_v45 = vpop.f32.mrf.mxu2 }
 0x7c7   : > { %v14891_v21 = vadd.f32 %v7267_v45, %v7180_v14  ;;  %v12455_v45 = vld [vmem:[%s15212_s1 + $0x1068] sm:$0xff] }
 0x7c8   : > { %7667 = vmatpush.bf16.msra.mxu1 %v12455_v45 }
 0x7c9   : > { %v7278_v63 = vmul.f32 %v14585_v53, %v14891_v21  ;;  %v7290_v42 = vmul.f32 %v14891_v21, %v14891_v21  ;;  %7773 = vmatpush.bf16.msra.mxu2 %v12462_v49 }
 0x7cb   : > { %v7280_v48 = vadd.f32 %v7278_v63, %v7277_v34  ;;  %v7293_v54 = vmul.f32 %v14585_v53, %v7290_v42  ;;  %v12437_v34 = vld [vmem:[%s15212_s1 + $0xfd8] sm:$0xff]  ;;  %v12454_v42 = vld [vmem:[%s15212_s1 + $0x1060] sm:$0xff] }
 0x7cc   : > { %7668 = vmatpush.bf16.msra.mxu1 %v12454_v42 }
 0x7cd   : > { %v7295_v29 = vadd.f32 %v7293_v54, %v7292_v36  ;;  %v12446_v54 = vld [vmem:[%s15212_s1 + $0x1020] sm:$0xff] }
 0x7ce   : > { %v7270_v58 = vpop.f32.mrf.mxu2 }
 0x7cf   : > { %v14901_v50 = vadd.f32 %v7270_v58, %v7181_v55  ;;  %v12624_v55 = vld [vmem:[%s15213_s2 + $0x6] ss:$0 sm:$0xff] }
 0x7d1   : > { %v7279_v28 = vmul.f32 %v14602_v35, %v14901_v50  ;;  %v7291_v61 = vmul.f32 %v14901_v50, %v14901_v50 }
 0x7d3   : > { %v7281_v51 = vsel %vm877_vm4, %v7279_v28, 0.0  ;;  %v7294_v0 = vmul.f32 %v14602_v35, %v7291_v61  ;;  %v12453_v28 = vld [vmem:[%s15212_s1 + $0x1058] sm:$0xff] }
 0x7d4   : > { %v7282_v22 = vadd.f32 %v7281_v51, %v7280_v48  ;;  %v12436_v48 = vld [vmem:[%s15212_s1 + $0xfd0] sm:$0xff]  ;;  %v12461_v61 = vld [vmem:[%s15212_s1 + $0x1098] sm:$0xff]  ;;  %7669 = vmatpush.bf16.msra.mxu1 %v12453_v28 }
 0x7d5   : > { %v7296_v52 = vsel %vm877_vm4, %v7294_v0, 0.0  ;;  %v12435_v0 = vld [vmem:[%s15212_s1 + $0xfc8] sm:$0xff]  ;;  %7774 = vmatpush.bf16.msra.mxu2 %v12461_v61  ;;  %v12478_v61 = vld [vmem:[%s15212_s1 + $0x1120] sm:$0xff] }
 0x7d6   : > { %v7283_v24 = vrot.slane %v7282_v22, 4  ;;  %v7297_v5 = vadd.f32 %v7296_v52, %v7295_v29  ;;  %v7272_v46 = vpop.f32.mrf.mxu2 }
 0x7d8   : > { %v7284_v8 = vadd.f32 %v7283_v24, %v7282_v22  ;;  %v7298_v17 = vrot.slane %v7297_v5, 4  ;;  %v12625_v24 = vld [vmem:[%s15214_s3 + $0x6] ss:$0 sm:$0xff] }
 0x7da   : > { %v7285_v15 = vrot.slane %v7284_v8, 2  ;;  %v7299_v56 = vadd.f32 %v7298_v17, %v7297_v5  ;;  %v12445_v5 = vld [vmem:[%s15212_s1 + $0x1018] sm:$0xff] }
 0x7dc   : > { %v7286_v9 = vadd.f32 %v7285_v15, %v7284_v8  ;;  %v7300_v1 = vrot.slane %v7299_v56, 2  ;;  %v12452_v15 = vld [vmem:[%s15212_s1 + $0x1050] sm:$0xff] }
 0x7dd   : > { %7670 = vmatpush.bf16.msra.mxu1 %v12452_v15  ;;  %v12477_v15 = vld [vmem:[%s15212_s1 + $0x1118] sm:$0xff] }
 0x7de   : > { %v7287_v11 = vrot.slane %v7286_v9, 1  ;;  %v7301_v60 = vadd.f32 %v7300_v1, %v7299_v56  ;;  %v12460_v56 = vld [vmem:[%s15212_s1 + $0x1090] sm:$0xff] }
 0x7df   : > { %7775 = vmatpush.bf16.msra.mxu2 %v12460_v56 }
 0x7e0   : > { %v7288_v18 = vadd.f32 %v7287_v11, %v7286_v9  ;;  %v7302_v26 = vrot.slane %v7301_v60, 1  ;;  %v12434_v9 = vld [vmem:[%s15212_s1 + $0xfc0] sm:$0xff] }
 0x7e2   : > { %v7303_v31 = vadd.f32 %v7302_v26, %v7301_v60  ;;  %v7304_v20 = vmul.f32 0.0625, %v7288_v18  ;;  %v12444_v18 = vld [vmem:[%s15212_s1 + $0x1010] sm:$0xff]  ;;  %v12481_v26 = vld [vmem:[%s15212_s1 + $0x1138] sm:$0xff] }
 0x7e4   : > { %v7305_v4 = vmul.f32 0.0625, %v7303_v31  ;;  %v7306_v10 = vmul.f32 %v7304_v20, %v7304_v20  ;;  %v7308_v25 = vsub.f32 %v14887_v30, %v7304_v20  ;;  %v7309_v13 = vsub.f32 %v14891_v21, %v7304_v20  ;;  %v12438_v30 = vld [vmem:[%s15212_s1 + $0xfe0] sm:$0xff]  ;;  %v12447_v21 = vld [vmem:[%s15212_s1 + $0x1028] sm:$0xff] }
 0x7e5   : > { %7576 = vmatpush.bf16.msra.mxu0 %v12438_v30  ;;  %7504 = vmatpush.bf16.msrb.mxu3 %v12447_v21  ;;  %v7310_v58 = vsub.f32 %v14901_v50, %v7304_v20  ;;  %v12442_v30 = vld [vmem:[%s15212_s1 + $0x1000] sm:$0xff] }
 0x7e6   : > { %v7307_v19 = vsub.f32 %v7305_v4, %v7306_v10  ;;  %v12451_v10 = vld [vmem:[%s15212_s1 + $0x1048] sm:$0xff] }
 0x7e7   : > { %7671 = vmatpush.bf16.msra.mxu1 %v12451_v10 }
 0x7e8   : > { %v7311_v2 = vadd.f32 1e-05, %v7307_v19 }
 0x7e9   : > { %7577 = vmatpush.bf16.msra.mxu0 %v12437_v34  ;;  %7505 = vmatpush.bf16.msrb.mxu3 %v12446_v54  ;;  %v12488_v54 = vld [vmem:[%s15212_s1 + $0x1170] sm:$0xff] }
 0x7ea   : > { %12640 = vrsqrt.f32 %v7311_v2  ;;  %vm7318_vm10 = vweird.f32 %v7311_v2 }
 0x7ed   : > { %7578 = vmatpush.bf16.msra.mxu0 %v12436_v48  ;;  %7506 = vmatpush.bf16.msrb.mxu3 %v12445_v5  ;;  %v7383_v48 = vld [vmem:[#allocation3] sm:$0x8]  ;;  %v12495_v5 = vld [vmem:[%s15212_s1 + $0x11a8] sm:$0xff] }
 0x7f0   : > { %v12641_v40 = vpop.eup %12640 }
 0x7f1   : > { %v7313_v7 = vmul.f32 %v12641_v40, %v7311_v2  ;;  %vm7319_vm9 = vweird.f32 %v12641_v40  ;;  %7579 = vmatpush.bf16.msra.mxu0 %v12435_v0  ;;  %7507 = vmatpush.bf16.msrb.mxu3 %v12444_v18  ;;  %v12443_v2 = vld [vmem:[%s15212_s1 + $0x1008] sm:$0xff]  ;;  %v12472_v0 = vld [vmem:[%s15212_s1 + $0x10f0] sm:$0xff] }
 0x7f2   : > { %vm7320_vm11 = vmor %vm7318_vm10, %vm7319_vm9 }
 0x7f3   : > { %v7314_v14 = vmul.f32 %v12641_v40, %v7313_v7 }
 0x7f5   : > { %v7315_v63 = vmul.f32 0.5, %v7314_v14  ;;  %7580 = vmatpush.bf16.msra.mxu0 %v12434_v9  ;;  %7508 = vmatpush.bf16.msrb.mxu3 %v12443_v2  ;;  %v12471_v9 = vld [vmem:[%s15212_s1 + $0x10e8] sm:$0xff] }
 0x7f7   : > { %v7316_v36 = vsub.f32 1.5, %v7315_v63 }
 0x7f9   : > { %v7317_v29 = vmul.f32 %v12641_v40, %v7316_v36  ;;  %7969 = vmatpush.bf16.msrb.mxu0 %v12481_v26  ;;  %7509 = vmatpush.bf16.msrb.mxu3 %v12442_v30  ;;  %v12485_v26 = vld [vmem:[%s15212_s1 + $0x1158] sm:$0xff]  ;;  %v12474_v30 = vld [vmem:[%s15212_s1 + $0x1100] sm:$0xff] }
 0x7fb   : > { %v7321_v51 = vsel %vm7320_vm11, %v12641_v40, %v7317_v29  ;;  %v12496_v29 = vld [vmem:[%s15212_s1 + $0x11b0] sm:$0xff] }
 0x7fc   : > { %v7322_v22 = vmul.f32 %v7321_v51, %v7308_v25  ;;  %v7323_v52 = vmul.f32 %v7321_v51, %v7309_v13  ;;  %v7324_v50 = vmul.f32 %v7321_v51, %v7310_v58  ;;  %v12459_v25 = vld [vmem:[%s15212_s1 + $0x1088] sm:$0xff] }
 0x7fd   : > { %7776 = vmatpush.bf16.msra.mxu2 %v12459_v25  ;;  %7970 = vmatpush.bf16.msrb.mxu0 %v12480_v39  ;;  %v12475_v25 = vld [vmem:[%s15212_s1 + $0x1108] sm:$0xff] }
 0x7fe   : > { %v7330_v46 = vmul.f32 %v12624_v55, %v7322_v22  ;;  %v7331_v8 = vmul.f32 %v12624_v55, %v7323_v52  ;;  %v7332_v17 = vmul.f32 %v12624_v55, %v7324_v50  ;;  %7879 = vmatpush.bf16.msra.mxu3 %v12473_v33 }
 0x800   : > { %v7338_v1 = vadd.f32 %v12625_v24, %v7330_v46  ;;  %v7339_v11 = vadd.f32 %v12625_v24, %v7331_v8  ;;  %v7340_v60 = vadd.f32 %v12625_v24, %v7332_v17  ;;  %v12487_v24 = vld [vmem:[%s15212_s1 + $0x1168] sm:$0xff]  ;;  %v7388_v17 = vld [vmem:[#allocation3 + $0xc] sm:$0x7] }
 0x801   : > { %7971 = vmatpush.bf16.msrb.mxu0 %v12479_v12 }
 0x802   : > { %v7341_v31 = vmax.f32 %v7338_v1, 0.0  ;;  %v7342_v20 = vmax.f32 %v7339_v11, 0.0  ;;  %v7343_v4 = vmax.f32 %v7340_v60, 0.0  ;;  %7880 = vmatpush.bf16.msra.mxu3 %v12472_v0  ;;  %v12494_v1 = vld [vmem:[%s15212_s1 + $0x11a0] sm:$0xff]  ;;  %v12476_v11 = vld [vmem:[%s15212_s1 + $0x1110] sm:$0xff] }
 0x803   : > { %v12470_v60 = vld [vmem:[%s15212_s1 + $0x10e0] sm:$0xff] }
 0x804   : > { %v7344_v13 = vmul.f32 %v14594_v38, %v7341_v31  ;;  %v7345_v57 = vmul.f32 %v14585_v53, %v7342_v20  ;;  %v7346_v19 = vmul.f32 %v14602_v35, %v7343_v4  ;;  %v12450_v53 = vld [vmem:[%s15212_s1 + $0x1040] sm:$0xff]  ;;  %v12489_v35 = vld [vmem:[%s15212_s1 + $0x1178] sm:$0xff] }
 0x805   : > { %v12458_v38 = vld [vmem:[%s15212_s1 + $0x1080] sm:$0xff]  ;;  %7672 = vmatpush.bf16.msra.mxu1 %v12450_v53  ;;  %7972 = vmatpush.bf16.msrb.mxu0 %v12478_v61  ;;  %v12493_v31 = vld [vmem:[%s15212_s1 + $0x1198] sm:$0xff] }
 0x806   : > { %v7347_v6 = vpack.c.bf16 %v7344_v13, %v7344_v13  ;;  %v7348_v23 = vpack.c.bf16 %v7345_v57, %v7345_v57  ;;  %v7349_v59 = vpack.c.bf16 %v7346_v19, %v7346_v19  ;;  %7777 = vmatpush.bf16.msra.mxu2 %v12458_v38  ;;  %7881 = vmatpush.bf16.msra.mxu3 %v12471_v9  ;;  %v12469_v20 = vld [vmem:[%s15212_s1 + $0x10d8] sm:$0xff]  ;;  %v12482_v0 = vld [vmem:[%s15212_s1 + $0x1140] sm:$0xff] }
 0x808   : > { %v7351_v40 = vshll.u32 %v7347_v6, 16  ;;  %v7354_v41 = vshrl.u32 %v7347_v6, 16  ;;  %v7360_v47 = vshll.u32 %v7348_v23, 16  ;;  %v7364_v7 = vshrl.u32 %v7348_v23, 16 }
 0x809   : > { %v7370_v14 = vshll.u32 %v7349_v59, 16  ;;  %v7374_v45 = vshrl.u32 %v7349_v59, 16  ;;  %8074 = vmatpush.bf16.msrb.mxu1 %v12489_v35  ;;  %7973 = vmatpush.bf16.msrb.mxu0 %v12477_v15 }
 0x80a   : > { %v7353_v21 = vrot.slane %v7351_v40, 5  ;;  %v7356_v34 = vrot.slane %v7354_v41, 4  ;;  %v7362_v63 = vrot.slane %v7360_v47, 5  ;;  %v7366_v42 = vrot.slane %v7364_v7, 4  ;;  %8183 = vmatpush.bf16.msrb.mxu2 %v12497_v27  ;;  %7882 = vmatpush.bf16.msra.mxu3 %v12470_v60  ;;  %v12484_v27 = vld [vmem:[%s15212_s1 + $0x1150] sm:$0xff]  ;;  %v12503_v60 = vld [vmem:[%s15212_s1 + $0x11e8] sm:$0xff] }
 0x80b   : > { %v7372_v49 = vrot.slane %v7370_v14, 5  ;;  %v7376_v36 = vrot.slane %v7374_v45, 4  ;;  %v12492_v40 = vld [vmem:[%s15212_s1 + $0x1190] sm:$0xff] }
 0x80c   : > { %v7357_v55 = vor.u32 %v7356_v34, %v7353_v21  ;;  %v7367_v58 = vor.u32 %v7366_v42, %v7362_v63  ;;  %v7384_v28 = vsel %vm13192_vm13, %v7353_v21, %v7383_v48  ;;  %v12468_v45 = vld [vmem:[%s15212_s1 + $0x10d0] sm:$0xff] }
 0x80d   : > { %v7377_v51 = vor.u32 %v7376_v36, %v7372_v49  ;;  %7385 = vst [vmem:[#allocation3] sm:$0x8] %v7384_v28  ;;  %8075 = vmatpush.bf16.msrb.mxu1 %v12488_v54  ;;  %7974 = vmatpush.bf16.msrb.mxu0 %v12476_v11  ;;  %v12467_v28 = vld [vmem:[%s15212_s1 + $0x10c8] sm:$0xff] }
 0x80e   : > { %v7358_v22 = vrot.slane %v7357_v55, 4  ;;  %v7368_v52 = vrot.slane %v7367_v58, 4  ;;  %8184 = vmatpush.bf16.msrb.mxu2 %v12496_v29  ;;  %7883 = vmatpush.bf16.msra.mxu3 %v12469_v20  ;;  %v12491_v55 = vld [vmem:[%s15212_s1 + $0x1188] sm:$0xff] }
 0x80f   : > { %v7378_v50 = vrot.slane %v7377_v51, 4 }
 0x810   : > { %v7363_v46 = vsel %vm13221_vm6, %v7358_v22, %v7362_v63  ;;  %v7373_v8 = vsel %vm13221_vm6, %v7368_v52, %v7372_v49  ;;  %v12483_v49 = vld [vmem:[%s15212_s1 + $0x1148] sm:$0xff]  ;;  %v12490_v22 = vld [vmem:[%s15212_s1 + $0x1180] sm:$0xff] }
 0x811   : > { %v7389_v56 = vsel %vm13230_vm7, %v7378_v50, %v7388_v17  ;;  %7386 = vst [vmem:[#allocation3 + $0x4] sm:$0xf] %v7363_v46  ;;  %8076 = vmatpush.bf16.msrb.mxu1 %v12487_v24  ;;  %7975 = vmatpush.bf16.msrb.mxu0 %v12475_v25  ;;  %v12466_v52 = vld [vmem:[%s15212_s1 + $0x10c0] sm:$0xff]  ;;  %v12505_v50 = vld [vmem:[%s15212_s1 + $0x11f8] sm:$0xff]  ;;  %v12504_v17 = vld [vmem:[%s15212_s1 + $0x11f0] sm:$0xff] }
 0x812   : > { %7387 = vst [vmem:[#allocation3 + $0x8] sm:$0xf] %v7373_v8  ;;  %8185 = vmatpush.bf16.msrb.mxu2 %v12495_v5  ;;  %7884 = vmatpush.bf16.msra.mxu3 %v12468_v45  ;;  %v8095_v5 = vld [vmem:[#allocation3 + $0x10] sm:$0x3]  ;;  %v12502_v25 = vld [vmem:[%s15212_s1 + $0x11e0] sm:$0xff] }
 0x813   : > { %7390 = vst [vmem:[#allocation3 + $0xc] sm:$0x7] %v7389_v56 }
 0x814   : > { %v7686_v18 = vld [vmem:[#allocation3] sm:$0x8] }
 0x815   : > { %8077 = vmatpush.bf16.msrb.mxu1 %v12486_v43  ;;  %v12599_v19 = vld [vmem:[#allocation3] sm:$0xe]  ;;  %v7711_v39 = vunpack.c.l.b16 %v7686_v18  ;;  %7976 = vmatpush.bf16.msrb.mxu0 %v12474_v30 }
 0x816   : > { %8186 = vmatpush.bf16.msrb.mxu2 %v12494_v1  ;;  %7885 = vmatpush.bf16.msra.mxu3 %v12467_v28  ;;  %v8114_v1 = vunpack.c.l.b16 %v8095_v5 }
 0x818   : > { %v12563_v4 = vld [vmem:[#allocation3] sm:$0xff]  }
 0x819   : > { %v12598_v10 = vld [vmem:[#allocation3] sm:$0xf0]  ;;  %v7440_v13 = vshll.u32 %v12563_v4, 16  ;;  %7581 = vmatmul.bf16.vlgmr.msra.gmra.mxu0 %v12563_v4  ;;  %v7688_v2 = vld [vmem:[#allocation3 + $0x8] sm:$0xf]  ;;  %8078 = vmatpush.bf16.msrb.mxu1 %v12485_v26  ;;  %v7438_v12 = vshrl.u32 %v12563_v4, 16 }
 0x81a   : > { %v15092_v57 = vld [vmem:[#allocation3 + $0x4] sm:$0xff]   ;;  %v12600_v23 = vor.u32 %v12599_v19, %v12598_v10  ;;  %v7689_v59 = vld [vmem:[#allocation3 + $0xc] sm:$0x3]  ;;  %v15096_v38 = vunpack.c.l.b16 %v7688_v2  ;;  %8187 = vmatpush.bf16.msrb.mxu2 %v12493_v31  ;;  %7886 = vmatpush.bf16.msra.mxu3 %v12466_v52  ;;  %v7993_v31 = vld [vmem:[#allocation3 + $0x10] sm:$0x1] }
 0x81b   : > { %v7434_v6 = vunpack.c.h.b16 %v15092_v57  ;;  %v7712_v53 = vunpack.c.l.b16 %v15092_v57  ;;  %v7714_v35 = vunpack.c.l.b16 %v7689_v59  ;;  %v7442_v41 = vrot.slane %v7440_v13, 1  ;;  %v7393_v29 = vld [vmem:[#allocation3 + $0x8] sm:$0x7]  ;;  %v7990_v46 = vld [vmem:[#allocation3 + $0x4] sm:$0xc] }
 0x81c   : > { %v7612_v33 = vrot.slane %v12600_v23, 1  ;;  %v7521_v51 = vunpack.c.l.b16 %v7393_v29  ;;  %v15140_v8 = vld [vmem:[#allocation3 + $0x8] sm:$0xff]   ;;  %v8015_v43 = vunpack.c.l.b16 %v7990_v46  ;;  %v8018_v13 = vunpack.c.l.b16 %v7993_v31 }
 0x81d   : > { %v7436_v47 = vpack.c.b16 %v7434_v6, %v7434_v6  ;;  %v15106_v7 = vpack.c.b16 %v7712_v53, %v7711_v39  ;;  %v7716_v14 = vpack.c.b16 %v7714_v35, %v15096_v38  ;;  %8079 = vmatpush.bf16.msrb.mxu1 %v12484_v27  ;;  %v7443_v36 = vor.u32 %v7442_v41, %v7438_v12  ;;  %v7791_v15 = vld [vmem:[#allocation3 + $0xc] sm:$0x7] }
 0x81e   : > { %8188 = vmatpush.bf16.msrb.mxu2 %v12492_v40  ;;  %v7522_v24 = vpack.c.b16 %v7521_v51, %v7521_v51  ;;  %v12568_v56 = vunpack.c.l.b16 %v15140_v8  ;;  %v12569_v9 = vunpack.c.h.b16 %v15140_v8  ;;  %v7810_v11 = vunpack.c.l.b16 %v7791_v15  ;;  %v12501_v40 = vld [vmem:[%s15212_s1 + $0x11d8] sm:$0xff] }
 0x81f   : > { %v7613_v21 = vrot.slane %v7436_v47, 1  ;;  %v7717_v34 = vrot.slane %v15106_v7, 3  ;;  %v7445_v63 = vshll.u32 %v7436_v47, 16  ;;  %v7718_v42 = vrot.slane %v7716_v14, 3 }
 0x820   : > { %v7449_v18 = vshrl.u32 %v7436_v47, 16  ;;  %v8019_v20 = vpack.c.b16 %v12568_v56, %v8015_v43  ;;  %v8115_v4 = vpack.c.b16 %v8114_v1, %v12569_v9  ;;  %v7811_v10 = vpack.c.b16 %v7810_v11, %v15096_v38 }
 0x821   : > { %v7614_v48 = vsel %vm465_vm1, %v7612_v33, %v7613_v21  ;;  %v7447_v54 = vrot.slane %v7445_v63, 1  ;;  %v7719_v58 = vsel %vm571_vm2, %v7717_v34, %v7718_v42  ;;  %8080 = vmatpush.bf16.msrb.mxu1 %v12483_v49  ;;  %v7813_v23 = vshrl.u32 %v15106_v7, 16  ;;  %v12500_v63 = vld [vmem:[%s15212_s1 + $0x11d0] sm:$0xff] }
 0x822   : > { %7673 = vmatmul.bf16.vlgmr.msra.gmra.mxu1 %v7614_v48  ;;  %7778 = vmatmul.bf16.vlgmr.msra.gmra.mxu2 %v7719_v58  ;;  %v8117_v19 = vshrl.u32 %v8019_v20, 16  ;;  %v8120_v2 = vshll.u32 %v8019_v20, 16  ;;  %v8125_v39 = vshrl.u32 %v8115_v4, 16  ;;  %v8128_v6 = vshll.u32 %v8115_v4, 16  ;;  %v12499_v48 = vld [vmem:[%s15212_s1 + $0x11c8] sm:$0xff]  ;;  %v12498_v58 = vld [vmem:[%s15212_s1 + $0x11c0] sm:$0xff] }
 0x823   : > { %v7448_v61 = vsel %vm289_vm0, %v7443_v36, %v7447_v54  ;;  %8189 = vmatpush.bf16.msrb.mxu2 %v12491_v55  ;;  %v7451_v26 = vor.u32 %v7449_v18, %v7447_v54  ;;  %v7816_v59 = vshll.u32 %v15106_v7, 16  ;;  %v7821_v35 = vshrl.u32 %v7811_v10, 16 }
 0x824   : > { %7510 = vmatmul.bf16.vlgmr.msrb.gmra.mxu3 %v7448_v61  ;;  %v7824_v27 = vshll.u32 %v7811_v10, 16  ;;  %v7917_v41 = vpack.c.b16 %v15096_v38, %v7712_v53  ;;  %v8020_v47 = vpack.c.b16 %v8018_v13, %v12569_v9  ;;  %v8119_v30 = vrot.slane %v8117_v19, 2  ;;  %v8204_v61 = vld [vmem:[#allocation3 + $0x4] sm:$0x8] }
 0x825   : > { %8081 = vmatpush.bf16.msrb.mxu1 %v12482_v0  ;;  %8278 = vmatpush.bf16.msrb.mxu3 %v12505_v50  ;;  %v8122_v12 = vrot.slane %v8120_v2, 3  ;;  %v8127_v14 = vrot.slane %v8125_v39, 2  ;;  %v8130_v45 = vrot.slane %v8128_v6, 3  ;;  %v7815_v33 = vrot.slane %v7813_v23, 3 }
 0x826   : > { %v7823_v7 = vrot.slane %v7821_v35, 3  ;;  %v7826_v34 = vrot.slane %v7824_v27, 4  ;;  %v8022_v49 = vrot.slane %v8020_v47, 2  ;;  %v7918_v28 = vpack.c.b16 %v7810_v11, %v7810_v11 }
 0x827   : > { %8190 = vmatpush.bf16.msrb.mxu2 %v12490_v22  ;;  %v8123_v57 = vor.u32 %v8122_v12, %v8119_v30  ;;  %v8131_v36 = vor.u32 %v8130_v45, %v8127_v14  ;;  %v8223_v51 = vunpack.c.l.b16 %v8204_v61  ;;  %v8226_v52 = vrot.slane %v8115_v4, 3 }
 0x828   : > { %v7827_v38 = vor.u32 %v7826_v34, %v7823_v7 }
 0x829   : > { %7586 = vmatmul.bf16.gmra.mxu0 %v7522_v24  ;;  %8279 = vmatpush.bf16.msrb.mxu3 %v12504_v17  ;;  %v8132_v29 = vsel %vm973_vm5, %v8123_v57, %v8131_v36  ;;  %v8224_v0 = vpack.c.b16 %v12568_v56, %v8223_v51 }
 0x82b   : > { %v8225_v22 = vrot.slane %v8224_v0, 3 }
 0x82d   : > { %8280 = vmatpush.bf16.msrb.mxu3 %v12503_v60  ;;  %v8227_v50 = vsel %vm571_vm2, %v8225_v22, %v8226_v52 }
 0x831   : > { %8281 = vmatpush.bf16.msrb.mxu3 %v12502_v25 }
 0x832   : > { %7678 = vmatmul.bf16.gmra.mxu1 %v7613_v21  ;;  %7783 = vmatmul.bf16.gmra.mxu2 %v7718_v42  ;;  %v7818_v21 = vrot.slane %v7816_v59, 4  ;;  %v8021_v42 = vrot.slane %v8019_v20, 2 }
 0x834   : > { %7515 = vmatmul.bf16.gmra.mxu3 %v7451_v26  ;;  %v7819_v53 = vor.u32 %v7818_v21, %v7815_v33  ;;  %v8023_v54 = vsel %vm877_vm4, %v8021_v42, %v8022_v49 }
 0x835   : > { %8282 = vmatpush.bf16.msrb.mxu3 %v12501_v40 }
 0x836   : > { %v7828_v55 = vsel %vm667_vm3, %v7819_v53, %v7827_v38 }
 0x839   : > { %7977 = vmatmul.bf16.vlgmr.msrb.gmra.mxu0 %v7917_v41  ;;  %8283 = vmatpush.bf16.msrb.mxu3 %v12500_v63 }
 0x83d   : > { %8284 = vmatpush.bf16.msrb.mxu3 %v12499_v48 }
 0x841   : > { %8285 = vmatpush.bf16.msrb.mxu3 %v12498_v58 }
 0x842   : > { %8082 = vmatmul.bf16.vlgmr.msrb.gmra.mxu1 %v8023_v54  ;;  %8191 = vmatmul.bf16.vlgmr.msrb.gmra.mxu2 %v8132_v29 }
 0x844   : > { %7887 = vmatmul.bf16.vlgmr.msra.gmra.mxu3 %v7828_v55 }
 0x849   : > { %7982 = vmatmul.bf16.gmra.mxu0 %v7918_v28 }
 0x852   : > { %8087 = vmatmul.bf16.gmra.mxu1 %v8022_v49  ;;  %8196 = vmatmul.bf16.gmra.mxu2 %v8131_v36 }
 0x854   : > { %7892 = vmatmul.bf16.gmra.mxu3 %v7827_v38 }
 0x864   : > { %8286 = vmatmul.bf16.vlgmr.msrb.gmra.mxu3 %v8227_v50 }
 0x874   : > { %8291 = vmatmul.bf16.gmra.mxu3 %v8226_v52  ;;  %v12653_v52 = vld [vmem:[%s15215_s4] sm:$0xff] }
 0x896   : > { %v7582_v24 = vpop.f32.mrf.mxu0 }
 0x89e   : > { %v7584_v46 = vpop.f32.mrf.mxu0 }
 0x89f   : > { %v7674_v5 = vpop.f32.mrf.mxu1 }
 0x8a5   : > { %v7779_v17 = vpop.f32.mrf.mxu2 }
 0x8a6   : > { %v7587_v1 = vpop.f32.mrf.mxu0 }
 0x8a7   : > { %v7511_v15 = vpop.f32.mrf.mxu3  ;;  %v7676_v9 = vpop.f32.mrf.mxu1 }
 0x8a8   : > { %v7583_v43 = vadd.f32 %v7582_v24, %v7511_v15  ;;  %v12654_v24 = vld [vmem:[%s15215_s4 + $0x8] sm:$0xff] }
 0x8aa   : > { %v7683_v11 = vadd.f32 %v7674_v5, %v7583_v43 }
 0x8ac   : > { %v7788_v60 = vadd.f32 %v7779_v17, %v7683_v11 }
 0x8ad   : > { %v7781_v18 = vpop.f32.mrf.mxu2 }
 0x8ae   : > { %v7589_v31 = vpop.f32.mrf.mxu0 }
 0x8af   : > { %v7513_v26 = vpop.f32.mrf.mxu3  ;;  %v7679_v8 = vpop.f32.mrf.mxu1 }
 0x8b0   : > { %v7585_v56 = vadd.f32 %v7584_v46, %v7513_v26  ;;  %v12655_v26 = vld [vmem:[%s15215_s4 + $0x10] sm:$0x3f] }
 0x8b2   : > { %v7684_v20 = vadd.f32 %v7676_v9, %v7585_v56 }
 0x8b4   : > { %v7789_v63 = vadd.f32 %v7781_v18, %v7684_v20 }
 0x8b5   : > { %v7784_v4 = vpop.f32.mrf.mxu2 }
 0x8b6   : > { %v7978_v13 = vpop.f32.mrf.mxu0 }
 0x8b7   : > { %v7516_v10 = vpop.f32.mrf.mxu3  ;;  %v7681_v25 = vpop.f32.mrf.mxu1 }
 0x8b8   : > { %v7588_v34 = vadd.f32 %v7587_v1, %v7516_v10 }
 0x8ba   : > { %v7685_v57 = vadd.f32 %v7679_v8, %v7588_v34 }
 0x8bc   : > { %v7790_v48 = vadd.f32 %v7784_v4, %v7685_v57 }
 0x8bd   : > { %v7786_v19 = vpop.f32.mrf.mxu2 }
 0x8be   : > { %v7980_v6 = vpop.f32.mrf.mxu0 }
 0x8bf   : > { %v7518_v2 = vpop.f32.mrf.mxu3  ;;  %v8083_v39 = vpop.f32.mrf.mxu1 }
 0x8c5   : > { %v8192_v23 = vpop.f32.mrf.mxu2 }
 0x8c6   : > { %v7983_v27 = vpop.f32.mrf.mxu0 }
 0x8c7   : > { %v7888_v59 = vpop.f32.mrf.mxu3  ;;  %v8085_v35 = vpop.f32.mrf.mxu1 }
 0x8c8   : > { %v7897_v33 = vadd.f32 %v7888_v59, %v7788_v60 }
 0x8ca   : > { %v7987_v42 = vadd.f32 %v7978_v13, %v7897_v33 }
 0x8cc   : > { %v8092_v53 = vadd.f32 %v8083_v39, %v7987_v42 }
 0x8cd   : > { %v8194_v40 = vpop.f32.mrf.mxu2 }
 0x8ce   : > { %v7985_v30 = vpop.f32.mrf.mxu0  ;;  %v8201_v29 = vadd.f32 %v8192_v23, %v8092_v53 }
 0x8cf   : > { %v7890_v41 = vpop.f32.mrf.mxu3  ;;  %v8088_v47 = vpop.f32.mrf.mxu1 }
 0x8d0   : > { %v7898_v49 = vadd.f32 %v7890_v41, %v7789_v63 }
 0x8d2   : > { %v7988_v36 = vadd.f32 %v7980_v6, %v7898_v49 }
 0x8d4   : > { %v8093_v55 = vadd.f32 %v8085_v35, %v7988_v36 }
 0x8d5   : > { %v8197_v12 = vpop.f32.mrf.mxu2 }
 0x8d6   : > { %v8202_v61 = vadd.f32 %v8194_v40, %v8093_v55 }
 0x8d7   : > { %v7893_v14 = vpop.f32.mrf.mxu3  ;;  %v8090_v45 = vpop.f32.mrf.mxu1 }
 0x8d8   : > { %v7899_v54 = vadd.f32 %v7893_v14, %v7790_v48  ;;  %v12626_v48 = vld [vmem:[%s15213_s2 + $0x7] ss:$0 sm:$0xff] }
 0x8da   : > { %v7989_v28 = vadd.f32 %v7983_v27, %v7899_v54 }
 0x8dc   : > { %v8094_v17 = vadd.f32 %v8088_v47, %v7989_v28  ;;  %v12627_v28 = vld [vmem:[%s15214_s3 + $0x7] ss:$0 sm:$0xff] }
 0x8dd   : > { %v8199_v21 = vpop.f32.mrf.mxu2 }
 0x8de   : > { %v8203_v11 = vadd.f32 %v8197_v12, %v8094_v17 }
 0x8df   : > { %v7895_v7 = vpop.f32.mrf.mxu3 }
 0x8e7   : > { %v8287_v38 = vpop.f32.mrf.mxu3 }
 0x8e8   : > { %v8296_v58 = vadd.f32 %v8287_v38, %v8201_v29 }
 0x8ea   : > { %v8311_v0 = vmul.f32 %v8296_v58, %v8296_v58  ;;  %v8299_v50 = vmul.f32 %v12653_v52, %v8296_v58 }
 0x8ec   : > { %v8314_v15 = vmul.f32 %v12653_v52, %v8311_v0  ;;  %v8366_v52 = vld [vmem:[#allocation2 + $0xc] sm:$0x7] }
 0x8ef   : > { %v8289_v51 = vpop.f32.mrf.mxu3 }
 0x8f0   : > { %v8297_v22 = vadd.f32 %v8289_v51, %v8202_v61 }
 0x8f2   : > { %v8300_v5 = vmul.f32 %v12654_v24, %v8297_v22  ;;  %v8312_v46 = vmul.f32 %v8297_v22, %v8297_v22 }
 0x8f4   : > { %v8302_v9 = vadd.f32 %v8300_v5, %v8299_v50  ;;  %v8315_v43 = vmul.f32 %v12654_v24, %v8312_v46  ;;  %v8364_v46 = vld [vmem:[#allocation2 + $0x4] sm:$0xff]  }
 0x8f6   : > { %v8317_v1 = vadd.f32 %v8315_v43, %v8314_v15  ;;  %v8370_v15 = vunpack.c.l.bf16 %v8366_v52 }
 0x8f7   : > { %v8292_v60 = vpop.f32.mrf.mxu3 }
 0x8f8   : > { %v8298_v18 = vadd.f32 %v8292_v60, %v8203_v11  ;;  %v8368_v11 = vunpack.c.l.bf16 %v8364_v46  ;;  %v8369_v60 = vunpack.c.h.bf16 %v8364_v46 }
 0x8fa   : > { %v8301_v8 = vmul.f32 %v12655_v26, %v8298_v18  ;;  %v8313_v56 = vmul.f32 %v8298_v18, %v8298_v18 }
 0x8fc   : > { %v8303_v31 = vsel %vm877_vm4, %v8301_v8, 0.0  ;;  %v8316_v20 = vmul.f32 %v12655_v26, %v8313_v56 }
 0x8fd   : > { %v8304_v4 = vadd.f32 %v8303_v31, %v8302_v9 }
 0x8fe   : > { %v8318_v10 = vsel %vm877_vm4, %v8316_v20, 0.0 }
 0x8ff   : > { %v8305_v25 = vrot.slane %v8304_v4, 4  ;;  %v8319_v13 = vadd.f32 %v8318_v10, %v8317_v1  ;;  %v8294_v19 = vpop.f32.mrf.mxu3 }
 0x901   : > { %v8306_v2 = vadd.f32 %v8305_v25, %v8304_v4  ;;  %v8320_v39 = vrot.slane %v8319_v13, 4 }
 0x903   : > { %v8307_v6 = vrot.slane %v8306_v2, 2  ;;  %v8321_v23 = vadd.f32 %v8320_v39, %v8319_v13 }
 0x905   : > { %v8308_v59 = vadd.f32 %v8307_v6, %v8306_v2  ;;  %v8322_v35 = vrot.slane %v8321_v23, 2 }
 0x907   : > { %v8309_v27 = vrot.slane %v8308_v59, 1  ;;  %v8323_v40 = vadd.f32 %v8322_v35, %v8321_v23 }
 0x909   : > { %v8310_v41 = vadd.f32 %v8309_v27, %v8308_v59  ;;  %v8324_v47 = vrot.slane %v8323_v40, 1  ;;  %v8399_v59 = vld [vmem:[#allocation2 + $0xc] sm:$0x7] }
 0x90b   : > { %v8325_v30 = vadd.f32 %v8324_v47, %v8323_v40  ;;  %v8326_v12 = vmul.f32 0.0625, %v8310_v41 }
 0x90d   : > { %v8327_v14 = vmul.f32 0.0625, %v8325_v30  ;;  %v8328_v45 = vmul.f32 %v8326_v12, %v8326_v12  ;;  %v8330_v33 = vsub.f32 %v8296_v58, %v8326_v12  ;;  %v8331_v21 = vsub.f32 %v8297_v22, %v8326_v12  ;;  %v8363_v22 = vld [vmem:[#allocation2] sm:$0x8] }
 0x90e   : > { %v8332_v7 = vsub.f32 %v8298_v18, %v8326_v12  ;;  %v8367_v17 = vunpack.c.l.bf16 %v8363_v22 }
 0x90f   : > { %v8329_v34 = vsub.f32 %v8327_v14, %v8328_v45 }
 0x911   : > { %v8333_v63 = vadd.f32 1e-05, %v8329_v34 }
 0x913   : > { %12642 = vrsqrt.f32 %v8333_v63  ;;  %vm8340_vm2 = vweird.f32 %v8333_v63 }
 0x919   : > { %v12643_v42 = vpop.eup %12642 }
 0x91a   : > { %v8335_v49 = vmul.f32 %v12643_v42, %v8333_v63  ;;  %vm8341_vm0 = vweird.f32 %v12643_v42 }
 0x91b   : > { %vm8342_vm3 = vmor %vm8340_vm2, %vm8341_vm0 }
 0x91c   : > { %v8336_v57 = vmul.f32 %v12643_v42, %v8335_v49 }
 0x91e   : > { %v8337_v36 = vmul.f32 0.5, %v8336_v57 }
 0x920   : > { %v8338_v53 = vsub.f32 1.5, %v8337_v36 }
 0x922   : > { %v8339_v38 = vmul.f32 %v12643_v42, %v8338_v53 }
 0x924   : > { %v8343_v54 = vsel %vm8342_vm3, %v12643_v42, %v8339_v38 }
 0x925   : > { %v8344_v29 = vmul.f32 %v8343_v54, %v8330_v33  ;;  %v8345_v55 = vmul.f32 %v8343_v54, %v8331_v21  ;;  %v8346_v58 = vmul.f32 %v8343_v54, %v8332_v7 }
 0x927   : > { %v8352_v61 = vmul.f32 %v12626_v48, %v8344_v29  ;;  %v8353_v51 = vmul.f32 %v12626_v48, %v8345_v55  ;;  %v8354_v0 = vmul.f32 %v12626_v48, %v8346_v58 }
 0x929   : > { %v8360_v50 = vadd.f32 %v12627_v28, %v8352_v61  ;;  %v8361_v24 = vadd.f32 %v12627_v28, %v8353_v51  ;;  %v8362_v5 = vadd.f32 %v12627_v28, %v8354_v0 }
 0x92b   : > { %v8374_v9 = vrot.slane %v8360_v50, 1  ;;  %v8375_v43 = vrot.slane %v8361_v24, 1  ;;  %v8377_v1 = vrot.slane %v8362_v5, 1 }
 0x92d   : > { %v8376_v18 = vsel %vm465_vm1, %v8374_v9, %v8375_v43  ;;  %v8378_v26 = vsel %vm465_vm1, %v8375_v43, %v8377_v1  ;;  %v8383_v8 = vadd.f32 %v8374_v9, %v8367_v17  ;;  %v8386_v56 = vadd.f32 %v8377_v1, %v8370_v15 }
 0x92e   : > { %v8384_v31 = vadd.f32 %v8376_v18, %v8368_v11  ;;  %v8385_v20 = vadd.f32 %v8378_v26, %v8369_v60 }
 0x92f   : > { %v8387_v4 = vmul.f32 %v8383_v8, %v13480_v32  ;;  %v8390_v10 = vmul.f32 %v8386_v56, %v13494_v3 }
 0x930   : > { %v8388_v25 = vmul.f32 %v8384_v31, %v13513_v62  ;;  %v8389_v13 = vmul.f32 %v8385_v20, %v13517_v37 }
 0x931   : > { %v8391_v19 = vpack.c.bf16 %v8387_v4, %v8387_v4  ;;  %v8394_v2 = vpack.c.bf16 %v8390_v10, %v8390_v10 }
 0x932   : > { %v8392_v39 = vpack.c.bf16 %v8388_v25, %v8388_v25  ;;  %v8393_v6 = vpack.c.bf16 %v8389_v13, %v8389_v13 }
 0x933   : > { %v8395_v23 = vsel %vm13192_vm13, %v8391_v19, %v8363_v22  ;;  %v8400_v32 = vsel %vm13230_vm7, %v8394_v2, %v8399_v59 }
 0x934   : > { %8396 = vst [vmem:[#allocation2] sm:$0x8] %v8395_v23 }
 0x935   : > { %8397 = vst [vmem:[#allocation2 + $0x4] sm:$0xf] %v8392_v39 }
 0x936   : > { %8398 = vst [vmem:[#allocation2 + $0x8] sm:$0xf] %v8393_v6 }
 0x937   : > { %8401 = vst [vmem:[#allocation2 + $0xc] sm:$0x7] %v8400_v32 }
 0x93c   : > { %v8402_v3 = vld [vmem:[#allocation2] sm:$0xff]  }
 0x93d   : > { %8407 = vst [vmem:[%s12860_s8] sm:$0xff] %v8402_v3  }
 0x93e   : > { %v8404_v62 = vld [vmem:[#allocation2 + $0x8] sm:$0xff]  }
 0x93f   : > { %8409 = vst [vmem:[%s12860_s8 + $0x8] sm:$0xff] %v8404_v62  }
 0x940 PF: > { %s15_s18 = sadd.s32 1, %s12662_s18  }
 0x941   : > { %p12_p4 = scmp.ge.s32.totalorder %s15_s18, 4  }
 0x943   :  { %14 = sbr.rel (!%p12_p4) target bundleno = 1 (0x1), region = 155 }

</bundles_post_ra>
